<compile_context>
chip_gen: v6e
topology: v6e:2x2x1
jax: 0.10.0
libtpu: 0.0.40
codegen_flags: <defaults>
</compile_context>

<pallas_src>
import functools

import jax
import jax.numpy as jnp
from jax.experimental import pallas as pl
from jax.experimental.pallas import tpu as pltpu


MM_DTYPE = jnp.bfloat16    # MXU input dtype (accumulation stays f32)
NUM_ACTIONS = 6
HEAD_PAD = 8               # actor(6) / critic(1) heads padded to a common width
HIDDEN = 256
NEG_BIG = -1e30            # finite "-inf" for the masked softmax


# ----------------------------------------------------------------------------
# Fully fused kernel: one grid step processes `nb` images end to end.
# ----------------------------------------------------------------------------
def _ppo_fused_kernel(cols1_ref, w1_ref, b1_ref, w2_ref, b2_ref,
                      wf1a_ref, bf1a_ref, wf1c_ref, bf1c_ref,
                      wf2_ref, bf2_ref,
                      out_ref,
                      h1_scr, cols2_scr, aflat_scr, cflat_scr,
                      *, nb, n_actions):
    f32 = jnp.float32

    # --- conv1 (actor+critic fused over output channels). cols1 rows are the
    #     100 "even" spatial positions, lanes hold the 4 (row,col)-parity
    #     patches, and w1 is 4x block-diagonal, so the matmul output lane
    #     layout is (parity, channel): exactly what conv2's im2col needs. ---
    h1 = jnp.dot(cols1_ref[...], w1_ref[...], preferred_element_type=f32)
    h1 = jnp.maximum(h1 + b1_ref[...], 0.0).astype(MM_DTYPE)      # (nb*100, 128)
    for n in range(nb):
        for rr in range(10):
            h1_scr[n, rr] = h1[n * 100 + rr * 10:n * 100 + rr * 10 + 10, :]

    # --- conv2 im2col entirely in VMEM: only contiguous slices + lane concat.
    #     Output row (n, r, s) gets features ((i*4+j)*32 + c). ---
    for n in range(nb):
        for r in range(9):
            row = []
            for i in range(4):
                for j in range(4):
                    q = (i % 2) * 2 + (j % 2)
                    row.append(h1_scr[n, r + i // 2,
                                      j // 2:j // 2 + 9,
                                      q * 32:(q + 1) * 32])        # (9, 32)
            cols2_scr[n * 81 + r * 9:n * 81 + r * 9 + 9, :] = (
                jnp.concatenate(row, axis=-1))                     # (9, 512)

    # --- conv2 (block-diagonal actor/critic weights) ---
    h2 = jnp.dot(cols2_scr[...], w2_ref[...], preferred_element_type=f32)
    h2 = jnp.maximum(h2 + b2_ref[...], 0.0).astype(MM_DTYPE)      # (nb*81, 64)

    # --- per-network flatten in (spatial, channel) order (fc1 weights are
    #     permuted once at pack time to match), via shape-matched stores ---
    for n in range(nb):
        for sp in range(81):
            src = h2[n * 81 + sp:n * 81 + sp + 1, :]               # (1, 64)
            aflat_scr[n:n + 1, sp * 32:(sp + 1) * 32] = src[:, :32]
            cflat_scr[n:n + 1, sp * 32:(sp + 1) * 32] = src[:, 32:]

    # --- fc1 (kept as two matmuls: a block-diagonal fc1 would double the
    #     dominant fc1-weight HBM traffic for zero-filled contraction) ---
    ha = jnp.dot(aflat_scr[...], wf1a_ref[...], preferred_element_type=f32)
    ha = jnp.maximum(ha + bf1a_ref[...], 0.0).astype(MM_DTYPE)     # (nb, 256)
    hc = jnp.dot(cflat_scr[...], wf1c_ref[...], preferred_element_type=f32)
    hc = jnp.maximum(hc + bf1c_ref[...], 0.0).astype(MM_DTYPE)     # (nb, 256)

    # --- fc2: block-diagonal heads -> one matmul; masked, exact softmax ---
    y = jnp.dot(jnp.concatenate([ha, hc], axis=-1), wf2_ref[...],
                preferred_element_type=f32) + bf2_ref[...]         # (nb, 16)
    col = jax.lax.broadcasted_iota(jnp.int32, y.shape, 1)
    logits = jnp.where(col < n_actions, y, NEG_BIG)
    m = jnp.max(logits, axis=-1, keepdims=True)
    e = jnp.exp(logits - m)
    probs = e / jnp.sum(e, axis=-1, keepdims=True)
    # cols [0, HEAD_PAD): actor probabilities; cols [HEAD_PAD, 16): raw critic.
    out_ref[...] = jnp.where(col < HEAD_PAD, probs, y)


def ppo_forward(packed, x, *, images_per_block=4):
    """x: (N, 1, 84, 84) NCHW, values in [0, 255] -> (probs (N,6), value (N,1))."""
    N = x.shape[0]

    # --- conv1 im2col (only remaining XLA prolog). C == 1 so NCHW == NHWC. ---
    xs = (x.reshape(N, 84, 84).astype(jnp.float32) * (1.0 / 255.0)).astype(MM_DTYPE)
    slices = [xs[:, i:i + 77:4, j:j + 77:4] for i in range(8) for j in range(8)]
    p = jnp.stack(slices, axis=-1)                                 # (N, 20, 20, 64)
    # rows = 10x10 "even" grid, lanes = (row-parity, col-parity, 8x8 patch)
    p = p.reshape(N, 10, 2, 10, 2, 64).transpose(0, 1, 3, 2, 4, 5)
    cols1 = p.reshape(N, 100, 256)

    nb = max(1, min(images_per_block, -(-N // 2)))   # >=2 grid steps when N>=2 (v7x)
    G = -(-N // nb)
    pad = G * nb - N
    if pad:
        cols1 = jnp.concatenate(
            [cols1, jnp.zeros((pad, 100, 256), cols1.dtype)], axis=0)
    cols1 = cols1.reshape(G, nb * 100, 256)

    kernel = functools.partial(_ppo_fused_kernel, nb=nb, n_actions=NUM_ACTIONS)
    out = pl.pallas_call(
        kernel,
        out_shape=jax.ShapeDtypeStruct((G, nb, 2 * HEAD_PAD), jnp.float32),
        grid=(G,),
        in_specs=[
            pl.BlockSpec((None, nb * 100, 256), lambda g: (g, 0, 0)),
            pl.BlockSpec((256, 128), lambda g: (0, 0)),
            pl.BlockSpec((1, 128), lambda g: (0, 0)),
            pl.BlockSpec((512, 64), lambda g: (0, 0)),
            pl.BlockSpec((1, 64), lambda g: (0, 0)),
            pl.BlockSpec((2592, HIDDEN), lambda g: (0, 0)),
            pl.BlockSpec((1, HIDDEN), lambda g: (0, 0)),
            pl.BlockSpec((2592, HIDDEN), lambda g: (0, 0)),
            pl.BlockSpec((1, HIDDEN), lambda g: (0, 0)),
            pl.BlockSpec((2 * HIDDEN, 2 * HEAD_PAD), lambda g: (0, 0)),
            pl.BlockSpec((1, 2 * HEAD_PAD), lambda g: (0, 0)),
        ],
        out_specs=pl.BlockSpec((None, nb, 2 * HEAD_PAD), lambda g: (g, 0, 0)),
        scratch_shapes=[
            pltpu.VMEM((nb, 10, 10, 128), MM_DTYPE),     # h1 (conv1 output)
            pltpu.VMEM((nb * 81, 512), MM_DTYPE),        # conv2 im2col patches
            pltpu.VMEM((nb, 2592), MM_DTYPE),            # actor flatten
            pltpu.VMEM((nb, 2592), MM_DTYPE),            # critic flatten
        ],
        compiler_params=pltpu.CompilerParams(
            dimension_semantics=("parallel",)),
    )(cols1, packed["w1"], packed["b1"], packed["w2"], packed["b2"],
      packed["wf1a"], packed["bf1a"], packed["wf1c"], packed["bf1c"],
      packed["wf2"], packed["bf2"])

    out = out.reshape(G * nb, 2 * HEAD_PAD)[:N]
    probs = out[:, :NUM_ACTIONS]                                   # (N, 6)
    value = out[:, HEAD_PAD:HEAD_PAD + 1]                          # (N, 1)
    # TODO(synk): torch.distributions.Categorical (dist object / sampling) has
    # no Pallas equivalent; the softmax probabilities that parameterize it are
    # returned instead.
    return probs, value


# ----------------------------------------------------------------------------
# Parameter init in PyTorch layout (conv OIHW, linear (out, in)), then a
# one-time packing pass that folds every layout/fusion decision into weights.
# ----------------------------------------------------------------------------
def _init_conv(key, oc, ic, kh, kw):
    k1, k2 = jax.random.split(key)
    bound = 1.0 / jnp.sqrt(ic * kh * kw)
    w = jax.random.uniform(k1, (oc, ic, kh, kw), jnp.float32, -bound, bound)
    b = jax.random.uniform(k2, (oc,), jnp.float32, -bound, bound)
    return w, b


def _init_linear(key, in_f, out_f):
    k1, k2 = jax.random.split(key)
    bound = 1.0 / jnp.sqrt(in_f)
    w = jax.random.uniform(k1, (out_f, in_f), jnp.float32, -bound, bound)
    b = jax.random.uniform(k2, (out_f,), jnp.float32, -bound, bound)
    return w, b


def init_ppo_params(key, num_inputs=1, num_outputs=NUM_ACTIONS, hidden_size=HIDDEN):
    keys = jax.random.split(key, 8)
    return {
        "critic": {
            "conv1": _init_conv(keys[0], 16, num_inputs, 8, 8),
            "conv2": _init_conv(keys[1], 32, 16, 4, 4),
            "fc1": _init_linear(keys[2], 2592, hidden_size),
            "fc2": _init_linear(keys[3], hidden_size, 1),
        },
        "actor": {
            "conv1": _init_conv(keys[4], 16, num_inputs, 8, 8),
            "conv2": _init_conv(keys[5], 32, 16, 4, 4),
            "fc1": _init_linear(keys[6], 2592, hidden_size),
            "fc2": _init_linear(keys[7], hidden_size, num_outputs),
        },
    }


def pack_params(params):
    a, c = params["actor"], params["critic"]

    def conv_w(w):                 # torch OIHW -> (KH*KW*IC, OC), order (kh, kw, c)
        oc, ic, kh, kw = w.shape
        return jnp.transpose(w, (2, 3, 1, 0)).reshape(kh * kw * ic, oc)

    # conv1: actor & critic fused along output channels, replicated 4x
    # block-diagonally over the (row, col) stride-2 parities.
    w1s = jnp.concatenate([conv_w(a["conv1"][0]), conv_w(c["conv1"][0])], axis=-1)
    b1s = jnp.concatenate([a["conv1"][1], c["conv1"][1]])           # (32,)
    w1 = jnp.zeros((256, 128), jnp.float32)
    for q in range(4):
        w1 = w1.at[q * 64:(q + 1) * 64, q * 32:(q + 1) * 32].set(w1s)
    b1 = jnp.tile(b1s, 4).reshape(1, 128)

    # conv2: block-diagonal over {actor, critic} channels -> single matmul.
    w2a = jnp.transpose(a["conv2"][0], (2, 3, 1, 0))                # (4, 4, 16, 32)
    w2c = jnp.transpose(c["conv2"][0], (2, 3, 1, 0))
    w2 = jnp.zeros((4, 4, 32, 64), jnp.float32)
    w2 = w2.at[:, :, :16, :32].set(w2a).at[:, :, 16:, 32:].set(w2c)
    w2 = w2.reshape(4 * 4 * 32, 64)
    b2 = jnp.concatenate([a["conv2"][1], c["conv2"][1]]).reshape(1, 64)

    # fc1: torch flattens (C, OH, OW); the kernel flattens (OH*OW, C).
    def fc1_w(w):                                                   # torch (256, 2592)
        hid = w.shape[0]
        return jnp.transpose(w.reshape(hid, 32, 81), (2, 1, 0)).reshape(81 * 32, hid)

    # fc2: block-diagonal heads; actor -> cols [0, 6), critic value -> col 8.
    wf2 = jnp.zeros((2 * HIDDEN, 2 * HEAD_PAD), jnp.float32)
    wf2 = wf2.at[:HIDDEN, :NUM_ACTIONS].set(jnp.transpose(a["fc2"][0]))
    wf2 = wf2.at[HIDDEN:, HEAD_PAD:HEAD_PAD + 1].set(jnp.transpose(c["fc2"][0]))
    bf2 = jnp.zeros((1, 2 * HEAD_PAD), jnp.float32)
    bf2 = bf2.at[0, :NUM_ACTIONS].set(a["fc2"][1])
    bf2 = bf2.at[0, HEAD_PAD].set(c["fc2"][1][0])

    return {
        "w1": w1.astype(MM_DTYPE), "b1": b1,
        "w2": w2.astype(MM_DTYPE), "b2": b2,
        "wf1a": fc1_w(a["fc1"][0]).astype(MM_DTYPE),
        "bf1a": a["fc1"][1].reshape(1, -1),
        "wf1c": fc1_w(c["fc1"][0]).astype(MM_DTYPE),
        "bf1c": c["fc1"][1].reshape(1, -1),
        "wf2": wf2.astype(MM_DTYPE), "bf2": bf2,
    }


# ----------------------------------------------------------------------------
# Pure-JAX reference of the torch module (f32) for a correctness check.
# ----------------------------------------------------------------------------
def ppo_reference(params, x):
    xs = x.astype(jnp.float32) / 255.0

    def conv(h, w, b, stride):
        out = jax.lax.conv_general_dilated(
            h, w, window_strides=(stride, stride), padding="VALID",
            dimension_numbers=("NCHW", "OIHW", "NCHW"))
        return jax.nn.relu(out + b[None, :, None, None])

    def net(p):
        h = conv(xs, p["conv1"][0], p["conv1"][1], 4)
        h = conv(h, p["conv2"][0], p["conv2"][1], 2)
        h = h.reshape(h.shape[0], -1)                   # torch nn.Flatten order
        h = jax.nn.relu(h @ p["fc1"][0].T + p["fc1"][1])
        return h @ p["fc2"][0].T + p["fc2"][1]

    return jax.nn.softmax(net(params["actor"]), axis=-1), net(params["critic"])


if __name__ == "__main__":
    key = jax.random.PRNGKey(0)
    pkey, xkey = jax.random.split(key)
    params = init_ppo_params(pkey)
    packed = pack_params(params)

    # Input size implied by Linear(2592, ...): 1x84x84 (Atari Pong frame).
    batch = 2
    x = jax.random.uniform(xkey, (batch, 1, 84, 84), jnp.float32, 0.0, 255.0)

    probs, value = jax.jit(ppo_forward)(packed, x)
    jax.block_until_ready((probs, value))

    assert probs.shape == (batch, NUM_ACTIONS) and value.shape == (batch, 1)
    assert bool(jnp.all(jnp.isfinite(probs))) and bool(jnp.all(jnp.isfinite(value)))
    assert bool(jnp.all(probs >= 0.0))
    assert jnp.allclose(jnp.sum(probs, axis=-1), 1.0, atol=1e-3)

    # Compare against the f32 reference (kernel matmuls run in bf16).
    probs_ref, value_ref = jax.jit(ppo_reference)(params, x)
    assert jnp.allclose(probs, probs_ref, atol=5e-2), float(
        jnp.max(jnp.abs(probs - probs_ref)))
    assert jnp.allclose(value, value_ref, atol=5e-2), float(
        jnp.max(jnp.abs(value - value_ref)))
    print("KERNEL_OK")
</pallas_src>

<mosaic_0001>
module attributes {stable_mosaic.version = 11 : i64} {
  func.func @_ppo_fused_kernel(%arg0: i32, %arg1: memref<1x100x256xbf16, #tpu.memory_space<vmem>>, %arg2: memref<256x128xbf16, #tpu.memory_space<vmem>>, %arg3: memref<1x128xf32, #tpu.memory_space<vmem>>, %arg4: memref<512x64xbf16, #tpu.memory_space<vmem>>, %arg5: memref<1x64xf32, #tpu.memory_space<vmem>>, %arg6: memref<2592x256xbf16, #tpu.memory_space<vmem>>, %arg7: memref<1x256xf32, #tpu.memory_space<vmem>>, %arg8: memref<2592x256xbf16, #tpu.memory_space<vmem>>, %arg9: memref<1x256xf32, #tpu.memory_space<vmem>>, %arg10: memref<512x16xbf16, #tpu.memory_space<vmem>>, %arg11: memref<1x16xf32, #tpu.memory_space<vmem>>, %arg12: memref<1x1x16xf32, #tpu.memory_space<vmem>>, %arg13: memref<1x10x10x128xbf16, #tpu.memory_space<vmem>>, %arg14: memref<81x512xbf16, #tpu.memory_space<vmem>>, %arg15: memref<1x2592xbf16, #tpu.memory_space<vmem>>, %arg16: memref<1x2592xbf16, #tpu.memory_space<vmem>>) attributes {dimension_semantics = [#tpu.dimension_semantics<parallel>], iteration_bounds = array<i64: 2>, scalar_prefetch = 0 : i64, scratch_operands = 4 : i64, tpu.core_type = #tpu.core_type<tc>, window_params = [{transform_indices = @transform_0, window_bounds = array<i64: 1, 100, 256>}, {pipeline_mode = #tpu.pipeline_mode<synchronous>, transform_indices = @transform_1, window_bounds = array<i64: 256, 128>}, {pipeline_mode = #tpu.pipeline_mode<synchronous>, transform_indices = @transform_2, window_bounds = array<i64: 1, 128>}, {pipeline_mode = #tpu.pipeline_mode<synchronous>, transform_indices = @transform_3, window_bounds = array<i64: 512, 64>}, {pipeline_mode = #tpu.pipeline_mode<synchronous>, transform_indices = @transform_4, window_bounds = array<i64: 1, 64>}, {pipeline_mode = #tpu.pipeline_mode<synchronous>, transform_indices = @transform_5, window_bounds = array<i64: 2592, 256>}, {pipeline_mode = #tpu.pipeline_mode<synchronous>, transform_indices = @transform_6, window_bounds = array<i64: 1, 256>}, {pipeline_mode = #tpu.pipeline_mode<synchronous>, transform_indices = @transform_7, window_bounds = array<i64: 2592, 256>}, {pipeline_mode = #tpu.pipeline_mode<synchronous>, transform_indices = @transform_8, window_bounds = array<i64: 1, 256>}, {pipeline_mode = #tpu.pipeline_mode<synchronous>, transform_indices = @transform_9, window_bounds = array<i64: 512, 16>}, {pipeline_mode = #tpu.pipeline_mode<synchronous>, transform_indices = @transform_10, window_bounds = array<i64: 1, 16>}, {transform_indices = @transform_11, window_bounds = array<i64: 1, 1, 16>}]} {
    %c0 = arith.constant 0 : index
    %c0_0 = arith.constant 0 : index
    %c0_1 = arith.constant 0 : index
    %0 = vector.load %arg1[%c0, %c0_0, %c0_1] : memref<1x100x256xbf16, #tpu.memory_space<vmem>>, vector<1x100x256xbf16>
    %1 = vector.shape_cast %0 : vector<1x100x256xbf16> to vector<100x256xbf16>
    %c0_2 = arith.constant 0 : index
    %c0_3 = arith.constant 0 : index
    %2 = vector.load %arg2[%c0_2, %c0_3] : memref<256x128xbf16, #tpu.memory_space<vmem>>, vector<256x128xbf16>
    %cst = arith.constant dense<0.000000e+00> : vector<100x128xf32>
    %3 = tpu.matmul %1, %2, %cst {dimension_numbers = #tpu.dot_dimension_numbers<[1], [0], [0], [1], [0, 0, 1, 1], [], []>} : vector<100x256xbf16>, vector<256x128xbf16>, vector<100x128xf32> -> vector<100x128xf32>
    %c0_4 = arith.constant 0 : index
    %c0_5 = arith.constant 0 : index
    %4 = vector.load %arg3[%c0_4, %c0_5] : memref<1x128xf32, #tpu.memory_space<vmem>>, vector<1x128xf32>
    %5 = vector.broadcast %4 : vector<1x128xf32> to vector<100x128xf32>
    %6 = arith.addf %3, %5 : vector<100x128xf32>
    %cst_6 = arith.constant 0.000000e+00 : f32
    %7 = vector.broadcast %cst_6 : f32 to vector<100x128xf32>
    %8 = arith.maximumf %6, %7 : vector<100x128xf32>
    %9 = arith.truncf %8 : vector<100x128xf32> to vector<100x128xbf16>
    %10 = vector.extract_strided_slice %9 {offsets = [0, 0], sizes = [10, 128], strides = [1, 1]} : vector<100x128xbf16> to vector<10x128xbf16>
    %c0_7 = arith.constant 0 : index
    %c0_8 = arith.constant 0 : index
    %c0_9 = arith.constant 0 : index
    %c0_10 = arith.constant 0 : index
    %11 = vector.load %arg13[%c0_7, %c0_8, %c0_9, %c0_10] : memref<1x10x10x128xbf16, #tpu.memory_space<vmem>>, vector<1x1x10x128xbf16>
    %12 = vector.shape_cast %11 : vector<1x1x10x128xbf16> to vector<10x128xbf16>
    %13 = vector.shape_cast %10 : vector<10x128xbf16> to vector<1x1x10x128xbf16>
    tpu.vector_store %arg13[%c0_7, %c0_8, %c0_9, %c0_10], %13 {strides = array<i32>} : memref<1x10x10x128xbf16, #tpu.memory_space<vmem>>, vector<1x1x10x128xbf16>,
    %14 = vector.extract_strided_slice %9 {offsets = [10, 0], sizes = [10, 128], strides = [1, 1]} : vector<100x128xbf16> to vector<10x128xbf16>
    %c0_11 = arith.constant 0 : index
    %c1 = arith.constant 1 : index
    %c0_12 = arith.constant 0 : index
    %c0_13 = arith.constant 0 : index
    %15 = vector.load %arg13[%c0_11, %c1, %c0_12, %c0_13] : memref<1x10x10x128xbf16, #tpu.memory_space<vmem>>, vector<1x1x10x128xbf16>
    %16 = vector.shape_cast %15 : vector<1x1x10x128xbf16> to vector<10x128xbf16>
    %17 = vector.shape_cast %14 : vector<10x128xbf16> to vector<1x1x10x128xbf16>
    tpu.vector_store %arg13[%c0_11, %c1, %c0_12, %c0_13], %17 {strides = array<i32>} : memref<1x10x10x128xbf16, #tpu.memory_space<vmem>>, vector<1x1x10x128xbf16>,
    %18 = vector.extract_strided_slice %9 {offsets = [20, 0], sizes = [10, 128], strides = [1, 1]} : vector<100x128xbf16> to vector<10x128xbf16>
    %c0_14 = arith.constant 0 : index
    %c2 = arith.constant 2 : index
    %c0_15 = arith.constant 0 : index
    %c0_16 = arith.constant 0 : index
    %19 = vector.load %arg13[%c0_14, %c2, %c0_15, %c0_16] : memref<1x10x10x128xbf16, #tpu.memory_space<vmem>>, vector<1x1x10x128xbf16>
    %20 = vector.shape_cast %19 : vector<1x1x10x128xbf16> to vector<10x128xbf16>
    %21 = vector.shape_cast %18 : vector<10x128xbf16> to vector<1x1x10x128xbf16>
    tpu.vector_store %arg13[%c0_14, %c2, %c0_15, %c0_16], %21 {strides = array<i32>} : memref<1x10x10x128xbf16, #tpu.memory_space<vmem>>, vector<1x1x10x128xbf16>,
    %22 = vector.extract_strided_slice %9 {offsets = [30, 0], sizes = [10, 128], strides = [1, 1]} : vector<100x128xbf16> to vector<10x128xbf16>
    %c0_17 = arith.constant 0 : index
    %c3 = arith.constant 3 : index
    %c0_18 = arith.constant 0 : index
    %c0_19 = arith.constant 0 : index
    %23 = vector.load %arg13[%c0_17, %c3, %c0_18, %c0_19] : memref<1x10x10x128xbf16, #tpu.memory_space<vmem>>, vector<1x1x10x128xbf16>
    %24 = vector.shape_cast %23 : vector<1x1x10x128xbf16> to vector<10x128xbf16>
    %25 = vector.shape_cast %22 : vector<10x128xbf16> to vector<1x1x10x128xbf16>
    tpu.vector_store %arg13[%c0_17, %c3, %c0_18, %c0_19], %25 {strides = array<i32>} : memref<1x10x10x128xbf16, #tpu.memory_space<vmem>>, vector<1x1x10x128xbf16>,
    %26 = vector.extract_strided_slice %9 {offsets = [40, 0], sizes = [10, 128], strides = [1, 1]} : vector<100x128xbf16> to vector<10x128xbf16>
    %c0_20 = arith.constant 0 : index
    %c4 = arith.constant 4 : index
    %c0_21 = arith.constant 0 : index
    %c0_22 = arith.constant 0 : index
    %27 = vector.load %arg13[%c0_20, %c4, %c0_21, %c0_22] : memref<1x10x10x128xbf16, #tpu.memory_space<vmem>>, vector<1x1x10x128xbf16>
    %28 = vector.shape_cast %27 : vector<1x1x10x128xbf16> to vector<10x128xbf16>
    %29 = vector.shape_cast %26 : vector<10x128xbf16> to vector<1x1x10x128xbf16>
    tpu.vector_store %arg13[%c0_20, %c4, %c0_21, %c0_22], %29 {strides = array<i32>} : memref<1x10x10x128xbf16, #tpu.memory_space<vmem>>, vector<1x1x10x128xbf16>,
    %30 = vector.extract_strided_slice %9 {offsets = [50, 0], sizes = [10, 128], strides = [1, 1]} : vector<100x128xbf16> to vector<10x128xbf16>
    %c0_23 = arith.constant 0 : index
    %c5 = arith.constant 5 : index
    %c0_24 = arith.constant 0 : index
    %c0_25 = arith.constant 0 : index
    %31 = vector.load %arg13[%c0_23, %c5, %c0_24, %c0_25] : memref<1x10x10x128xbf16, #tpu.memory_space<vmem>>, vector<1x1x10x128xbf16>
    %32 = vector.shape_cast %31 : vector<1x1x10x128xbf16> to vector<10x128xbf16>
    %33 = vector.shape_cast %30 : vector<10x128xbf16> to vector<1x1x10x128xbf16>
    tpu.vector_store %arg13[%c0_23, %c5, %c0_24, %c0_25], %33 {strides = array<i32>} : memref<1x10x10x128xbf16, #tpu.memory_space<vmem>>, vector<1x1x10x128xbf16>,
    %34 = vector.extract_strided_slice %9 {offsets = [60, 0], sizes = [10, 128], strides = [1, 1]} : vector<100x128xbf16> to vector<10x128xbf16>
    %c0_26 = arith.constant 0 : index
    %c6 = arith.constant 6 : index
    %c0_27 = arith.constant 0 : index
    %c0_28 = arith.constant 0 : index
    %35 = vector.load %arg13[%c0_26, %c6, %c0_27, %c0_28] : memref<1x10x10x128xbf16, #tpu.memory_space<vmem>>, vector<1x1x10x128xbf16>
    %36 = vector.shape_cast %35 : vector<1x1x10x128xbf16> to vector<10x128xbf16>
    %37 = vector.shape_cast %34 : vector<10x128xbf16> to vector<1x1x10x128xbf16>
    tpu.vector_store %arg13[%c0_26, %c6, %c0_27, %c0_28], %37 {strides = array<i32>} : memref<1x10x10x128xbf16, #tpu.memory_space<vmem>>, vector<1x1x10x128xbf16>,
    %38 = vector.extract_strided_slice %9 {offsets = [70, 0], sizes = [10, 128], strides = [1, 1]} : vector<100x128xbf16> to vector<10x128xbf16>
    %c0_29 = arith.constant 0 : index
    %c7 = arith.constant 7 : index
    %c0_30 = arith.constant 0 : index
    %c0_31 = arith.constant 0 : index
    %39 = vector.load %arg13[%c0_29, %c7, %c0_30, %c0_31] : memref<1x10x10x128xbf16, #tpu.memory_space<vmem>>, vector<1x1x10x128xbf16>
    %40 = vector.shape_cast %39 : vector<1x1x10x128xbf16> to vector<10x128xbf16>
    %41 = vector.shape_cast %38 : vector<10x128xbf16> to vector<1x1x10x128xbf16>
    tpu.vector_store %arg13[%c0_29, %c7, %c0_30, %c0_31], %41 {strides = array<i32>} : memref<1x10x10x128xbf16, #tpu.memory_space<vmem>>, vector<1x1x10x128xbf16>,
    %42 = vector.extract_strided_slice %9 {offsets = [80, 0], sizes = [10, 128], strides = [1, 1]} : vector<100x128xbf16> to vector<10x128xbf16>
    %c0_32 = arith.constant 0 : index
    %c8 = arith.constant 8 : index
    %c0_33 = arith.constant 0 : index
    %c0_34 = arith.constant 0 : index
    %43 = vector.load %arg13[%c0_32, %c8, %c0_33, %c0_34] : memref<1x10x10x128xbf16, #tpu.memory_space<vmem>>, vector<1x1x10x128xbf16>
    %44 = vector.shape_cast %43 : vector<1x1x10x128xbf16> to vector<10x128xbf16>
    %45 = vector.shape_cast %42 : vector<10x128xbf16> to vector<1x1x10x128xbf16>
    tpu.vector_store %arg13[%c0_32, %c8, %c0_33, %c0_34], %45 {strides = array<i32>} : memref<1x10x10x128xbf16, #tpu.memory_space<vmem>>, vector<1x1x10x128xbf16>,
    %46 = vector.extract_strided_slice %9 {offsets = [90, 0], sizes = [10, 128], strides = [1, 1]} : vector<100x128xbf16> to vector<10x128xbf16>
    %c0_35 = arith.constant 0 : index
    %c9 = arith.constant 9 : index
    %c0_36 = arith.constant 0 : index
    %c0_37 = arith.constant 0 : index
    %47 = vector.load %arg13[%c0_35, %c9, %c0_36, %c0_37] : memref<1x10x10x128xbf16, #tpu.memory_space<vmem>>, vector<1x1x10x128xbf16>
    %48 = vector.shape_cast %47 : vector<1x1x10x128xbf16> to vector<10x128xbf16>
    %49 = vector.shape_cast %46 : vector<10x128xbf16> to vector<1x1x10x128xbf16>
    tpu.vector_store %arg13[%c0_35, %c9, %c0_36, %c0_37], %49 {strides = array<i32>} : memref<1x10x10x128xbf16, #tpu.memory_space<vmem>>, vector<1x1x10x128xbf16>,
    %c0_38 = arith.constant 0 : index
    %c0_39 = arith.constant 0 : index
    %c0_40 = arith.constant 0 : index
    %c0_41 = arith.constant 0 : index
    %50 = vector.load %arg13[%c0_38, %c0_39, %c0_40, %c0_41] : memref<1x10x10x128xbf16, #tpu.memory_space<vmem>>, vector<1x1x9x32xbf16>
    %51 = vector.shape_cast %50 : vector<1x1x9x32xbf16> to vector<9x32xbf16>
    %c0_42 = arith.constant 0 : index
    %c0_43 = arith.constant 0 : index
    %c0_44 = arith.constant 0 : index
    %c32 = arith.constant 32 : index
    %52 = vector.load %arg13[%c0_42, %c0_43, %c0_44, %c32] : memref<1x10x10x128xbf16, #tpu.memory_space<vmem>>, vector<1x1x9x32xbf16>
    %53 = vector.shape_cast %52 : vector<1x1x9x32xbf16> to vector<9x32xbf16>
    %c0_45 = arith.constant 0 : index
    %c0_46 = arith.constant 0 : index
    %c1_47 = arith.constant 1 : index
    %c0_48 = arith.constant 0 : index
    %54 = vector.load %arg13[%c0_45, %c0_46, %c1_47, %c0_48] : memref<1x10x10x128xbf16, #tpu.memory_space<vmem>>, vector<1x1x9x32xbf16>
    %55 = vector.shape_cast %54 : vector<1x1x9x32xbf16> to vector<9x32xbf16>
    %c0_49 = arith.constant 0 : index
    %c0_50 = arith.constant 0 : index
    %c1_51 = arith.constant 1 : index
    %c32_52 = arith.constant 32 : index
    %56 = vector.load %arg13[%c0_49, %c0_50, %c1_51, %c32_52] : memref<1x10x10x128xbf16, #tpu.memory_space<vmem>>, vector<1x1x9x32xbf16>
    %57 = vector.shape_cast %56 : vector<1x1x9x32xbf16> to vector<9x32xbf16>
    %c0_53 = arith.constant 0 : index
    %c0_54 = arith.constant 0 : index
    %c0_55 = arith.constant 0 : index
    %c64 = arith.constant 64 : index
    %58 = vector.load %arg13[%c0_53, %c0_54, %c0_55, %c64] : memref<1x10x10x128xbf16, #tpu.memory_space<vmem>>, vector<1x1x9x32xbf16>
    %59 = vector.shape_cast %58 : vector<1x1x9x32xbf16> to vector<9x32xbf16>
    %c0_56 = arith.constant 0 : index
    %c0_57 = arith.constant 0 : index
    %c0_58 = arith.constant 0 : index
    %c96 = arith.constant 96 : index
    %60 = vector.load %arg13[%c0_56, %c0_57, %c0_58, %c96] : memref<1x10x10x128xbf16, #tpu.memory_space<vmem>>, vector<1x1x9x32xbf16>
    %61 = vector.shape_cast %60 : vector<1x1x9x32xbf16> to vector<9x32xbf16>
    %c0_59 = arith.constant 0 : index
    %c0_60 = arith.constant 0 : index
    %c1_61 = arith.constant 1 : index
    %c64_62 = arith.constant 64 : index
    %62 = vector.load %arg13[%c0_59, %c0_60, %c1_61, %c64_62] : memref<1x10x10x128xbf16, #tpu.memory_space<vmem>>, vector<1x1x9x32xbf16>
    %63 = vector.shape_cast %62 : vector<1x1x9x32xbf16> to vector<9x32xbf16>
    %c0_63 = arith.constant 0 : index
    %c0_64 = arith.constant 0 : index
    %c1_65 = arith.constant 1 : index
    %c96_66 = arith.constant 96 : index
    %64 = vector.load %arg13[%c0_63, %c0_64, %c1_65, %c96_66] : memref<1x10x10x128xbf16, #tpu.memory_space<vmem>>, vector<1x1x9x32xbf16>
    %65 = vector.shape_cast %64 : vector<1x1x9x32xbf16> to vector<9x32xbf16>
    %c0_67 = arith.constant 0 : index
    %c1_68 = arith.constant 1 : index
    %c0_69 = arith.constant 0 : index
    %c0_70 = arith.constant 0 : index
    %66 = vector.load %arg13[%c0_67, %c1_68, %c0_69, %c0_70] : memref<1x10x10x128xbf16, #tpu.memory_space<vmem>>, vector<1x1x9x32xbf16>
    %67 = vector.shape_cast %66 : vector<1x1x9x32xbf16> to vector<9x32xbf16>
    %c0_71 = arith.constant 0 : index
    %c1_72 = arith.constant 1 : index
    %c0_73 = arith.constant 0 : index
    %c32_74 = arith.constant 32 : index
    %68 = vector.load %arg13[%c0_71, %c1_72, %c0_73, %c32_74] : memref<1x10x10x128xbf16, #tpu.memory_space<vmem>>, vector<1x1x9x32xbf16>
    %69 = vector.shape_cast %68 : vector<1x1x9x32xbf16> to vector<9x32xbf16>
    %c0_75 = arith.constant 0 : index
    %c1_76 = arith.constant 1 : index
    %c1_77 = arith.constant 1 : index
    %c0_78 = arith.constant 0 : index
    %70 = vector.load %arg13[%c0_75, %c1_76, %c1_77, %c0_78] : memref<1x10x10x128xbf16, #tpu.memory_space<vmem>>, vector<1x1x9x32xbf16>
    %71 = vector.shape_cast %70 : vector<1x1x9x32xbf16> to vector<9x32xbf16>
    %c0_79 = arith.constant 0 : index
    %c1_80 = arith.constant 1 : index
    %c1_81 = arith.constant 1 : index
    %c32_82 = arith.constant 32 : index
    %72 = vector.load %arg13[%c0_79, %c1_80, %c1_81, %c32_82] : memref<1x10x10x128xbf16, #tpu.memory_space<vmem>>, vector<1x1x9x32xbf16>
    %73 = vector.shape_cast %72 : vector<1x1x9x32xbf16> to vector<9x32xbf16>
    %c0_83 = arith.constant 0 : index
    %c1_84 = arith.constant 1 : index
    %c0_85 = arith.constant 0 : index
    %c64_86 = arith.constant 64 : index
    %74 = vector.load %arg13[%c0_83, %c1_84, %c0_85, %c64_86] : memref<1x10x10x128xbf16, #tpu.memory_space<vmem>>, vector<1x1x9x32xbf16>
    %75 = vector.shape_cast %74 : vector<1x1x9x32xbf16> to vector<9x32xbf16>
    %c0_87 = arith.constant 0 : index
    %c1_88 = arith.constant 1 : index
    %c0_89 = arith.constant 0 : index
    %c96_90 = arith.constant 96 : index
    %76 = vector.load %arg13[%c0_87, %c1_88, %c0_89, %c96_90] : memref<1x10x10x128xbf16, #tpu.memory_space<vmem>>, vector<1x1x9x32xbf16>
    %77 = vector.shape_cast %76 : vector<1x1x9x32xbf16> to vector<9x32xbf16>
    %c0_91 = arith.constant 0 : index
    %c1_92 = arith.constant 1 : index
    %c1_93 = arith.constant 1 : index
    %c64_94 = arith.constant 64 : index
    %78 = vector.load %arg13[%c0_91, %c1_92, %c1_93, %c64_94] : memref<1x10x10x128xbf16, #tpu.memory_space<vmem>>, vector<1x1x9x32xbf16>
    %79 = vector.shape_cast %78 : vector<1x1x9x32xbf16> to vector<9x32xbf16>
    %c0_95 = arith.constant 0 : index
    %c1_96 = arith.constant 1 : index
    %c1_97 = arith.constant 1 : index
    %c96_98 = arith.constant 96 : index
    %80 = vector.load %arg13[%c0_95, %c1_96, %c1_97, %c96_98] : memref<1x10x10x128xbf16, #tpu.memory_space<vmem>>, vector<1x1x9x32xbf16>
    %81 = vector.shape_cast %80 : vector<1x1x9x32xbf16> to vector<9x32xbf16>
    %82 = tpu.concatenate %51, %53, %55, %57, %59, %61, %63, %65, %67, %69, %71, %73, %75, %77, %79, %81 in 1 : vector<9x32xbf16>, vector<9x32xbf16>, vector<9x32xbf16>, vector<9x32xbf16>, vector<9x32xbf16>, vector<9x32xbf16>, vector<9x32xbf16>, vector<9x32xbf16>, vector<9x32xbf16>, vector<9x32xbf16>, vector<9x32xbf16>, vector<9x32xbf16>, vector<9x32xbf16>, vector<9x32xbf16>, vector<9x32xbf16>, vector<9x32xbf16> -> vector<9x512xbf16>
    %c0_99 = arith.constant 0 : index
    %c0_100 = arith.constant 0 : index
    %83 = vector.load %arg14[%c0_99, %c0_100] : memref<81x512xbf16, #tpu.memory_space<vmem>>, vector<9x512xbf16>
    tpu.vector_store %arg14[%c0_99, %c0_100], %82 {strides = array<i32>} : memref<81x512xbf16, #tpu.memory_space<vmem>>, vector<9x512xbf16>,
    %c0_101 = arith.constant 0 : index
    %c1_102 = arith.constant 1 : index
    %c0_103 = arith.constant 0 : index
    %c0_104 = arith.constant 0 : index
    %84 = vector.load %arg13[%c0_101, %c1_102, %c0_103, %c0_104] : memref<1x10x10x128xbf16, #tpu.memory_space<vmem>>, vector<1x1x9x32xbf16>
    %85 = vector.shape_cast %84 : vector<1x1x9x32xbf16> to vector<9x32xbf16>
    %c0_105 = arith.constant 0 : index
    %c1_106 = arith.constant 1 : index
    %c0_107 = arith.constant 0 : index
    %c32_108 = arith.constant 32 : index
    %86 = vector.load %arg13[%c0_105, %c1_106, %c0_107, %c32_108] : memref<1x10x10x128xbf16, #tpu.memory_space<vmem>>, vector<1x1x9x32xbf16>
    %87 = vector.shape_cast %86 : vector<1x1x9x32xbf16> to vector<9x32xbf16>
    %c0_109 = arith.constant 0 : index
    %c1_110 = arith.constant 1 : index
    %c1_111 = arith.constant 1 : index
    %c0_112 = arith.constant 0 : index
    %88 = vector.load %arg13[%c0_109, %c1_110, %c1_111, %c0_112] : memref<1x10x10x128xbf16, #tpu.memory_space<vmem>>, vector<1x1x9x32xbf16>
    %89 = vector.shape_cast %88 : vector<1x1x9x32xbf16> to vector<9x32xbf16>
    %c0_113 = arith.constant 0 : index
    %c1_114 = arith.constant 1 : index
    %c1_115 = arith.constant 1 : index
    %c32_116 = arith.constant 32 : index
    %90 = vector.load %arg13[%c0_113, %c1_114, %c1_115, %c32_116] : memref<1x10x10x128xbf16, #tpu.memory_space<vmem>>, vector<1x1x9x32xbf16>
    %91 = vector.shape_cast %90 : vector<1x1x9x32xbf16> to vector<9x32xbf16>
    %c0_117 = arith.constant 0 : index
    %c1_118 = arith.constant 1 : index
    %c0_119 = arith.constant 0 : index
    %c64_120 = arith.constant 64 : index
    %92 = vector.load %arg13[%c0_117, %c1_118, %c0_119, %c64_120] : memref<1x10x10x128xbf16, #tpu.memory_space<vmem>>, vector<1x1x9x32xbf16>
    %93 = vector.shape_cast %92 : vector<1x1x9x32xbf16> to vector<9x32xbf16>
    %c0_121 = arith.constant 0 : index
    %c1_122 = arith.constant 1 : index
    %c0_123 = arith.constant 0 : index
    %c96_124 = arith.constant 96 : index
    %94 = vector.load %arg13[%c0_121, %c1_122, %c0_123, %c96_124] : memref<1x10x10x128xbf16, #tpu.memory_space<vmem>>, vector<1x1x9x32xbf16>
    %95 = vector.shape_cast %94 : vector<1x1x9x32xbf16> to vector<9x32xbf16>
    %c0_125 = arith.constant 0 : index
    %c1_126 = arith.constant 1 : index
    %c1_127 = arith.constant 1 : index
    %c64_128 = arith.constant 64 : index
    %96 = vector.load %arg13[%c0_125, %c1_126, %c1_127, %c64_128] : memref<1x10x10x128xbf16, #tpu.memory_space<vmem>>, vector<1x1x9x32xbf16>
    %97 = vector.shape_cast %96 : vector<1x1x9x32xbf16> to vector<9x32xbf16>
    %c0_129 = arith.constant 0 : index
    %c1_130 = arith.constant 1 : index
    %c1_131 = arith.constant 1 : index
    %c96_132 = arith.constant 96 : index
    %98 = vector.load %arg13[%c0_129, %c1_130, %c1_131, %c96_132] : memref<1x10x10x128xbf16, #tpu.memory_space<vmem>>, vector<1x1x9x32xbf16>
    %99 = vector.shape_cast %98 : vector<1x1x9x32xbf16> to vector<9x32xbf16>
    %c0_133 = arith.constant 0 : index
    %c2_134 = arith.constant 2 : index
    %c0_135 = arith.constant 0 : index
    %c0_136 = arith.constant 0 : index
    %100 = vector.load %arg13[%c0_133, %c2_134, %c0_135, %c0_136] : memref<1x10x10x128xbf16, #tpu.memory_space<vmem>>, vector<1x1x9x32xbf16>
    %101 = vector.shape_cast %100 : vector<1x1x9x32xbf16> to vector<9x32xbf16>
    %c0_137 = arith.constant 0 : index
    %c2_138 = arith.constant 2 : index
    %c0_139 = arith.constant 0 : index
    %c32_140 = arith.constant 32 : index
    %102 = vector.load %arg13[%c0_137, %c2_138, %c0_139, %c32_140] : memref<1x10x10x128xbf16, #tpu.memory_space<vmem>>, vector<1x1x9x32xbf16>
    %103 = vector.shape_cast %102 : vector<1x1x9x32xbf16> to vector<9x32xbf16>
    %c0_141 = arith.constant 0 : index
    %c2_142 = arith.constant 2 : index
    %c1_143 = arith.constant 1 : index
    %c0_144 = arith.constant 0 : index
    %104 = vector.load %arg13[%c0_141, %c2_142, %c1_143, %c0_144] : memref<1x10x10x128xbf16, #tpu.memory_space<vmem>>, vector<1x1x9x32xbf16>
    %105 = vector.shape_cast %104 : vector<1x1x9x32xbf16> to vector<9x32xbf16>
    %c0_145 = arith.constant 0 : index
    %c2_146 = arith.constant 2 : index
    %c1_147 = arith.constant 1 : index
    %c32_148 = arith.constant 32 : index
    %106 = vector.load %arg13[%c0_145, %c2_146, %c1_147, %c32_148] : memref<1x10x10x128xbf16, #tpu.memory_space<vmem>>, vector<1x1x9x32xbf16>
    %107 = vector.shape_cast %106 : vector<1x1x9x32xbf16> to vector<9x32xbf16>
    %c0_149 = arith.constant 0 : index
    %c2_150 = arith.constant 2 : index
    %c0_151 = arith.constant 0 : index
    %c64_152 = arith.constant 64 : index
    %108 = vector.load %arg13[%c0_149, %c2_150, %c0_151, %c64_152] : memref<1x10x10x128xbf16, #tpu.memory_space<vmem>>, vector<1x1x9x32xbf16>
    %109 = vector.shape_cast %108 : vector<1x1x9x32xbf16> to vector<9x32xbf16>
    %c0_153 = arith.constant 0 : index
    %c2_154 = arith.constant 2 : index
    %c0_155 = arith.constant 0 : index
    %c96_156 = arith.constant 96 : index
    %110 = vector.load %arg13[%c0_153, %c2_154, %c0_155, %c96_156] : memref<1x10x10x128xbf16, #tpu.memory_space<vmem>>, vector<1x1x9x32xbf16>
    %111 = vector.shape_cast %110 : vector<1x1x9x32xbf16> to vector<9x32xbf16>
    %c0_157 = arith.constant 0 : index
    %c2_158 = arith.constant 2 : index
    %c1_159 = arith.constant 1 : index
    %c64_160 = arith.constant 64 : index
    %112 = vector.load %arg13[%c0_157, %c2_158, %c1_159, %c64_160] : memref<1x10x10x128xbf16, #tpu.memory_space<vmem>>, vector<1x1x9x32xbf16>
    %113 = vector.shape_cast %112 : vector<1x1x9x32xbf16> to vector<9x32xbf16>
    %c0_161 = arith.constant 0 : index
    %c2_162 = arith.constant 2 : index
    %c1_163 = arith.constant 1 : index
    %c96_164 = arith.constant 96 : index
    %114 = vector.load %arg13[%c0_161, %c2_162, %c1_163, %c96_164] : memref<1x10x10x128xbf16, #tpu.memory_space<vmem>>, vector<1x1x9x32xbf16>
    %115 = vector.shape_cast %114 : vector<1x1x9x32xbf16> to vector<9x32xbf16>
    %116 = tpu.concatenate %85, %87, %89, %91, %93, %95, %97, %99, %101, %103, %105, %107, %109, %111, %113, %115 in 1 : vector<9x32xbf16>, vector<9x32xbf16>, vector<9x32xbf16>, vector<9x32xbf16>, vector<9x32xbf16>, vector<9x32xbf16>, vector<9x32xbf16>, vector<9x32xbf16>, vector<9x32xbf16>, vector<9x32xbf16>, vector<9x32xbf16>, vector<9x32xbf16>, vector<9x32xbf16>, vector<9x32xbf16>, vector<9x32xbf16>, vector<9x32xbf16> -> vector<9x512xbf16>
    %c9_165 = arith.constant 9 : index
    %c0_166 = arith.constant 0 : index
    %117 = vector.load %arg14[%c9_165, %c0_166] : memref<81x512xbf16, #tpu.memory_space<vmem>>, vector<9x512xbf16>
    tpu.vector_store %arg14[%c9_165, %c0_166], %116 {strides = array<i32>} : memref<81x512xbf16, #tpu.memory_space<vmem>>, vector<9x512xbf16>,
    %c0_167 = arith.constant 0 : index
    %c2_168 = arith.constant 2 : index
    %c0_169 = arith.constant 0 : index
    %c0_170 = arith.constant 0 : index
    %118 = vector.load %arg13[%c0_167, %c2_168, %c0_169, %c0_170] : memref<1x10x10x128xbf16, #tpu.memory_space<vmem>>, vector<1x1x9x32xbf16>
    %119 = vector.shape_cast %118 : vector<1x1x9x32xbf16> to vector<9x32xbf16>
    %c0_171 = arith.constant 0 : index
    %c2_172 = arith.constant 2 : index
    %c0_173 = arith.constant 0 : index
    %c32_174 = arith.constant 32 : index
    %120 = vector.load %arg13[%c0_171, %c2_172, %c0_173, %c32_174] : memref<1x10x10x128xbf16, #tpu.memory_space<vmem>>, vector<1x1x9x32xbf16>
    %121 = vector.shape_cast %120 : vector<1x1x9x32xbf16> to vector<9x32xbf16>
    %c0_175 = arith.constant 0 : index
    %c2_176 = arith.constant 2 : index
    %c1_177 = arith.constant 1 : index
    %c0_178 = arith.constant 0 : index
    %122 = vector.load %arg13[%c0_175, %c2_176, %c1_177, %c0_178] : memref<1x10x10x128xbf16, #tpu.memory_space<vmem>>, vector<1x1x9x32xbf16>
    %123 = vector.shape_cast %122 : vector<1x1x9x32xbf16> to vector<9x32xbf16>
    %c0_179 = arith.constant 0 : index
    %c2_180 = arith.constant 2 : index
    %c1_181 = arith.constant 1 : index
    %c32_182 = arith.constant 32 : index
    %124 = vector.load %arg13[%c0_179, %c2_180, %c1_181, %c32_182] : memref<1x10x10x128xbf16, #tpu.memory_space<vmem>>, vector<1x1x9x32xbf16>
    %125 = vector.shape_cast %124 : vector<1x1x9x32xbf16> to vector<9x32xbf16>
    %c0_183 = arith.constant 0 : index
    %c2_184 = arith.constant 2 : index
    %c0_185 = arith.constant 0 : index
    %c64_186 = arith.constant 64 : index
    %126 = vector.load %arg13[%c0_183, %c2_184, %c0_185, %c64_186] : memref<1x10x10x128xbf16, #tpu.memory_space<vmem>>, vector<1x1x9x32xbf16>
    %127 = vector.shape_cast %126 : vector<1x1x9x32xbf16> to vector<9x32xbf16>
    %c0_187 = arith.constant 0 : index
    %c2_188 = arith.constant 2 : index
    %c0_189 = arith.constant 0 : index
    %c96_190 = arith.constant 96 : index
    %128 = vector.load %arg13[%c0_187, %c2_188, %c0_189, %c96_190] : memref<1x10x10x128xbf16, #tpu.memory_space<vmem>>, vector<1x1x9x32xbf16>
    %129 = vector.shape_cast %128 : vector<1x1x9x32xbf16> to vector<9x32xbf16>
    %c0_191 = arith.constant 0 : index
    %c2_192 = arith.constant 2 : index
    %c1_193 = arith.constant 1 : index
    %c64_194 = arith.constant 64 : index
    %130 = vector.load %arg13[%c0_191, %c2_192, %c1_193, %c64_194] : memref<1x10x10x128xbf16, #tpu.memory_space<vmem>>, vector<1x1x9x32xbf16>
    %131 = vector.shape_cast %130 : vector<1x1x9x32xbf16> to vector<9x32xbf16>
    %c0_195 = arith.constant 0 : index
    %c2_196 = arith.constant 2 : index
    %c1_197 = arith.constant 1 : index
    %c96_198 = arith.constant 96 : index
    %132 = vector.load %arg13[%c0_195, %c2_196, %c1_197, %c96_198] : memref<1x10x10x128xbf16, #tpu.memory_space<vmem>>, vector<1x1x9x32xbf16>
    %133 = vector.shape_cast %132 : vector<1x1x9x32xbf16> to vector<9x32xbf16>
    %c0_199 = arith.constant 0 : index
    %c3_200 = arith.constant 3 : index
    %c0_201 = arith.constant 0 : index
    %c0_202 = arith.constant 0 : index
    %134 = vector.load %arg13[%c0_199, %c3_200, %c0_201, %c0_202] : memref<1x10x10x128xbf16, #tpu.memory_space<vmem>>, vector<1x1x9x32xbf16>
    %135 = vector.shape_cast %134 : vector<1x1x9x32xbf16> to vector<9x32xbf16>
    %c0_203 = arith.constant 0 : index
    %c3_204 = arith.constant 3 : index
    %c0_205 = arith.constant 0 : index
    %c32_206 = arith.constant 32 : index
    %136 = vector.load %arg13[%c0_203, %c3_204, %c0_205, %c32_206] : memref<1x10x10x128xbf16, #tpu.memory_space<vmem>>, vector<1x1x9x32xbf16>
    %137 = vector.shape_cast %136 : vector<1x1x9x32xbf16> to vector<9x32xbf16>
    %c0_207 = arith.constant 0 : index
    %c3_208 = arith.constant 3 : index
    %c1_209 = arith.constant 1 : index
    %c0_210 = arith.constant 0 : index
    %138 = vector.load %arg13[%c0_207, %c3_208, %c1_209, %c0_210] : memref<1x10x10x128xbf16, #tpu.memory_space<vmem>>, vector<1x1x9x32xbf16>
    %139 = vector.shape_cast %138 : vector<1x1x9x32xbf16> to vector<9x32xbf16>
    %c0_211 = arith.constant 0 : index
    %c3_212 = arith.constant 3 : index
    %c1_213 = arith.constant 1 : index
    %c32_214 = arith.constant 32 : index
    %140 = vector.load %arg13[%c0_211, %c3_212, %c1_213, %c32_214] : memref<1x10x10x128xbf16, #tpu.memory_space<vmem>>, vector<1x1x9x32xbf16>
    %141 = vector.shape_cast %140 : vector<1x1x9x32xbf16> to vector<9x32xbf16>
    %c0_215 = arith.constant 0 : index
    %c3_216 = arith.constant 3 : index
    %c0_217 = arith.constant 0 : index
    %c64_218 = arith.constant 64 : index
    %142 = vector.load %arg13[%c0_215, %c3_216, %c0_217, %c64_218] : memref<1x10x10x128xbf16, #tpu.memory_space<vmem>>, vector<1x1x9x32xbf16>
    %143 = vector.shape_cast %142 : vector<1x1x9x32xbf16> to vector<9x32xbf16>
    %c0_219 = arith.constant 0 : index
    %c3_220 = arith.constant 3 : index
    %c0_221 = arith.constant 0 : index
    %c96_222 = arith.constant 96 : index
    %144 = vector.load %arg13[%c0_219, %c3_220, %c0_221, %c96_222] : memref<1x10x10x128xbf16, #tpu.memory_space<vmem>>, vector<1x1x9x32xbf16>
    %145 = vector.shape_cast %144 : vector<1x1x9x32xbf16> to vector<9x32xbf16>
    %c0_223 = arith.constant 0 : index
    %c3_224 = arith.constant 3 : index
    %c1_225 = arith.constant 1 : index
    %c64_226 = arith.constant 64 : index
    %146 = vector.load %arg13[%c0_223, %c3_224, %c1_225, %c64_226] : memref<1x10x10x128xbf16, #tpu.memory_space<vmem>>, vector<1x1x9x32xbf16>
    %147 = vector.shape_cast %146 : vector<1x1x9x32xbf16> to vector<9x32xbf16>
    %c0_227 = arith.constant 0 : index
    %c3_228 = arith.constant 3 : index
    %c1_229 = arith.constant 1 : index
    %c96_230 = arith.constant 96 : index
    %148 = vector.load %arg13[%c0_227, %c3_228, %c1_229, %c96_230] : memref<1x10x10x128xbf16, #tpu.memory_space<vmem>>, vector<1x1x9x32xbf16>
    %149 = vector.shape_cast %148 : vector<1x1x9x32xbf16> to vector<9x32xbf16>
    %150 = tpu.concatenate %119, %121, %123, %125, %127, %129, %131, %133, %135, %137, %139, %141, %143, %145, %147, %149 in 1 : vector<9x32xbf16>, vector<9x32xbf16>, vector<9x32xbf16>, vector<9x32xbf16>, vector<9x32xbf16>, vector<9x32xbf16>, vector<9x32xbf16>, vector<9x32xbf16>, vector<9x32xbf16>, vector<9x32xbf16>, vector<9x32xbf16>, vector<9x32xbf16>, vector<9x32xbf16>, vector<9x32xbf16>, vector<9x32xbf16>, vector<9x32xbf16> -> vector<9x512xbf16>
    %c18 = arith.constant 18 : index
    %c0_231 = arith.constant 0 : index
    %151 = vector.load %arg14[%c18, %c0_231] : memref<81x512xbf16, #tpu.memory_space<vmem>>, vector<9x512xbf16>
    tpu.vector_store %arg14[%c18, %c0_231], %150 {strides = array<i32>} : memref<81x512xbf16, #tpu.memory_space<vmem>>, vector<9x512xbf16>,
    %c0_232 = arith.constant 0 : index
    %c3_233 = arith.constant 3 : index
    %c0_234 = arith.constant 0 : index
    %c0_235 = arith.constant 0 : index
    %152 = vector.load %arg13[%c0_232, %c3_233, %c0_234, %c0_235] : memref<1x10x10x128xbf16, #tpu.memory_space<vmem>>, vector<1x1x9x32xbf16>
    %153 = vector.shape_cast %152 : vector<1x1x9x32xbf16> to vector<9x32xbf16>
    %c0_236 = arith.constant 0 : index
    %c3_237 = arith.constant 3 : index
    %c0_238 = arith.constant 0 : index
    %c32_239 = arith.constant 32 : index
    %154 = vector.load %arg13[%c0_236, %c3_237, %c0_238, %c32_239] : memref<1x10x10x128xbf16, #tpu.memory_space<vmem>>, vector<1x1x9x32xbf16>
    %155 = vector.shape_cast %154 : vector<1x1x9x32xbf16> to vector<9x32xbf16>
    %c0_240 = arith.constant 0 : index
    %c3_241 = arith.constant 3 : index
    %c1_242 = arith.constant 1 : index
    %c0_243 = arith.constant 0 : index
    %156 = vector.load %arg13[%c0_240, %c3_241, %c1_242, %c0_243] : memref<1x10x10x128xbf16, #tpu.memory_space<vmem>>, vector<1x1x9x32xbf16>
    %157 = vector.shape_cast %156 : vector<1x1x9x32xbf16> to vector<9x32xbf16>
    %c0_244 = arith.constant 0 : index
    %c3_245 = arith.constant 3 : index
    %c1_246 = arith.constant 1 : index
    %c32_247 = arith.constant 32 : index
    %158 = vector.load %arg13[%c0_244, %c3_245, %c1_246, %c32_247] : memref<1x10x10x128xbf16, #tpu.memory_space<vmem>>, vector<1x1x9x32xbf16>
    %159 = vector.shape_cast %158 : vector<1x1x9x32xbf16> to vector<9x32xbf16>
    %c0_248 = arith.constant 0 : index
    %c3_249 = arith.constant 3 : index
    %c0_250 = arith.constant 0 : index
    %c64_251 = arith.constant 64 : index
    %160 = vector.load %arg13[%c0_248, %c3_249, %c0_250, %c64_251] : memref<1x10x10x128xbf16, #tpu.memory_space<vmem>>, vector<1x1x9x32xbf16>
    %161 = vector.shape_cast %160 : vector<1x1x9x32xbf16> to vector<9x32xbf16>
    %c0_252 = arith.constant 0 : index
    %c3_253 = arith.constant 3 : index
    %c0_254 = arith.constant 0 : index
    %c96_255 = arith.constant 96 : index
    %162 = vector.load %arg13[%c0_252, %c3_253, %c0_254, %c96_255] : memref<1x10x10x128xbf16, #tpu.memory_space<vmem>>, vector<1x1x9x32xbf16>
    %163 = vector.shape_cast %162 : vector<1x1x9x32xbf16> to vector<9x32xbf16>
    %c0_256 = arith.constant 0 : index
    %c3_257 = arith.constant 3 : index
    %c1_258 = arith.constant 1 : index
    %c64_259 = arith.constant 64 : index
    %164 = vector.load %arg13[%c0_256, %c3_257, %c1_258, %c64_259] : memref<1x10x10x128xbf16, #tpu.memory_space<vmem>>, vector<1x1x9x32xbf16>
    %165 = vector.shape_cast %164 : vector<1x1x9x32xbf16> to vector<9x32xbf16>
    %c0_260 = arith.constant 0 : index
    %c3_261 = arith.constant 3 : index
    %c1_262 = arith.constant 1 : index
    %c96_263 = arith.constant 96 : index
    %166 = vector.load %arg13[%c0_260, %c3_261, %c1_262, %c96_263] : memref<1x10x10x128xbf16, #tpu.memory_space<vmem>>, vector<1x1x9x32xbf16>
    %167 = vector.shape_cast %166 : vector<1x1x9x32xbf16> to vector<9x32xbf16>
    %c0_264 = arith.constant 0 : index
    %c4_265 = arith.constant 4 : index
    %c0_266 = arith.constant 0 : index
    %c0_267 = arith.constant 0 : index
    %168 = vector.load %arg13[%c0_264, %c4_265, %c0_266, %c0_267] : memref<1x10x10x128xbf16, #tpu.memory_space<vmem>>, vector<1x1x9x32xbf16>
    %169 = vector.shape_cast %168 : vector<1x1x9x32xbf16> to vector<9x32xbf16>
    %c0_268 = arith.constant 0 : index
    %c4_269 = arith.constant 4 : index
    %c0_270 = arith.constant 0 : index
    %c32_271 = arith.constant 32 : index
    %170 = vector.load %arg13[%c0_268, %c4_269, %c0_270, %c32_271] : memref<1x10x10x128xbf16, #tpu.memory_space<vmem>>, vector<1x1x9x32xbf16>
    %171 = vector.shape_cast %170 : vector<1x1x9x32xbf16> to vector<9x32xbf16>
    %c0_272 = arith.constant 0 : index
    %c4_273 = arith.constant 4 : index
    %c1_274 = arith.constant 1 : index
    %c0_275 = arith.constant 0 : index
    %172 = vector.load %arg13[%c0_272, %c4_273, %c1_274, %c0_275] : memref<1x10x10x128xbf16, #tpu.memory_space<vmem>>, vector<1x1x9x32xbf16>
    %173 = vector.shape_cast %172 : vector<1x1x9x32xbf16> to vector<9x32xbf16>
    %c0_276 = arith.constant 0 : index
    %c4_277 = arith.constant 4 : index
    %c1_278 = arith.constant 1 : index
    %c32_279 = arith.constant 32 : index
    %174 = vector.load %arg13[%c0_276, %c4_277, %c1_278, %c32_279] : memref<1x10x10x128xbf16, #tpu.memory_space<vmem>>, vector<1x1x9x32xbf16>
    %175 = vector.shape_cast %174 : vector<1x1x9x32xbf16> to vector<9x32xbf16>
    %c0_280 = arith.constant 0 : index
    %c4_281 = arith.constant 4 : index
    %c0_282 = arith.constant 0 : index
    %c64_283 = arith.constant 64 : index
    %176 = vector.load %arg13[%c0_280, %c4_281, %c0_282, %c64_283] : memref<1x10x10x128xbf16, #tpu.memory_space<vmem>>, vector<1x1x9x32xbf16>
    %177 = vector.shape_cast %176 : vector<1x1x9x32xbf16> to vector<9x32xbf16>
    %c0_284 = arith.constant 0 : index
    %c4_285 = arith.constant 4 : index
    %c0_286 = arith.constant 0 : index
    %c96_287 = arith.constant 96 : index
    %178 = vector.load %arg13[%c0_284, %c4_285, %c0_286, %c96_287] : memref<1x10x10x128xbf16, #tpu.memory_space<vmem>>, vector<1x1x9x32xbf16>
    %179 = vector.shape_cast %178 : vector<1x1x9x32xbf16> to vector<9x32xbf16>
    %c0_288 = arith.constant 0 : index
    %c4_289 = arith.constant 4 : index
    %c1_290 = arith.constant 1 : index
    %c64_291 = arith.constant 64 : index
    %180 = vector.load %arg13[%c0_288, %c4_289, %c1_290, %c64_291] : memref<1x10x10x128xbf16, #tpu.memory_space<vmem>>, vector<1x1x9x32xbf16>
    %181 = vector.shape_cast %180 : vector<1x1x9x32xbf16> to vector<9x32xbf16>
    %c0_292 = arith.constant 0 : index
    %c4_293 = arith.constant 4 : index
    %c1_294 = arith.constant 1 : index
    %c96_295 = arith.constant 96 : index
    %182 = vector.load %arg13[%c0_292, %c4_293, %c1_294, %c96_295] : memref<1x10x10x128xbf16, #tpu.memory_space<vmem>>, vector<1x1x9x32xbf16>
    %183 = vector.shape_cast %182 : vector<1x1x9x32xbf16> to vector<9x32xbf16>
    %184 = tpu.concatenate %153, %155, %157, %159, %161, %163, %165, %167, %169, %171, %173, %175, %177, %179, %181, %183 in 1 : vector<9x32xbf16>, vector<9x32xbf16>, vector<9x32xbf16>, vector<9x32xbf16>, vector<9x32xbf16>, vector<9x32xbf16>, vector<9x32xbf16>, vector<9x32xbf16>, vector<9x32xbf16>, vector<9x32xbf16>, vector<9x32xbf16>, vector<9x32xbf16>, vector<9x32xbf16>, vector<9x32xbf16>, vector<9x32xbf16>, vector<9x32xbf16> -> vector<9x512xbf16>
    %c27 = arith.constant 27 : index
    %c0_296 = arith.constant 0 : index
    %185 = vector.load %arg14[%c27, %c0_296] : memref<81x512xbf16, #tpu.memory_space<vmem>>, vector<9x512xbf16>
    tpu.vector_store %arg14[%c27, %c0_296], %184 {strides = array<i32>} : memref<81x512xbf16, #tpu.memory_space<vmem>>, vector<9x512xbf16>,
    %c0_297 = arith.constant 0 : index
    %c4_298 = arith.constant 4 : index
    %c0_299 = arith.constant 0 : index
    %c0_300 = arith.constant 0 : index
    %186 = vector.load %arg13[%c0_297, %c4_298, %c0_299, %c0_300] : memref<1x10x10x128xbf16, #tpu.memory_space<vmem>>, vector<1x1x9x32xbf16>
    %187 = vector.shape_cast %186 : vector<1x1x9x32xbf16> to vector<9x32xbf16>
    %c0_301 = arith.constant 0 : index
    %c4_302 = arith.constant 4 : index
    %c0_303 = arith.constant 0 : index
    %c32_304 = arith.constant 32 : index
    %188 = vector.load %arg13[%c0_301, %c4_302, %c0_303, %c32_304] : memref<1x10x10x128xbf16, #tpu.memory_space<vmem>>, vector<1x1x9x32xbf16>
    %189 = vector.shape_cast %188 : vector<1x1x9x32xbf16> to vector<9x32xbf16>
    %c0_305 = arith.constant 0 : index
    %c4_306 = arith.constant 4 : index
    %c1_307 = arith.constant 1 : index
    %c0_308 = arith.constant 0 : index
    %190 = vector.load %arg13[%c0_305, %c4_306, %c1_307, %c0_308] : memref<1x10x10x128xbf16, #tpu.memory_space<vmem>>, vector<1x1x9x32xbf16>
    %191 = vector.shape_cast %190 : vector<1x1x9x32xbf16> to vector<9x32xbf16>
    %c0_309 = arith.constant 0 : index
    %c4_310 = arith.constant 4 : index
    %c1_311 = arith.constant 1 : index
    %c32_312 = arith.constant 32 : index
    %192 = vector.load %arg13[%c0_309, %c4_310, %c1_311, %c32_312] : memref<1x10x10x128xbf16, #tpu.memory_space<vmem>>, vector<1x1x9x32xbf16>
    %193 = vector.shape_cast %192 : vector<1x1x9x32xbf16> to vector<9x32xbf16>
    %c0_313 = arith.constant 0 : index
    %c4_314 = arith.constant 4 : index
    %c0_315 = arith.constant 0 : index
    %c64_316 = arith.constant 64 : index
    %194 = vector.load %arg13[%c0_313, %c4_314, %c0_315, %c64_316] : memref<1x10x10x128xbf16, #tpu.memory_space<vmem>>, vector<1x1x9x32xbf16>
    %195 = vector.shape_cast %194 : vector<1x1x9x32xbf16> to vector<9x32xbf16>
    %c0_317 = arith.constant 0 : index
    %c4_318 = arith.constant 4 : index
    %c0_319 = arith.constant 0 : index
    %c96_320 = arith.constant 96 : index
    %196 = vector.load %arg13[%c0_317, %c4_318, %c0_319, %c96_320] : memref<1x10x10x128xbf16, #tpu.memory_space<vmem>>, vector<1x1x9x32xbf16>
    %197 = vector.shape_cast %196 : vector<1x1x9x32xbf16> to vector<9x32xbf16>
    %c0_321 = arith.constant 0 : index
    %c4_322 = arith.constant 4 : index
    %c1_323 = arith.constant 1 : index
    %c64_324 = arith.constant 64 : index
    %198 = vector.load %arg13[%c0_321, %c4_322, %c1_323, %c64_324] : memref<1x10x10x128xbf16, #tpu.memory_space<vmem>>, vector<1x1x9x32xbf16>
    %199 = vector.shape_cast %198 : vector<1x1x9x32xbf16> to vector<9x32xbf16>
    %c0_325 = arith.constant 0 : index
    %c4_326 = arith.constant 4 : index
    %c1_327 = arith.constant 1 : index
    %c96_328 = arith.constant 96 : index
    %200 = vector.load %arg13[%c0_325, %c4_326, %c1_327, %c96_328] : memref<1x10x10x128xbf16, #tpu.memory_space<vmem>>, vector<1x1x9x32xbf16>
    %201 = vector.shape_cast %200 : vector<1x1x9x32xbf16> to vector<9x32xbf16>
    %c0_329 = arith.constant 0 : index
    %c5_330 = arith.constant 5 : index
    %c0_331 = arith.constant 0 : index
    %c0_332 = arith.constant 0 : index
    %202 = vector.load %arg13[%c0_329, %c5_330, %c0_331, %c0_332] : memref<1x10x10x128xbf16, #tpu.memory_space<vmem>>, vector<1x1x9x32xbf16>
    %203 = vector.shape_cast %202 : vector<1x1x9x32xbf16> to vector<9x32xbf16>
    %c0_333 = arith.constant 0 : index
    %c5_334 = arith.constant 5 : index
    %c0_335 = arith.constant 0 : index
    %c32_336 = arith.constant 32 : index
    %204 = vector.load %arg13[%c0_333, %c5_334, %c0_335, %c32_336] : memref<1x10x10x128xbf16, #tpu.memory_space<vmem>>, vector<1x1x9x32xbf16>
    %205 = vector.shape_cast %204 : vector<1x1x9x32xbf16> to vector<9x32xbf16>
    %c0_337 = arith.constant 0 : index
    %c5_338 = arith.constant 5 : index
    %c1_339 = arith.constant 1 : index
    %c0_340 = arith.constant 0 : index
    %206 = vector.load %arg13[%c0_337, %c5_338, %c1_339, %c0_340] : memref<1x10x10x128xbf16, #tpu.memory_space<vmem>>, vector<1x1x9x32xbf16>
    %207 = vector.shape_cast %206 : vector<1x1x9x32xbf16> to vector<9x32xbf16>
    %c0_341 = arith.constant 0 : index
    %c5_342 = arith.constant 5 : index
    %c1_343 = arith.constant 1 : index
    %c32_344 = arith.constant 32 : index
    %208 = vector.load %arg13[%c0_341, %c5_342, %c1_343, %c32_344] : memref<1x10x10x128xbf16, #tpu.memory_space<vmem>>, vector<1x1x9x32xbf16>
    %209 = vector.shape_cast %208 : vector<1x1x9x32xbf16> to vector<9x32xbf16>
    %c0_345 = arith.constant 0 : index
    %c5_346 = arith.constant 5 : index
    %c0_347 = arith.constant 0 : index
    %c64_348 = arith.constant 64 : index
    %210 = vector.load %arg13[%c0_345, %c5_346, %c0_347, %c64_348] : memref<1x10x10x128xbf16, #tpu.memory_space<vmem>>, vector<1x1x9x32xbf16>
    %211 = vector.shape_cast %210 : vector<1x1x9x32xbf16> to vector<9x32xbf16>
    %c0_349 = arith.constant 0 : index
    %c5_350 = arith.constant 5 : index
    %c0_351 = arith.constant 0 : index
    %c96_352 = arith.constant 96 : index
    %212 = vector.load %arg13[%c0_349, %c5_350, %c0_351, %c96_352] : memref<1x10x10x128xbf16, #tpu.memory_space<vmem>>, vector<1x1x9x32xbf16>
    %213 = vector.shape_cast %212 : vector<1x1x9x32xbf16> to vector<9x32xbf16>
    %c0_353 = arith.constant 0 : index
    %c5_354 = arith.constant 5 : index
    %c1_355 = arith.constant 1 : index
    %c64_356 = arith.constant 64 : index
    %214 = vector.load %arg13[%c0_353, %c5_354, %c1_355, %c64_356] : memref<1x10x10x128xbf16, #tpu.memory_space<vmem>>, vector<1x1x9x32xbf16>
    %215 = vector.shape_cast %214 : vector<1x1x9x32xbf16> to vector<9x32xbf16>
    %c0_357 = arith.constant 0 : index
    %c5_358 = arith.constant 5 : index
    %c1_359 = arith.constant 1 : index
    %c96_360 = arith.constant 96 : index
    %216 = vector.load %arg13[%c0_357, %c5_358, %c1_359, %c96_360] : memref<1x10x10x128xbf16, #tpu.memory_space<vmem>>, vector<1x1x9x32xbf16>
    %217 = vector.shape_cast %216 : vector<1x1x9x32xbf16> to vector<9x32xbf16>
    %218 = tpu.concatenate %187, %189, %191, %193, %195, %197, %199, %201, %203, %205, %207, %209, %211, %213, %215, %217 in 1 : vector<9x32xbf16>, vector<9x32xbf16>, vector<9x32xbf16>, vector<9x32xbf16>, vector<9x32xbf16>, vector<9x32xbf16>, vector<9x32xbf16>, vector<9x32xbf16>, vector<9x32xbf16>, vector<9x32xbf16>, vector<9x32xbf16>, vector<9x32xbf16>, vector<9x32xbf16>, vector<9x32xbf16>, vector<9x32xbf16>, vector<9x32xbf16> -> vector<9x512xbf16>
    %c36 = arith.constant 36 : index
    %c0_361 = arith.constant 0 : index
    %219 = vector.load %arg14[%c36, %c0_361] : memref<81x512xbf16, #tpu.memory_space<vmem>>, vector<9x512xbf16>
    tpu.vector_store %arg14[%c36, %c0_361], %218 {strides = array<i32>} : memref<81x512xbf16, #tpu.memory_space<vmem>>, vector<9x512xbf16>,
    %c0_362 = arith.constant 0 : index
    %c5_363 = arith.constant 5 : index
    %c0_364 = arith.constant 0 : index
    %c0_365 = arith.constant 0 : index
    %220 = vector.load %arg13[%c0_362, %c5_363, %c0_364, %c0_365] : memref<1x10x10x128xbf16, #tpu.memory_space<vmem>>, vector<1x1x9x32xbf16>
    %221 = vector.shape_cast %220 : vector<1x1x9x32xbf16> to vector<9x32xbf16>
    %c0_366 = arith.constant 0 : index
    %c5_367 = arith.constant 5 : index
    %c0_368 = arith.constant 0 : index
    %c32_369 = arith.constant 32 : index
    %222 = vector.load %arg13[%c0_366, %c5_367, %c0_368, %c32_369] : memref<1x10x10x128xbf16, #tpu.memory_space<vmem>>, vector<1x1x9x32xbf16>
    %223 = vector.shape_cast %222 : vector<1x1x9x32xbf16> to vector<9x32xbf16>
    %c0_370 = arith.constant 0 : index
    %c5_371 = arith.constant 5 : index
    %c1_372 = arith.constant 1 : index
    %c0_373 = arith.constant 0 : index
    %224 = vector.load %arg13[%c0_370, %c5_371, %c1_372, %c0_373] : memref<1x10x10x128xbf16, #tpu.memory_space<vmem>>, vector<1x1x9x32xbf16>
    %225 = vector.shape_cast %224 : vector<1x1x9x32xbf16> to vector<9x32xbf16>
    %c0_374 = arith.constant 0 : index
    %c5_375 = arith.constant 5 : index
    %c1_376 = arith.constant 1 : index
    %c32_377 = arith.constant 32 : index
    %226 = vector.load %arg13[%c0_374, %c5_375, %c1_376, %c32_377] : memref<1x10x10x128xbf16, #tpu.memory_space<vmem>>, vector<1x1x9x32xbf16>
    %227 = vector.shape_cast %226 : vector<1x1x9x32xbf16> to vector<9x32xbf16>
    %c0_378 = arith.constant 0 : index
    %c5_379 = arith.constant 5 : index
    %c0_380 = arith.constant 0 : index
    %c64_381 = arith.constant 64 : index
    %228 = vector.load %arg13[%c0_378, %c5_379, %c0_380, %c64_381] : memref<1x10x10x128xbf16, #tpu.memory_space<vmem>>, vector<1x1x9x32xbf16>
    %229 = vector.shape_cast %228 : vector<1x1x9x32xbf16> to vector<9x32xbf16>
    %c0_382 = arith.constant 0 : index
    %c5_383 = arith.constant 5 : index
    %c0_384 = arith.constant 0 : index
    %c96_385 = arith.constant 96 : index
    %230 = vector.load %arg13[%c0_382, %c5_383, %c0_384, %c96_385] : memref<1x10x10x128xbf16, #tpu.memory_space<vmem>>, vector<1x1x9x32xbf16>
    %231 = vector.shape_cast %230 : vector<1x1x9x32xbf16> to vector<9x32xbf16>
    %c0_386 = arith.constant 0 : index
    %c5_387 = arith.constant 5 : index
    %c1_388 = arith.constant 1 : index
    %c64_389 = arith.constant 64 : index
    %232 = vector.load %arg13[%c0_386, %c5_387, %c1_388, %c64_389] : memref<1x10x10x128xbf16, #tpu.memory_space<vmem>>, vector<1x1x9x32xbf16>
    %233 = vector.shape_cast %232 : vector<1x1x9x32xbf16> to vector<9x32xbf16>
    %c0_390 = arith.constant 0 : index
    %c5_391 = arith.constant 5 : index
    %c1_392 = arith.constant 1 : index
    %c96_393 = arith.constant 96 : index
    %234 = vector.load %arg13[%c0_390, %c5_391, %c1_392, %c96_393] : memref<1x10x10x128xbf16, #tpu.memory_space<vmem>>, vector<1x1x9x32xbf16>
    %235 = vector.shape_cast %234 : vector<1x1x9x32xbf16> to vector<9x32xbf16>
    %c0_394 = arith.constant 0 : index
    %c6_395 = arith.constant 6 : index
    %c0_396 = arith.constant 0 : index
    %c0_397 = arith.constant 0 : index
    %236 = vector.load %arg13[%c0_394, %c6_395, %c0_396, %c0_397] : memref<1x10x10x128xbf16, #tpu.memory_space<vmem>>, vector<1x1x9x32xbf16>
    %237 = vector.shape_cast %236 : vector<1x1x9x32xbf16> to vector<9x32xbf16>
    %c0_398 = arith.constant 0 : index
    %c6_399 = arith.constant 6 : index
    %c0_400 = arith.constant 0 : index
    %c32_401 = arith.constant 32 : index
    %238 = vector.load %arg13[%c0_398, %c6_399, %c0_400, %c32_401] : memref<1x10x10x128xbf16, #tpu.memory_space<vmem>>, vector<1x1x9x32xbf16>
    %239 = vector.shape_cast %238 : vector<1x1x9x32xbf16> to vector<9x32xbf16>
    %c0_402 = arith.constant 0 : index
    %c6_403 = arith.constant 6 : index
    %c1_404 = arith.constant 1 : index
    %c0_405 = arith.constant 0 : index
    %240 = vector.load %arg13[%c0_402, %c6_403, %c1_404, %c0_405] : memref<1x10x10x128xbf16, #tpu.memory_space<vmem>>, vector<1x1x9x32xbf16>
    %241 = vector.shape_cast %240 : vector<1x1x9x32xbf16> to vector<9x32xbf16>
    %c0_406 = arith.constant 0 : index
    %c6_407 = arith.constant 6 : index
    %c1_408 = arith.constant 1 : index
    %c32_409 = arith.constant 32 : index
    %242 = vector.load %arg13[%c0_406, %c6_407, %c1_408, %c32_409] : memref<1x10x10x128xbf16, #tpu.memory_space<vmem>>, vector<1x1x9x32xbf16>
    %243 = vector.shape_cast %242 : vector<1x1x9x32xbf16> to vector<9x32xbf16>
    %c0_410 = arith.constant 0 : index
    %c6_411 = arith.constant 6 : index
    %c0_412 = arith.constant 0 : index
    %c64_413 = arith.constant 64 : index
    %244 = vector.load %arg13[%c0_410, %c6_411, %c0_412, %c64_413] : memref<1x10x10x128xbf16, #tpu.memory_space<vmem>>, vector<1x1x9x32xbf16>
    %245 = vector.shape_cast %244 : vector<1x1x9x32xbf16> to vector<9x32xbf16>
    %c0_414 = arith.constant 0 : index
    %c6_415 = arith.constant 6 : index
    %c0_416 = arith.constant 0 : index
    %c96_417 = arith.constant 96 : index
    %246 = vector.load %arg13[%c0_414, %c6_415, %c0_416, %c96_417] : memref<1x10x10x128xbf16, #tpu.memory_space<vmem>>, vector<1x1x9x32xbf16>
    %247 = vector.shape_cast %246 : vector<1x1x9x32xbf16> to vector<9x32xbf16>
    %c0_418 = arith.constant 0 : index
    %c6_419 = arith.constant 6 : index
    %c1_420 = arith.constant 1 : index
    %c64_421 = arith.constant 64 : index
    %248 = vector.load %arg13[%c0_418, %c6_419, %c1_420, %c64_421] : memref<1x10x10x128xbf16, #tpu.memory_space<vmem>>, vector<1x1x9x32xbf16>
    %249 = vector.shape_cast %248 : vector<1x1x9x32xbf16> to vector<9x32xbf16>
    %c0_422 = arith.constant 0 : index
    %c6_423 = arith.constant 6 : index
    %c1_424 = arith.constant 1 : index
    %c96_425 = arith.constant 96 : index
    %250 = vector.load %arg13[%c0_422, %c6_423, %c1_424, %c96_425] : memref<1x10x10x128xbf16, #tpu.memory_space<vmem>>, vector<1x1x9x32xbf16>
    %251 = vector.shape_cast %250 : vector<1x1x9x32xbf16> to vector<9x32xbf16>
    %252 = tpu.concatenate %221, %223, %225, %227, %229, %231, %233, %235, %237, %239, %241, %243, %245, %247, %249, %251 in 1 : vector<9x32xbf16>, vector<9x32xbf16>, vector<9x32xbf16>, vector<9x32xbf16>, vector<9x32xbf16>, vector<9x32xbf16>, vector<9x32xbf16>, vector<9x32xbf16>, vector<9x32xbf16>, vector<9x32xbf16>, vector<9x32xbf16>, vector<9x32xbf16>, vector<9x32xbf16>, vector<9x32xbf16>, vector<9x32xbf16>, vector<9x32xbf16> -> vector<9x512xbf16>
    %c45 = arith.constant 45 : index
    %c0_426 = arith.constant 0 : index
    %253 = vector.load %arg14[%c45, %c0_426] : memref<81x512xbf16, #tpu.memory_space<vmem>>, vector<9x512xbf16>
    tpu.vector_store %arg14[%c45, %c0_426], %252 {strides = array<i32>} : memref<81x512xbf16, #tpu.memory_space<vmem>>, vector<9x512xbf16>,
    %c0_427 = arith.constant 0 : index
    %c6_428 = arith.constant 6 : index
    %c0_429 = arith.constant 0 : index
    %c0_430 = arith.constant 0 : index
    %254 = vector.load %arg13[%c0_427, %c6_428, %c0_429, %c0_430] : memref<1x10x10x128xbf16, #tpu.memory_space<vmem>>, vector<1x1x9x32xbf16>
    %255 = vector.shape_cast %254 : vector<1x1x9x32xbf16> to vector<9x32xbf16>
    %c0_431 = arith.constant 0 : index
    %c6_432 = arith.constant 6 : index
    %c0_433 = arith.constant 0 : index
    %c32_434 = arith.constant 32 : index
    %256 = vector.load %arg13[%c0_431, %c6_432, %c0_433, %c32_434] : memref<1x10x10x128xbf16, #tpu.memory_space<vmem>>, vector<1x1x9x32xbf16>
    %257 = vector.shape_cast %256 : vector<1x1x9x32xbf16> to vector<9x32xbf16>
    %c0_435 = arith.constant 0 : index
    %c6_436 = arith.constant 6 : index
    %c1_437 = arith.constant 1 : index
    %c0_438 = arith.constant 0 : index
    %258 = vector.load %arg13[%c0_435, %c6_436, %c1_437, %c0_438] : memref<1x10x10x128xbf16, #tpu.memory_space<vmem>>, vector<1x1x9x32xbf16>
    %259 = vector.shape_cast %258 : vector<1x1x9x32xbf16> to vector<9x32xbf16>
    %c0_439 = arith.constant 0 : index
    %c6_440 = arith.constant 6 : index
    %c1_441 = arith.constant 1 : index
    %c32_442 = arith.constant 32 : index
    %260 = vector.load %arg13[%c0_439, %c6_440, %c1_441, %c32_442] : memref<1x10x10x128xbf16, #tpu.memory_space<vmem>>, vector<1x1x9x32xbf16>
    %261 = vector.shape_cast %260 : vector<1x1x9x32xbf16> to vector<9x32xbf16>
    %c0_443 = arith.constant 0 : index
    %c6_444 = arith.constant 6 : index
    %c0_445 = arith.constant 0 : index
    %c64_446 = arith.constant 64 : index
    %262 = vector.load %arg13[%c0_443, %c6_444, %c0_445, %c64_446] : memref<1x10x10x128xbf16, #tpu.memory_space<vmem>>, vector<1x1x9x32xbf16>
    %263 = vector.shape_cast %262 : vector<1x1x9x32xbf16> to vector<9x32xbf16>
    %c0_447 = arith.constant 0 : index
    %c6_448 = arith.constant 6 : index
    %c0_449 = arith.constant 0 : index
    %c96_450 = arith.constant 96 : index
    %264 = vector.load %arg13[%c0_447, %c6_448, %c0_449, %c96_450] : memref<1x10x10x128xbf16, #tpu.memory_space<vmem>>, vector<1x1x9x32xbf16>
    %265 = vector.shape_cast %264 : vector<1x1x9x32xbf16> to vector<9x32xbf16>
    %c0_451 = arith.constant 0 : index
    %c6_452 = arith.constant 6 : index
    %c1_453 = arith.constant 1 : index
    %c64_454 = arith.constant 64 : index
    %266 = vector.load %arg13[%c0_451, %c6_452, %c1_453, %c64_454] : memref<1x10x10x128xbf16, #tpu.memory_space<vmem>>, vector<1x1x9x32xbf16>
    %267 = vector.shape_cast %266 : vector<1x1x9x32xbf16> to vector<9x32xbf16>
    %c0_455 = arith.constant 0 : index
    %c6_456 = arith.constant 6 : index
    %c1_457 = arith.constant 1 : index
    %c96_458 = arith.constant 96 : index
    %268 = vector.load %arg13[%c0_455, %c6_456, %c1_457, %c96_458] : memref<1x10x10x128xbf16, #tpu.memory_space<vmem>>, vector<1x1x9x32xbf16>
    %269 = vector.shape_cast %268 : vector<1x1x9x32xbf16> to vector<9x32xbf16>
    %c0_459 = arith.constant 0 : index
    %c7_460 = arith.constant 7 : index
    %c0_461 = arith.constant 0 : index
    %c0_462 = arith.constant 0 : index
    %270 = vector.load %arg13[%c0_459, %c7_460, %c0_461, %c0_462] : memref<1x10x10x128xbf16, #tpu.memory_space<vmem>>, vector<1x1x9x32xbf16>
    %271 = vector.shape_cast %270 : vector<1x1x9x32xbf16> to vector<9x32xbf16>
    %c0_463 = arith.constant 0 : index
    %c7_464 = arith.constant 7 : index
    %c0_465 = arith.constant 0 : index
    %c32_466 = arith.constant 32 : index
    %272 = vector.load %arg13[%c0_463, %c7_464, %c0_465, %c32_466] : memref<1x10x10x128xbf16, #tpu.memory_space<vmem>>, vector<1x1x9x32xbf16>
    %273 = vector.shape_cast %272 : vector<1x1x9x32xbf16> to vector<9x32xbf16>
    %c0_467 = arith.constant 0 : index
    %c7_468 = arith.constant 7 : index
    %c1_469 = arith.constant 1 : index
    %c0_470 = arith.constant 0 : index
    %274 = vector.load %arg13[%c0_467, %c7_468, %c1_469, %c0_470] : memref<1x10x10x128xbf16, #tpu.memory_space<vmem>>, vector<1x1x9x32xbf16>
    %275 = vector.shape_cast %274 : vector<1x1x9x32xbf16> to vector<9x32xbf16>
    %c0_471 = arith.constant 0 : index
    %c7_472 = arith.constant 7 : index
    %c1_473 = arith.constant 1 : index
    %c32_474 = arith.constant 32 : index
    %276 = vector.load %arg13[%c0_471, %c7_472, %c1_473, %c32_474] : memref<1x10x10x128xbf16, #tpu.memory_space<vmem>>, vector<1x1x9x32xbf16>
    %277 = vector.shape_cast %276 : vector<1x1x9x32xbf16> to vector<9x32xbf16>
    %c0_475 = arith.constant 0 : index
    %c7_476 = arith.constant 7 : index
    %c0_477 = arith.constant 0 : index
    %c64_478 = arith.constant 64 : index
    %278 = vector.load %arg13[%c0_475, %c7_476, %c0_477, %c64_478] : memref<1x10x10x128xbf16, #tpu.memory_space<vmem>>, vector<1x1x9x32xbf16>
    %279 = vector.shape_cast %278 : vector<1x1x9x32xbf16> to vector<9x32xbf16>
    %c0_479 = arith.constant 0 : index
    %c7_480 = arith.constant 7 : index
    %c0_481 = arith.constant 0 : index
    %c96_482 = arith.constant 96 : index
    %280 = vector.load %arg13[%c0_479, %c7_480, %c0_481, %c96_482] : memref<1x10x10x128xbf16, #tpu.memory_space<vmem>>, vector<1x1x9x32xbf16>
    %281 = vector.shape_cast %280 : vector<1x1x9x32xbf16> to vector<9x32xbf16>
    %c0_483 = arith.constant 0 : index
    %c7_484 = arith.constant 7 : index
    %c1_485 = arith.constant 1 : index
    %c64_486 = arith.constant 64 : index
    %282 = vector.load %arg13[%c0_483, %c7_484, %c1_485, %c64_486] : memref<1x10x10x128xbf16, #tpu.memory_space<vmem>>, vector<1x1x9x32xbf16>
    %283 = vector.shape_cast %282 : vector<1x1x9x32xbf16> to vector<9x32xbf16>
    %c0_487 = arith.constant 0 : index
    %c7_488 = arith.constant 7 : index
    %c1_489 = arith.constant 1 : index
    %c96_490 = arith.constant 96 : index
    %284 = vector.load %arg13[%c0_487, %c7_488, %c1_489, %c96_490] : memref<1x10x10x128xbf16, #tpu.memory_space<vmem>>, vector<1x1x9x32xbf16>
    %285 = vector.shape_cast %284 : vector<1x1x9x32xbf16> to vector<9x32xbf16>
    %286 = tpu.concatenate %255, %257, %259, %261, %263, %265, %267, %269, %271, %273, %275, %277, %279, %281, %283, %285 in 1 : vector<9x32xbf16>, vector<9x32xbf16>, vector<9x32xbf16>, vector<9x32xbf16>, vector<9x32xbf16>, vector<9x32xbf16>, vector<9x32xbf16>, vector<9x32xbf16>, vector<9x32xbf16>, vector<9x32xbf16>, vector<9x32xbf16>, vector<9x32xbf16>, vector<9x32xbf16>, vector<9x32xbf16>, vector<9x32xbf16>, vector<9x32xbf16> -> vector<9x512xbf16>
    %c54 = arith.constant 54 : index
    %c0_491 = arith.constant 0 : index
    %287 = vector.load %arg14[%c54, %c0_491] : memref<81x512xbf16, #tpu.memory_space<vmem>>, vector<9x512xbf16>
    tpu.vector_store %arg14[%c54, %c0_491], %286 {strides = array<i32>} : memref<81x512xbf16, #tpu.memory_space<vmem>>, vector<9x512xbf16>,
    %c0_492 = arith.constant 0 : index
    %c7_493 = arith.constant 7 : index
    %c0_494 = arith.constant 0 : index
    %c0_495 = arith.constant 0 : index
    %288 = vector.load %arg13[%c0_492, %c7_493, %c0_494, %c0_495] : memref<1x10x10x128xbf16, #tpu.memory_space<vmem>>, vector<1x1x9x32xbf16>
    %289 = vector.shape_cast %288 : vector<1x1x9x32xbf16> to vector<9x32xbf16>
    %c0_496 = arith.constant 0 : index
    %c7_497 = arith.constant 7 : index
    %c0_498 = arith.constant 0 : index
    %c32_499 = arith.constant 32 : index
    %290 = vector.load %arg13[%c0_496, %c7_497, %c0_498, %c32_499] : memref<1x10x10x128xbf16, #tpu.memory_space<vmem>>, vector<1x1x9x32xbf16>
    %291 = vector.shape_cast %290 : vector<1x1x9x32xbf16> to vector<9x32xbf16>
    %c0_500 = arith.constant 0 : index
    %c7_501 = arith.constant 7 : index
    %c1_502 = arith.constant 1 : index
    %c0_503 = arith.constant 0 : index
    %292 = vector.load %arg13[%c0_500, %c7_501, %c1_502, %c0_503] : memref<1x10x10x128xbf16, #tpu.memory_space<vmem>>, vector<1x1x9x32xbf16>
    %293 = vector.shape_cast %292 : vector<1x1x9x32xbf16> to vector<9x32xbf16>
    %c0_504 = arith.constant 0 : index
    %c7_505 = arith.constant 7 : index
    %c1_506 = arith.constant 1 : index
    %c32_507 = arith.constant 32 : index
    %294 = vector.load %arg13[%c0_504, %c7_505, %c1_506, %c32_507] : memref<1x10x10x128xbf16, #tpu.memory_space<vmem>>, vector<1x1x9x32xbf16>
    %295 = vector.shape_cast %294 : vector<1x1x9x32xbf16> to vector<9x32xbf16>
    %c0_508 = arith.constant 0 : index
    %c7_509 = arith.constant 7 : index
    %c0_510 = arith.constant 0 : index
    %c64_511 = arith.constant 64 : index
    %296 = vector.load %arg13[%c0_508, %c7_509, %c0_510, %c64_511] : memref<1x10x10x128xbf16, #tpu.memory_space<vmem>>, vector<1x1x9x32xbf16>
    %297 = vector.shape_cast %296 : vector<1x1x9x32xbf16> to vector<9x32xbf16>
    %c0_512 = arith.constant 0 : index
    %c7_513 = arith.constant 7 : index
    %c0_514 = arith.constant 0 : index
    %c96_515 = arith.constant 96 : index
    %298 = vector.load %arg13[%c0_512, %c7_513, %c0_514, %c96_515] : memref<1x10x10x128xbf16, #tpu.memory_space<vmem>>, vector<1x1x9x32xbf16>
    %299 = vector.shape_cast %298 : vector<1x1x9x32xbf16> to vector<9x32xbf16>
    %c0_516 = arith.constant 0 : index
    %c7_517 = arith.constant 7 : index
    %c1_518 = arith.constant 1 : index
    %c64_519 = arith.constant 64 : index
    %300 = vector.load %arg13[%c0_516, %c7_517, %c1_518, %c64_519] : memref<1x10x10x128xbf16, #tpu.memory_space<vmem>>, vector<1x1x9x32xbf16>
    %301 = vector.shape_cast %300 : vector<1x1x9x32xbf16> to vector<9x32xbf16>
    %c0_520 = arith.constant 0 : index
    %c7_521 = arith.constant 7 : index
    %c1_522 = arith.constant 1 : index
    %c96_523 = arith.constant 96 : index
    %302 = vector.load %arg13[%c0_520, %c7_521, %c1_522, %c96_523] : memref<1x10x10x128xbf16, #tpu.memory_space<vmem>>, vector<1x1x9x32xbf16>
    %303 = vector.shape_cast %302 : vector<1x1x9x32xbf16> to vector<9x32xbf16>
    %c0_524 = arith.constant 0 : index
    %c8_525 = arith.constant 8 : index
    %c0_526 = arith.constant 0 : index
    %c0_527 = arith.constant 0 : index
    %304 = vector.load %arg13[%c0_524, %c8_525, %c0_526, %c0_527] : memref<1x10x10x128xbf16, #tpu.memory_space<vmem>>, vector<1x1x9x32xbf16>
    %305 = vector.shape_cast %304 : vector<1x1x9x32xbf16> to vector<9x32xbf16>
    %c0_528 = arith.constant 0 : index
    %c8_529 = arith.constant 8 : index
    %c0_530 = arith.constant 0 : index
    %c32_531 = arith.constant 32 : index
    %306 = vector.load %arg13[%c0_528, %c8_529, %c0_530, %c32_531] : memref<1x10x10x128xbf16, #tpu.memory_space<vmem>>, vector<1x1x9x32xbf16>
    %307 = vector.shape_cast %306 : vector<1x1x9x32xbf16> to vector<9x32xbf16>
    %c0_532 = arith.constant 0 : index
    %c8_533 = arith.constant 8 : index
    %c1_534 = arith.constant 1 : index
    %c0_535 = arith.constant 0 : index
    %308 = vector.load %arg13[%c0_532, %c8_533, %c1_534, %c0_535] : memref<1x10x10x128xbf16, #tpu.memory_space<vmem>>, vector<1x1x9x32xbf16>
    %309 = vector.shape_cast %308 : vector<1x1x9x32xbf16> to vector<9x32xbf16>
    %c0_536 = arith.constant 0 : index
    %c8_537 = arith.constant 8 : index
    %c1_538 = arith.constant 1 : index
    %c32_539 = arith.constant 32 : index
    %310 = vector.load %arg13[%c0_536, %c8_537, %c1_538, %c32_539] : memref<1x10x10x128xbf16, #tpu.memory_space<vmem>>, vector<1x1x9x32xbf16>
    %311 = vector.shape_cast %310 : vector<1x1x9x32xbf16> to vector<9x32xbf16>
    %c0_540 = arith.constant 0 : index
    %c8_541 = arith.constant 8 : index
    %c0_542 = arith.constant 0 : index
    %c64_543 = arith.constant 64 : index
    %312 = vector.load %arg13[%c0_540, %c8_541, %c0_542, %c64_543] : memref<1x10x10x128xbf16, #tpu.memory_space<vmem>>, vector<1x1x9x32xbf16>
    %313 = vector.shape_cast %312 : vector<1x1x9x32xbf16> to vector<9x32xbf16>
    %c0_544 = arith.constant 0 : index
    %c8_545 = arith.constant 8 : index
    %c0_546 = arith.constant 0 : index
    %c96_547 = arith.constant 96 : index
    %314 = vector.load %arg13[%c0_544, %c8_545, %c0_546, %c96_547] : memref<1x10x10x128xbf16, #tpu.memory_space<vmem>>, vector<1x1x9x32xbf16>
    %315 = vector.shape_cast %314 : vector<1x1x9x32xbf16> to vector<9x32xbf16>
    %c0_548 = arith.constant 0 : index
    %c8_549 = arith.constant 8 : index
    %c1_550 = arith.constant 1 : index
    %c64_551 = arith.constant 64 : index
    %316 = vector.load %arg13[%c0_548, %c8_549, %c1_550, %c64_551] : memref<1x10x10x128xbf16, #tpu.memory_space<vmem>>, vector<1x1x9x32xbf16>
    %317 = vector.shape_cast %316 : vector<1x1x9x32xbf16> to vector<9x32xbf16>
    %c0_552 = arith.constant 0 : index
    %c8_553 = arith.constant 8 : index
    %c1_554 = arith.constant 1 : index
    %c96_555 = arith.constant 96 : index
    %318 = vector.load %arg13[%c0_552, %c8_553, %c1_554, %c96_555] : memref<1x10x10x128xbf16, #tpu.memory_space<vmem>>, vector<1x1x9x32xbf16>
    %319 = vector.shape_cast %318 : vector<1x1x9x32xbf16> to vector<9x32xbf16>
    %320 = tpu.concatenate %289, %291, %293, %295, %297, %299, %301, %303, %305, %307, %309, %311, %313, %315, %317, %319 in 1 : vector<9x32xbf16>, vector<9x32xbf16>, vector<9x32xbf16>, vector<9x32xbf16>, vector<9x32xbf16>, vector<9x32xbf16>, vector<9x32xbf16>, vector<9x32xbf16>, vector<9x32xbf16>, vector<9x32xbf16>, vector<9x32xbf16>, vector<9x32xbf16>, vector<9x32xbf16>, vector<9x32xbf16>, vector<9x32xbf16>, vector<9x32xbf16> -> vector<9x512xbf16>
    %c63 = arith.constant 63 : index
    %c0_556 = arith.constant 0 : index
    %321 = vector.load %arg14[%c63, %c0_556] : memref<81x512xbf16, #tpu.memory_space<vmem>>, vector<9x512xbf16>
    tpu.vector_store %arg14[%c63, %c0_556], %320 {strides = array<i32>} : memref<81x512xbf16, #tpu.memory_space<vmem>>, vector<9x512xbf16>,
    %c0_557 = arith.constant 0 : index
    %c8_558 = arith.constant 8 : index
    %c0_559 = arith.constant 0 : index
    %c0_560 = arith.constant 0 : index
    %322 = vector.load %arg13[%c0_557, %c8_558, %c0_559, %c0_560] : memref<1x10x10x128xbf16, #tpu.memory_space<vmem>>, vector<1x1x9x32xbf16>
    %323 = vector.shape_cast %322 : vector<1x1x9x32xbf16> to vector<9x32xbf16>
    %c0_561 = arith.constant 0 : index
    %c8_562 = arith.constant 8 : index
    %c0_563 = arith.constant 0 : index
    %c32_564 = arith.constant 32 : index
    %324 = vector.load %arg13[%c0_561, %c8_562, %c0_563, %c32_564] : memref<1x10x10x128xbf16, #tpu.memory_space<vmem>>, vector<1x1x9x32xbf16>
    %325 = vector.shape_cast %324 : vector<1x1x9x32xbf16> to vector<9x32xbf16>
    %c0_565 = arith.constant 0 : index
    %c8_566 = arith.constant 8 : index
    %c1_567 = arith.constant 1 : index
    %c0_568 = arith.constant 0 : index
    %326 = vector.load %arg13[%c0_565, %c8_566, %c1_567, %c0_568] : memref<1x10x10x128xbf16, #tpu.memory_space<vmem>>, vector<1x1x9x32xbf16>
    %327 = vector.shape_cast %326 : vector<1x1x9x32xbf16> to vector<9x32xbf16>
    %c0_569 = arith.constant 0 : index
    %c8_570 = arith.constant 8 : index
    %c1_571 = arith.constant 1 : index
    %c32_572 = arith.constant 32 : index
    %328 = vector.load %arg13[%c0_569, %c8_570, %c1_571, %c32_572] : memref<1x10x10x128xbf16, #tpu.memory_space<vmem>>, vector<1x1x9x32xbf16>
    %329 = vector.shape_cast %328 : vector<1x1x9x32xbf16> to vector<9x32xbf16>
    %c0_573 = arith.constant 0 : index
    %c8_574 = arith.constant 8 : index
    %c0_575 = arith.constant 0 : index
    %c64_576 = arith.constant 64 : index
    %330 = vector.load %arg13[%c0_573, %c8_574, %c0_575, %c64_576] : memref<1x10x10x128xbf16, #tpu.memory_space<vmem>>, vector<1x1x9x32xbf16>
    %331 = vector.shape_cast %330 : vector<1x1x9x32xbf16> to vector<9x32xbf16>
    %c0_577 = arith.constant 0 : index
    %c8_578 = arith.constant 8 : index
    %c0_579 = arith.constant 0 : index
    %c96_580 = arith.constant 96 : index
    %332 = vector.load %arg13[%c0_577, %c8_578, %c0_579, %c96_580] : memref<1x10x10x128xbf16, #tpu.memory_space<vmem>>, vector<1x1x9x32xbf16>
    %333 = vector.shape_cast %332 : vector<1x1x9x32xbf16> to vector<9x32xbf16>
    %c0_581 = arith.constant 0 : index
    %c8_582 = arith.constant 8 : index
    %c1_583 = arith.constant 1 : index
    %c64_584 = arith.constant 64 : index
    %334 = vector.load %arg13[%c0_581, %c8_582, %c1_583, %c64_584] : memref<1x10x10x128xbf16, #tpu.memory_space<vmem>>, vector<1x1x9x32xbf16>
    %335 = vector.shape_cast %334 : vector<1x1x9x32xbf16> to vector<9x32xbf16>
    %c0_585 = arith.constant 0 : index
    %c8_586 = arith.constant 8 : index
    %c1_587 = arith.constant 1 : index
    %c96_588 = arith.constant 96 : index
    %336 = vector.load %arg13[%c0_585, %c8_586, %c1_587, %c96_588] : memref<1x10x10x128xbf16, #tpu.memory_space<vmem>>, vector<1x1x9x32xbf16>
    %337 = vector.shape_cast %336 : vector<1x1x9x32xbf16> to vector<9x32xbf16>
    %c0_589 = arith.constant 0 : index
    %c9_590 = arith.constant 9 : index
    %c0_591 = arith.constant 0 : index
    %c0_592 = arith.constant 0 : index
    %338 = vector.load %arg13[%c0_589, %c9_590, %c0_591, %c0_592] : memref<1x10x10x128xbf16, #tpu.memory_space<vmem>>, vector<1x1x9x32xbf16>
    %339 = vector.shape_cast %338 : vector<1x1x9x32xbf16> to vector<9x32xbf16>
    %c0_593 = arith.constant 0 : index
    %c9_594 = arith.constant 9 : index
    %c0_595 = arith.constant 0 : index
    %c32_596 = arith.constant 32 : index
    %340 = vector.load %arg13[%c0_593, %c9_594, %c0_595, %c32_596] : memref<1x10x10x128xbf16, #tpu.memory_space<vmem>>, vector<1x1x9x32xbf16>
    %341 = vector.shape_cast %340 : vector<1x1x9x32xbf16> to vector<9x32xbf16>
    %c0_597 = arith.constant 0 : index
    %c9_598 = arith.constant 9 : index
    %c1_599 = arith.constant 1 : index
    %c0_600 = arith.constant 0 : index
    %342 = vector.load %arg13[%c0_597, %c9_598, %c1_599, %c0_600] : memref<1x10x10x128xbf16, #tpu.memory_space<vmem>>, vector<1x1x9x32xbf16>
    %343 = vector.shape_cast %342 : vector<1x1x9x32xbf16> to vector<9x32xbf16>
    %c0_601 = arith.constant 0 : index
    %c9_602 = arith.constant 9 : index
    %c1_603 = arith.constant 1 : index
    %c32_604 = arith.constant 32 : index
    %344 = vector.load %arg13[%c0_601, %c9_602, %c1_603, %c32_604] : memref<1x10x10x128xbf16, #tpu.memory_space<vmem>>, vector<1x1x9x32xbf16>
    %345 = vector.shape_cast %344 : vector<1x1x9x32xbf16> to vector<9x32xbf16>
    %c0_605 = arith.constant 0 : index
    %c9_606 = arith.constant 9 : index
    %c0_607 = arith.constant 0 : index
    %c64_608 = arith.constant 64 : index
    %346 = vector.load %arg13[%c0_605, %c9_606, %c0_607, %c64_608] : memref<1x10x10x128xbf16, #tpu.memory_space<vmem>>, vector<1x1x9x32xbf16>
    %347 = vector.shape_cast %346 : vector<1x1x9x32xbf16> to vector<9x32xbf16>
    %c0_609 = arith.constant 0 : index
    %c9_610 = arith.constant 9 : index
    %c0_611 = arith.constant 0 : index
    %c96_612 = arith.constant 96 : index
    %348 = vector.load %arg13[%c0_609, %c9_610, %c0_611, %c96_612] : memref<1x10x10x128xbf16, #tpu.memory_space<vmem>>, vector<1x1x9x32xbf16>
    %349 = vector.shape_cast %348 : vector<1x1x9x32xbf16> to vector<9x32xbf16>
    %c0_613 = arith.constant 0 : index
    %c9_614 = arith.constant 9 : index
    %c1_615 = arith.constant 1 : index
    %c64_616 = arith.constant 64 : index
    %350 = vector.load %arg13[%c0_613, %c9_614, %c1_615, %c64_616] : memref<1x10x10x128xbf16, #tpu.memory_space<vmem>>, vector<1x1x9x32xbf16>
    %351 = vector.shape_cast %350 : vector<1x1x9x32xbf16> to vector<9x32xbf16>
    %c0_617 = arith.constant 0 : index
    %c9_618 = arith.constant 9 : index
    %c1_619 = arith.constant 1 : index
    %c96_620 = arith.constant 96 : index
    %352 = vector.load %arg13[%c0_617, %c9_618, %c1_619, %c96_620] : memref<1x10x10x128xbf16, #tpu.memory_space<vmem>>, vector<1x1x9x32xbf16>
    %353 = vector.shape_cast %352 : vector<1x1x9x32xbf16> to vector<9x32xbf16>
    %354 = tpu.concatenate %323, %325, %327, %329, %331, %333, %335, %337, %339, %341, %343, %345, %347, %349, %351, %353 in 1 : vector<9x32xbf16>, vector<9x32xbf16>, vector<9x32xbf16>, vector<9x32xbf16>, vector<9x32xbf16>, vector<9x32xbf16>, vector<9x32xbf16>, vector<9x32xbf16>, vector<9x32xbf16>, vector<9x32xbf16>, vector<9x32xbf16>, vector<9x32xbf16>, vector<9x32xbf16>, vector<9x32xbf16>, vector<9x32xbf16>, vector<9x32xbf16> -> vector<9x512xbf16>
    %c72 = arith.constant 72 : index
    %c0_621 = arith.constant 0 : index
    %355 = vector.load %arg14[%c72, %c0_621] : memref<81x512xbf16, #tpu.memory_space<vmem>>, vector<9x512xbf16>
    tpu.vector_store %arg14[%c72, %c0_621], %354 {strides = array<i32>} : memref<81x512xbf16, #tpu.memory_space<vmem>>, vector<9x512xbf16>,
    %c0_622 = arith.constant 0 : index
    %c0_623 = arith.constant 0 : index
    %356 = vector.load %arg14[%c0_622, %c0_623] : memref<81x512xbf16, #tpu.memory_space<vmem>>, vector<81x512xbf16>
    %c0_624 = arith.constant 0 : index
    %c0_625 = arith.constant 0 : index
    %357 = vector.load %arg4[%c0_624, %c0_625] : memref<512x64xbf16, #tpu.memory_space<vmem>>, vector<512x64xbf16>
    %cst_626 = arith.constant dense<0.000000e+00> : vector<81x64xf32>
    %358 = tpu.matmul %356, %357, %cst_626 {dimension_numbers = #tpu.dot_dimension_numbers<[1], [0], [0], [1], [0, 0, 1, 1], [], []>} : vector<81x512xbf16>, vector<512x64xbf16>, vector<81x64xf32> -> vector<81x64xf32>
    %c0_627 = arith.constant 0 : index
    %c0_628 = arith.constant 0 : index
    %359 = vector.load %arg5[%c0_627, %c0_628] : memref<1x64xf32, #tpu.memory_space<vmem>>, vector<1x64xf32>
    %360 = vector.broadcast %359 : vector<1x64xf32> to vector<81x64xf32>
    %361 = arith.addf %358, %360 : vector<81x64xf32>
    %cst_629 = arith.constant 0.000000e+00 : f32
    %362 = vector.broadcast %cst_629 : f32 to vector<81x64xf32>
    %363 = arith.maximumf %361, %362 : vector<81x64xf32>
    %364 = arith.truncf %363 : vector<81x64xf32> to vector<81x64xbf16>
    %365 = vector.extract_strided_slice %364 {offsets = [0, 0], sizes = [1, 64], strides = [1, 1]} : vector<81x64xbf16> to vector<1x64xbf16>
    %366 = vector.extract_strided_slice %365 {offsets = [0, 0], sizes = [1, 32], strides = [1, 1]} : vector<1x64xbf16> to vector<1x32xbf16>
    %c0_630 = arith.constant 0 : index
    %c0_631 = arith.constant 0 : index
    %367 = vector.load %arg15[%c0_630, %c0_631] : memref<1x2592xbf16, #tpu.memory_space<vmem>>, vector<1x32xbf16>
    tpu.vector_store %arg15[%c0_630, %c0_631], %366 {strides = array<i32>} : memref<1x2592xbf16, #tpu.memory_space<vmem>>, vector<1x32xbf16>,
    %368 = vector.extract_strided_slice %365 {offsets = [0, 32], sizes = [1, 32], strides = [1, 1]} : vector<1x64xbf16> to vector<1x32xbf16>
    %c0_632 = arith.constant 0 : index
    %c0_633 = arith.constant 0 : index
    %369 = vector.load %arg16[%c0_632, %c0_633] : memref<1x2592xbf16, #tpu.memory_space<vmem>>, vector<1x32xbf16>
    tpu.vector_store %arg16[%c0_632, %c0_633], %368 {strides = array<i32>} : memref<1x2592xbf16, #tpu.memory_space<vmem>>, vector<1x32xbf16>,
    %370 = vector.extract_strided_slice %364 {offsets = [1, 0], sizes = [1, 64], strides = [1, 1]} : vector<81x64xbf16> to vector<1x64xbf16>
    %371 = vector.extract_strided_slice %370 {offsets = [0, 0], sizes = [1, 32], strides = [1, 1]} : vector<1x64xbf16> to vector<1x32xbf16>
    %c0_634 = arith.constant 0 : index
    %c32_635 = arith.constant 32 : index
    %372 = vector.load %arg15[%c0_634, %c32_635] : memref<1x2592xbf16, #tpu.memory_space<vmem>>, vector<1x32xbf16>
    tpu.vector_store %arg15[%c0_634, %c32_635], %371 {strides = array<i32>} : memref<1x2592xbf16, #tpu.memory_space<vmem>>, vector<1x32xbf16>,
    %373 = vector.extract_strided_slice %370 {offsets = [0, 32], sizes = [1, 32], strides = [1, 1]} : vector<1x64xbf16> to vector<1x32xbf16>
    %c0_636 = arith.constant 0 : index
    %c32_637 = arith.constant 32 : index
    %374 = vector.load %arg16[%c0_636, %c32_637] : memref<1x2592xbf16, #tpu.memory_space<vmem>>, vector<1x32xbf16>
    tpu.vector_store %arg16[%c0_636, %c32_637], %373 {strides = array<i32>} : memref<1x2592xbf16, #tpu.memory_space<vmem>>, vector<1x32xbf16>,
    %375 = vector.extract_strided_slice %364 {offsets = [2, 0], sizes = [1, 64], strides = [1, 1]} : vector<81x64xbf16> to vector<1x64xbf16>
    %376 = vector.extract_strided_slice %375 {offsets = [0, 0], sizes = [1, 32], strides = [1, 1]} : vector<1x64xbf16> to vector<1x32xbf16>
    %c0_638 = arith.constant 0 : index
    %c64_639 = arith.constant 64 : index
    %377 = vector.load %arg15[%c0_638, %c64_639] : memref<1x2592xbf16, #tpu.memory_space<vmem>>, vector<1x32xbf16>
    tpu.vector_store %arg15[%c0_638, %c64_639], %376 {strides = array<i32>} : memref<1x2592xbf16, #tpu.memory_space<vmem>>, vector<1x32xbf16>,
    %378 = vector.extract_strided_slice %375 {offsets = [0, 32], sizes = [1, 32], strides = [1, 1]} : vector<1x64xbf16> to vector<1x32xbf16>
    %c0_640 = arith.constant 0 : index
    %c64_641 = arith.constant 64 : index
    %379 = vector.load %arg16[%c0_640, %c64_641] : memref<1x2592xbf16, #tpu.memory_space<vmem>>, vector<1x32xbf16>
    tpu.vector_store %arg16[%c0_640, %c64_641], %378 {strides = array<i32>} : memref<1x2592xbf16, #tpu.memory_space<vmem>>, vector<1x32xbf16>,
    %380 = vector.extract_strided_slice %364 {offsets = [3, 0], sizes = [1, 64], strides = [1, 1]} : vector<81x64xbf16> to vector<1x64xbf16>
    %381 = vector.extract_strided_slice %380 {offsets = [0, 0], sizes = [1, 32], strides = [1, 1]} : vector<1x64xbf16> to vector<1x32xbf16>
    %c0_642 = arith.constant 0 : index
    %c96_643 = arith.constant 96 : index
    %382 = vector.load %arg15[%c0_642, %c96_643] : memref<1x2592xbf16, #tpu.memory_space<vmem>>, vector<1x32xbf16>
    tpu.vector_store %arg15[%c0_642, %c96_643], %381 {strides = array<i32>} : memref<1x2592xbf16, #tpu.memory_space<vmem>>, vector<1x32xbf16>,
    %383 = vector.extract_strided_slice %380 {offsets = [0, 32], sizes = [1, 32], strides = [1, 1]} : vector<1x64xbf16> to vector<1x32xbf16>
    %c0_644 = arith.constant 0 : index
    %c96_645 = arith.constant 96 : index
    %384 = vector.load %arg16[%c0_644, %c96_645] : memref<1x2592xbf16, #tpu.memory_space<vmem>>, vector<1x32xbf16>
    tpu.vector_store %arg16[%c0_644, %c96_645], %383 {strides = array<i32>} : memref<1x2592xbf16, #tpu.memory_space<vmem>>, vector<1x32xbf16>,
    %385 = vector.extract_strided_slice %364 {offsets = [4, 0], sizes = [1, 64], strides = [1, 1]} : vector<81x64xbf16> to vector<1x64xbf16>
    %386 = vector.extract_strided_slice %385 {offsets = [0, 0], sizes = [1, 32], strides = [1, 1]} : vector<1x64xbf16> to vector<1x32xbf16>
    %c0_646 = arith.constant 0 : index
    %c128 = arith.constant 128 : index
    %387 = vector.load %arg15[%c0_646, %c128] : memref<1x2592xbf16, #tpu.memory_space<vmem>>, vector<1x32xbf16>
    tpu.vector_store %arg15[%c0_646, %c128], %386 {strides = array<i32>} : memref<1x2592xbf16, #tpu.memory_space<vmem>>, vector<1x32xbf16>,
    %388 = vector.extract_strided_slice %385 {offsets = [0, 32], sizes = [1, 32], strides = [1, 1]} : vector<1x64xbf16> to vector<1x32xbf16>
    %c0_647 = arith.constant 0 : index
    %c128_648 = arith.constant 128 : index
    %389 = vector.load %arg16[%c0_647, %c128_648] : memref<1x2592xbf16, #tpu.memory_space<vmem>>, vector<1x32xbf16>
    tpu.vector_store %arg16[%c0_647, %c128_648], %388 {strides = array<i32>} : memref<1x2592xbf16, #tpu.memory_space<vmem>>, vector<1x32xbf16>,
    %390 = vector.extract_strided_slice %364 {offsets = [5, 0], sizes = [1, 64], strides = [1, 1]} : vector<81x64xbf16> to vector<1x64xbf16>
    %391 = vector.extract_strided_slice %390 {offsets = [0, 0], sizes = [1, 32], strides = [1, 1]} : vector<1x64xbf16> to vector<1x32xbf16>
    %c0_649 = arith.constant 0 : index
    %c160 = arith.constant 160 : index
    %392 = vector.load %arg15[%c0_649, %c160] : memref<1x2592xbf16, #tpu.memory_space<vmem>>, vector<1x32xbf16>
    tpu.vector_store %arg15[%c0_649, %c160], %391 {strides = array<i32>} : memref<1x2592xbf16, #tpu.memory_space<vmem>>, vector<1x32xbf16>,
    %393 = vector.extract_strided_slice %390 {offsets = [0, 32], sizes = [1, 32], strides = [1, 1]} : vector<1x64xbf16> to vector<1x32xbf16>
    %c0_650 = arith.constant 0 : index
    %c160_651 = arith.constant 160 : index
    %394 = vector.load %arg16[%c0_650, %c160_651] : memref<1x2592xbf16, #tpu.memory_space<vmem>>, vector<1x32xbf16>
    tpu.vector_store %arg16[%c0_650, %c160_651], %393 {strides = array<i32>} : memref<1x2592xbf16, #tpu.memory_space<vmem>>, vector<1x32xbf16>,
    %395 = vector.extract_strided_slice %364 {offsets = [6, 0], sizes = [1, 64], strides = [1, 1]} : vector<81x64xbf16> to vector<1x64xbf16>
    %396 = vector.extract_strided_slice %395 {offsets = [0, 0], sizes = [1, 32], strides = [1, 1]} : vector<1x64xbf16> to vector<1x32xbf16>
    %c0_652 = arith.constant 0 : index
    %c192 = arith.constant 192 : index
    %397 = vector.load %arg15[%c0_652, %c192] : memref<1x2592xbf16, #tpu.memory_space<vmem>>, vector<1x32xbf16>
    tpu.vector_store %arg15[%c0_652, %c192], %396 {strides = array<i32>} : memref<1x2592xbf16, #tpu.memory_space<vmem>>, vector<1x32xbf16>,
    %398 = vector.extract_strided_slice %395 {offsets = [0, 32], sizes = [1, 32], strides = [1, 1]} : vector<1x64xbf16> to vector<1x32xbf16>
    %c0_653 = arith.constant 0 : index
    %c192_654 = arith.constant 192 : index
    %399 = vector.load %arg16[%c0_653, %c192_654] : memref<1x2592xbf16, #tpu.memory_space<vmem>>, vector<1x32xbf16>
    tpu.vector_store %arg16[%c0_653, %c192_654], %398 {strides = array<i32>} : memref<1x2592xbf16, #tpu.memory_space<vmem>>, vector<1x32xbf16>,
    %400 = vector.extract_strided_slice %364 {offsets = [7, 0], sizes = [1, 64], strides = [1, 1]} : vector<81x64xbf16> to vector<1x64xbf16>
    %401 = vector.extract_strided_slice %400 {offsets = [0, 0], sizes = [1, 32], strides = [1, 1]} : vector<1x64xbf16> to vector<1x32xbf16>
    %c0_655 = arith.constant 0 : index
    %c224 = arith.constant 224 : index
    %402 = vector.load %arg15[%c0_655, %c224] : memref<1x2592xbf16, #tpu.memory_space<vmem>>, vector<1x32xbf16>
    tpu.vector_store %arg15[%c0_655, %c224], %401 {strides = array<i32>} : memref<1x2592xbf16, #tpu.memory_space<vmem>>, vector<1x32xbf16>,
    %403 = vector.extract_strided_slice %400 {offsets = [0, 32], sizes = [1, 32], strides = [1, 1]} : vector<1x64xbf16> to vector<1x32xbf16>
    %c0_656 = arith.constant 0 : index
    %c224_657 = arith.constant 224 : index
    %404 = vector.load %arg16[%c0_656, %c224_657] : memref<1x2592xbf16, #tpu.memory_space<vmem>>, vector<1x32xbf16>
    tpu.vector_store %arg16[%c0_656, %c224_657], %403 {strides = array<i32>} : memref<1x2592xbf16, #tpu.memory_space<vmem>>, vector<1x32xbf16>,
    %405 = vector.extract_strided_slice %364 {offsets = [8, 0], sizes = [1, 64], strides = [1, 1]} : vector<81x64xbf16> to vector<1x64xbf16>
    %406 = vector.extract_strided_slice %405 {offsets = [0, 0], sizes = [1, 32], strides = [1, 1]} : vector<1x64xbf16> to vector<1x32xbf16>
    %c0_658 = arith.constant 0 : index
    %c256 = arith.constant 256 : index
    %407 = vector.load %arg15[%c0_658, %c256] : memref<1x2592xbf16, #tpu.memory_space<vmem>>, vector<1x32xbf16>
    tpu.vector_store %arg15[%c0_658, %c256], %406 {strides = array<i32>} : memref<1x2592xbf16, #tpu.memory_space<vmem>>, vector<1x32xbf16>,
    %408 = vector.extract_strided_slice %405 {offsets = [0, 32], sizes = [1, 32], strides = [1, 1]} : vector<1x64xbf16> to vector<1x32xbf16>
    %c0_659 = arith.constant 0 : index
    %c256_660 = arith.constant 256 : index
    %409 = vector.load %arg16[%c0_659, %c256_660] : memref<1x2592xbf16, #tpu.memory_space<vmem>>, vector<1x32xbf16>
    tpu.vector_store %arg16[%c0_659, %c256_660], %408 {strides = array<i32>} : memref<1x2592xbf16, #tpu.memory_space<vmem>>, vector<1x32xbf16>,
    %410 = vector.extract_strided_slice %364 {offsets = [9, 0], sizes = [1, 64], strides = [1, 1]} : vector<81x64xbf16> to vector<1x64xbf16>
    %411 = vector.extract_strided_slice %410 {offsets = [0, 0], sizes = [1, 32], strides = [1, 1]} : vector<1x64xbf16> to vector<1x32xbf16>
    %c0_661 = arith.constant 0 : index
    %c288 = arith.constant 288 : index
    %412 = vector.load %arg15[%c0_661, %c288] : memref<1x2592xbf16, #tpu.memory_space<vmem>>, vector<1x32xbf16>
    tpu.vector_store %arg15[%c0_661, %c288], %411 {strides = array<i32>} : memref<1x2592xbf16, #tpu.memory_space<vmem>>, vector<1x32xbf16>,
    %413 = vector.extract_strided_slice %410 {offsets = [0, 32], sizes = [1, 32], strides = [1, 1]} : vector<1x64xbf16> to vector<1x32xbf16>
    %c0_662 = arith.constant 0 : index
    %c288_663 = arith.constant 288 : index
    %414 = vector.load %arg16[%c0_662, %c288_663] : memref<1x2592xbf16, #tpu.memory_space<vmem>>, vector<1x32xbf16>
    tpu.vector_store %arg16[%c0_662, %c288_663], %413 {strides = array<i32>} : memref<1x2592xbf16, #tpu.memory_space<vmem>>, vector<1x32xbf16>,
    %415 = vector.extract_strided_slice %364 {offsets = [10, 0], sizes = [1, 64], strides = [1, 1]} : vector<81x64xbf16> to vector<1x64xbf16>
    %416 = vector.extract_strided_slice %415 {offsets = [0, 0], sizes = [1, 32], strides = [1, 1]} : vector<1x64xbf16> to vector<1x32xbf16>
    %c0_664 = arith.constant 0 : index
    %c320 = arith.constant 320 : index
    %417 = vector.load %arg15[%c0_664, %c320] : memref<1x2592xbf16, #tpu.memory_space<vmem>>, vector<1x32xbf16>
    tpu.vector_store %arg15[%c0_664, %c320], %416 {strides = array<i32>} : memref<1x2592xbf16, #tpu.memory_space<vmem>>, vector<1x32xbf16>,
    %418 = vector.extract_strided_slice %415 {offsets = [0, 32], sizes = [1, 32], strides = [1, 1]} : vector<1x64xbf16> to vector<1x32xbf16>
    %c0_665 = arith.constant 0 : index
    %c320_666 = arith.constant 320 : index
    %419 = vector.load %arg16[%c0_665, %c320_666] : memref<1x2592xbf16, #tpu.memory_space<vmem>>, vector<1x32xbf16>
    tpu.vector_store %arg16[%c0_665, %c320_666], %418 {strides = array<i32>} : memref<1x2592xbf16, #tpu.memory_space<vmem>>, vector<1x32xbf16>,
    %420 = vector.extract_strided_slice %364 {offsets = [11, 0], sizes = [1, 64], strides = [1, 1]} : vector<81x64xbf16> to vector<1x64xbf16>
    %421 = vector.extract_strided_slice %420 {offsets = [0, 0], sizes = [1, 32], strides = [1, 1]} : vector<1x64xbf16> to vector<1x32xbf16>
    %c0_667 = arith.constant 0 : index
    %c352 = arith.constant 352 : index
    %422 = vector.load %arg15[%c0_667, %c352] : memref<1x2592xbf16, #tpu.memory_space<vmem>>, vector<1x32xbf16>
    tpu.vector_store %arg15[%c0_667, %c352], %421 {strides = array<i32>} : memref<1x2592xbf16, #tpu.memory_space<vmem>>, vector<1x32xbf16>,
    %423 = vector.extract_strided_slice %420 {offsets = [0, 32], sizes = [1, 32], strides = [1, 1]} : vector<1x64xbf16> to vector<1x32xbf16>
    %c0_668 = arith.constant 0 : index
    %c352_669 = arith.constant 352 : index
    %424 = vector.load %arg16[%c0_668, %c352_669] : memref<1x2592xbf16, #tpu.memory_space<vmem>>, vector<1x32xbf16>
    tpu.vector_store %arg16[%c0_668, %c352_669], %423 {strides = array<i32>} : memref<1x2592xbf16, #tpu.memory_space<vmem>>, vector<1x32xbf16>,
    %425 = vector.extract_strided_slice %364 {offsets = [12, 0], sizes = [1, 64], strides = [1, 1]} : vector<81x64xbf16> to vector<1x64xbf16>
    %426 = vector.extract_strided_slice %425 {offsets = [0, 0], sizes = [1, 32], strides = [1, 1]} : vector<1x64xbf16> to vector<1x32xbf16>
    %c0_670 = arith.constant 0 : index
    %c384 = arith.constant 384 : index
    %427 = vector.load %arg15[%c0_670, %c384] : memref<1x2592xbf16, #tpu.memory_space<vmem>>, vector<1x32xbf16>
    tpu.vector_store %arg15[%c0_670, %c384], %426 {strides = array<i32>} : memref<1x2592xbf16, #tpu.memory_space<vmem>>, vector<1x32xbf16>,
    %428 = vector.extract_strided_slice %425 {offsets = [0, 32], sizes = [1, 32], strides = [1, 1]} : vector<1x64xbf16> to vector<1x32xbf16>
    %c0_671 = arith.constant 0 : index
    %c384_672 = arith.constant 384 : index
    %429 = vector.load %arg16[%c0_671, %c384_672] : memref<1x2592xbf16, #tpu.memory_space<vmem>>, vector<1x32xbf16>
    tpu.vector_store %arg16[%c0_671, %c384_672], %428 {strides = array<i32>} : memref<1x2592xbf16, #tpu.memory_space<vmem>>, vector<1x32xbf16>,
    %430 = vector.extract_strided_slice %364 {offsets = [13, 0], sizes = [1, 64], strides = [1, 1]} : vector<81x64xbf16> to vector<1x64xbf16>
    %431 = vector.extract_strided_slice %430 {offsets = [0, 0], sizes = [1, 32], strides = [1, 1]} : vector<1x64xbf16> to vector<1x32xbf16>
    %c0_673 = arith.constant 0 : index
    %c416 = arith.constant 416 : index
    %432 = vector.load %arg15[%c0_673, %c416] : memref<1x2592xbf16, #tpu.memory_space<vmem>>, vector<1x32xbf16>
    tpu.vector_store %arg15[%c0_673, %c416], %431 {strides = array<i32>} : memref<1x2592xbf16, #tpu.memory_space<vmem>>, vector<1x32xbf16>,
    %433 = vector.extract_strided_slice %430 {offsets = [0, 32], sizes = [1, 32], strides = [1, 1]} : vector<1x64xbf16> to vector<1x32xbf16>
    %c0_674 = arith.constant 0 : index
    %c416_675 = arith.constant 416 : index
    %434 = vector.load %arg16[%c0_674, %c416_675] : memref<1x2592xbf16, #tpu.memory_space<vmem>>, vector<1x32xbf16>
    tpu.vector_store %arg16[%c0_674, %c416_675], %433 {strides = array<i32>} : memref<1x2592xbf16, #tpu.memory_space<vmem>>, vector<1x32xbf16>,
    %435 = vector.extract_strided_slice %364 {offsets = [14, 0], sizes = [1, 64], strides = [1, 1]} : vector<81x64xbf16> to vector<1x64xbf16>
    %436 = vector.extract_strided_slice %435 {offsets = [0, 0], sizes = [1, 32], strides = [1, 1]} : vector<1x64xbf16> to vector<1x32xbf16>
    %c0_676 = arith.constant 0 : index
    %c448 = arith.constant 448 : index
    %437 = vector.load %arg15[%c0_676, %c448] : memref<1x2592xbf16, #tpu.memory_space<vmem>>, vector<1x32xbf16>
    tpu.vector_store %arg15[%c0_676, %c448], %436 {strides = array<i32>} : memref<1x2592xbf16, #tpu.memory_space<vmem>>, vector<1x32xbf16>,
    %438 = vector.extract_strided_slice %435 {offsets = [0, 32], sizes = [1, 32], strides = [1, 1]} : vector<1x64xbf16> to vector<1x32xbf16>
    %c0_677 = arith.constant 0 : index
    %c448_678 = arith.constant 448 : index
    %439 = vector.load %arg16[%c0_677, %c448_678] : memref<1x2592xbf16, #tpu.memory_space<vmem>>, vector<1x32xbf16>
    tpu.vector_store %arg16[%c0_677, %c448_678], %438 {strides = array<i32>} : memref<1x2592xbf16, #tpu.memory_space<vmem>>, vector<1x32xbf16>,
    %440 = vector.extract_strided_slice %364 {offsets = [15, 0], sizes = [1, 64], strides = [1, 1]} : vector<81x64xbf16> to vector<1x64xbf16>
    %441 = vector.extract_strided_slice %440 {offsets = [0, 0], sizes = [1, 32], strides = [1, 1]} : vector<1x64xbf16> to vector<1x32xbf16>
    %c0_679 = arith.constant 0 : index
    %c480 = arith.constant 480 : index
    %442 = vector.load %arg15[%c0_679, %c480] : memref<1x2592xbf16, #tpu.memory_space<vmem>>, vector<1x32xbf16>
    tpu.vector_store %arg15[%c0_679, %c480], %441 {strides = array<i32>} : memref<1x2592xbf16, #tpu.memory_space<vmem>>, vector<1x32xbf16>,
    %443 = vector.extract_strided_slice %440 {offsets = [0, 32], sizes = [1, 32], strides = [1, 1]} : vector<1x64xbf16> to vector<1x32xbf16>
    %c0_680 = arith.constant 0 : index
    %c480_681 = arith.constant 480 : index
    %444 = vector.load %arg16[%c0_680, %c480_681] : memref<1x2592xbf16, #tpu.memory_space<vmem>>, vector<1x32xbf16>
    tpu.vector_store %arg16[%c0_680, %c480_681], %443 {strides = array<i32>} : memref<1x2592xbf16, #tpu.memory_space<vmem>>, vector<1x32xbf16>,
    %445 = vector.extract_strided_slice %364 {offsets = [16, 0], sizes = [1, 64], strides = [1, 1]} : vector<81x64xbf16> to vector<1x64xbf16>
    %446 = vector.extract_strided_slice %445 {offsets = [0, 0], sizes = [1, 32], strides = [1, 1]} : vector<1x64xbf16> to vector<1x32xbf16>
    %c0_682 = arith.constant 0 : index
    %c512 = arith.constant 512 : index
    %447 = vector.load %arg15[%c0_682, %c512] : memref<1x2592xbf16, #tpu.memory_space<vmem>>, vector<1x32xbf16>
    tpu.vector_store %arg15[%c0_682, %c512], %446 {strides = array<i32>} : memref<1x2592xbf16, #tpu.memory_space<vmem>>, vector<1x32xbf16>,
    %448 = vector.extract_strided_slice %445 {offsets = [0, 32], sizes = [1, 32], strides = [1, 1]} : vector<1x64xbf16> to vector<1x32xbf16>
    %c0_683 = arith.constant 0 : index
    %c512_684 = arith.constant 512 : index
    %449 = vector.load %arg16[%c0_683, %c512_684] : memref<1x2592xbf16, #tpu.memory_space<vmem>>, vector<1x32xbf16>
    tpu.vector_store %arg16[%c0_683, %c512_684], %448 {strides = array<i32>} : memref<1x2592xbf16, #tpu.memory_space<vmem>>, vector<1x32xbf16>,
    %450 = vector.extract_strided_slice %364 {offsets = [17, 0], sizes = [1, 64], strides = [1, 1]} : vector<81x64xbf16> to vector<1x64xbf16>
    %451 = vector.extract_strided_slice %450 {offsets = [0, 0], sizes = [1, 32], strides = [1, 1]} : vector<1x64xbf16> to vector<1x32xbf16>
    %c0_685 = arith.constant 0 : index
    %c544 = arith.constant 544 : index
    %452 = vector.load %arg15[%c0_685, %c544] : memref<1x2592xbf16, #tpu.memory_space<vmem>>, vector<1x32xbf16>
    tpu.vector_store %arg15[%c0_685, %c544], %451 {strides = array<i32>} : memref<1x2592xbf16, #tpu.memory_space<vmem>>, vector<1x32xbf16>,
    %453 = vector.extract_strided_slice %450 {offsets = [0, 32], sizes = [1, 32], strides = [1, 1]} : vector<1x64xbf16> to vector<1x32xbf16>
    %c0_686 = arith.constant 0 : index
    %c544_687 = arith.constant 544 : index
    %454 = vector.load %arg16[%c0_686, %c544_687] : memref<1x2592xbf16, #tpu.memory_space<vmem>>, vector<1x32xbf16>
    tpu.vector_store %arg16[%c0_686, %c544_687], %453 {strides = array<i32>} : memref<1x2592xbf16, #tpu.memory_space<vmem>>, vector<1x32xbf16>,
    %455 = vector.extract_strided_slice %364 {offsets = [18, 0], sizes = [1, 64], strides = [1, 1]} : vector<81x64xbf16> to vector<1x64xbf16>
    %456 = vector.extract_strided_slice %455 {offsets = [0, 0], sizes = [1, 32], strides = [1, 1]} : vector<1x64xbf16> to vector<1x32xbf16>
    %c0_688 = arith.constant 0 : index
    %c576 = arith.constant 576 : index
    %457 = vector.load %arg15[%c0_688, %c576] : memref<1x2592xbf16, #tpu.memory_space<vmem>>, vector<1x32xbf16>
    tpu.vector_store %arg15[%c0_688, %c576], %456 {strides = array<i32>} : memref<1x2592xbf16, #tpu.memory_space<vmem>>, vector<1x32xbf16>,
    %458 = vector.extract_strided_slice %455 {offsets = [0, 32], sizes = [1, 32], strides = [1, 1]} : vector<1x64xbf16> to vector<1x32xbf16>
    %c0_689 = arith.constant 0 : index
    %c576_690 = arith.constant 576 : index
    %459 = vector.load %arg16[%c0_689, %c576_690] : memref<1x2592xbf16, #tpu.memory_space<vmem>>, vector<1x32xbf16>
    tpu.vector_store %arg16[%c0_689, %c576_690], %458 {strides = array<i32>} : memref<1x2592xbf16, #tpu.memory_space<vmem>>, vector<1x32xbf16>,
    %460 = vector.extract_strided_slice %364 {offsets = [19, 0], sizes = [1, 64], strides = [1, 1]} : vector<81x64xbf16> to vector<1x64xbf16>
    %461 = vector.extract_strided_slice %460 {offsets = [0, 0], sizes = [1, 32], strides = [1, 1]} : vector<1x64xbf16> to vector<1x32xbf16>
    %c0_691 = arith.constant 0 : index
    %c608 = arith.constant 608 : index
    %462 = vector.load %arg15[%c0_691, %c608] : memref<1x2592xbf16, #tpu.memory_space<vmem>>, vector<1x32xbf16>
    tpu.vector_store %arg15[%c0_691, %c608], %461 {strides = array<i32>} : memref<1x2592xbf16, #tpu.memory_space<vmem>>, vector<1x32xbf16>,
    %463 = vector.extract_strided_slice %460 {offsets = [0, 32], sizes = [1, 32], strides = [1, 1]} : vector<1x64xbf16> to vector<1x32xbf16>
    %c0_692 = arith.constant 0 : index
    %c608_693 = arith.constant 608 : index
    %464 = vector.load %arg16[%c0_692, %c608_693] : memref<1x2592xbf16, #tpu.memory_space<vmem>>, vector<1x32xbf16>
    tpu.vector_store %arg16[%c0_692, %c608_693], %463 {strides = array<i32>} : memref<1x2592xbf16, #tpu.memory_space<vmem>>, vector<1x32xbf16>,
    %465 = vector.extract_strided_slice %364 {offsets = [20, 0], sizes = [1, 64], strides = [1, 1]} : vector<81x64xbf16> to vector<1x64xbf16>
    %466 = vector.extract_strided_slice %465 {offsets = [0, 0], sizes = [1, 32], strides = [1, 1]} : vector<1x64xbf16> to vector<1x32xbf16>
    %c0_694 = arith.constant 0 : index
    %c640 = arith.constant 640 : index
    %467 = vector.load %arg15[%c0_694, %c640] : memref<1x2592xbf16, #tpu.memory_space<vmem>>, vector<1x32xbf16>
    tpu.vector_store %arg15[%c0_694, %c640], %466 {strides = array<i32>} : memref<1x2592xbf16, #tpu.memory_space<vmem>>, vector<1x32xbf16>,
    %468 = vector.extract_strided_slice %465 {offsets = [0, 32], sizes = [1, 32], strides = [1, 1]} : vector<1x64xbf16> to vector<1x32xbf16>
    %c0_695 = arith.constant 0 : index
    %c640_696 = arith.constant 640 : index
    %469 = vector.load %arg16[%c0_695, %c640_696] : memref<1x2592xbf16, #tpu.memory_space<vmem>>, vector<1x32xbf16>
    tpu.vector_store %arg16[%c0_695, %c640_696], %468 {strides = array<i32>} : memref<1x2592xbf16, #tpu.memory_space<vmem>>, vector<1x32xbf16>,
    %470 = vector.extract_strided_slice %364 {offsets = [21, 0], sizes = [1, 64], strides = [1, 1]} : vector<81x64xbf16> to vector<1x64xbf16>
    %471 = vector.extract_strided_slice %470 {offsets = [0, 0], sizes = [1, 32], strides = [1, 1]} : vector<1x64xbf16> to vector<1x32xbf16>
    %c0_697 = arith.constant 0 : index
    %c672 = arith.constant 672 : index
    %472 = vector.load %arg15[%c0_697, %c672] : memref<1x2592xbf16, #tpu.memory_space<vmem>>, vector<1x32xbf16>
    tpu.vector_store %arg15[%c0_697, %c672], %471 {strides = array<i32>} : memref<1x2592xbf16, #tpu.memory_space<vmem>>, vector<1x32xbf16>,
    %473 = vector.extract_strided_slice %470 {offsets = [0, 32], sizes = [1, 32], strides = [1, 1]} : vector<1x64xbf16> to vector<1x32xbf16>
    %c0_698 = arith.constant 0 : index
    %c672_699 = arith.constant 672 : index
    %474 = vector.load %arg16[%c0_698, %c672_699] : memref<1x2592xbf16, #tpu.memory_space<vmem>>, vector<1x32xbf16>
    tpu.vector_store %arg16[%c0_698, %c672_699], %473 {strides = array<i32>} : memref<1x2592xbf16, #tpu.memory_space<vmem>>, vector<1x32xbf16>,
    %475 = vector.extract_strided_slice %364 {offsets = [22, 0], sizes = [1, 64], strides = [1, 1]} : vector<81x64xbf16> to vector<1x64xbf16>
    %476 = vector.extract_strided_slice %475 {offsets = [0, 0], sizes = [1, 32], strides = [1, 1]} : vector<1x64xbf16> to vector<1x32xbf16>
    %c0_700 = arith.constant 0 : index
    %c704 = arith.constant 704 : index
    %477 = vector.load %arg15[%c0_700, %c704] : memref<1x2592xbf16, #tpu.memory_space<vmem>>, vector<1x32xbf16>
    tpu.vector_store %arg15[%c0_700, %c704], %476 {strides = array<i32>} : memref<1x2592xbf16, #tpu.memory_space<vmem>>, vector<1x32xbf16>,
    %478 = vector.extract_strided_slice %475 {offsets = [0, 32], sizes = [1, 32], strides = [1, 1]} : vector<1x64xbf16> to vector<1x32xbf16>
    %c0_701 = arith.constant 0 : index
    %c704_702 = arith.constant 704 : index
    %479 = vector.load %arg16[%c0_701, %c704_702] : memref<1x2592xbf16, #tpu.memory_space<vmem>>, vector<1x32xbf16>
    tpu.vector_store %arg16[%c0_701, %c704_702], %478 {strides = array<i32>} : memref<1x2592xbf16, #tpu.memory_space<vmem>>, vector<1x32xbf16>,
    %480 = vector.extract_strided_slice %364 {offsets = [23, 0], sizes = [1, 64], strides = [1, 1]} : vector<81x64xbf16> to vector<1x64xbf16>
    %481 = vector.extract_strided_slice %480 {offsets = [0, 0], sizes = [1, 32], strides = [1, 1]} : vector<1x64xbf16> to vector<1x32xbf16>
    %c0_703 = arith.constant 0 : index
    %c736 = arith.constant 736 : index
    %482 = vector.load %arg15[%c0_703, %c736] : memref<1x2592xbf16, #tpu.memory_space<vmem>>, vector<1x32xbf16>
    tpu.vector_store %arg15[%c0_703, %c736], %481 {strides = array<i32>} : memref<1x2592xbf16, #tpu.memory_space<vmem>>, vector<1x32xbf16>,
    %483 = vector.extract_strided_slice %480 {offsets = [0, 32], sizes = [1, 32], strides = [1, 1]} : vector<1x64xbf16> to vector<1x32xbf16>
    %c0_704 = arith.constant 0 : index
    %c736_705 = arith.constant 736 : index
    %484 = vector.load %arg16[%c0_704, %c736_705] : memref<1x2592xbf16, #tpu.memory_space<vmem>>, vector<1x32xbf16>
    tpu.vector_store %arg16[%c0_704, %c736_705], %483 {strides = array<i32>} : memref<1x2592xbf16, #tpu.memory_space<vmem>>, vector<1x32xbf16>,
    %485 = vector.extract_strided_slice %364 {offsets = [24, 0], sizes = [1, 64], strides = [1, 1]} : vector<81x64xbf16> to vector<1x64xbf16>
    %486 = vector.extract_strided_slice %485 {offsets = [0, 0], sizes = [1, 32], strides = [1, 1]} : vector<1x64xbf16> to vector<1x32xbf16>
    %c0_706 = arith.constant 0 : index
    %c768 = arith.constant 768 : index
    %487 = vector.load %arg15[%c0_706, %c768] : memref<1x2592xbf16, #tpu.memory_space<vmem>>, vector<1x32xbf16>
    tpu.vector_store %arg15[%c0_706, %c768], %486 {strides = array<i32>} : memref<1x2592xbf16, #tpu.memory_space<vmem>>, vector<1x32xbf16>,
    %488 = vector.extract_strided_slice %485 {offsets = [0, 32], sizes = [1, 32], strides = [1, 1]} : vector<1x64xbf16> to vector<1x32xbf16>
    %c0_707 = arith.constant 0 : index
    %c768_708 = arith.constant 768 : index
    %489 = vector.load %arg16[%c0_707, %c768_708] : memref<1x2592xbf16, #tpu.memory_space<vmem>>, vector<1x32xbf16>
    tpu.vector_store %arg16[%c0_707, %c768_708], %488 {strides = array<i32>} : memref<1x2592xbf16, #tpu.memory_space<vmem>>, vector<1x32xbf16>,
    %490 = vector.extract_strided_slice %364 {offsets = [25, 0], sizes = [1, 64], strides = [1, 1]} : vector<81x64xbf16> to vector<1x64xbf16>
    %491 = vector.extract_strided_slice %490 {offsets = [0, 0], sizes = [1, 32], strides = [1, 1]} : vector<1x64xbf16> to vector<1x32xbf16>
    %c0_709 = arith.constant 0 : index
    %c800 = arith.constant 800 : index
    %492 = vector.load %arg15[%c0_709, %c800] : memref<1x2592xbf16, #tpu.memory_space<vmem>>, vector<1x32xbf16>
    tpu.vector_store %arg15[%c0_709, %c800], %491 {strides = array<i32>} : memref<1x2592xbf16, #tpu.memory_space<vmem>>, vector<1x32xbf16>,
    %493 = vector.extract_strided_slice %490 {offsets = [0, 32], sizes = [1, 32], strides = [1, 1]} : vector<1x64xbf16> to vector<1x32xbf16>
    %c0_710 = arith.constant 0 : index
    %c800_711 = arith.constant 800 : index
    %494 = vector.load %arg16[%c0_710, %c800_711] : memref<1x2592xbf16, #tpu.memory_space<vmem>>, vector<1x32xbf16>
    tpu.vector_store %arg16[%c0_710, %c800_711], %493 {strides = array<i32>} : memref<1x2592xbf16, #tpu.memory_space<vmem>>, vector<1x32xbf16>,
    %495 = vector.extract_strided_slice %364 {offsets = [26, 0], sizes = [1, 64], strides = [1, 1]} : vector<81x64xbf16> to vector<1x64xbf16>
    %496 = vector.extract_strided_slice %495 {offsets = [0, 0], sizes = [1, 32], strides = [1, 1]} : vector<1x64xbf16> to vector<1x32xbf16>
    %c0_712 = arith.constant 0 : index
    %c832 = arith.constant 832 : index
    %497 = vector.load %arg15[%c0_712, %c832] : memref<1x2592xbf16, #tpu.memory_space<vmem>>, vector<1x32xbf16>
    tpu.vector_store %arg15[%c0_712, %c832], %496 {strides = array<i32>} : memref<1x2592xbf16, #tpu.memory_space<vmem>>, vector<1x32xbf16>,
    %498 = vector.extract_strided_slice %495 {offsets = [0, 32], sizes = [1, 32], strides = [1, 1]} : vector<1x64xbf16> to vector<1x32xbf16>
    %c0_713 = arith.constant 0 : index
    %c832_714 = arith.constant 832 : index
    %499 = vector.load %arg16[%c0_713, %c832_714] : memref<1x2592xbf16, #tpu.memory_space<vmem>>, vector<1x32xbf16>
    tpu.vector_store %arg16[%c0_713, %c832_714], %498 {strides = array<i32>} : memref<1x2592xbf16, #tpu.memory_space<vmem>>, vector<1x32xbf16>,
    %500 = vector.extract_strided_slice %364 {offsets = [27, 0], sizes = [1, 64], strides = [1, 1]} : vector<81x64xbf16> to vector<1x64xbf16>
    %501 = vector.extract_strided_slice %500 {offsets = [0, 0], sizes = [1, 32], strides = [1, 1]} : vector<1x64xbf16> to vector<1x32xbf16>
    %c0_715 = arith.constant 0 : index
    %c864 = arith.constant 864 : index
    %502 = vector.load %arg15[%c0_715, %c864] : memref<1x2592xbf16, #tpu.memory_space<vmem>>, vector<1x32xbf16>
    tpu.vector_store %arg15[%c0_715, %c864], %501 {strides = array<i32>} : memref<1x2592xbf16, #tpu.memory_space<vmem>>, vector<1x32xbf16>,
    %503 = vector.extract_strided_slice %500 {offsets = [0, 32], sizes = [1, 32], strides = [1, 1]} : vector<1x64xbf16> to vector<1x32xbf16>
    %c0_716 = arith.constant 0 : index
    %c864_717 = arith.constant 864 : index
    %504 = vector.load %arg16[%c0_716, %c864_717] : memref<1x2592xbf16, #tpu.memory_space<vmem>>, vector<1x32xbf16>
    tpu.vector_store %arg16[%c0_716, %c864_717], %503 {strides = array<i32>} : memref<1x2592xbf16, #tpu.memory_space<vmem>>, vector<1x32xbf16>,
    %505 = vector.extract_strided_slice %364 {offsets = [28, 0], sizes = [1, 64], strides = [1, 1]} : vector<81x64xbf16> to vector<1x64xbf16>
    %506 = vector.extract_strided_slice %505 {offsets = [0, 0], sizes = [1, 32], strides = [1, 1]} : vector<1x64xbf16> to vector<1x32xbf16>
    %c0_718 = arith.constant 0 : index
    %c896 = arith.constant 896 : index
    %507 = vector.load %arg15[%c0_718, %c896] : memref<1x2592xbf16, #tpu.memory_space<vmem>>, vector<1x32xbf16>
    tpu.vector_store %arg15[%c0_718, %c896], %506 {strides = array<i32>} : memref<1x2592xbf16, #tpu.memory_space<vmem>>, vector<1x32xbf16>,
    %508 = vector.extract_strided_slice %505 {offsets = [0, 32], sizes = [1, 32], strides = [1, 1]} : vector<1x64xbf16> to vector<1x32xbf16>
    %c0_719 = arith.constant 0 : index
    %c896_720 = arith.constant 896 : index
    %509 = vector.load %arg16[%c0_719, %c896_720] : memref<1x2592xbf16, #tpu.memory_space<vmem>>, vector<1x32xbf16>
    tpu.vector_store %arg16[%c0_719, %c896_720], %508 {strides = array<i32>} : memref<1x2592xbf16, #tpu.memory_space<vmem>>, vector<1x32xbf16>,
    %510 = vector.extract_strided_slice %364 {offsets = [29, 0], sizes = [1, 64], strides = [1, 1]} : vector<81x64xbf16> to vector<1x64xbf16>
    %511 = vector.extract_strided_slice %510 {offsets = [0, 0], sizes = [1, 32], strides = [1, 1]} : vector<1x64xbf16> to vector<1x32xbf16>
    %c0_721 = arith.constant 0 : index
    %c928 = arith.constant 928 : index
    %512 = vector.load %arg15[%c0_721, %c928] : memref<1x2592xbf16, #tpu.memory_space<vmem>>, vector<1x32xbf16>
    tpu.vector_store %arg15[%c0_721, %c928], %511 {strides = array<i32>} : memref<1x2592xbf16, #tpu.memory_space<vmem>>, vector<1x32xbf16>,
    %513 = vector.extract_strided_slice %510 {offsets = [0, 32], sizes = [1, 32], strides = [1, 1]} : vector<1x64xbf16> to vector<1x32xbf16>
    %c0_722 = arith.constant 0 : index
    %c928_723 = arith.constant 928 : index
    %514 = vector.load %arg16[%c0_722, %c928_723] : memref<1x2592xbf16, #tpu.memory_space<vmem>>, vector<1x32xbf16>
    tpu.vector_store %arg16[%c0_722, %c928_723], %513 {strides = array<i32>} : memref<1x2592xbf16, #tpu.memory_space<vmem>>, vector<1x32xbf16>,
    %515 = vector.extract_strided_slice %364 {offsets = [30, 0], sizes = [1, 64], strides = [1, 1]} : vector<81x64xbf16> to vector<1x64xbf16>
    %516 = vector.extract_strided_slice %515 {offsets = [0, 0], sizes = [1, 32], strides = [1, 1]} : vector<1x64xbf16> to vector<1x32xbf16>
    %c0_724 = arith.constant 0 : index
    %c960 = arith.constant 960 : index
    %517 = vector.load %arg15[%c0_724, %c960] : memref<1x2592xbf16, #tpu.memory_space<vmem>>, vector<1x32xbf16>
    tpu.vector_store %arg15[%c0_724, %c960], %516 {strides = array<i32>} : memref<1x2592xbf16, #tpu.memory_space<vmem>>, vector<1x32xbf16>,
    %518 = vector.extract_strided_slice %515 {offsets = [0, 32], sizes = [1, 32], strides = [1, 1]} : vector<1x64xbf16> to vector<1x32xbf16>
    %c0_725 = arith.constant 0 : index
    %c960_726 = arith.constant 960 : index
    %519 = vector.load %arg16[%c0_725, %c960_726] : memref<1x2592xbf16, #tpu.memory_space<vmem>>, vector<1x32xbf16>
    tpu.vector_store %arg16[%c0_725, %c960_726], %518 {strides = array<i32>} : memref<1x2592xbf16, #tpu.memory_space<vmem>>, vector<1x32xbf16>,
    %520 = vector.extract_strided_slice %364 {offsets = [31, 0], sizes = [1, 64], strides = [1, 1]} : vector<81x64xbf16> to vector<1x64xbf16>
    %521 = vector.extract_strided_slice %520 {offsets = [0, 0], sizes = [1, 32], strides = [1, 1]} : vector<1x64xbf16> to vector<1x32xbf16>
    %c0_727 = arith.constant 0 : index
    %c992 = arith.constant 992 : index
    %522 = vector.load %arg15[%c0_727, %c992] : memref<1x2592xbf16, #tpu.memory_space<vmem>>, vector<1x32xbf16>
    tpu.vector_store %arg15[%c0_727, %c992], %521 {strides = array<i32>} : memref<1x2592xbf16, #tpu.memory_space<vmem>>, vector<1x32xbf16>,
    %523 = vector.extract_strided_slice %520 {offsets = [0, 32], sizes = [1, 32], strides = [1, 1]} : vector<1x64xbf16> to vector<1x32xbf16>
    %c0_728 = arith.constant 0 : index
    %c992_729 = arith.constant 992 : index
    %524 = vector.load %arg16[%c0_728, %c992_729] : memref<1x2592xbf16, #tpu.memory_space<vmem>>, vector<1x32xbf16>
    tpu.vector_store %arg16[%c0_728, %c992_729], %523 {strides = array<i32>} : memref<1x2592xbf16, #tpu.memory_space<vmem>>, vector<1x32xbf16>,
    %525 = vector.extract_strided_slice %364 {offsets = [32, 0], sizes = [1, 64], strides = [1, 1]} : vector<81x64xbf16> to vector<1x64xbf16>
    %526 = vector.extract_strided_slice %525 {offsets = [0, 0], sizes = [1, 32], strides = [1, 1]} : vector<1x64xbf16> to vector<1x32xbf16>
    %c0_730 = arith.constant 0 : index
    %c1024 = arith.constant 1024 : index
    %527 = vector.load %arg15[%c0_730, %c1024] : memref<1x2592xbf16, #tpu.memory_space<vmem>>, vector<1x32xbf16>
    tpu.vector_store %arg15[%c0_730, %c1024], %526 {strides = array<i32>} : memref<1x2592xbf16, #tpu.memory_space<vmem>>, vector<1x32xbf16>,
    %528 = vector.extract_strided_slice %525 {offsets = [0, 32], sizes = [1, 32], strides = [1, 1]} : vector<1x64xbf16> to vector<1x32xbf16>
    %c0_731 = arith.constant 0 : index
    %c1024_732 = arith.constant 1024 : index
    %529 = vector.load %arg16[%c0_731, %c1024_732] : memref<1x2592xbf16, #tpu.memory_space<vmem>>, vector<1x32xbf16>
    tpu.vector_store %arg16[%c0_731, %c1024_732], %528 {strides = array<i32>} : memref<1x2592xbf16, #tpu.memory_space<vmem>>, vector<1x32xbf16>,
    %530 = vector.extract_strided_slice %364 {offsets = [33, 0], sizes = [1, 64], strides = [1, 1]} : vector<81x64xbf16> to vector<1x64xbf16>
    %531 = vector.extract_strided_slice %530 {offsets = [0, 0], sizes = [1, 32], strides = [1, 1]} : vector<1x64xbf16> to vector<1x32xbf16>
    %c0_733 = arith.constant 0 : index
    %c1056 = arith.constant 1056 : index
    %532 = vector.load %arg15[%c0_733, %c1056] : memref<1x2592xbf16, #tpu.memory_space<vmem>>, vector<1x32xbf16>
    tpu.vector_store %arg15[%c0_733, %c1056], %531 {strides = array<i32>} : memref<1x2592xbf16, #tpu.memory_space<vmem>>, vector<1x32xbf16>,
    %533 = vector.extract_strided_slice %530 {offsets = [0, 32], sizes = [1, 32], strides = [1, 1]} : vector<1x64xbf16> to vector<1x32xbf16>
    %c0_734 = arith.constant 0 : index
    %c1056_735 = arith.constant 1056 : index
    %534 = vector.load %arg16[%c0_734, %c1056_735] : memref<1x2592xbf16, #tpu.memory_space<vmem>>, vector<1x32xbf16>
    tpu.vector_store %arg16[%c0_734, %c1056_735], %533 {strides = array<i32>} : memref<1x2592xbf16, #tpu.memory_space<vmem>>, vector<1x32xbf16>,
    %535 = vector.extract_strided_slice %364 {offsets = [34, 0], sizes = [1, 64], strides = [1, 1]} : vector<81x64xbf16> to vector<1x64xbf16>
    %536 = vector.extract_strided_slice %535 {offsets = [0, 0], sizes = [1, 32], strides = [1, 1]} : vector<1x64xbf16> to vector<1x32xbf16>
    %c0_736 = arith.constant 0 : index
    %c1088 = arith.constant 1088 : index
    %537 = vector.load %arg15[%c0_736, %c1088] : memref<1x2592xbf16, #tpu.memory_space<vmem>>, vector<1x32xbf16>
    tpu.vector_store %arg15[%c0_736, %c1088], %536 {strides = array<i32>} : memref<1x2592xbf16, #tpu.memory_space<vmem>>, vector<1x32xbf16>,
    %538 = vector.extract_strided_slice %535 {offsets = [0, 32], sizes = [1, 32], strides = [1, 1]} : vector<1x64xbf16> to vector<1x32xbf16>
    %c0_737 = arith.constant 0 : index
    %c1088_738 = arith.constant 1088 : index
    %539 = vector.load %arg16[%c0_737, %c1088_738] : memref<1x2592xbf16, #tpu.memory_space<vmem>>, vector<1x32xbf16>
    tpu.vector_store %arg16[%c0_737, %c1088_738], %538 {strides = array<i32>} : memref<1x2592xbf16, #tpu.memory_space<vmem>>, vector<1x32xbf16>,
    %540 = vector.extract_strided_slice %364 {offsets = [35, 0], sizes = [1, 64], strides = [1, 1]} : vector<81x64xbf16> to vector<1x64xbf16>
    %541 = vector.extract_strided_slice %540 {offsets = [0, 0], sizes = [1, 32], strides = [1, 1]} : vector<1x64xbf16> to vector<1x32xbf16>
    %c0_739 = arith.constant 0 : index
    %c1120 = arith.constant 1120 : index
    %542 = vector.load %arg15[%c0_739, %c1120] : memref<1x2592xbf16, #tpu.memory_space<vmem>>, vector<1x32xbf16>
    tpu.vector_store %arg15[%c0_739, %c1120], %541 {strides = array<i32>} : memref<1x2592xbf16, #tpu.memory_space<vmem>>, vector<1x32xbf16>,
    %543 = vector.extract_strided_slice %540 {offsets = [0, 32], sizes = [1, 32], strides = [1, 1]} : vector<1x64xbf16> to vector<1x32xbf16>
    %c0_740 = arith.constant 0 : index
    %c1120_741 = arith.constant 1120 : index
    %544 = vector.load %arg16[%c0_740, %c1120_741] : memref<1x2592xbf16, #tpu.memory_space<vmem>>, vector<1x32xbf16>
    tpu.vector_store %arg16[%c0_740, %c1120_741], %543 {strides = array<i32>} : memref<1x2592xbf16, #tpu.memory_space<vmem>>, vector<1x32xbf16>,
    %545 = vector.extract_strided_slice %364 {offsets = [36, 0], sizes = [1, 64], strides = [1, 1]} : vector<81x64xbf16> to vector<1x64xbf16>
    %546 = vector.extract_strided_slice %545 {offsets = [0, 0], sizes = [1, 32], strides = [1, 1]} : vector<1x64xbf16> to vector<1x32xbf16>
    %c0_742 = arith.constant 0 : index
    %c1152 = arith.constant 1152 : index
    %547 = vector.load %arg15[%c0_742, %c1152] : memref<1x2592xbf16, #tpu.memory_space<vmem>>, vector<1x32xbf16>
    tpu.vector_store %arg15[%c0_742, %c1152], %546 {strides = array<i32>} : memref<1x2592xbf16, #tpu.memory_space<vmem>>, vector<1x32xbf16>,
    %548 = vector.extract_strided_slice %545 {offsets = [0, 32], sizes = [1, 32], strides = [1, 1]} : vector<1x64xbf16> to vector<1x32xbf16>
    %c0_743 = arith.constant 0 : index
    %c1152_744 = arith.constant 1152 : index
    %549 = vector.load %arg16[%c0_743, %c1152_744] : memref<1x2592xbf16, #tpu.memory_space<vmem>>, vector<1x32xbf16>
    tpu.vector_store %arg16[%c0_743, %c1152_744], %548 {strides = array<i32>} : memref<1x2592xbf16, #tpu.memory_space<vmem>>, vector<1x32xbf16>,
    %550 = vector.extract_strided_slice %364 {offsets = [37, 0], sizes = [1, 64], strides = [1, 1]} : vector<81x64xbf16> to vector<1x64xbf16>
    %551 = vector.extract_strided_slice %550 {offsets = [0, 0], sizes = [1, 32], strides = [1, 1]} : vector<1x64xbf16> to vector<1x32xbf16>
    %c0_745 = arith.constant 0 : index
    %c1184 = arith.constant 1184 : index
    %552 = vector.load %arg15[%c0_745, %c1184] : memref<1x2592xbf16, #tpu.memory_space<vmem>>, vector<1x32xbf16>
    tpu.vector_store %arg15[%c0_745, %c1184], %551 {strides = array<i32>} : memref<1x2592xbf16, #tpu.memory_space<vmem>>, vector<1x32xbf16>,
    %553 = vector.extract_strided_slice %550 {offsets = [0, 32], sizes = [1, 32], strides = [1, 1]} : vector<1x64xbf16> to vector<1x32xbf16>
    %c0_746 = arith.constant 0 : index
    %c1184_747 = arith.constant 1184 : index
    %554 = vector.load %arg16[%c0_746, %c1184_747] : memref<1x2592xbf16, #tpu.memory_space<vmem>>, vector<1x32xbf16>
    tpu.vector_store %arg16[%c0_746, %c1184_747], %553 {strides = array<i32>} : memref<1x2592xbf16, #tpu.memory_space<vmem>>, vector<1x32xbf16>,
    %555 = vector.extract_strided_slice %364 {offsets = [38, 0], sizes = [1, 64], strides = [1, 1]} : vector<81x64xbf16> to vector<1x64xbf16>
    %556 = vector.extract_strided_slice %555 {offsets = [0, 0], sizes = [1, 32], strides = [1, 1]} : vector<1x64xbf16> to vector<1x32xbf16>
    %c0_748 = arith.constant 0 : index
    %c1216 = arith.constant 1216 : index
    %557 = vector.load %arg15[%c0_748, %c1216] : memref<1x2592xbf16, #tpu.memory_space<vmem>>, vector<1x32xbf16>
    tpu.vector_store %arg15[%c0_748, %c1216], %556 {strides = array<i32>} : memref<1x2592xbf16, #tpu.memory_space<vmem>>, vector<1x32xbf16>,
    %558 = vector.extract_strided_slice %555 {offsets = [0, 32], sizes = [1, 32], strides = [1, 1]} : vector<1x64xbf16> to vector<1x32xbf16>
    %c0_749 = arith.constant 0 : index
    %c1216_750 = arith.constant 1216 : index
    %559 = vector.load %arg16[%c0_749, %c1216_750] : memref<1x2592xbf16, #tpu.memory_space<vmem>>, vector<1x32xbf16>
    tpu.vector_store %arg16[%c0_749, %c1216_750], %558 {strides = array<i32>} : memref<1x2592xbf16, #tpu.memory_space<vmem>>, vector<1x32xbf16>,
    %560 = vector.extract_strided_slice %364 {offsets = [39, 0], sizes = [1, 64], strides = [1, 1]} : vector<81x64xbf16> to vector<1x64xbf16>
    %561 = vector.extract_strided_slice %560 {offsets = [0, 0], sizes = [1, 32], strides = [1, 1]} : vector<1x64xbf16> to vector<1x32xbf16>
    %c0_751 = arith.constant 0 : index
    %c1248 = arith.constant 1248 : index
    %562 = vector.load %arg15[%c0_751, %c1248] : memref<1x2592xbf16, #tpu.memory_space<vmem>>, vector<1x32xbf16>
    tpu.vector_store %arg15[%c0_751, %c1248], %561 {strides = array<i32>} : memref<1x2592xbf16, #tpu.memory_space<vmem>>, vector<1x32xbf16>,
    %563 = vector.extract_strided_slice %560 {offsets = [0, 32], sizes = [1, 32], strides = [1, 1]} : vector<1x64xbf16> to vector<1x32xbf16>
    %c0_752 = arith.constant 0 : index
    %c1248_753 = arith.constant 1248 : index
    %564 = vector.load %arg16[%c0_752, %c1248_753] : memref<1x2592xbf16, #tpu.memory_space<vmem>>, vector<1x32xbf16>
    tpu.vector_store %arg16[%c0_752, %c1248_753], %563 {strides = array<i32>} : memref<1x2592xbf16, #tpu.memory_space<vmem>>, vector<1x32xbf16>,
    %565 = vector.extract_strided_slice %364 {offsets = [40, 0], sizes = [1, 64], strides = [1, 1]} : vector<81x64xbf16> to vector<1x64xbf16>
    %566 = vector.extract_strided_slice %565 {offsets = [0, 0], sizes = [1, 32], strides = [1, 1]} : vector<1x64xbf16> to vector<1x32xbf16>
    %c0_754 = arith.constant 0 : index
    %c1280 = arith.constant 1280 : index
    %567 = vector.load %arg15[%c0_754, %c1280] : memref<1x2592xbf16, #tpu.memory_space<vmem>>, vector<1x32xbf16>
    tpu.vector_store %arg15[%c0_754, %c1280], %566 {strides = array<i32>} : memref<1x2592xbf16, #tpu.memory_space<vmem>>, vector<1x32xbf16>,
    %568 = vector.extract_strided_slice %565 {offsets = [0, 32], sizes = [1, 32], strides = [1, 1]} : vector<1x64xbf16> to vector<1x32xbf16>
    %c0_755 = arith.constant 0 : index
    %c1280_756 = arith.constant 1280 : index
    %569 = vector.load %arg16[%c0_755, %c1280_756] : memref<1x2592xbf16, #tpu.memory_space<vmem>>, vector<1x32xbf16>
    tpu.vector_store %arg16[%c0_755, %c1280_756], %568 {strides = array<i32>} : memref<1x2592xbf16, #tpu.memory_space<vmem>>, vector<1x32xbf16>,
    %570 = vector.extract_strided_slice %364 {offsets = [41, 0], sizes = [1, 64], strides = [1, 1]} : vector<81x64xbf16> to vector<1x64xbf16>
    %571 = vector.extract_strided_slice %570 {offsets = [0, 0], sizes = [1, 32], strides = [1, 1]} : vector<1x64xbf16> to vector<1x32xbf16>
    %c0_757 = arith.constant 0 : index
    %c1312 = arith.constant 1312 : index
    %572 = vector.load %arg15[%c0_757, %c1312] : memref<1x2592xbf16, #tpu.memory_space<vmem>>, vector<1x32xbf16>
    tpu.vector_store %arg15[%c0_757, %c1312], %571 {strides = array<i32>} : memref<1x2592xbf16, #tpu.memory_space<vmem>>, vector<1x32xbf16>,
    %573 = vector.extract_strided_slice %570 {offsets = [0, 32], sizes = [1, 32], strides = [1, 1]} : vector<1x64xbf16> to vector<1x32xbf16>
    %c0_758 = arith.constant 0 : index
    %c1312_759 = arith.constant 1312 : index
    %574 = vector.load %arg16[%c0_758, %c1312_759] : memref<1x2592xbf16, #tpu.memory_space<vmem>>, vector<1x32xbf16>
    tpu.vector_store %arg16[%c0_758, %c1312_759], %573 {strides = array<i32>} : memref<1x2592xbf16, #tpu.memory_space<vmem>>, vector<1x32xbf16>,
    %575 = vector.extract_strided_slice %364 {offsets = [42, 0], sizes = [1, 64], strides = [1, 1]} : vector<81x64xbf16> to vector<1x64xbf16>
    %576 = vector.extract_strided_slice %575 {offsets = [0, 0], sizes = [1, 32], strides = [1, 1]} : vector<1x64xbf16> to vector<1x32xbf16>
    %c0_760 = arith.constant 0 : index
    %c1344 = arith.constant 1344 : index
    %577 = vector.load %arg15[%c0_760, %c1344] : memref<1x2592xbf16, #tpu.memory_space<vmem>>, vector<1x32xbf16>
    tpu.vector_store %arg15[%c0_760, %c1344], %576 {strides = array<i32>} : memref<1x2592xbf16, #tpu.memory_space<vmem>>, vector<1x32xbf16>,
    %578 = vector.extract_strided_slice %575 {offsets = [0, 32], sizes = [1, 32], strides = [1, 1]} : vector<1x64xbf16> to vector<1x32xbf16>
    %c0_761 = arith.constant 0 : index
    %c1344_762 = arith.constant 1344 : index
    %579 = vector.load %arg16[%c0_761, %c1344_762] : memref<1x2592xbf16, #tpu.memory_space<vmem>>, vector<1x32xbf16>
    tpu.vector_store %arg16[%c0_761, %c1344_762], %578 {strides = array<i32>} : memref<1x2592xbf16, #tpu.memory_space<vmem>>, vector<1x32xbf16>,
    %580 = vector.extract_strided_slice %364 {offsets = [43, 0], sizes = [1, 64], strides = [1, 1]} : vector<81x64xbf16> to vector<1x64xbf16>
    %581 = vector.extract_strided_slice %580 {offsets = [0, 0], sizes = [1, 32], strides = [1, 1]} : vector<1x64xbf16> to vector<1x32xbf16>
    %c0_763 = arith.constant 0 : index
    %c1376 = arith.constant 1376 : index
    %582 = vector.load %arg15[%c0_763, %c1376] : memref<1x2592xbf16, #tpu.memory_space<vmem>>, vector<1x32xbf16>
    tpu.vector_store %arg15[%c0_763, %c1376], %581 {strides = array<i32>} : memref<1x2592xbf16, #tpu.memory_space<vmem>>, vector<1x32xbf16>,
    %583 = vector.extract_strided_slice %580 {offsets = [0, 32], sizes = [1, 32], strides = [1, 1]} : vector<1x64xbf16> to vector<1x32xbf16>
    %c0_764 = arith.constant 0 : index
    %c1376_765 = arith.constant 1376 : index
    %584 = vector.load %arg16[%c0_764, %c1376_765] : memref<1x2592xbf16, #tpu.memory_space<vmem>>, vector<1x32xbf16>
    tpu.vector_store %arg16[%c0_764, %c1376_765], %583 {strides = array<i32>} : memref<1x2592xbf16, #tpu.memory_space<vmem>>, vector<1x32xbf16>,
    %585 = vector.extract_strided_slice %364 {offsets = [44, 0], sizes = [1, 64], strides = [1, 1]} : vector<81x64xbf16> to vector<1x64xbf16>
    %586 = vector.extract_strided_slice %585 {offsets = [0, 0], sizes = [1, 32], strides = [1, 1]} : vector<1x64xbf16> to vector<1x32xbf16>
    %c0_766 = arith.constant 0 : index
    %c1408 = arith.constant 1408 : index
    %587 = vector.load %arg15[%c0_766, %c1408] : memref<1x2592xbf16, #tpu.memory_space<vmem>>, vector<1x32xbf16>
    tpu.vector_store %arg15[%c0_766, %c1408], %586 {strides = array<i32>} : memref<1x2592xbf16, #tpu.memory_space<vmem>>, vector<1x32xbf16>,
    %588 = vector.extract_strided_slice %585 {offsets = [0, 32], sizes = [1, 32], strides = [1, 1]} : vector<1x64xbf16> to vector<1x32xbf16>
    %c0_767 = arith.constant 0 : index
    %c1408_768 = arith.constant 1408 : index
    %589 = vector.load %arg16[%c0_767, %c1408_768] : memref<1x2592xbf16, #tpu.memory_space<vmem>>, vector<1x32xbf16>
    tpu.vector_store %arg16[%c0_767, %c1408_768], %588 {strides = array<i32>} : memref<1x2592xbf16, #tpu.memory_space<vmem>>, vector<1x32xbf16>,
    %590 = vector.extract_strided_slice %364 {offsets = [45, 0], sizes = [1, 64], strides = [1, 1]} : vector<81x64xbf16> to vector<1x64xbf16>
    %591 = vector.extract_strided_slice %590 {offsets = [0, 0], sizes = [1, 32], strides = [1, 1]} : vector<1x64xbf16> to vector<1x32xbf16>
    %c0_769 = arith.constant 0 : index
    %c1440 = arith.constant 1440 : index
    %592 = vector.load %arg15[%c0_769, %c1440] : memref<1x2592xbf16, #tpu.memory_space<vmem>>, vector<1x32xbf16>
    tpu.vector_store %arg15[%c0_769, %c1440], %591 {strides = array<i32>} : memref<1x2592xbf16, #tpu.memory_space<vmem>>, vector<1x32xbf16>,
    %593 = vector.extract_strided_slice %590 {offsets = [0, 32], sizes = [1, 32], strides = [1, 1]} : vector<1x64xbf16> to vector<1x32xbf16>
    %c0_770 = arith.constant 0 : index
    %c1440_771 = arith.constant 1440 : index
    %594 = vector.load %arg16[%c0_770, %c1440_771] : memref<1x2592xbf16, #tpu.memory_space<vmem>>, vector<1x32xbf16>
    tpu.vector_store %arg16[%c0_770, %c1440_771], %593 {strides = array<i32>} : memref<1x2592xbf16, #tpu.memory_space<vmem>>, vector<1x32xbf16>,
    %595 = vector.extract_strided_slice %364 {offsets = [46, 0], sizes = [1, 64], strides = [1, 1]} : vector<81x64xbf16> to vector<1x64xbf16>
    %596 = vector.extract_strided_slice %595 {offsets = [0, 0], sizes = [1, 32], strides = [1, 1]} : vector<1x64xbf16> to vector<1x32xbf16>
    %c0_772 = arith.constant 0 : index
    %c1472 = arith.constant 1472 : index
    %597 = vector.load %arg15[%c0_772, %c1472] : memref<1x2592xbf16, #tpu.memory_space<vmem>>, vector<1x32xbf16>
    tpu.vector_store %arg15[%c0_772, %c1472], %596 {strides = array<i32>} : memref<1x2592xbf16, #tpu.memory_space<vmem>>, vector<1x32xbf16>,
    %598 = vector.extract_strided_slice %595 {offsets = [0, 32], sizes = [1, 32], strides = [1, 1]} : vector<1x64xbf16> to vector<1x32xbf16>
    %c0_773 = arith.constant 0 : index
    %c1472_774 = arith.constant 1472 : index
    %599 = vector.load %arg16[%c0_773, %c1472_774] : memref<1x2592xbf16, #tpu.memory_space<vmem>>, vector<1x32xbf16>
    tpu.vector_store %arg16[%c0_773, %c1472_774], %598 {strides = array<i32>} : memref<1x2592xbf16, #tpu.memory_space<vmem>>, vector<1x32xbf16>,
    %600 = vector.extract_strided_slice %364 {offsets = [47, 0], sizes = [1, 64], strides = [1, 1]} : vector<81x64xbf16> to vector<1x64xbf16>
    %601 = vector.extract_strided_slice %600 {offsets = [0, 0], sizes = [1, 32], strides = [1, 1]} : vector<1x64xbf16> to vector<1x32xbf16>
    %c0_775 = arith.constant 0 : index
    %c1504 = arith.constant 1504 : index
    %602 = vector.load %arg15[%c0_775, %c1504] : memref<1x2592xbf16, #tpu.memory_space<vmem>>, vector<1x32xbf16>
    tpu.vector_store %arg15[%c0_775, %c1504], %601 {strides = array<i32>} : memref<1x2592xbf16, #tpu.memory_space<vmem>>, vector<1x32xbf16>,
    %603 = vector.extract_strided_slice %600 {offsets = [0, 32], sizes = [1, 32], strides = [1, 1]} : vector<1x64xbf16> to vector<1x32xbf16>
    %c0_776 = arith.constant 0 : index
    %c1504_777 = arith.constant 1504 : index
    %604 = vector.load %arg16[%c0_776, %c1504_777] : memref<1x2592xbf16, #tpu.memory_space<vmem>>, vector<1x32xbf16>
    tpu.vector_store %arg16[%c0_776, %c1504_777], %603 {strides = array<i32>} : memref<1x2592xbf16, #tpu.memory_space<vmem>>, vector<1x32xbf16>,
    %605 = vector.extract_strided_slice %364 {offsets = [48, 0], sizes = [1, 64], strides = [1, 1]} : vector<81x64xbf16> to vector<1x64xbf16>
    %606 = vector.extract_strided_slice %605 {offsets = [0, 0], sizes = [1, 32], strides = [1, 1]} : vector<1x64xbf16> to vector<1x32xbf16>
    %c0_778 = arith.constant 0 : index
    %c1536 = arith.constant 1536 : index
    %607 = vector.load %arg15[%c0_778, %c1536] : memref<1x2592xbf16, #tpu.memory_space<vmem>>, vector<1x32xbf16>
    tpu.vector_store %arg15[%c0_778, %c1536], %606 {strides = array<i32>} : memref<1x2592xbf16, #tpu.memory_space<vmem>>, vector<1x32xbf16>,
    %608 = vector.extract_strided_slice %605 {offsets = [0, 32], sizes = [1, 32], strides = [1, 1]} : vector<1x64xbf16> to vector<1x32xbf16>
    %c0_779 = arith.constant 0 : index
    %c1536_780 = arith.constant 1536 : index
    %609 = vector.load %arg16[%c0_779, %c1536_780] : memref<1x2592xbf16, #tpu.memory_space<vmem>>, vector<1x32xbf16>
    tpu.vector_store %arg16[%c0_779, %c1536_780], %608 {strides = array<i32>} : memref<1x2592xbf16, #tpu.memory_space<vmem>>, vector<1x32xbf16>,
    %610 = vector.extract_strided_slice %364 {offsets = [49, 0], sizes = [1, 64], strides = [1, 1]} : vector<81x64xbf16> to vector<1x64xbf16>
    %611 = vector.extract_strided_slice %610 {offsets = [0, 0], sizes = [1, 32], strides = [1, 1]} : vector<1x64xbf16> to vector<1x32xbf16>
    %c0_781 = arith.constant 0 : index
    %c1568 = arith.constant 1568 : index
    %612 = vector.load %arg15[%c0_781, %c1568] : memref<1x2592xbf16, #tpu.memory_space<vmem>>, vector<1x32xbf16>
    tpu.vector_store %arg15[%c0_781, %c1568], %611 {strides = array<i32>} : memref<1x2592xbf16, #tpu.memory_space<vmem>>, vector<1x32xbf16>,
    %613 = vector.extract_strided_slice %610 {offsets = [0, 32], sizes = [1, 32], strides = [1, 1]} : vector<1x64xbf16> to vector<1x32xbf16>
    %c0_782 = arith.constant 0 : index
    %c1568_783 = arith.constant 1568 : index
    %614 = vector.load %arg16[%c0_782, %c1568_783] : memref<1x2592xbf16, #tpu.memory_space<vmem>>, vector<1x32xbf16>
    tpu.vector_store %arg16[%c0_782, %c1568_783], %613 {strides = array<i32>} : memref<1x2592xbf16, #tpu.memory_space<vmem>>, vector<1x32xbf16>,
    %615 = vector.extract_strided_slice %364 {offsets = [50, 0], sizes = [1, 64], strides = [1, 1]} : vector<81x64xbf16> to vector<1x64xbf16>
    %616 = vector.extract_strided_slice %615 {offsets = [0, 0], sizes = [1, 32], strides = [1, 1]} : vector<1x64xbf16> to vector<1x32xbf16>
    %c0_784 = arith.constant 0 : index
    %c1600 = arith.constant 1600 : index
    %617 = vector.load %arg15[%c0_784, %c1600] : memref<1x2592xbf16, #tpu.memory_space<vmem>>, vector<1x32xbf16>
    tpu.vector_store %arg15[%c0_784, %c1600], %616 {strides = array<i32>} : memref<1x2592xbf16, #tpu.memory_space<vmem>>, vector<1x32xbf16>,
    %618 = vector.extract_strided_slice %615 {offsets = [0, 32], sizes = [1, 32], strides = [1, 1]} : vector<1x64xbf16> to vector<1x32xbf16>
    %c0_785 = arith.constant 0 : index
    %c1600_786 = arith.constant 1600 : index
    %619 = vector.load %arg16[%c0_785, %c1600_786] : memref<1x2592xbf16, #tpu.memory_space<vmem>>, vector<1x32xbf16>
    tpu.vector_store %arg16[%c0_785, %c1600_786], %618 {strides = array<i32>} : memref<1x2592xbf16, #tpu.memory_space<vmem>>, vector<1x32xbf16>,
    %620 = vector.extract_strided_slice %364 {offsets = [51, 0], sizes = [1, 64], strides = [1, 1]} : vector<81x64xbf16> to vector<1x64xbf16>
    %621 = vector.extract_strided_slice %620 {offsets = [0, 0], sizes = [1, 32], strides = [1, 1]} : vector<1x64xbf16> to vector<1x32xbf16>
    %c0_787 = arith.constant 0 : index
    %c1632 = arith.constant 1632 : index
    %622 = vector.load %arg15[%c0_787, %c1632] : memref<1x2592xbf16, #tpu.memory_space<vmem>>, vector<1x32xbf16>
    tpu.vector_store %arg15[%c0_787, %c1632], %621 {strides = array<i32>} : memref<1x2592xbf16, #tpu.memory_space<vmem>>, vector<1x32xbf16>,
    %623 = vector.extract_strided_slice %620 {offsets = [0, 32], sizes = [1, 32], strides = [1, 1]} : vector<1x64xbf16> to vector<1x32xbf16>
    %c0_788 = arith.constant 0 : index
    %c1632_789 = arith.constant 1632 : index
    %624 = vector.load %arg16[%c0_788, %c1632_789] : memref<1x2592xbf16, #tpu.memory_space<vmem>>, vector<1x32xbf16>
    tpu.vector_store %arg16[%c0_788, %c1632_789], %623 {strides = array<i32>} : memref<1x2592xbf16, #tpu.memory_space<vmem>>, vector<1x32xbf16>,
    %625 = vector.extract_strided_slice %364 {offsets = [52, 0], sizes = [1, 64], strides = [1, 1]} : vector<81x64xbf16> to vector<1x64xbf16>
    %626 = vector.extract_strided_slice %625 {offsets = [0, 0], sizes = [1, 32], strides = [1, 1]} : vector<1x64xbf16> to vector<1x32xbf16>
    %c0_790 = arith.constant 0 : index
    %c1664 = arith.constant 1664 : index
    %627 = vector.load %arg15[%c0_790, %c1664] : memref<1x2592xbf16, #tpu.memory_space<vmem>>, vector<1x32xbf16>
    tpu.vector_store %arg15[%c0_790, %c1664], %626 {strides = array<i32>} : memref<1x2592xbf16, #tpu.memory_space<vmem>>, vector<1x32xbf16>,
    %628 = vector.extract_strided_slice %625 {offsets = [0, 32], sizes = [1, 32], strides = [1, 1]} : vector<1x64xbf16> to vector<1x32xbf16>
    %c0_791 = arith.constant 0 : index
    %c1664_792 = arith.constant 1664 : index
    %629 = vector.load %arg16[%c0_791, %c1664_792] : memref<1x2592xbf16, #tpu.memory_space<vmem>>, vector<1x32xbf16>
    tpu.vector_store %arg16[%c0_791, %c1664_792], %628 {strides = array<i32>} : memref<1x2592xbf16, #tpu.memory_space<vmem>>, vector<1x32xbf16>,
    %630 = vector.extract_strided_slice %364 {offsets = [53, 0], sizes = [1, 64], strides = [1, 1]} : vector<81x64xbf16> to vector<1x64xbf16>
    %631 = vector.extract_strided_slice %630 {offsets = [0, 0], sizes = [1, 32], strides = [1, 1]} : vector<1x64xbf16> to vector<1x32xbf16>
    %c0_793 = arith.constant 0 : index
    %c1696 = arith.constant 1696 : index
    %632 = vector.load %arg15[%c0_793, %c1696] : memref<1x2592xbf16, #tpu.memory_space<vmem>>, vector<1x32xbf16>
    tpu.vector_store %arg15[%c0_793, %c1696], %631 {strides = array<i32>} : memref<1x2592xbf16, #tpu.memory_space<vmem>>, vector<1x32xbf16>,
    %633 = vector.extract_strided_slice %630 {offsets = [0, 32], sizes = [1, 32], strides = [1, 1]} : vector<1x64xbf16> to vector<1x32xbf16>
    %c0_794 = arith.constant 0 : index
    %c1696_795 = arith.constant 1696 : index
    %634 = vector.load %arg16[%c0_794, %c1696_795] : memref<1x2592xbf16, #tpu.memory_space<vmem>>, vector<1x32xbf16>
    tpu.vector_store %arg16[%c0_794, %c1696_795], %633 {strides = array<i32>} : memref<1x2592xbf16, #tpu.memory_space<vmem>>, vector<1x32xbf16>,
    %635 = vector.extract_strided_slice %364 {offsets = [54, 0], sizes = [1, 64], strides = [1, 1]} : vector<81x64xbf16> to vector<1x64xbf16>
    %636 = vector.extract_strided_slice %635 {offsets = [0, 0], sizes = [1, 32], strides = [1, 1]} : vector<1x64xbf16> to vector<1x32xbf16>
    %c0_796 = arith.constant 0 : index
    %c1728 = arith.constant 1728 : index
    %637 = vector.load %arg15[%c0_796, %c1728] : memref<1x2592xbf16, #tpu.memory_space<vmem>>, vector<1x32xbf16>
    tpu.vector_store %arg15[%c0_796, %c1728], %636 {strides = array<i32>} : memref<1x2592xbf16, #tpu.memory_space<vmem>>, vector<1x32xbf16>,
    %638 = vector.extract_strided_slice %635 {offsets = [0, 32], sizes = [1, 32], strides = [1, 1]} : vector<1x64xbf16> to vector<1x32xbf16>
    %c0_797 = arith.constant 0 : index
    %c1728_798 = arith.constant 1728 : index
    %639 = vector.load %arg16[%c0_797, %c1728_798] : memref<1x2592xbf16, #tpu.memory_space<vmem>>, vector<1x32xbf16>
    tpu.vector_store %arg16[%c0_797, %c1728_798], %638 {strides = array<i32>} : memref<1x2592xbf16, #tpu.memory_space<vmem>>, vector<1x32xbf16>,
    %640 = vector.extract_strided_slice %364 {offsets = [55, 0], sizes = [1, 64], strides = [1, 1]} : vector<81x64xbf16> to vector<1x64xbf16>
    %641 = vector.extract_strided_slice %640 {offsets = [0, 0], sizes = [1, 32], strides = [1, 1]} : vector<1x64xbf16> to vector<1x32xbf16>
    %c0_799 = arith.constant 0 : index
    %c1760 = arith.constant 1760 : index
    %642 = vector.load %arg15[%c0_799, %c1760] : memref<1x2592xbf16, #tpu.memory_space<vmem>>, vector<1x32xbf16>
    tpu.vector_store %arg15[%c0_799, %c1760], %641 {strides = array<i32>} : memref<1x2592xbf16, #tpu.memory_space<vmem>>, vector<1x32xbf16>,
    %643 = vector.extract_strided_slice %640 {offsets = [0, 32], sizes = [1, 32], strides = [1, 1]} : vector<1x64xbf16> to vector<1x32xbf16>
    %c0_800 = arith.constant 0 : index
    %c1760_801 = arith.constant 1760 : index
    %644 = vector.load %arg16[%c0_800, %c1760_801] : memref<1x2592xbf16, #tpu.memory_space<vmem>>, vector<1x32xbf16>
    tpu.vector_store %arg16[%c0_800, %c1760_801], %643 {strides = array<i32>} : memref<1x2592xbf16, #tpu.memory_space<vmem>>, vector<1x32xbf16>,
    %645 = vector.extract_strided_slice %364 {offsets = [56, 0], sizes = [1, 64], strides = [1, 1]} : vector<81x64xbf16> to vector<1x64xbf16>
    %646 = vector.extract_strided_slice %645 {offsets = [0, 0], sizes = [1, 32], strides = [1, 1]} : vector<1x64xbf16> to vector<1x32xbf16>
    %c0_802 = arith.constant 0 : index
    %c1792 = arith.constant 1792 : index
    %647 = vector.load %arg15[%c0_802, %c1792] : memref<1x2592xbf16, #tpu.memory_space<vmem>>, vector<1x32xbf16>
    tpu.vector_store %arg15[%c0_802, %c1792], %646 {strides = array<i32>} : memref<1x2592xbf16, #tpu.memory_space<vmem>>, vector<1x32xbf16>,
    %648 = vector.extract_strided_slice %645 {offsets = [0, 32], sizes = [1, 32], strides = [1, 1]} : vector<1x64xbf16> to vector<1x32xbf16>
    %c0_803 = arith.constant 0 : index
    %c1792_804 = arith.constant 1792 : index
    %649 = vector.load %arg16[%c0_803, %c1792_804] : memref<1x2592xbf16, #tpu.memory_space<vmem>>, vector<1x32xbf16>
    tpu.vector_store %arg16[%c0_803, %c1792_804], %648 {strides = array<i32>} : memref<1x2592xbf16, #tpu.memory_space<vmem>>, vector<1x32xbf16>,
    %650 = vector.extract_strided_slice %364 {offsets = [57, 0], sizes = [1, 64], strides = [1, 1]} : vector<81x64xbf16> to vector<1x64xbf16>
    %651 = vector.extract_strided_slice %650 {offsets = [0, 0], sizes = [1, 32], strides = [1, 1]} : vector<1x64xbf16> to vector<1x32xbf16>
    %c0_805 = arith.constant 0 : index
    %c1824 = arith.constant 1824 : index
    %652 = vector.load %arg15[%c0_805, %c1824] : memref<1x2592xbf16, #tpu.memory_space<vmem>>, vector<1x32xbf16>
    tpu.vector_store %arg15[%c0_805, %c1824], %651 {strides = array<i32>} : memref<1x2592xbf16, #tpu.memory_space<vmem>>, vector<1x32xbf16>,
    %653 = vector.extract_strided_slice %650 {offsets = [0, 32], sizes = [1, 32], strides = [1, 1]} : vector<1x64xbf16> to vector<1x32xbf16>
    %c0_806 = arith.constant 0 : index
    %c1824_807 = arith.constant 1824 : index
    %654 = vector.load %arg16[%c0_806, %c1824_807] : memref<1x2592xbf16, #tpu.memory_space<vmem>>, vector<1x32xbf16>
    tpu.vector_store %arg16[%c0_806, %c1824_807], %653 {strides = array<i32>} : memref<1x2592xbf16, #tpu.memory_space<vmem>>, vector<1x32xbf16>,
    %655 = vector.extract_strided_slice %364 {offsets = [58, 0], sizes = [1, 64], strides = [1, 1]} : vector<81x64xbf16> to vector<1x64xbf16>
    %656 = vector.extract_strided_slice %655 {offsets = [0, 0], sizes = [1, 32], strides = [1, 1]} : vector<1x64xbf16> to vector<1x32xbf16>
    %c0_808 = arith.constant 0 : index
    %c1856 = arith.constant 1856 : index
    %657 = vector.load %arg15[%c0_808, %c1856] : memref<1x2592xbf16, #tpu.memory_space<vmem>>, vector<1x32xbf16>
    tpu.vector_store %arg15[%c0_808, %c1856], %656 {strides = array<i32>} : memref<1x2592xbf16, #tpu.memory_space<vmem>>, vector<1x32xbf16>,
    %658 = vector.extract_strided_slice %655 {offsets = [0, 32], sizes = [1, 32], strides = [1, 1]} : vector<1x64xbf16> to vector<1x32xbf16>
    %c0_809 = arith.constant 0 : index
    %c1856_810 = arith.constant 1856 : index
    %659 = vector.load %arg16[%c0_809, %c1856_810] : memref<1x2592xbf16, #tpu.memory_space<vmem>>, vector<1x32xbf16>
    tpu.vector_store %arg16[%c0_809, %c1856_810], %658 {strides = array<i32>} : memref<1x2592xbf16, #tpu.memory_space<vmem>>, vector<1x32xbf16>,
    %660 = vector.extract_strided_slice %364 {offsets = [59, 0], sizes = [1, 64], strides = [1, 1]} : vector<81x64xbf16> to vector<1x64xbf16>
    %661 = vector.extract_strided_slice %660 {offsets = [0, 0], sizes = [1, 32], strides = [1, 1]} : vector<1x64xbf16> to vector<1x32xbf16>
    %c0_811 = arith.constant 0 : index
    %c1888 = arith.constant 1888 : index
    %662 = vector.load %arg15[%c0_811, %c1888] : memref<1x2592xbf16, #tpu.memory_space<vmem>>, vector<1x32xbf16>
    tpu.vector_store %arg15[%c0_811, %c1888], %661 {strides = array<i32>} : memref<1x2592xbf16, #tpu.memory_space<vmem>>, vector<1x32xbf16>,
    %663 = vector.extract_strided_slice %660 {offsets = [0, 32], sizes = [1, 32], strides = [1, 1]} : vector<1x64xbf16> to vector<1x32xbf16>
    %c0_812 = arith.constant 0 : index
    %c1888_813 = arith.constant 1888 : index
    %664 = vector.load %arg16[%c0_812, %c1888_813] : memref<1x2592xbf16, #tpu.memory_space<vmem>>, vector<1x32xbf16>
    tpu.vector_store %arg16[%c0_812, %c1888_813], %663 {strides = array<i32>} : memref<1x2592xbf16, #tpu.memory_space<vmem>>, vector<1x32xbf16>,
    %665 = vector.extract_strided_slice %364 {offsets = [60, 0], sizes = [1, 64], strides = [1, 1]} : vector<81x64xbf16> to vector<1x64xbf16>
    %666 = vector.extract_strided_slice %665 {offsets = [0, 0], sizes = [1, 32], strides = [1, 1]} : vector<1x64xbf16> to vector<1x32xbf16>
    %c0_814 = arith.constant 0 : index
    %c1920 = arith.constant 1920 : index
    %667 = vector.load %arg15[%c0_814, %c1920] : memref<1x2592xbf16, #tpu.memory_space<vmem>>, vector<1x32xbf16>
    tpu.vector_store %arg15[%c0_814, %c1920], %666 {strides = array<i32>} : memref<1x2592xbf16, #tpu.memory_space<vmem>>, vector<1x32xbf16>,
    %668 = vector.extract_strided_slice %665 {offsets = [0, 32], sizes = [1, 32], strides = [1, 1]} : vector<1x64xbf16> to vector<1x32xbf16>
    %c0_815 = arith.constant 0 : index
    %c1920_816 = arith.constant 1920 : index
    %669 = vector.load %arg16[%c0_815, %c1920_816] : memref<1x2592xbf16, #tpu.memory_space<vmem>>, vector<1x32xbf16>
    tpu.vector_store %arg16[%c0_815, %c1920_816], %668 {strides = array<i32>} : memref<1x2592xbf16, #tpu.memory_space<vmem>>, vector<1x32xbf16>,
    %670 = vector.extract_strided_slice %364 {offsets = [61, 0], sizes = [1, 64], strides = [1, 1]} : vector<81x64xbf16> to vector<1x64xbf16>
    %671 = vector.extract_strided_slice %670 {offsets = [0, 0], sizes = [1, 32], strides = [1, 1]} : vector<1x64xbf16> to vector<1x32xbf16>
    %c0_817 = arith.constant 0 : index
    %c1952 = arith.constant 1952 : index
    %672 = vector.load %arg15[%c0_817, %c1952] : memref<1x2592xbf16, #tpu.memory_space<vmem>>, vector<1x32xbf16>
    tpu.vector_store %arg15[%c0_817, %c1952], %671 {strides = array<i32>} : memref<1x2592xbf16, #tpu.memory_space<vmem>>, vector<1x32xbf16>,
    %673 = vector.extract_strided_slice %670 {offsets = [0, 32], sizes = [1, 32], strides = [1, 1]} : vector<1x64xbf16> to vector<1x32xbf16>
    %c0_818 = arith.constant 0 : index
    %c1952_819 = arith.constant 1952 : index
    %674 = vector.load %arg16[%c0_818, %c1952_819] : memref<1x2592xbf16, #tpu.memory_space<vmem>>, vector<1x32xbf16>
    tpu.vector_store %arg16[%c0_818, %c1952_819], %673 {strides = array<i32>} : memref<1x2592xbf16, #tpu.memory_space<vmem>>, vector<1x32xbf16>,
    %675 = vector.extract_strided_slice %364 {offsets = [62, 0], sizes = [1, 64], strides = [1, 1]} : vector<81x64xbf16> to vector<1x64xbf16>
    %676 = vector.extract_strided_slice %675 {offsets = [0, 0], sizes = [1, 32], strides = [1, 1]} : vector<1x64xbf16> to vector<1x32xbf16>
    %c0_820 = arith.constant 0 : index
    %c1984 = arith.constant 1984 : index
    %677 = vector.load %arg15[%c0_820, %c1984] : memref<1x2592xbf16, #tpu.memory_space<vmem>>, vector<1x32xbf16>
    tpu.vector_store %arg15[%c0_820, %c1984], %676 {strides = array<i32>} : memref<1x2592xbf16, #tpu.memory_space<vmem>>, vector<1x32xbf16>,
    %678 = vector.extract_strided_slice %675 {offsets = [0, 32], sizes = [1, 32], strides = [1, 1]} : vector<1x64xbf16> to vector<1x32xbf16>
    %c0_821 = arith.constant 0 : index
    %c1984_822 = arith.constant 1984 : index
    %679 = vector.load %arg16[%c0_821, %c1984_822] : memref<1x2592xbf16, #tpu.memory_space<vmem>>, vector<1x32xbf16>
    tpu.vector_store %arg16[%c0_821, %c1984_822], %678 {strides = array<i32>} : memref<1x2592xbf16, #tpu.memory_space<vmem>>, vector<1x32xbf16>,
    %680 = vector.extract_strided_slice %364 {offsets = [63, 0], sizes = [1, 64], strides = [1, 1]} : vector<81x64xbf16> to vector<1x64xbf16>
    %681 = vector.extract_strided_slice %680 {offsets = [0, 0], sizes = [1, 32], strides = [1, 1]} : vector<1x64xbf16> to vector<1x32xbf16>
    %c0_823 = arith.constant 0 : index
    %c2016 = arith.constant 2016 : index
    %682 = vector.load %arg15[%c0_823, %c2016] : memref<1x2592xbf16, #tpu.memory_space<vmem>>, vector<1x32xbf16>
    tpu.vector_store %arg15[%c0_823, %c2016], %681 {strides = array<i32>} : memref<1x2592xbf16, #tpu.memory_space<vmem>>, vector<1x32xbf16>,
    %683 = vector.extract_strided_slice %680 {offsets = [0, 32], sizes = [1, 32], strides = [1, 1]} : vector<1x64xbf16> to vector<1x32xbf16>
    %c0_824 = arith.constant 0 : index
    %c2016_825 = arith.constant 2016 : index
    %684 = vector.load %arg16[%c0_824, %c2016_825] : memref<1x2592xbf16, #tpu.memory_space<vmem>>, vector<1x32xbf16>
    tpu.vector_store %arg16[%c0_824, %c2016_825], %683 {strides = array<i32>} : memref<1x2592xbf16, #tpu.memory_space<vmem>>, vector<1x32xbf16>,
    %685 = vector.extract_strided_slice %364 {offsets = [64, 0], sizes = [1, 64], strides = [1, 1]} : vector<81x64xbf16> to vector<1x64xbf16>
    %686 = vector.extract_strided_slice %685 {offsets = [0, 0], sizes = [1, 32], strides = [1, 1]} : vector<1x64xbf16> to vector<1x32xbf16>
    %c0_826 = arith.constant 0 : index
    %c2048 = arith.constant 2048 : index
    %687 = vector.load %arg15[%c0_826, %c2048] : memref<1x2592xbf16, #tpu.memory_space<vmem>>, vector<1x32xbf16>
    tpu.vector_store %arg15[%c0_826, %c2048], %686 {strides = array<i32>} : memref<1x2592xbf16, #tpu.memory_space<vmem>>, vector<1x32xbf16>,
    %688 = vector.extract_strided_slice %685 {offsets = [0, 32], sizes = [1, 32], strides = [1, 1]} : vector<1x64xbf16> to vector<1x32xbf16>
    %c0_827 = arith.constant 0 : index
    %c2048_828 = arith.constant 2048 : index
    %689 = vector.load %arg16[%c0_827, %c2048_828] : memref<1x2592xbf16, #tpu.memory_space<vmem>>, vector<1x32xbf16>
    tpu.vector_store %arg16[%c0_827, %c2048_828], %688 {strides = array<i32>} : memref<1x2592xbf16, #tpu.memory_space<vmem>>, vector<1x32xbf16>,
    %690 = vector.extract_strided_slice %364 {offsets = [65, 0], sizes = [1, 64], strides = [1, 1]} : vector<81x64xbf16> to vector<1x64xbf16>
    %691 = vector.extract_strided_slice %690 {offsets = [0, 0], sizes = [1, 32], strides = [1, 1]} : vector<1x64xbf16> to vector<1x32xbf16>
    %c0_829 = arith.constant 0 : index
    %c2080 = arith.constant 2080 : index
    %692 = vector.load %arg15[%c0_829, %c2080] : memref<1x2592xbf16, #tpu.memory_space<vmem>>, vector<1x32xbf16>
    tpu.vector_store %arg15[%c0_829, %c2080], %691 {strides = array<i32>} : memref<1x2592xbf16, #tpu.memory_space<vmem>>, vector<1x32xbf16>,
    %693 = vector.extract_strided_slice %690 {offsets = [0, 32], sizes = [1, 32], strides = [1, 1]} : vector<1x64xbf16> to vector<1x32xbf16>
    %c0_830 = arith.constant 0 : index
    %c2080_831 = arith.constant 2080 : index
    %694 = vector.load %arg16[%c0_830, %c2080_831] : memref<1x2592xbf16, #tpu.memory_space<vmem>>, vector<1x32xbf16>
    tpu.vector_store %arg16[%c0_830, %c2080_831], %693 {strides = array<i32>} : memref<1x2592xbf16, #tpu.memory_space<vmem>>, vector<1x32xbf16>,
    %695 = vector.extract_strided_slice %364 {offsets = [66, 0], sizes = [1, 64], strides = [1, 1]} : vector<81x64xbf16> to vector<1x64xbf16>
    %696 = vector.extract_strided_slice %695 {offsets = [0, 0], sizes = [1, 32], strides = [1, 1]} : vector<1x64xbf16> to vector<1x32xbf16>
    %c0_832 = arith.constant 0 : index
    %c2112 = arith.constant 2112 : index
    %697 = vector.load %arg15[%c0_832, %c2112] : memref<1x2592xbf16, #tpu.memory_space<vmem>>, vector<1x32xbf16>
    tpu.vector_store %arg15[%c0_832, %c2112], %696 {strides = array<i32>} : memref<1x2592xbf16, #tpu.memory_space<vmem>>, vector<1x32xbf16>,
    %698 = vector.extract_strided_slice %695 {offsets = [0, 32], sizes = [1, 32], strides = [1, 1]} : vector<1x64xbf16> to vector<1x32xbf16>
    %c0_833 = arith.constant 0 : index
    %c2112_834 = arith.constant 2112 : index
    %699 = vector.load %arg16[%c0_833, %c2112_834] : memref<1x2592xbf16, #tpu.memory_space<vmem>>, vector<1x32xbf16>
    tpu.vector_store %arg16[%c0_833, %c2112_834], %698 {strides = array<i32>} : memref<1x2592xbf16, #tpu.memory_space<vmem>>, vector<1x32xbf16>,
    %700 = vector.extract_strided_slice %364 {offsets = [67, 0], sizes = [1, 64], strides = [1, 1]} : vector<81x64xbf16> to vector<1x64xbf16>
    %701 = vector.extract_strided_slice %700 {offsets = [0, 0], sizes = [1, 32], strides = [1, 1]} : vector<1x64xbf16> to vector<1x32xbf16>
    %c0_835 = arith.constant 0 : index
    %c2144 = arith.constant 2144 : index
    %702 = vector.load %arg15[%c0_835, %c2144] : memref<1x2592xbf16, #tpu.memory_space<vmem>>, vector<1x32xbf16>
    tpu.vector_store %arg15[%c0_835, %c2144], %701 {strides = array<i32>} : memref<1x2592xbf16, #tpu.memory_space<vmem>>, vector<1x32xbf16>,
    %703 = vector.extract_strided_slice %700 {offsets = [0, 32], sizes = [1, 32], strides = [1, 1]} : vector<1x64xbf16> to vector<1x32xbf16>
    %c0_836 = arith.constant 0 : index
    %c2144_837 = arith.constant 2144 : index
    %704 = vector.load %arg16[%c0_836, %c2144_837] : memref<1x2592xbf16, #tpu.memory_space<vmem>>, vector<1x32xbf16>
    tpu.vector_store %arg16[%c0_836, %c2144_837], %703 {strides = array<i32>} : memref<1x2592xbf16, #tpu.memory_space<vmem>>, vector<1x32xbf16>,
    %705 = vector.extract_strided_slice %364 {offsets = [68, 0], sizes = [1, 64], strides = [1, 1]} : vector<81x64xbf16> to vector<1x64xbf16>
    %706 = vector.extract_strided_slice %705 {offsets = [0, 0], sizes = [1, 32], strides = [1, 1]} : vector<1x64xbf16> to vector<1x32xbf16>
    %c0_838 = arith.constant 0 : index
    %c2176 = arith.constant 2176 : index
    %707 = vector.load %arg15[%c0_838, %c2176] : memref<1x2592xbf16, #tpu.memory_space<vmem>>, vector<1x32xbf16>
    tpu.vector_store %arg15[%c0_838, %c2176], %706 {strides = array<i32>} : memref<1x2592xbf16, #tpu.memory_space<vmem>>, vector<1x32xbf16>,
    %708 = vector.extract_strided_slice %705 {offsets = [0, 32], sizes = [1, 32], strides = [1, 1]} : vector<1x64xbf16> to vector<1x32xbf16>
    %c0_839 = arith.constant 0 : index
    %c2176_840 = arith.constant 2176 : index
    %709 = vector.load %arg16[%c0_839, %c2176_840] : memref<1x2592xbf16, #tpu.memory_space<vmem>>, vector<1x32xbf16>
    tpu.vector_store %arg16[%c0_839, %c2176_840], %708 {strides = array<i32>} : memref<1x2592xbf16, #tpu.memory_space<vmem>>, vector<1x32xbf16>,
    %710 = vector.extract_strided_slice %364 {offsets = [69, 0], sizes = [1, 64], strides = [1, 1]} : vector<81x64xbf16> to vector<1x64xbf16>
    %711 = vector.extract_strided_slice %710 {offsets = [0, 0], sizes = [1, 32], strides = [1, 1]} : vector<1x64xbf16> to vector<1x32xbf16>
    %c0_841 = arith.constant 0 : index
    %c2208 = arith.constant 2208 : index
    %712 = vector.load %arg15[%c0_841, %c2208] : memref<1x2592xbf16, #tpu.memory_space<vmem>>, vector<1x32xbf16>
    tpu.vector_store %arg15[%c0_841, %c2208], %711 {strides = array<i32>} : memref<1x2592xbf16, #tpu.memory_space<vmem>>, vector<1x32xbf16>,
    %713 = vector.extract_strided_slice %710 {offsets = [0, 32], sizes = [1, 32], strides = [1, 1]} : vector<1x64xbf16> to vector<1x32xbf16>
    %c0_842 = arith.constant 0 : index
    %c2208_843 = arith.constant 2208 : index
    %714 = vector.load %arg16[%c0_842, %c2208_843] : memref<1x2592xbf16, #tpu.memory_space<vmem>>, vector<1x32xbf16>
    tpu.vector_store %arg16[%c0_842, %c2208_843], %713 {strides = array<i32>} : memref<1x2592xbf16, #tpu.memory_space<vmem>>, vector<1x32xbf16>,
    %715 = vector.extract_strided_slice %364 {offsets = [70, 0], sizes = [1, 64], strides = [1, 1]} : vector<81x64xbf16> to vector<1x64xbf16>
    %716 = vector.extract_strided_slice %715 {offsets = [0, 0], sizes = [1, 32], strides = [1, 1]} : vector<1x64xbf16> to vector<1x32xbf16>
    %c0_844 = arith.constant 0 : index
    %c2240 = arith.constant 2240 : index
    %717 = vector.load %arg15[%c0_844, %c2240] : memref<1x2592xbf16, #tpu.memory_space<vmem>>, vector<1x32xbf16>
    tpu.vector_store %arg15[%c0_844, %c2240], %716 {strides = array<i32>} : memref<1x2592xbf16, #tpu.memory_space<vmem>>, vector<1x32xbf16>,
    %718 = vector.extract_strided_slice %715 {offsets = [0, 32], sizes = [1, 32], strides = [1, 1]} : vector<1x64xbf16> to vector<1x32xbf16>
    %c0_845 = arith.constant 0 : index
    %c2240_846 = arith.constant 2240 : index
    %719 = vector.load %arg16[%c0_845, %c2240_846] : memref<1x2592xbf16, #tpu.memory_space<vmem>>, vector<1x32xbf16>
    tpu.vector_store %arg16[%c0_845, %c2240_846], %718 {strides = array<i32>} : memref<1x2592xbf16, #tpu.memory_space<vmem>>, vector<1x32xbf16>,
    %720 = vector.extract_strided_slice %364 {offsets = [71, 0], sizes = [1, 64], strides = [1, 1]} : vector<81x64xbf16> to vector<1x64xbf16>
    %721 = vector.extract_strided_slice %720 {offsets = [0, 0], sizes = [1, 32], strides = [1, 1]} : vector<1x64xbf16> to vector<1x32xbf16>
    %c0_847 = arith.constant 0 : index
    %c2272 = arith.constant 2272 : index
    %722 = vector.load %arg15[%c0_847, %c2272] : memref<1x2592xbf16, #tpu.memory_space<vmem>>, vector<1x32xbf16>
    tpu.vector_store %arg15[%c0_847, %c2272], %721 {strides = array<i32>} : memref<1x2592xbf16, #tpu.memory_space<vmem>>, vector<1x32xbf16>,
    %723 = vector.extract_strided_slice %720 {offsets = [0, 32], sizes = [1, 32], strides = [1, 1]} : vector<1x64xbf16> to vector<1x32xbf16>
    %c0_848 = arith.constant 0 : index
    %c2272_849 = arith.constant 2272 : index
    %724 = vector.load %arg16[%c0_848, %c2272_849] : memref<1x2592xbf16, #tpu.memory_space<vmem>>, vector<1x32xbf16>
    tpu.vector_store %arg16[%c0_848, %c2272_849], %723 {strides = array<i32>} : memref<1x2592xbf16, #tpu.memory_space<vmem>>, vector<1x32xbf16>,
    %725 = vector.extract_strided_slice %364 {offsets = [72, 0], sizes = [1, 64], strides = [1, 1]} : vector<81x64xbf16> to vector<1x64xbf16>
    %726 = vector.extract_strided_slice %725 {offsets = [0, 0], sizes = [1, 32], strides = [1, 1]} : vector<1x64xbf16> to vector<1x32xbf16>
    %c0_850 = arith.constant 0 : index
    %c2304 = arith.constant 2304 : index
    %727 = vector.load %arg15[%c0_850, %c2304] : memref<1x2592xbf16, #tpu.memory_space<vmem>>, vector<1x32xbf16>
    tpu.vector_store %arg15[%c0_850, %c2304], %726 {strides = array<i32>} : memref<1x2592xbf16, #tpu.memory_space<vmem>>, vector<1x32xbf16>,
    %728 = vector.extract_strided_slice %725 {offsets = [0, 32], sizes = [1, 32], strides = [1, 1]} : vector<1x64xbf16> to vector<1x32xbf16>
    %c0_851 = arith.constant 0 : index
    %c2304_852 = arith.constant 2304 : index
    %729 = vector.load %arg16[%c0_851, %c2304_852] : memref<1x2592xbf16, #tpu.memory_space<vmem>>, vector<1x32xbf16>
    tpu.vector_store %arg16[%c0_851, %c2304_852], %728 {strides = array<i32>} : memref<1x2592xbf16, #tpu.memory_space<vmem>>, vector<1x32xbf16>,
    %730 = vector.extract_strided_slice %364 {offsets = [73, 0], sizes = [1, 64], strides = [1, 1]} : vector<81x64xbf16> to vector<1x64xbf16>
    %731 = vector.extract_strided_slice %730 {offsets = [0, 0], sizes = [1, 32], strides = [1, 1]} : vector<1x64xbf16> to vector<1x32xbf16>
    %c0_853 = arith.constant 0 : index
    %c2336 = arith.constant 2336 : index
    %732 = vector.load %arg15[%c0_853, %c2336] : memref<1x2592xbf16, #tpu.memory_space<vmem>>, vector<1x32xbf16>
    tpu.vector_store %arg15[%c0_853, %c2336], %731 {strides = array<i32>} : memref<1x2592xbf16, #tpu.memory_space<vmem>>, vector<1x32xbf16>,
    %733 = vector.extract_strided_slice %730 {offsets = [0, 32], sizes = [1, 32], strides = [1, 1]} : vector<1x64xbf16> to vector<1x32xbf16>
    %c0_854 = arith.constant 0 : index
    %c2336_855 = arith.constant 2336 : index
    %734 = vector.load %arg16[%c0_854, %c2336_855] : memref<1x2592xbf16, #tpu.memory_space<vmem>>, vector<1x32xbf16>
    tpu.vector_store %arg16[%c0_854, %c2336_855], %733 {strides = array<i32>} : memref<1x2592xbf16, #tpu.memory_space<vmem>>, vector<1x32xbf16>,
    %735 = vector.extract_strided_slice %364 {offsets = [74, 0], sizes = [1, 64], strides = [1, 1]} : vector<81x64xbf16> to vector<1x64xbf16>
    %736 = vector.extract_strided_slice %735 {offsets = [0, 0], sizes = [1, 32], strides = [1, 1]} : vector<1x64xbf16> to vector<1x32xbf16>
    %c0_856 = arith.constant 0 : index
    %c2368 = arith.constant 2368 : index
    %737 = vector.load %arg15[%c0_856, %c2368] : memref<1x2592xbf16, #tpu.memory_space<vmem>>, vector<1x32xbf16>
    tpu.vector_store %arg15[%c0_856, %c2368], %736 {strides = array<i32>} : memref<1x2592xbf16, #tpu.memory_space<vmem>>, vector<1x32xbf16>,
    %738 = vector.extract_strided_slice %735 {offsets = [0, 32], sizes = [1, 32], strides = [1, 1]} : vector<1x64xbf16> to vector<1x32xbf16>
    %c0_857 = arith.constant 0 : index
    %c2368_858 = arith.constant 2368 : index
    %739 = vector.load %arg16[%c0_857, %c2368_858] : memref<1x2592xbf16, #tpu.memory_space<vmem>>, vector<1x32xbf16>
    tpu.vector_store %arg16[%c0_857, %c2368_858], %738 {strides = array<i32>} : memref<1x2592xbf16, #tpu.memory_space<vmem>>, vector<1x32xbf16>,
    %740 = vector.extract_strided_slice %364 {offsets = [75, 0], sizes = [1, 64], strides = [1, 1]} : vector<81x64xbf16> to vector<1x64xbf16>
    %741 = vector.extract_strided_slice %740 {offsets = [0, 0], sizes = [1, 32], strides = [1, 1]} : vector<1x64xbf16> to vector<1x32xbf16>
    %c0_859 = arith.constant 0 : index
    %c2400 = arith.constant 2400 : index
    %742 = vector.load %arg15[%c0_859, %c2400] : memref<1x2592xbf16, #tpu.memory_space<vmem>>, vector<1x32xbf16>
    tpu.vector_store %arg15[%c0_859, %c2400], %741 {strides = array<i32>} : memref<1x2592xbf16, #tpu.memory_space<vmem>>, vector<1x32xbf16>,
    %743 = vector.extract_strided_slice %740 {offsets = [0, 32], sizes = [1, 32], strides = [1, 1]} : vector<1x64xbf16> to vector<1x32xbf16>
    %c0_860 = arith.constant 0 : index
    %c2400_861 = arith.constant 2400 : index
    %744 = vector.load %arg16[%c0_860, %c2400_861] : memref<1x2592xbf16, #tpu.memory_space<vmem>>, vector<1x32xbf16>
    tpu.vector_store %arg16[%c0_860, %c2400_861], %743 {strides = array<i32>} : memref<1x2592xbf16, #tpu.memory_space<vmem>>, vector<1x32xbf16>,
    %745 = vector.extract_strided_slice %364 {offsets = [76, 0], sizes = [1, 64], strides = [1, 1]} : vector<81x64xbf16> to vector<1x64xbf16>
    %746 = vector.extract_strided_slice %745 {offsets = [0, 0], sizes = [1, 32], strides = [1, 1]} : vector<1x64xbf16> to vector<1x32xbf16>
    %c0_862 = arith.constant 0 : index
    %c2432 = arith.constant 2432 : index
    %747 = vector.load %arg15[%c0_862, %c2432] : memref<1x2592xbf16, #tpu.memory_space<vmem>>, vector<1x32xbf16>
    tpu.vector_store %arg15[%c0_862, %c2432], %746 {strides = array<i32>} : memref<1x2592xbf16, #tpu.memory_space<vmem>>, vector<1x32xbf16>,
    %748 = vector.extract_strided_slice %745 {offsets = [0, 32], sizes = [1, 32], strides = [1, 1]} : vector<1x64xbf16> to vector<1x32xbf16>
    %c0_863 = arith.constant 0 : index
    %c2432_864 = arith.constant 2432 : index
    %749 = vector.load %arg16[%c0_863, %c2432_864] : memref<1x2592xbf16, #tpu.memory_space<vmem>>, vector<1x32xbf16>
    tpu.vector_store %arg16[%c0_863, %c2432_864], %748 {strides = array<i32>} : memref<1x2592xbf16, #tpu.memory_space<vmem>>, vector<1x32xbf16>,
    %750 = vector.extract_strided_slice %364 {offsets = [77, 0], sizes = [1, 64], strides = [1, 1]} : vector<81x64xbf16> to vector<1x64xbf16>
    %751 = vector.extract_strided_slice %750 {offsets = [0, 0], sizes = [1, 32], strides = [1, 1]} : vector<1x64xbf16> to vector<1x32xbf16>
    %c0_865 = arith.constant 0 : index
    %c2464 = arith.constant 2464 : index
    %752 = vector.load %arg15[%c0_865, %c2464] : memref<1x2592xbf16, #tpu.memory_space<vmem>>, vector<1x32xbf16>
    tpu.vector_store %arg15[%c0_865, %c2464], %751 {strides = array<i32>} : memref<1x2592xbf16, #tpu.memory_space<vmem>>, vector<1x32xbf16>,
    %753 = vector.extract_strided_slice %750 {offsets = [0, 32], sizes = [1, 32], strides = [1, 1]} : vector<1x64xbf16> to vector<1x32xbf16>
    %c0_866 = arith.constant 0 : index
    %c2464_867 = arith.constant 2464 : index
    %754 = vector.load %arg16[%c0_866, %c2464_867] : memref<1x2592xbf16, #tpu.memory_space<vmem>>, vector<1x32xbf16>
    tpu.vector_store %arg16[%c0_866, %c2464_867], %753 {strides = array<i32>} : memref<1x2592xbf16, #tpu.memory_space<vmem>>, vector<1x32xbf16>,
    %755 = vector.extract_strided_slice %364 {offsets = [78, 0], sizes = [1, 64], strides = [1, 1]} : vector<81x64xbf16> to vector<1x64xbf16>
    %756 = vector.extract_strided_slice %755 {offsets = [0, 0], sizes = [1, 32], strides = [1, 1]} : vector<1x64xbf16> to vector<1x32xbf16>
    %c0_868 = arith.constant 0 : index
    %c2496 = arith.constant 2496 : index
    %757 = vector.load %arg15[%c0_868, %c2496] : memref<1x2592xbf16, #tpu.memory_space<vmem>>, vector<1x32xbf16>
    tpu.vector_store %arg15[%c0_868, %c2496], %756 {strides = array<i32>} : memref<1x2592xbf16, #tpu.memory_space<vmem>>, vector<1x32xbf16>,
    %758 = vector.extract_strided_slice %755 {offsets = [0, 32], sizes = [1, 32], strides = [1, 1]} : vector<1x64xbf16> to vector<1x32xbf16>
    %c0_869 = arith.constant 0 : index
    %c2496_870 = arith.constant 2496 : index
    %759 = vector.load %arg16[%c0_869, %c2496_870] : memref<1x2592xbf16, #tpu.memory_space<vmem>>, vector<1x32xbf16>
    tpu.vector_store %arg16[%c0_869, %c2496_870], %758 {strides = array<i32>} : memref<1x2592xbf16, #tpu.memory_space<vmem>>, vector<1x32xbf16>,
    %760 = vector.extract_strided_slice %364 {offsets = [79, 0], sizes = [1, 64], strides = [1, 1]} : vector<81x64xbf16> to vector<1x64xbf16>
    %761 = vector.extract_strided_slice %760 {offsets = [0, 0], sizes = [1, 32], strides = [1, 1]} : vector<1x64xbf16> to vector<1x32xbf16>
    %c0_871 = arith.constant 0 : index
    %c2528 = arith.constant 2528 : index
    %762 = vector.load %arg15[%c0_871, %c2528] : memref<1x2592xbf16, #tpu.memory_space<vmem>>, vector<1x32xbf16>
    tpu.vector_store %arg15[%c0_871, %c2528], %761 {strides = array<i32>} : memref<1x2592xbf16, #tpu.memory_space<vmem>>, vector<1x32xbf16>,
    %763 = vector.extract_strided_slice %760 {offsets = [0, 32], sizes = [1, 32], strides = [1, 1]} : vector<1x64xbf16> to vector<1x32xbf16>
    %c0_872 = arith.constant 0 : index
    %c2528_873 = arith.constant 2528 : index
    %764 = vector.load %arg16[%c0_872, %c2528_873] : memref<1x2592xbf16, #tpu.memory_space<vmem>>, vector<1x32xbf16>
    tpu.vector_store %arg16[%c0_872, %c2528_873], %763 {strides = array<i32>} : memref<1x2592xbf16, #tpu.memory_space<vmem>>, vector<1x32xbf16>,
    %765 = vector.extract_strided_slice %364 {offsets = [80, 0], sizes = [1, 64], strides = [1, 1]} : vector<81x64xbf16> to vector<1x64xbf16>
    %766 = vector.extract_strided_slice %765 {offsets = [0, 0], sizes = [1, 32], strides = [1, 1]} : vector<1x64xbf16> to vector<1x32xbf16>
    %c0_874 = arith.constant 0 : index
    %c2560 = arith.constant 2560 : index
    %767 = vector.load %arg15[%c0_874, %c2560] : memref<1x2592xbf16, #tpu.memory_space<vmem>>, vector<1x32xbf16>
    tpu.vector_store %arg15[%c0_874, %c2560], %766 {strides = array<i32>} : memref<1x2592xbf16, #tpu.memory_space<vmem>>, vector<1x32xbf16>,
    %768 = vector.extract_strided_slice %765 {offsets = [0, 32], sizes = [1, 32], strides = [1, 1]} : vector<1x64xbf16> to vector<1x32xbf16>
    %c0_875 = arith.constant 0 : index
    %c2560_876 = arith.constant 2560 : index
    %769 = vector.load %arg16[%c0_875, %c2560_876] : memref<1x2592xbf16, #tpu.memory_space<vmem>>, vector<1x32xbf16>
    tpu.vector_store %arg16[%c0_875, %c2560_876], %768 {strides = array<i32>} : memref<1x2592xbf16, #tpu.memory_space<vmem>>, vector<1x32xbf16>,
    %c0_877 = arith.constant 0 : index
    %c0_878 = arith.constant 0 : index
    %770 = vector.load %arg15[%c0_877, %c0_878] : memref<1x2592xbf16, #tpu.memory_space<vmem>>, vector<1x2592xbf16>
    %c0_879 = arith.constant 0 : index
    %c0_880 = arith.constant 0 : index
    %771 = vector.load %arg6[%c0_879, %c0_880] : memref<2592x256xbf16, #tpu.memory_space<vmem>>, vector<2592x256xbf16>
    %cst_881 = arith.constant dense<0.000000e+00> : vector<1x256xf32>
    %772 = tpu.matmul %770, %771, %cst_881 {dimension_numbers = #tpu.dot_dimension_numbers<[1], [0], [0], [1], [0, 0, 1, 1], [], []>} : vector<1x2592xbf16>, vector<2592x256xbf16>, vector<1x256xf32> -> vector<1x256xf32>
    %c0_882 = arith.constant 0 : index
    %c0_883 = arith.constant 0 : index
    %773 = vector.load %arg7[%c0_882, %c0_883] : memref<1x256xf32, #tpu.memory_space<vmem>>, vector<1x256xf32>
    %774 = arith.addf %772, %773 : vector<1x256xf32>
    %cst_884 = arith.constant 0.000000e+00 : f32
    %775 = vector.broadcast %cst_884 : f32 to vector<1x256xf32>
    %776 = arith.maximumf %774, %775 : vector<1x256xf32>
    %777 = arith.truncf %776 : vector<1x256xf32> to vector<1x256xbf16>
    %c0_885 = arith.constant 0 : index
    %c0_886 = arith.constant 0 : index
    %778 = vector.load %arg16[%c0_885, %c0_886] : memref<1x2592xbf16, #tpu.memory_space<vmem>>, vector<1x2592xbf16>
    %c0_887 = arith.constant 0 : index
    %c0_888 = arith.constant 0 : index
    %779 = vector.load %arg8[%c0_887, %c0_888] : memref<2592x256xbf16, #tpu.memory_space<vmem>>, vector<2592x256xbf16>
    %cst_889 = arith.constant dense<0.000000e+00> : vector<1x256xf32>
    %780 = tpu.matmul %778, %779, %cst_889 {dimension_numbers = #tpu.dot_dimension_numbers<[1], [0], [0], [1], [0, 0, 1, 1], [], []>} : vector<1x2592xbf16>, vector<2592x256xbf16>, vector<1x256xf32> -> vector<1x256xf32>
    %c0_890 = arith.constant 0 : index
    %c0_891 = arith.constant 0 : index
    %781 = vector.load %arg9[%c0_890, %c0_891] : memref<1x256xf32, #tpu.memory_space<vmem>>, vector<1x256xf32>
    %782 = arith.addf %780, %781 : vector<1x256xf32>
    %cst_892 = arith.constant 0.000000e+00 : f32
    %783 = vector.broadcast %cst_892 : f32 to vector<1x256xf32>
    %784 = arith.maximumf %782, %783 : vector<1x256xf32>
    %785 = arith.truncf %784 : vector<1x256xf32> to vector<1x256xbf16>
    %786 = tpu.concatenate %777, %785 in 1 : vector<1x256xbf16>, vector<1x256xbf16> -> vector<1x512xbf16>
    %c0_893 = arith.constant 0 : index
    %c0_894 = arith.constant 0 : index
    %787 = vector.load %arg10[%c0_893, %c0_894] : memref<512x16xbf16, #tpu.memory_space<vmem>>, vector<512x16xbf16>
    %cst_895 = arith.constant dense<0.000000e+00> : vector<1x16xf32>
    %788 = tpu.matmul %786, %787, %cst_895 {dimension_numbers = #tpu.dot_dimension_numbers<[1], [0], [0], [1], [0, 0, 1, 1], [], []>} : vector<1x512xbf16>, vector<512x16xbf16>, vector<1x16xf32> -> vector<1x16xf32>
    %c0_896 = arith.constant 0 : index
    %c0_897 = arith.constant 0 : index
    %789 = vector.load %arg11[%c0_896, %c0_897] : memref<1x16xf32, #tpu.memory_space<vmem>>, vector<1x16xf32>
    %790 = arith.addf %788, %789 : vector<1x16xf32>
    %791 = tpu.iota {dimensions = array<i32: 1>} : vector<1x16xi32>
    %c6_i32 = arith.constant 6 : i32
    %792 = vector.broadcast %c6_i32 : i32 to vector<1x16xi32>
    %793 = arith.cmpi slt, %791, %792 : vector<1x16xi32>
    %cst_898 = arith.constant -1.000000e+30 : f32
    %794 = vector.broadcast %cst_898 : f32 to vector<1x16xf32>
    %795 = arith.select %793, %790, %794 : vector<1x16xi1>, vector<1x16xf32>
    %cst_899 = arith.constant dense<0xFF800000> : vector<1xf32>
    %796 = vector.multi_reduction <maximumf>, %795, %cst_899 [1] : vector<1x16xf32> to vector<1xf32>
    %797 = vector.shape_cast %796 : vector<1xf32> to vector<1x1xf32>
    %798 = vector.broadcast %797 : vector<1x1xf32> to vector<1x16xf32>
    %799 = arith.subf %795, %798 : vector<1x16xf32>
    %800 = math.exp %799 : vector<1x16xf32>
    %cst_900 = arith.constant dense<0.000000e+00> : vector<1xf32>
    %801 = vector.multi_reduction <add>, %800, %cst_900 [1] : vector<1x16xf32> to vector<1xf32>
    %802 = vector.shape_cast %801 : vector<1xf32> to vector<1x1xf32>
    %803 = vector.broadcast %802 : vector<1x1xf32> to vector<1x16xf32>
    %804 = arith.divf %800, %803 : vector<1x16xf32>
    %c8_i32 = arith.constant 8 : i32
    %805 = vector.broadcast %c8_i32 : i32 to vector<1x16xi32>
    %806 = arith.cmpi slt, %791, %805 : vector<1x16xi32>
    %807 = arith.select %806, %804, %790 : vector<1x16xi1>, vector<1x16xf32>
    %c0_901 = arith.constant 0 : index
    %c0_902 = arith.constant 0 : index
    %c0_903 = arith.constant 0 : index
    %808 = vector.load %arg12[%c0_901, %c0_902, %c0_903] : memref<1x1x16xf32, #tpu.memory_space<vmem>>, vector<1x1x16xf32>
    %809 = vector.shape_cast %808 : vector<1x1x16xf32> to vector<1x16xf32>
    %810 = vector.shape_cast %807 : vector<1x16xf32> to vector<1x1x16xf32>
    tpu.vector_store %arg12[%c0_901, %c0_902, %c0_903], %810 {strides = array<i32>} : memref<1x1x16xf32, #tpu.memory_space<vmem>>, vector<1x1x16xf32>,
    return
  }
  func.func @transform_0(%arg0: i32) -> (i32, i32, i32) {
    %c0_i32 = arith.constant 0 : i32
    %c0_i32_0 = arith.constant 0 : i32
    %c0_i32_1 = arith.constant 0 : i32
    return %arg0, %c0_i32, %c0_i32_0 : i32, i32, i32
  }
  func.func @transform_1(%arg0: i32) -> (i32, i32) {
    %c0_i32 = arith.constant 0 : i32
    %c0_i32_0 = arith.constant 0 : i32
    %c0_i32_1 = arith.constant 0 : i32
    return %c0_i32, %c0_i32_0 : i32, i32
  }
  func.func @transform_2(%arg0: i32) -> (i32, i32) {
    %c0_i32 = arith.constant 0 : i32
    %c0_i32_0 = arith.constant 0 : i32
    %c0_i32_1 = arith.constant 0 : i32
    return %c0_i32, %c0_i32_0 : i32, i32
  }
  func.func @transform_3(%arg0: i32) -> (i32, i32) {
    %c0_i32 = arith.constant 0 : i32
    %c0_i32_0 = arith.constant 0 : i32
    %c0_i32_1 = arith.constant 0 : i32
    return %c0_i32, %c0_i32_0 : i32, i32
  }
  func.func @transform_4(%arg0: i32) -> (i32, i32) {
    %c0_i32 = arith.constant 0 : i32
    %c0_i32_0 = arith.constant 0 : i32
    %c0_i32_1 = arith.constant 0 : i32
    return %c0_i32, %c0_i32_0 : i32, i32
  }
  func.func @transform_5(%arg0: i32) -> (i32, i32) {
    %c0_i32 = arith.constant 0 : i32
    %c0_i32_0 = arith.constant 0 : i32
    %c0_i32_1 = arith.constant 0 : i32
    return %c0_i32, %c0_i32_0 : i32, i32
  }
  func.func @transform_6(%arg0: i32) -> (i32, i32) {
    %c0_i32 = arith.constant 0 : i32
    %c0_i32_0 = arith.constant 0 : i32
    %c0_i32_1 = arith.constant 0 : i32
    return %c0_i32, %c0_i32_0 : i32, i32
  }
  func.func @transform_7(%arg0: i32) -> (i32, i32) {
    %c0_i32 = arith.constant 0 : i32
    %c0_i32_0 = arith.constant 0 : i32
    %c0_i32_1 = arith.constant 0 : i32
    return %c0_i32, %c0_i32_0 : i32, i32
  }
  func.func @transform_8(%arg0: i32) -> (i32, i32) {
    %c0_i32 = arith.constant 0 : i32
    %c0_i32_0 = arith.constant 0 : i32
    %c0_i32_1 = arith.constant 0 : i32
    return %c0_i32, %c0_i32_0 : i32, i32
  }
  func.func @transform_9(%arg0: i32) -> (i32, i32) {
    %c0_i32 = arith.constant 0 : i32
    %c0_i32_0 = arith.constant 0 : i32
    %c0_i32_1 = arith.constant 0 : i32
    return %c0_i32, %c0_i32_0 : i32, i32
  }
  func.func @transform_10(%arg0: i32) -> (i32, i32) {
    %c0_i32 = arith.constant 0 : i32
    %c0_i32_0 = arith.constant 0 : i32
    %c0_i32_1 = arith.constant 0 : i32
    return %c0_i32, %c0_i32_0 : i32, i32
  }
  func.func @transform_11(%arg0: i32) -> (i32, i32, i32) {
    %c0_i32 = arith.constant 0 : i32
    %c0_i32_0 = arith.constant 0 : i32
    %c0_i32_1 = arith.constant 0 : i32
    return %arg0, %c0_i32, %c0_i32_0 : i32, i32, i32
  }
}

</mosaic_0001>

<bundles_post_ra>
// kernel: ppo_forward.1
= control target key start
LH: loop header
LB: loop body
LE: loop exit
PB: predicated region body
PF: predicated region fallthrough
CT: control target
= control target key end

     0   :  { %s11502_s17 = smov 0   ;;  %s15687_s0 = inlined_call_operand.vmem [shape: bf16[2,100,256], index: 0, kind: input, shape index: {}]   ;;  %s15688_s1 = inlined_call_operand.vmem [shape: bf16[256,128], index: 1, kind: input, shape index: {}]   ;;  %s15689_s2 = inlined_call_operand.vmem [shape: f32[1,128], index: 2, kind: input, shape index: {}]   ;;  %s15690_s3 = inlined_call_operand.vmem [shape: bf16[512,64], index: 3, kind: input, shape index: {}]   ;;  %s15691_s4 = inlined_call_operand.vmem [shape: f32[1,64], index: 4, kind: input, shape index: {}]   ;;  %s15692_s5 = inlined_call_operand.vmem [shape: bf16[2592,256], index: 5, kind: input, shape index: {}]   ;;  %s15693_s6 = inlined_call_operand.vmem [shape: f32[1,256], index: 6, kind: input, shape index: {}]   ;;  %s15694_s7 = inlined_call_operand.vmem [shape: bf16[2592,256], index: 7, kind: input, shape index: {}]   ;;  %s15695_s8 = inlined_call_operand.vmem [shape: f32[1,256], index: 8, kind: input, shape index: {}]   ;;  %s15696_s9 = inlined_call_operand.vmem [shape: bf16[512,16], index: 9, kind: input, shape index: {}]   ;;  %s15697_s10 = inlined_call_operand.vmem [shape: f32[1,16], index: 10, kind: input, shape index: {}]   ;;  %s15698_s11 = inlined_call_operand.vmem [shape: f32[2,1,16], index: 11, kind: output, shape index: {}]  }
   0x1 LB: > { %s9216_s18 = sadd.s32 4294967295, %s11435_s17   ;;  %p9220_p0 = scmp.ge.s32.totalorder %s11435_s17, 1  ;;  %s11435_s17 = sphi %s11502_s17, %s21_s17  }
   0x2   : > { %p337_p1 = scmp.lt.s32.totalorder %s11435_s17, 3 }
   0x4   : > { %p338_p2 = pnand %p9220_p0, %p337_p1 }
   0x6   : > { %341 = sbr.rel (%p338_p2) target bundleno = 2172 (0x87c), region = 64 }
   0xb   : > { %v10306_v0 = vld [vmem:[%s15688_s1 + $0x78] sm:$0xff]   ;;  %v10308_v2 = vld [vmem:[%s15688_s1 + $0x70] sm:$0xff]   ;;  %p375_p3 = scmp.lt.s32.totalorder %s9216_s18, 1  ;;  %v10310_v4 = vld [vmem:[%s15688_s1 + $0x68] sm:$0xff]   ;;  %vm15700_vm0 = vcmask 1042432   ;;  %vm15699_vm1 = vcmask 1046532  }
   0xc   : > { %v10307_v1 = vld [vmem:[%s15688_s1 + $0x38] sm:$0xff]   ;;  %10086 = vmatprep.subr.bf16.mxu0 %v10306_v0  ;;  %v10309_v3 = vld [vmem:[%s15688_s1 + $0x30] sm:$0xff]   ;;  %v10311_v5 = vld [vmem:[%s15688_s1 + $0x28] sm:$0xff]   ;;  %vm734_vm2 = vcmask 1041408   ;;  %vm15702_vm3 = vcmask 1045508   ;;  %v15806_v58 = vmov 0 }
   0xd   : > { %10087 = vmatpush3.bf16.msra.mxu0 %v10307_v1  ;;  %s16064_s18 = smov (!%p375_p3, %s9216_s18), 1  ;;  %v10312_v6 = vld [vmem:[%s15688_s1 + $0x60] sm:$0xff]   ;;  %v10314_v8 = vld [vmem:[%s15688_s1 + $0x58] sm:$0xff]   ;;  %v10316_v10 = vld [vmem:[%s15688_s1 + $0x50] sm:$0xff]   ;;  %v15808_v0 = vmov 0  ;;  %vm750_vm6 = vcmask 1040384  }
   0xe   : > { %10088 = vmatprep.subr.bf16.mxu0 %v10308_v2  ;;  %s10292_s14 = smul.u32 104, %s16064_s18  ;;  %v10313_v7 = vld [vmem:[%s15688_s1 + $0x20] sm:$0xff]   ;;  %v10315_v9 = vld [vmem:[%s15688_s1 + $0x18] sm:$0xff]   ;;  %v10317_v12 = vld [vmem:[%s15688_s1 + $0x10] sm:$0xff]   ;;  %vm751_vm7 = vcmask 1044484   ;;  %s11437_s16 = smov 64  }
   0xf   : > { %v10318_v13 = vld [vmem:[%s15688_s1 + $0x48] sm:$0xff]   ;;  %v10320_v15 = vld [vmem:[%s15688_s1 + $0x40] sm:$0xff]   ;;  %v10360_v49 = vld [vmem:[%s15690_s3 + $0x78] sm:$0xff]   ;;  %vm15701_vm9 = vsmask.f32 256  ;;  %vm15704_vm10 = vcmask 523264  }
  0x10   : > { %s11543_s23 = scalar_lea.vmem %s15687_s0, %s10292_s14  ;;  %v10319_v14 = vld [vmem:[%s15688_s1 + $0x8] sm:$0xff]   ;;  %v10321_v16 = vld [vmem:[%s15688_s1] sm:$0xff]   ;;  %v10361_v51 = vld [vmem:[%s15690_s3 + $0x38] sm:$0xff]   ;;  %10144 = vmatprep.subr.bf16.mxu1 %v10360_v49  ;;  %vm910_vm11 = vsmask.f32 4352  ;;  %vm15706_vm13 = vcmask 785408  }
  0x11   : > { %10089 = vmatpush3.bf16.msra.mxu0 %v10309_v3  ;;  %v10324_v11 = vld [vmem:[%s11543_s23 + $0x4] ss:$8 sps:$4 sm:$0xff]   ;;  %v10322_v17 = vld [vmem:[%s11543_s23] ss:$8 sps:$4 sm:$0xff]   ;;  %v10325_v18 = vld [vmem:[%s11543_s23 + $0x14] ss:$8 sps:$4 sm:$0xff]   ;;  %10145 = vmatpush3.bf16.msra.mxu1 %v10361_v51 }
  0x12   : > { %10090 = vmatprep.subr.bf16.mxu0 %v10310_v4  ;;  %631 = vmatprep.mubr.bf16.mxu0 %v10324_v11  ;;  %v10327_v19 = vld [vmem:[%s11543_s23 + $0x10] ss:$8 sps:$4 sm:$0xff]   ;;  %v10328_v20 = vld [vmem:[%s11543_s23 + $0x24] ss:$8 sps:$4 sm:$0xff]   ;;  %v10330_v21 = vld [vmem:[%s11543_s23 + $0x20] ss:$8 sps:$4 sm:$0xff]  }
  0x13   : > { %v10331_v22 = vld [vmem:[%s11543_s23 + $0x34] ss:$8 sps:$4 sm:$0xff]   ;;  %v10333_v23 = vld [vmem:[%s11543_s23 + $0x30] ss:$8 sps:$4 sm:$0xff]   ;;  %v10334_v24 = vld [vmem:[%s11543_s23 + $0x44] ss:$8 sps:$4 sm:$0xff]  }
  0x14   : > { %v10336_v25 = vld [vmem:[%s11543_s23 + $0x40] ss:$8 sps:$4 sm:$0xff]   ;;  %v10337_v26 = vld [vmem:[%s11543_s23 + $0x54] ss:$8 sps:$4 sm:$0xff]   ;;  %v10339_v28 = vld [vmem:[%s11543_s23 + $0x50] ss:$8 sps:$4 sm:$0xff]  }
  0x15   : > { %10091 = vmatpush3.bf16.msra.mxu0 %v10311_v5  ;;  %v396_v27 = vld [vmem:[%s11543_s23 + $0x60] sm:$0x33]  ;;  %v10362_v57 = vld [vmem:[%s15690_s3 + $0x70] sm:$0xff]   ;;  %vm11599_vm4 = vmor %vm15700_vm0, %vm15699_vm1  ;;  %vm1112_vm0 = vsmask.f32 5376  ;;  %s11439_s25 = smov 32  }
  0x16   : > { %10092 = vmatprep.subr.bf16.mxu0 %v10312_v6  ;;  %v9236_v29 = vcombine.high %v396_v27, %v396_v27  ;;  %v9235_v30 = vcombine.low %v396_v27, %v396_v27  ;;  %v11582_v32 = vld [vmem:[%s15689_s2] ss:$0 sm:$0xff]  ;;  %v15807_v58 = vsel %vm11599_vm4, 4294967295, %v15806_v58  ;;  %v10363_v60 = vld [vmem:[%s15690_s3 + $0x30] sm:$0xff]   ;;  %vm11608_vm5 = vmor %vm734_vm2, %vm15702_vm3  ;;  %10146 = vmatprep.subr.bf16.mxu1 %v10362_v57  ;;  %s11440_s29 = smov 96  }
  0x17   : > { %v15809_v0 = vsel %vm11608_vm5, 4294967295, %v15808_v0  ;;  %10147 = vmatpush3.bf16.msra.mxu1 %v10363_v60  ;;  %vm11634_vm8 = vmor %vm750_vm6, %vm751_vm7  ;;  %v10370_v51 = vld [vmem:[%s15690_s3 + $0x50] sm:$0xff]  }
  0x18   : > { %v10371_v57 = vld [vmem:[%s15690_s3 + $0x10] sm:$0xff]   ;;  %vm909_vm12 = vmand %vm750_vm6, %vm15701_vm9  ;;  %vm15703_vm6 = vcmask 1043456   ;;  %vm985_vm9 = vsmask.f32 4368 }
  0x19   : > { %10093 = vmatpush3.bf16.msra.mxu0 %v10313_v7  ;;  %v10364_v7 = vld [vmem:[%s15690_s3 + $0x68] sm:$0xff]   ;;  %vm911_vm14 = vmand %vm751_vm7, %vm910_vm11  ;;  %vm1016_vm7 = vsmask.f32 7938  ;;  %vm15705_vm11 = vcmask 1047556  }
  0x1a   : > { %10094 = vmatprep.subr.bf16.mxu0 %v10314_v8  ;;  %10148 = vmatprep.subr.bf16.mxu1 %v10364_v7  ;;  %vm11871_vm15 = vmor %vm911_vm14, %vm909_vm12  ;;  %vm1019_vm12 = vsmask.f32 7954  ;;  %vm15712_vm14 = vsmask.f32 1280 }
  0x1b   : > { %vm11894_vm1 = vmand %vm15703_vm6, %vm1016_vm7  ;;  %vm15820_vm6 = vcmask 1045508  }
  0x1c   : > { %vm11903_vm3 = vmand %vm15705_vm11, %vm1019_vm12  ;;  %vm15823_vm12 = vcmask 523264   ;;  %vm1221_vm11 = vcmask 1043457  }
  0x1d   : > { %10095 = vmatpush3.bf16.msra.mxu0 %v10315_v9  ;;  %vm11910_vm7 = vmand %vm734_vm2, %vm15712_vm14  ;;  %vm1318_vm14 = vsmask.f32 6400 }
  0x1e   : > { %10096 = vmatprep.subr.bf16.mxu0 %v10316_v10  ;;  %v10365_v10 = vld [vmem:[%s15690_s3 + $0x28] sm:$0xff]   ;;  %vm15711_vm2 = vmor %vm11903_vm3, %vm11894_vm1 }
  0x1f   : > { %10149 = vmatpush3.bf16.msra.mxu1 %v10365_v10 }
  0x21   : > { %10097 = vmatpush3.bf16.msra.mxu0 %v10317_v12 }
  0x22   : > { %10098 = vmatprep.subr.bf16.mxu0 %v10318_v13 }
  0x25   : > { %10099 = vmatpush3.bf16.msra.mxu0 %v10319_v14 }
  0x26   : > { %10100 = vmatprep.subr.bf16.mxu0 %v10320_v15 }
  0x29   : > { %10101 = vmatpush3.bf16.msra.mxu0 %v10321_v16 }
  0x2c   : > { %632 = vmatmul.mubr.bf16.vlgmr.msra.gmra.mxu0 %v10322_v17 }
  0x2d   : > { %639 = vmatprep.mubr.bf16.mxu0 %v10325_v18 }
  0x34   : > { %640 = vmatmul.mubr.bf16.gmra.mxu0 %v10327_v19 }
  0x35   : > { %647 = vmatprep.mubr.bf16.mxu0 %v10328_v20 }
  0x3c   : > { %648 = vmatmul.mubr.bf16.gmra.mxu0 %v10330_v21  ;;  %v10366_v21 = vld [vmem:[%s15690_s3 + $0x60] sm:$0xff]  }
  0x3d   : > { %655 = vmatprep.mubr.bf16.mxu0 %v10331_v22  ;;  %v15810_v22 = vmov 0  ;;  %10150 = vmatprep.subr.bf16.mxu1 %v10366_v21 }
  0x3e   : > { %v15811_v22 = vsel %vm11634_vm8, 4294967295, %v15810_v22 }
  0x44   : > { %656 = vmatmul.mubr.bf16.gmra.mxu0 %v10333_v23 }
  0x45   : > { %663 = vmatprep.mubr.bf16.mxu0 %v10334_v24 }
  0x4c   : > { %664 = vmatmul.mubr.bf16.gmra.mxu0 %v10336_v25 }
  0x4d   : > { %671 = vmatprep.mubr.bf16.mxu0 %v10337_v26 }
  0x54   : > { %672 = vmatmul.mubr.bf16.gmra.mxu0 %v10339_v28 }
  0x55   : > { %679 = vmatprep.mubr.bf16.mxu0 %v9236_v29 }
  0x5c   : > { %680 = vmatmul.mubr.bf16.gmra.mxu0 %v9235_v30  ;;  %v10367_v30 = vld [vmem:[%s15690_s3 + $0x20] sm:$0xff]  }
  0x5d   : > { %10151 = vmatpush3.bf16.msra.mxu1 %v10367_v30 }
  0xec   : > { %v10102_v31 = vpop.f32.mrf.mxu0 }
  0xee   : > { %v10103_v33 = vpop.f32.mrf.mxu0 }
  0xef   : > { %v10104_v34 = vadd.f32 %v10103_v33, %v10102_v31 }
  0xf0   : > { %v10105_v35 = vpop.f32.mrf.mxu0 }
  0xf1   : > { %v634_v36 = vadd.f32 %v10104_v34, %v11582_v32 }
  0xf2   : > { %v10106_v37 = vpop.f32.mrf.mxu0 }
  0xf3   : > { %v687_v38 = vmax.f32 %v634_v36, 0.0  ;;  %v10107_v39 = vadd.f32 %v10106_v37, %v10105_v35 }
  0xf4   : > { %v10108_v40 = vpop.f32.mrf.mxu0 }
  0xf5   : > { %v10073_v41 = vpack.c.bf16 %v687_v38, %v687_v38  ;;  %v637_v42 = vadd.f32 %v10107_v39, %v11582_v32 }
  0xf6   : > { %v10109_v43 = vpop.f32.mrf.mxu0 }
  0xf7   : > { %714 = vst [vmem:[#allocation2] sm:$0xf] %v10073_v41  ;;  %v688_v44 = vmax.f32 %v637_v42, 0.0  ;;  %v10110_v45 = vadd.f32 %v10109_v43, %v10108_v40  ;;  %v10368_v42 = vld [vmem:[%s15690_s3 + $0x58] sm:$0xff]  }
  0xf8   : > { %v10111_v46 = vpop.f32.mrf.mxu0  ;;  %v10369_v43 = vld [vmem:[%s15690_s3 + $0x18] sm:$0xff]   ;;  %10152 = vmatprep.subr.bf16.mxu1 %v10368_v42 }
  0xf9   : > { %v10074_v47 = vpack.c.bf16 %v688_v44, %v688_v44  ;;  %v642_v48 = vadd.f32 %v10110_v45, %v11582_v32  ;;  %10153 = vmatpush3.bf16.msra.mxu1 %v10369_v43 }
  0xfa   : > { %v10112_v50 = vpop.f32.mrf.mxu0  ;;  %10154 = vmatprep.subr.bf16.mxu1 %v10370_v51 }
  0xfb   : > { %715 = vst [vmem:[#allocation2 + $0x4] sm:$0x1] %v10074_v47  ;;  %v689_v52 = vmax.f32 %v642_v48, 0.0  ;;  %v10113_v53 = vadd.f32 %v10112_v50, %v10111_v46  ;;  %v9256_v61 = vrot.slane %v10074_v47, 9 }
  0xfc   : > { %v10114_v54 = vpop.f32.mrf.mxu0 }
  0xfd   : > { %v10075_v55 = vpack.c.bf16 %v689_v52, %v689_v52  ;;  %v645_v56 = vadd.f32 %v10113_v53, %v11582_v32  ;;  %10155 = vmatpush3.bf16.msra.mxu1 %v10371_v57 }
  0xfe   : > { %v10115_v59 = vpop.f32.mrf.mxu0 }
  0xff   : > { %v724_v62 = vrot.slane %v10075_v55, 5  ;;  %v690_v63 = vmax.f32 %v645_v56, 0.0  ;;  %v10116_v1 = vadd.f32 %v10115_v59, %v10114_v54  ;;  %v9258_v11 = vrot.slane %v10075_v55, 10 }
 0x100   : > { %v10117_v2 = vpop.f32.mrf.mxu0 }
 0x101   : > { %v725_v3 = vsel %vm11599_vm4, %v9256_v61, %v724_v62  ;;  %v726_v4 = vrot.slane %v724_v62, 4  ;;  %v10076_v5 = vpack.c.bf16 %v690_v63, %v690_v63  ;;  %v650_v6 = vadd.f32 %v10116_v1, %v11582_v32 }
 0x102   : > { %730 = vst [vmem:[#allocation2 + $0x8] sm:$0xf] %v725_v3  ;;  %v10118_v8 = vpop.f32.mrf.mxu0  ;;  %v11618_v9 = vld [vmem:[#allocation2] sm:$0x1f]   ;;  %v10372_v3 = vld [vmem:[%s15690_s3 + $0x48] sm:$0xff]  }
 0x103   : > { %731 = vst [vmem:[#allocation2 + $0xc] sm:$0x1] %v726_v4  ;;  %v739_v12 = vrot.slane %v10076_v5, 6  ;;  %v691_v13 = vmax.f32 %v650_v6, 0.0  ;;  %v10119_v14 = vadd.f32 %v10118_v8, %v10117_v2  ;;  %851 = vrot.lane.b32.xlu0 %v11618_v9, %s11437_s16  ;;  %v845_v16 = vshll.u32 %v11618_v9, 16  ;;  %v10373_v8 = vld [vmem:[%s15690_s3 + $0x8] sm:$0xff]   ;;  %10156 = vmatprep.subr.bf16.mxu1 %v10372_v3 }
 0x104   : > { %v10120_v15 = vpop.f32.mrf.mxu0  ;;  %v843_v24 = vshrl.u32 %v11618_v9, 16  ;;  %v9260_v26 = vrot.slane %v10076_v5, 11  ;;  %10157 = vmatpush3.bf16.msra.mxu1 %v10373_v8 }
 0x105   : > { %v740_v17 = vsel %vm11608_vm5, %v9258_v11, %v739_v12  ;;  %v741_v18 = vrot.slane %v739_v12, 4  ;;  %v10077_v19 = vpack.c.bf16 %v691_v13, %v691_v13  ;;  %v653_v20 = vadd.f32 %v10119_v14, %v11582_v32 }
 0x106   : > { %745 = vst [vmem:[#allocation2 + $0x10] sm:$0xf] %v740_v17  ;;  %v10121_v23 = vpop.f32.mrf.mxu0  ;;  %v847_v25 = vrot.slane %v845_v16, 1  ;;  %v10374_v17 = vld [vmem:[%s15690_s3 + $0x40] sm:$0xff]  }
 0x107   : > { %746 = vst [vmem:[#allocation2 + $0x14] sm:$0x1] %v741_v18  ;;  %v755_v27 = vrot.slane %v10077_v19, 7  ;;  %v692_v28 = vmax.f32 %v653_v20, 0.0  ;;  %v10122_v29 = vadd.f32 %v10121_v23, %v10120_v15  ;;  %10158 = vmatprep.subr.bf16.mxu1 %v10374_v17 }
 0x108   : > { %v10123_v31 = vpop.f32.mrf.mxu0  ;;  %v11642_v33 = vor.u32 %v847_v25, %v843_v24 }
 0x109   : > { %v756_v34 = vsel %vm11634_vm8, %v9260_v26, %v755_v27  ;;  %v757_v35 = vrot.slane %v755_v27, 4  ;;  %v10078_v36 = vpack.c.bf16 %v692_v28, %v692_v28  ;;  %v658_v37 = vadd.f32 %v10122_v29, %v11582_v32  ;;  %v10375_v27 = vld [vmem:[%s15690_s3] sm:$0xff]  }
 0x10a   : > { %761 = vst [vmem:[#allocation2 + $0x18] sm:$0xf] %v756_v34  ;;  %v10124_v38 = vpop.f32.mrf.mxu0  ;;  %849 = vrot.lane.b32.xlu0 %v11642_v33, %s11437_s16  ;;  %v11649_v39 = vld [vmem:[#allocation2 + $0x8] sm:$0x1f]   ;;  %10159 = vmatpush3.bf16.msra.mxu1 %v10375_v27 }
 0x10b   : > { %762 = vst [vmem:[#allocation2 + $0x1c] sm:$0x1] %v757_v35  ;;  %771 = vst [vmem:[#allocation2 + $0x20] sm:$0xf] %v10078_v36  ;;  %v693_v40 = vmax.f32 %v658_v37, 0.0  ;;  %v10125_v41 = vadd.f32 %v10124_v38, %v10123_v31  ;;  %937 = vrot.lane.b32.xlu1 %v11649_v39, %s11437_s16  ;;  %v931_v45 = vshll.u32 %v11649_v39, 16 }
 0x10c   : > { %v10126_v44 = vpop.f32.mrf.mxu0  ;;  %v929_v55 = vshrl.u32 %v11649_v39, 16 }
 0x10d   : > { %v10079_v46 = vpack.c.bf16 %v693_v40, %v693_v40  ;;  %v661_v47 = vadd.f32 %v10125_v41, %v11582_v32  ;;  %v933_v50 = vrot.slane %v931_v45, 1 }
 0x10e   : > { %v10127_v48 = vpop.f32.mrf.mxu0  ;;  %v11661_v49 = vld [vmem:[#allocation2 + $0x10] sm:$0x1f]  }
 0x10f   : > { %772 = vst [vmem:[#allocation2 + $0x24] sm:$0x1] %v10079_v46  ;;  %v694_v52 = vmax.f32 %v661_v47, 0.0  ;;  %v10128_v53 = vadd.f32 %v10127_v48, %v10126_v44  ;;  %1048 = vrot.lane.b32.xlu1 %v11661_v49, %s11437_s16  ;;  %v1042_v56 = vshll.u32 %v11661_v49, 16  ;;  %v1040_v61 = vshrl.u32 %v11661_v49, 16 }
 0x110   : > { %v10129_v54 = vpop.f32.mrf.mxu0  ;;  %v11675_v63 = vor.u32 %v933_v50, %v929_v55  ;;  %v9264_v4 = vrot.slane %v10079_v46, 9 }
 0x111   : > { %v10080_v59 = vpack.c.bf16 %v694_v52, %v694_v52  ;;  %v666_v60 = vadd.f32 %v10128_v53, %v11582_v32  ;;  %v1044_v1 = vrot.slane %v1042_v56, 1 }
 0x112   : > { %v10130_v62 = vpop.f32.mrf.mxu0  ;;  %v11677_v2 = vld [vmem:[#allocation2 + $0x18] sm:$0x1f]  }
 0x113   : > { %v777_v5 = vrot.slane %v10080_v59, 5  ;;  %v695_v6 = vmax.f32 %v666_v60, 0.0  ;;  %v10131_v7 = vadd.f32 %v10130_v62, %v10129_v54  ;;  %935 = vrot.lane.b32.xlu1 %v11675_v63, %s11437_s16  ;;  %v11687_v11 = vor.u32 %v1044_v1, %v1040_v61 }
 0x114   : > { %v10132_v10 = vpop.f32.mrf.mxu0  ;;  %v1133_v12 = vshll.u32 %v11677_v2, 16  ;;  %v1131_v19 = vshrl.u32 %v11677_v2, 16  ;;  %v9266_v23 = vrot.slane %v10080_v59, 10 }
 0x115   : > { %v778_v13 = vsel %vm11599_vm4, %v9264_v4, %v777_v5  ;;  %v779_v14 = vrot.slane %v777_v5, 4  ;;  %v10081_v15 = vpack.c.bf16 %v695_v6, %v695_v6  ;;  %v669_v16 = vadd.f32 %v10131_v7, %v11582_v32  ;;  %1046 = vrot.lane.b32.xlu0 %v11687_v11, %s11437_s16 }
 0x116   : > { %783 = vst [vmem:[#allocation2 + $0x28] sm:$0xf] %v778_v13  ;;  %v10133_v18 = vpop.f32.mrf.mxu0  ;;  %v1135_v20 = vrot.slane %v1133_v12, 1  ;;  %v11699_v21 = vld [vmem:[#allocation2 + $0x20] sm:$0x1f]  }
 0x117   : > { %784 = vst [vmem:[#allocation2 + $0x2c] sm:$0x1] %v779_v14  ;;  %v790_v24 = vrot.slane %v10081_v15, 6  ;;  %v696_v25 = vmax.f32 %v669_v16, 0.0  ;;  %v10134_v26 = vadd.f32 %v10133_v18, %v10132_v10  ;;  %1139 = vrot.lane.b32.xlu1 %v11677_v2, %s11437_s16  ;;  %v1248_v30 = vshll.u32 %v11699_v21, 16 }
 0x118   : > { %v10135_v28 = vpop.f32.mrf.mxu0  ;;  %v11706_v29 = vor.u32 %v1135_v20, %v1131_v19  ;;  %v1246_v38 = vshrl.u32 %v11699_v21, 16  ;;  %v9268_v41 = vrot.slane %v10081_v15, 11  ;;  %v11738_v10 = vld [vmem:[#allocation2 + $0x8] sm:$0x1f]  }
 0x119   : > { %v791_v31 = vsel %vm11608_vm5, %v9266_v23, %v790_v24  ;;  %v792_v34 = vrot.slane %v790_v24, 4  ;;  %v10082_v35 = vpack.c.bf16 %v696_v25, %v696_v25  ;;  %v674_v36 = vadd.f32 %v10134_v26, %v11582_v32 }
 0x11a   : > { %796 = vst [vmem:[#allocation2 + $0x30] sm:$0xf] %v791_v31  ;;  %v10136_v37 = vpop.f32.mrf.mxu0  ;;  %1137 = vrot.lane.b32.xlu0 %v11706_v29, %s11437_s16  ;;  %v1250_v40 = vrot.slane %v1248_v30, 1  ;;  %v861_v24 = vshll.u32 %v11738_v10, 16 }
 0x11b   : > { %797 = vst [vmem:[#allocation2 + $0x34] sm:$0x1] %v792_v34  ;;  %v802_v42 = vrot.slane %v10082_v35, 7  ;;  %v697_v43 = vmax.f32 %v674_v36, 0.0  ;;  %v10137_v44 = vadd.f32 %v10136_v37, %v10135_v28  ;;  %1254 = vrot.lane.b32.xlu1 %v11699_v21, %s11437_s16  ;;  %v11764_v28 = vld [vmem:[#allocation2 + $0x10] sm:$0x1f]  }
 0x11c   : > { %v10138_v45 = vpop.f32.mrf.mxu0  ;;  %v11717_v46 = vor.u32 %v1250_v40, %v1246_v38  ;;  %v863_v34 = vrot.slane %v861_v24, 1  ;;  %v11772_v35 = vld [vmem:[#allocation2 + $0x18] sm:$0x1f]   ;;  %v947_v36 = vshll.u32 %v11764_v28, 16  ;;  %v859_v38 = vshrl.u32 %v11738_v10, 16 }
 0x11d   : > { %v803_v47 = vsel %vm11634_vm8, %v9268_v41, %v802_v42  ;;  %v804_v48 = vrot.slane %v802_v42, 4  ;;  %v10083_v50 = vpack.c.bf16 %v697_v43, %v697_v43  ;;  %v677_v51 = vadd.f32 %v10137_v44, %v11582_v32  ;;  %v10376_v37 = vld [vmem:[%s15690_s3 + $0xf8] sm:$0xff]   ;;  %v11785_v42 = vld [vmem:[#allocation2 + $0x20] sm:$0x1f]  }
 0x11e   : > { %808 = vst [vmem:[#allocation2 + $0x38] sm:$0xf] %v803_v47  ;;  %1252 = vrot.lane.b32.xlu0 %v11717_v46, %s11437_s16  ;;  %v10139_v52 = vpop.f32.mrf.mxu0  ;;  %v11724_v53 = vld [vmem:[#allocation2 + $0x28] sm:$0x1f]   ;;  %10196 = vmatprep.subr.bf16.mxu1 %v10376_v37  ;;  %v11783_v40 = vor.u32 %v863_v34, %v859_v38  ;;  %v949_v41 = vrot.slane %v947_v36, 1  ;;  %v1058_v43 = vshll.u32 %v11772_v35, 16 }
 0x11f   : > { %809 = vst [vmem:[#allocation2 + $0x3c] sm:$0x1] %v804_v48  ;;  %818 = vst [vmem:[#allocation2 + $0x40] sm:$0xf] %v10083_v50  ;;  %v698_v54 = vmax.f32 %v677_v51, 0.0  ;;  %v10140_v55 = vadd.f32 %v10139_v52, %v10138_v45  ;;  %1345 = vrot.lane.b32.xlu1 %v11724_v53, %s11437_s16  ;;  %v1339_v56 = vshll.u32 %v11724_v53, 16 }
 0x120   : > { %v10141_v57 = vpop.f32.mrf.mxu0  ;;  %v1337_v62 = vshrl.u32 %v11724_v53, 16  ;;  %v945_v44 = vshrl.u32 %v11764_v28, 16  ;;  %v1060_v47 = vrot.slane %v1058_v43, 1  ;;  %v11795_v48 = vld [vmem:[#allocation2 + $0x28] sm:$0x1f]   ;;  %v1149_v50 = vshll.u32 %v11785_v42, 16 }
 0x121   : > { %v10084_v59 = vpack.c.bf16 %v698_v54, %v698_v54  ;;  %v682_v60 = vadd.f32 %v10140_v55, %v11582_v32  ;;  %v1341_v1 = vrot.slane %v1339_v56, 1  ;;  %v1056_v51 = vshrl.u32 %v11772_v35, 16 }
 0x122   : > { %v11730_v61 = vld [vmem:[#allocation2 + $0x30] sm:$0x1f]   ;;  %v10142_v3 = vpop.f32.mrf.mxu0  ;;  %v11793_v45 = vor.u32 %v949_v41, %v945_v44  ;;  %v1151_v55 = vrot.slane %v1149_v50, 1  ;;  %v1264_v56 = vshll.u32 %v11795_v48, 16  ;;  %v1147_v57 = vshrl.u32 %v11785_v42, 16 }
 0x123   : > { %819 = vst [vmem:[#allocation2 + $0x44] sm:$0x1] %v10084_v59  ;;  %v699_v4 = vmax.f32 %v682_v60, 0.0  ;;  %1460 = vrot.lane.b32.xlu1 %v11730_v61, %s11437_s16  ;;  %v11735_v5 = vor.u32 %v1341_v1, %v1337_v62  ;;  %v1454_v6 = vshll.u32 %v11730_v61, 16  ;;  %v9272_v7 = vrot.slane %v10084_v59, 9 }
 0x124   : > { %v1452_v12 = vshrl.u32 %v11730_v61, 16  ;;  %v11801_v52 = vld [vmem:[#allocation2 + $0x30] sm:$0x1f]   ;;  %v11805_v54 = vor.u32 %v1060_v47, %v1056_v51  ;;  %v11815_v60 = vor.u32 %v1151_v55, %v1147_v57  ;;  %v1266_v62 = vrot.slane %v1264_v56, 1 }
 0x125   : > { %v10085_v8 = vpack.c.bf16 %v699_v4, %v699_v4  ;;  %1343 = vrot.lane.b32.xlu0 %v11735_v5, %s11437_s16  ;;  %v1456_v13 = vrot.slane %v1454_v6, 1  ;;  %v1355_v1 = vshll.u32 %v11801_v52, 16  ;;  %v1262_v3 = vshrl.u32 %v11795_v48, 16  ;;  %v913_v50 = vld [vmem:[#allocation3 + $0x40] sm:$0x11] }
 0x126   : > { %v11742_v32 = vld [vmem:[#allocation2 + $0x38] sm:$0x1f]   ;;  %v15812_v47 = vmov 0 }
 0x127   : > { %v825_v14 = vrot.slane %v10085_v8, 5  ;;  %1551 = vrot.lane.b32.xlu1 %v11742_v32, %s11437_s16  ;;  %v11747_v15 = vor.u32 %v1456_v13, %v1452_v12  ;;  %v1545_v16 = vshll.u32 %v11742_v32, 16  ;;  %v1543_v20 = vshrl.u32 %v11742_v32, 16  ;;  %v11811_v59 = vld [vmem:[#allocation2 + $0x38] sm:$0x1f]  }
 0x128   : > { %v11825_v6 = vor.u32 %v1266_v62, %v1262_v3  ;;  %v1470_v8 = vshll.u32 %v11811_v59, 16  ;;  %v1353_v12 = vshrl.u32 %v11801_v52, 16  ;;  %v15813_v47 = vsel %vm11871_vm15, 4294967295, %v15812_v47 }
 0x129   : > { %v826_v17 = vsel %vm11599_vm4, %v9272_v7, %v825_v14  ;;  %v827_v18 = vrot.slane %v825_v14, 4  ;;  %1458 = vrot.lane.b32.xlu0 %v11747_v15, %s11437_s16  ;;  %v1547_v23 = vrot.slane %v1545_v16, 1  ;;  %v1357_v7 = vrot.slane %v1355_v1, 1 }
 0x12a   : > { %831 = vst [vmem:[#allocation2 + $0x48] sm:$0xf] %v826_v17  ;;  %v11754_v19 = vld [vmem:[#allocation2 + $0x40] sm:$0x1f]   ;;  %v1472_v17 = vrot.slane %v1470_v8, 1 }
 0x12b   : > { %832 = vst [vmem:[#allocation2 + $0x4c] sm:$0x1] %v827_v18  ;;  %1666 = vrot.lane.b32.xlu1 %v11754_v19, %s11437_s16  ;;  %v11760_v25 = vor.u32 %v1547_v23, %v1543_v20  ;;  %v1658_v26 = vshrl.u32 %v11754_v19, 16  ;;  %v1660_v27 = vshll.u32 %v11754_v19, 16  ;;  %v11821_v4 = vld [vmem:[#allocation2 + $0x40] sm:$0x1f]   ;;  %v11836_v16 = vor.u32 %v1357_v7, %v1353_v12 }
 0x12c   : > { %v1561_v13 = vshll.u32 %v11821_v4, 16  ;;  %v1468_v18 = vshrl.u32 %v11811_v59, 16  ;;  %v1559_v20 = vshrl.u32 %v11821_v4, 16 }
 0x12d   : > { %1549 = vrot.lane.b32.xlu0 %v11760_v25, %s11437_s16  ;;  %v1662_v30 = vrot.slane %v1660_v27, 1 }
 0x12e   : > { %v1563_v23 = vrot.slane %v1561_v13, 1 }
 0x12f   : > { %867 = vrot.lane.b32.xlu1 %v11738_v10, %s11437_s16  ;;  %v11770_v31 = vor.u32 %v1662_v30, %v1658_v26  ;;  %v11845_v26 = vor.u32 %v1472_v17, %v1468_v18  ;;  %v15814_v17 = vmov 0 }
 0x130   : > { %v11852_v34 = vor.u32 %v1563_v23, %v1559_v20  ;;  %v15815_v17 = vsel %vm11894_vm1, 4294967295, %v15814_v17 }
 0x131   : > { %1664 = vrot.lane.b32.xlu0 %v11770_v31, %s11437_s16 }
 0x132   : > { %v11832_v14 = vld [vmem:[#allocation2 + $0x48] sm:$0x1f]  }
 0x133   : > { %953 = vrot.lane.b32.xlu1 %v11764_v28, %s11437_s16  ;;  %v1676_v24 = vshll.u32 %v11832_v14, 16  ;;  %v1674_v27 = vshrl.u32 %v11832_v14, 16 }
 0x135   : > { %865 = vrot.lane.b32.xlu0 %v11783_v40, %s11437_s16  ;;  %v1678_v30 = vrot.slane %v1676_v24, 1 }
 0x137   : > { %1064 = vrot.lane.b32.xlu1 %v11772_v35, %s11437_s16  ;;  %v11856_v36 = vor.u32 %v1678_v30, %v1674_v27 }
 0x139   : > { %951 = vrot.lane.b32.xlu0 %v11793_v45, %s11437_s16 }
 0x13b   : > { %1155 = vrot.lane.b32.xlu1 %v11785_v42, %s11437_s16 }
 0x13d   : > { %1062 = vrot.lane.b32.xlu0 %v11805_v54, %s11437_s16 }
 0x13f   : > { %1270 = vrot.lane.b32.xlu1 %v11795_v48, %s11437_s16 }
 0x141   : > { %1153 = vrot.lane.b32.xlu0 %v11815_v60, %s11437_s16 }
 0x143   : > { %1361 = vrot.lane.b32.xlu1 %v11801_v52, %s11437_s16 }
 0x145   : > { %1268 = vrot.lane.b32.xlu0 %v11825_v6, %s11437_s16 }
 0x147   : > { %1476 = vrot.lane.b32.xlu1 %v11811_v59, %s11437_s16 }
 0x149   : > { %1359 = vrot.lane.b32.xlu0 %v11836_v16, %s11437_s16 }
 0x14b   : > { %1567 = vrot.lane.b32.xlu1 %v11821_v4, %s11437_s16 }
 0x14d   : > { %1474 = vrot.lane.b32.xlu0 %v11845_v26, %s11437_s16 }
 0x14f   : > { %1682 = vrot.lane.b32.xlu1 %v11832_v14, %s11437_s16 }
 0x151   : > { %1565 = vrot.lane.b32.xlu0 %v11852_v34, %s11437_s16 }
 0x155   : > { %1680 = vrot.lane.b32.xlu0 %v11856_v36, %s11437_s16 }
 0x175   : > { %v852_v37 = vpop.permute.xlu0 %851 }
 0x176   : > { %v877_v38 = vsel %vm15704_vm10, %v852_v37, %v11642_v33  ;;  %v15818_v37 = vmov 0 }
 0x177   : > { %v11869_v44 = vsel %vm15706_vm13, %v877_v38, %v11642_v33  ;;  %v15819_v37 = vsel %vm11910_vm7, 4294967295, %v15818_v37 }
 0x17c   : > { %v850_v41 = vpop.permute.xlu0 %849 }
 0x17d   : > { %v872_v43 = vsel %vm15704_vm10, %v11618_v9, %v850_v41  ;;  %v938_v55 = vpop.permute.xlu1 %937 }
 0x17e   : > { %v11876_v51 = vsel %vm15706_vm13, %v872_v43, %v850_v41  ;;  %v960_v62 = vsel %vm15704_vm10, %v938_v55, %v11675_v63 }
 0x17f   : > { %v9275_v56 = vcombine.low %v11876_v51, %v11869_v44  ;;  %v9277_v57 = vcombine.high %v11876_v51, %v11869_v44  ;;  %v961_v8 = vsel %vm15706_vm13, %v960_v62, %v11675_v63  ;;  %v15845_v44 = vmov 0 }
 0x181   : > { %v914_v9 = vsel %vm11871_vm15, %v9277_v57, %v913_v50  ;;  %v1049_v33 = vpop.permute.xlu1 %1048  ;;  %vm15824_vm15 = vsmask.f32 256 }
 0x182   : > { %915 = vst [vmem:[#allocation3 + $0x40] sm:$0x11] %v914_v9  ;;  %v1071_v3 = vsel %vm15704_vm10, %v1049_v33, %v11687_v11  ;;  %vm11922_vm4 = vmor %vm15824_vm15, %vm985_vm9 }
 0x185   : > { %v936_v1 = vpop.permute.xlu1 %935 }
 0x186   : > { %v956_v7 = vsel %vm15704_vm10, %v11649_v39, %v936_v1  ;;  %v1072_v39 = vsel %vm15706_vm13, %v1071_v3, %v11687_v11  ;;  %v15821_v11 = vmov 0 }
 0x187   : > { %v957_v12 = vsel %vm15706_vm13, %v956_v7, %v936_v1  ;;  %v1047_v13 = vpop.permute.xlu0 %1046 }
 0x188   : > { %v9281_v18 = vcombine.low %v957_v12, %v961_v8  ;;  %v1067_v20 = vsel %vm15704_vm10, %v11661_v49, %v1047_v13  ;;  %v9283_v23 = vcombine.high %v957_v12, %v961_v8  ;;  %vm11915_vm10 = vmand %vm15820_vm6, %vm1112_vm0  ;;  %vm15828_vm6 = vcmask 785408  }
 0x189   : > { %v1068_v24 = vsel %vm15706_vm13, %v1067_v20, %v1047_v13  ;;  %v1140_v27 = vpop.permute.xlu1 %1139  ;;  %v15822_v11 = vsel %vm11915_vm10, 4294967295, %v15821_v11  ;;  %vm1222_vm13 = vsmask.f32 7942  ;;  %vm15827_vm0 = vmmov %vm15823_vm12 }
 0x18a   : > { %v988_v30 = vshrl.u32 %v9281_v18, 16  ;;  %v9287_v49 = vcombine.low %v1068_v24, %v1072_v39  ;;  %v9289_v38 = vcombine.high %v1068_v24, %v1072_v39  ;;  %v1162_v41 = vsel %vm15823_vm12, %v1140_v27, %v11706_v29  ;;  %vm15829_vm9 = vmmov %vm15828_vm6  ;;  %v1022_v39 = vld [vmem:[#allocation3 + $0x40] sm:$0xff] }
 0x18b   : > { %v991_v57 = vshll.u32 %v9281_v18, 16  ;;  %v1003_v62 = vshll.u32 %v9283_v23, 16  ;;  %v1163_v3 = vsel %vm15828_vm6, %v1162_v41, %v11706_v29  ;;  %vm15714_vm15 = vmor %vm11915_vm10, %vm11910_vm7  ;;  %vm15833_vm7 = vcmask 1047557  }
 0x18c   : > { %v1138_v43 = vpop.permute.xlu0 %1137  ;;  %v990_v55 = vrot.slane %v988_v30, 7  ;;  %v1096_v9 = vrot.slane %v9287_v49, 7  ;;  %v1099_v1 = vrot.slane %v9289_v38, 7  ;;  %vm15830_vm6 = vmmov %vm15823_vm12 }
 0x18d   : > { %v1158_v33 = vsel %vm15827_vm0, %v11677_v2, %v1138_v43  ;;  %v1255_v8 = vpop.permute.xlu1 %1254  ;;  %v1115_v2 = vld [vmem:[#allocation3 + $0x70] sm:$0x33]  ;;  %vm1225_vm0 = vsmask.f32 7958 }
 0x18e   : > { %v1159_v7 = vsel %vm15829_vm9, %v1158_v33, %v1138_v43  ;;  %v993_v12 = vor.u32 %v991_v57, %v990_v55  ;;  %v1001_v13 = vrot.slane %v990_v55, 4  ;;  %v1098_v18 = vrot.slane %v1096_v9, 4  ;;  %1108 = vst [vmem:[#allocation3 + $0x20] sm:$0xee] %v1096_v9 }
 0x18f   : > { %v9293_v20 = vcombine.low %v1159_v7, %v1163_v3  ;;  %v9295_v23 = vcombine.high %v1159_v7, %v1163_v3  ;;  %v1277_v29 = vsel %vm15830_vm6, %v1255_v8, %v11717_v46  ;;  %vm15716_vm6 = vsmask.f32 2304 }
 0x190   : > { %v1253_v24 = vpop.permute.xlu0 %1252  ;;  %v1005_v27 = vsel %vm11922_vm4, %v1001_v13, %v1003_v62  ;;  %v1023_v30 = vsel %vm15711_vm2, %v993_v12, %v1022_v39  ;;  %v1100_v49 = vsel %vm11634_vm8, %v1098_v18, %v1099_v1  ;;  %vm11957_vm2 = vmand %vm1221_vm11, %vm1222_vm13  ;;  %v15831_v57 = vmov 0 }
 0x191   : > { %v1190_v38 = vshrl.u32 %v9293_v20, 16  ;;  %1024 = vst [vmem:[#allocation3 + $0x40] sm:$0xff] %v1023_v30  ;;  %1028 = vst [vmem:[#allocation3 + $0x20] sm:$0x11] %v1005_v27  ;;  %v1116_v41 = vsel %vm15714_vm15, %v1100_v49, %v1115_v2  ;;  %v1193_v43 = vshll.u32 %v9293_v20, 16  ;;  %v1346_v55 = vpop.permute.xlu1 %1345  ;;  %v15832_v57 = vsel %vm11957_vm2, 4294967295, %v15831_v57 }
 0x192   : > { %1117 = vst [vmem:[#allocation3 + $0x70] sm:$0x33] %v1116_v41  ;;  %v1207_v33 = vshll.u32 %v9295_v23, 16  ;;  %v1273_v62 = vsel %vm15823_vm12, %v11699_v21, %v1253_v24  ;;  %vm11965_vm15 = vmand %vm15833_vm7, %vm1225_vm0  ;;  %v15834_v1 = vmov 0  ;;  %v1278_v7 = vsel %vm15829_vm9, %v1277_v29, %v11717_v46  ;;  %v10377_v46 = vld [vmem:[%s15690_s3 + $0xb8] sm:$0xff]   ;;  %v10381_v29 = vld [vmem:[%s15690_s3 + $0xf0] sm:$0xff]  }
 0x193   : > { %v1192_v9 = vrot.slane %v1190_v38, 6  ;;  %v15835_v1 = vsel %vm11965_vm15, 4294967295, %v15834_v1  ;;  %v1195_v3 = vrot.slane %v1193_v43, 7  ;;  %vm15836_vm13 = vmmov %vm15829_vm9  ;;  %v11425_v12 = vcombine.low %v11876_v51, %v1023_v30  ;;  %v1321_v51 = vld [vmem:[#allocation3 + $0x90] sm:$0x77] }
 0x194   : > { %v1274_v8 = vsel %vm15836_vm13, %v1273_v62, %v1253_v24  ;;  %vm15837_vm11 = vcmask 1042432   ;;  %v15838_v13 = vmov 0  ;;  %v9329_v18 = vcombine.high %v9275_v56, %v1023_v30 }
 0x195   : > { %vm11975_vm10 = vmand %vm15837_vm11, %vm15716_vm6  ;;  %v9299_v21 = vcombine.low %v1274_v8, %v1278_v7  ;;  %v9301_v2 = vcombine.high %v1274_v8, %v1278_v7  ;;  %v1196_v20 = vor.u32 %v1195_v3, %v1192_v9  ;;  %vm15840_vm7 = vcmask 1046532   ;;  %v1461_v23 = vpop.permute.xlu1 %1460 }
 0x196   : > { %v15839_v13 = vsel %vm11975_vm10, 4294967295, %v15838_v13  ;;  %vm11986_vm12 = vmand %vm15840_vm7, %vm1318_vm14  ;;  %v15841_v39 = vmov 0  ;;  %vm15843_vm0 = vsmask.f32 5392  ;;  %vm15844_vm9 = vsmask.f32 1280  ;;  %2157 = vmatprep.mubr.bf16.mxu1 %v9329_v18 }
 0x197   : > { %v15842_v39 = vsel %vm11986_vm12, 4294967295, %v15841_v39  ;;  %vm11995_vm13 = vmor %vm15844_vm9, %vm15843_vm0  ;;  %v1302_v56 = vrot.slane %v9299_v21, 6  ;;  %vm15847_vm11 = vcmask 523264   ;;  %v1205_v27 = vrot.slane %v1196_v20, 4  ;;  %v1344_v49 = vpop.permute.xlu0 %1343  ;;  %2158 = vmatmul.mubr.bf16.vlgmr.msra.gmra.mxu1 %v11425_v12 }
 0x198   : > { %v15846_v44 = vsel %vm11995_vm13, 4294967295, %v15845_v44  ;;  %v1368_v24 = vsel %vm15847_vm11, %v1346_v55, %v11735_v5  ;;  %vm15717_vm14 = vmor %vm11965_vm15, %vm11957_vm2  ;;  %v1209_v30 = vrot.slane %v1207_v33, 7  ;;  %v1305_v41 = vrot.slane %v9301_v2, 6  ;;  %10197 = vmatpush3.bf16.msra.mxu1 %v10377_v46  ;;  %v10382_v55 = vld [vmem:[%s15690_s3 + $0xb0] sm:$0xff]  }
 0x199   : > { %v1304_v38 = vrot.slane %v1302_v56, 4  ;;  %1314 = vst [vmem:[#allocation3 + $0x88] sm:$0xcc] %v1302_v56  ;;  %v1364_v43 = vsel %vm15847_vm11, %v11724_v53, %v1344_v49  ;;  %v1228_v9 = vld [vmem:[#allocation3 + $0x70] sm:$0xee]  ;;  %vm15848_vm6 = vcmask 785408   ;;  %vm15849_vm7 = vmmov %vm15847_vm11  ;;  %v1552_v8 = vpop.permute.xlu1 %1551  ;;  %10198 = vmatprep.subr.bf16.mxu1 %v10381_v29 }
 0x19a   : > { %v1210_v33 = vsel %vm11995_vm13, %v1205_v27, %v1209_v30  ;;  %v1369_v62 = vsel %vm15848_vm6, %v1368_v24, %v11735_v5  ;;  %v1483_v3 = vsel %vm15849_vm7, %v1461_v23, %v11747_v15  ;;  %vm15850_vm0 = vmmov %vm15848_vm6  ;;  %v10386_v53 = vld [vmem:[%s15690_s3 + $0xe8] sm:$0xff]   ;;  %v1229_v12 = vsel %vm15717_vm14, %v1196_v20, %v1228_v9 }
 0x19b   : > { %v1365_v7 = vsel %vm15850_vm0, %v1364_v43, %v1344_v49  ;;  %1234 = vst [vmem:[#allocation3 + $0x88] sm:$0x33] %v1210_v33  ;;  %v1306_v5 = vsel %vm11608_vm5, %v1304_v38, %v1305_v41  ;;  %1230 = vst [vmem:[#allocation3 + $0x70] sm:$0xee] %v1229_v12  ;;  %v1459_v46 = vpop.permute.xlu0 %1458  ;;  %vm15852_vm11 = vsmask.f32 6416 }
 0x19c   : > { %v9305_v21 = vcombine.low %v1365_v7, %v1369_v62  ;;  %v9307_v2 = vcombine.high %v1365_v7, %v1369_v62  ;;  %vm15851_vm6 = vmor %vm11986_vm12, %vm11975_vm10  ;;  %vm15853_vm9 = vsmask.f32 2304  ;;  %10199 = vmatpush3.bf16.msra.mxu1 %v10382_v55  ;;  %v10387_v56 = vld [vmem:[%s15690_s3 + $0xa8] sm:$0xff]   ;;  %vm15857_vm7 = vsmask.f32 7946  ;;  %v10388_v38 = vld [vmem:[%s15690_s3 + $0xe0] sm:$0xff]  }
 0x19d   : > { %v1322_v18 = vsel %vm15851_vm6, %v1306_v5, %v1321_v51  ;;  %vm12038_vm14 = vmor %vm15853_vm9, %vm15852_vm11  ;;  %vm15861_vm11 = vcmask 523264   ;;  %v1667_v49 = vpop.permute.xlu1 %1666  ;;  %10200 = vmatprep.subr.bf16.mxu1 %v10386_v53  ;;  %vm15862_vm2 = vsmask.f32 7962  ;;  %vm15863_vm12 = vcmask 1047558   ;;  %v10389_v5 = vld [vmem:[%s15690_s3 + $0xa0] sm:$0xff]  }
 0x19e   : > { %1323 = vst [vmem:[#allocation3 + $0x90] sm:$0x77] %v1322_v18  ;;  %v1396_v23 = vshrl.u32 %v9305_v21, 16  ;;  %v1399_v29 = vshll.u32 %v9305_v21, 16  ;;  %vm15856_vm6 = vmmov %vm15850_vm0  ;;  %vm15858_vm0 = vcmask 1043458   ;;  %v1413_v27 = vshll.u32 %v9307_v2, 16 }
 0x19f   : > { %v1484_v51 = vsel %vm15856_vm6, %v1483_v3, %v11747_v15  ;;  %vm12049_vm10 = vmand %vm15858_vm0, %vm15857_vm7  ;;  %v1479_v30 = vsel %vm15861_vm11, %v11730_v61, %v1459_v46  ;;  %vm15867_vm0 = vcmask 785408   ;;  %vm15868_vm9 = vsmask.f32 3328  ;;  %v1550_v3 = vpop.permute.xlu0 %1549  ;;  %v1527_v18 = vld [vmem:[#allocation3 + $0x98] sm:$0xff] }
 0x1a0   : > { %vm12060_vm6 = vmand %vm15863_vm12, %vm15862_vm2  ;;  %v1398_v41 = vrot.slane %v1396_v23, 5  ;;  %v1401_v43 = vrot.slane %v1399_v29, 6  ;;  %v1480_v9 = vsel %vm15867_vm0, %v1479_v30, %v1459_v46  ;;  %vm15869_vm15 = vcmask 1043456   ;;  %10201 = vmatpush3.bf16.msra.mxu1 %v10387_v56 }
 0x1a1   : > { %vm15866_vm7 = vmmov %vm15861_vm11  ;;  %v9311_v33 = vcombine.low %v1480_v9, %v1484_v51  ;;  %v9313_v62 = vcombine.high %v1480_v9, %v1484_v51  ;;  %vm1633_vm2 = vcmask 1043459   ;;  %vm1634_vm12 = vsmask.f32 7950  ;;  %v868_v29 = vpop.permute.xlu1 %867  ;;  %10202 = vmatprep.subr.bf16.mxu1 %v10388_v38 }
 0x1a2   : > { %v1574_v55 = vsel %vm15866_vm7, %v1552_v8, %v11760_v25  ;;  %vm12069_vm5 = vmand %vm15869_vm15, %vm15868_vm9  ;;  %v1402_v7 = vor.u32 %v1401_v43, %v1398_v41  ;;  %vm15872_vm13 = vsmask.f32 7424  ;;  %vm15873_vm8 = vcmask 1047556   ;;  %v10380_v41 = vld [vmem:[#allocation3 + $0x20] ss:$80 sps:$4 sm:$0xff]  }
 0x1a3   : > { %vm12075_vm1 = vmand %vm15873_vm8, %vm15872_vm13  ;;  %v1689_v8 = vsel %vm15866_vm7, %v1667_v49, %v11770_v31  ;;  %vm1636_vm0 = vcmask 1047559   ;;  %v1415_v21 = vrot.slane %v1413_v27, 6  ;;  %vm15877_vm13 = vcmask 785408   ;;  %v10378_v49 = vld [vmem:[#allocation3 + $0x24] ss:$80 sps:$4 sm:$0xff]  }
 0x1a4   : > { %vm15876_vm15 = vmmov %vm15866_vm7  ;;  %v1575_v2 = vsel %vm15877_vm13, %v1574_v55, %v11760_v25  ;;  %v1508_v46 = vrot.slane %v9311_v33, 5  ;;  %v1411_v56 = vrot.slane %v1402_v7, 4  ;;  %v1511_v27 = vrot.slane %v9313_v62, 5  ;;  %v1665_v55 = vpop.permute.xlu0 %1664  ;;  %2165 = vmatprep.mubr.bf16.mxu1 %v10378_v49  ;;  %10203 = vmatpush3.bf16.msra.mxu1 %v10389_v5  ;;  %v10395_v5 = vld [vmem:[%s15690_s3 + $0xd0] sm:$0xff]  }
 0x1a5   : > { %v1570_v12 = vsel %vm15876_vm15, %v11742_v32, %v1550_v3  ;;  %vm15726_vm8 = vmor %vm12060_vm6, %vm12049_vm10  ;;  %v10393_v32 = vld [vmem:[%s15690_s3 + $0xd8] sm:$0xff]   ;;  %v1434_v43 = vld [vmem:[#allocation3 + $0x90] sm:$0xcc]  ;;  %2166 = vmatmul.mubr.bf16.gmra.mxu1 %v10380_v41  ;;  %v15885_v49 = vmov 0 }
 0x1a6   : > { %vm15878_vm9 = vmmov %vm15877_vm13  ;;  %v1510_v25 = vrot.slane %v1508_v46, 4  ;;  %1520 = vst [vmem:[#allocation3 + $0x48] sm:$0x88] %v1508_v46  ;;  %vm1637_vm13 = vsmask.f32 7966  ;;  %v1416_v9 = vsel %vm12038_vm14, %v1411_v56, %v1415_v21  ;;  %v1435_v33 = vsel %vm15726_vm8, %v1402_v7, %v1434_v43  ;;  %10204 = vmatprep.subr.bf16.mxu1 %v10393_v32 }
 0x1a7   : > { %v1571_v23 = vsel %vm15878_vm9, %v1570_v12, %v1550_v3  ;;  %vm15727_vm7 = vmor %vm12075_vm1, %vm12069_vm5  ;;  %1436 = vst [vmem:[#allocation3 + $0x90] sm:$0xcc] %v1435_v33  ;;  %v1685_v7 = vsel %vm15861_vm11, %v11754_v19, %v1665_v55  ;;  %v15883_v19 = vmov 0 }
 0x1a8   : > { %v9317_v51 = vcombine.low %v1571_v23, %v1575_v2  ;;  %v9319_v30 = vcombine.high %v1571_v23, %v1575_v2  ;;  %vm15879_vm15 = vmmov %vm15878_vm9  ;;  %1440 = vst [vmem:[#allocation3 + $0x48] sm:$0x77] %v1416_v9  ;;  %vm15880_vm9 = vnez %v15807_v58  ;;  %v954_v2 = vpop.permute.xlu1 %953 }
 0x1a9   : > { %v12102_v38 = vsel %vm15879_vm15, %v1689_v8, %v11770_v31  ;;  %v10394_v31 = vld [vmem:[%s15690_s3 + $0x98] sm:$0xff]   ;;  %v1512_v62 = vsel %vm15880_vm9, %v1510_v25, %v1511_v27  ;;  %vm15881_vm15 = vmmov %vm15861_vm11  ;;  %v10396_v25 = vld [vmem:[%s15690_s3 + $0x90] sm:$0xff]   ;;  %v15890_v27 = vmov 0 }
 0x1aa   : > { %v1602_v3 = vshll.u32 %v9317_v51, 16  ;;  %v1609_v12 = vshrl.u32 %v9317_v51, 16  ;;  %v1615_v8 = vshll.u32 %v9319_v30, 16  ;;  %v884_v21 = vsel %vm15881_vm15, %v868_v29, %v11783_v40  ;;  %v1720_v51 = vld [vmem:[#allocation3 + $0x18] sm:$0x11]  ;;  %vm12133_vm11 = vmand %vm1633_vm2, %vm1634_vm12  ;;  %10205 = vmatpush3.bf16.msra.mxu1 %v10394_v31 }
 0x1ab   : > { %v1528_v46 = vsel %vm15727_vm7, %v1512_v62, %v1527_v18  ;;  %vm15882_vm15 = vcmask 785408   ;;  %v15884_v19 = vsel %vm12133_vm11, 4294967295, %v15883_v19  ;;  %v866_v18 = vpop.permute.xlu0 %865  ;;  %vm12143_vm8 = vmand %vm1636_vm0, %vm1637_vm13  ;;  %vm15888_vm2 = vsmask.f32 7440  ;;  %10206 = vmatprep.subr.bf16.mxu1 %v10395_v5  ;;  %v10398_v31 = vld [vmem:[%s15690_s3 + $0xc8] sm:$0xff]  }
 0x1ac   : > { %v1604_v23 = vrot.slane %v1602_v3, 5  ;;  %v1611_v56 = vrot.slane %v1609_v12, 4  ;;  %v12129_v29 = vsel %vm15882_vm15, %v1685_v7, %v1665_v55  ;;  %1529 = vst [vmem:[#allocation3 + $0x98] sm:$0xff] %v1528_v46  ;;  %v15886_v49 = vsel %vm12143_vm8, 4294967295, %v15885_v49  ;;  %v1065_v12 = vpop.permute.xlu1 %1064  ;;  %v10399_v5 = vld [vmem:[%s15690_s3 + $0x88] sm:$0xff]  }
 0x1ad   : > { %v9323_v32 = vcombine.low %v12129_v29, %v12102_v38  ;;  %v9325_v30 = vcombine.high %v12129_v29, %v12102_v38  ;;  %vm15887_vm15 = vcmask 523264   ;;  %vm15889_vm12 = vsmask.f32 3328 }
 0x1ae   : > { %v1612_v41 = vor.u32 %v1611_v56, %v1604_v23  ;;  %v880_v43 = vsel %vm15887_vm15, %v11738_v10, %v866_v18  ;;  %vm12154_vm7 = vmor %vm15889_vm12, %vm15888_vm2  ;;  %v1617_v55 = vrot.slane %v1615_v8, 5  ;;  %vm15892_vm0 = vcmask 785408   ;;  %v916_v10 = vld [vmem:[#allocation3 + $0x58] sm:$0x11]  ;;  %10207 = vmatpush3.bf16.msra.mxu1 %v10396_v25 }
 0x1af   : > { %v15891_v27 = vsel %vm12154_vm7, 4294967295, %v15890_v27  ;;  %v12160_v9 = vsel %vm15892_vm0, %v884_v21, %v11783_v40  ;;  %vm15893_vm13 = vnez %v15813_v47  ;;  %vm15894_vm15 = vmmov %vm15892_vm0  ;;  %vm15895_vm2 = vcmask 523264   ;;  %v952_v7 = vpop.permute.xlu0 %951  ;;  %10208 = vmatprep.subr.bf16.mxu1 %v10398_v31 }
 0x1b0   : > { %v1721_v33 = vsel %vm15893_vm13, %v9325_v30, %v1720_v51  ;;  %v12165_v3 = vsel %vm15894_vm15, %v880_v43, %v866_v18  ;;  %v1613_v62 = vrot.slane %v1612_v41, 4  ;;  %v967_v8 = vsel %vm15895_vm2, %v954_v2, %v11793_v45  ;;  %vm15896_vm0 = vmmov %vm15895_vm2  ;;  %v10383_v51 = vld [vmem:[#allocation3 + $0x8c] ss:$8 sps:$4 sm:$0xff]   ;;  %v10385_v30 = vld [vmem:[#allocation3 + $0x88] ss:$8 sps:$4 sm:$0xff]   ;;  %v1156_v43 = vpop.permute.xlu1 %1155 }
 0x1b1   : > { %1722 = vst [vmem:[#allocation3 + $0x18] sm:$0x11] %v1721_v33  ;;  %v9278_v21 = vcombine.high %v12165_v3, %v12160_v9  ;;  %v963_v56 = vsel %vm15896_vm0, %v11764_v28, %v952_v7  ;;  %v968_v18 = vsel %vm15894_vm15, %v967_v8, %v11793_v45  ;;  %vm15897_vm2 = vmmov %vm15894_vm15  ;;  %2173 = vmatprep.mubr.bf16.mxu1 %v10383_v51 }
 0x1b2   : > { %v12185_v46 = vsel %vm12154_vm7, %v1613_v62, %v1617_v55  ;;  %v964_v41 = vsel %vm15897_vm2, %v963_v56, %v952_v7  ;;  %v10401_v55 = vld [vmem:[%s15690_s3 + $0xc0] sm:$0xff]   ;;  %vm15898_vm12 = vmmov %vm15896_vm0  ;;  %2174 = vmatmul.mubr.bf16.gmra.mxu1 %v10385_v30 }
 0x1b3   : > { %v917_v2 = vsel %vm15893_vm13, %v9278_v21, %v916_v10  ;;  %v1640_v33 = vld [vmem:[#allocation3 + $0x98] sm:$0x88]  ;;  %v1078_v10 = vsel %vm15898_vm12, %v1065_v12, %v11805_v54  ;;  %v9282_v28 = vcombine.low %v964_v41, %v968_v18  ;;  %vm15899_vm0 = vmor %vm12143_vm8, %vm12133_vm11  ;;  %v1063_v25 = vpop.permute.xlu0 %1062  ;;  %v9284_v31 = vcombine.high %v964_v41, %v968_v18  ;;  %10209 = vmatpush3.bf16.msra.mxu1 %v10399_v5  ;;  %v10402_v12 = vld [vmem:[%s15690_s3 + $0x80] sm:$0xff]  }
 0x1b4   : > { %918 = vst [vmem:[#allocation3 + $0x58] sm:$0x11] %v917_v2  ;;  %v1641_v45 = vsel %vm15899_vm0, %v1604_v23, %v1640_v33  ;;  %vm15900_vm15 = vmmov %vm15898_vm12  ;;  %v1271_v2 = vpop.permute.xlu1 %1270  ;;  %10210 = vmatprep.subr.bf16.mxu1 %v10401_v55 }
 0x1b5   : > { %1642 = vst [vmem:[#allocation3 + $0x98] sm:$0x88] %v1641_v45  ;;  %v995_v62 = vshrl.u32 %v9282_v28, 16  ;;  %v1074_v8 = vsel %vm15900_vm15, %v11772_v35, %v1063_v25  ;;  %vm15901_vm12 = vmmov %vm15897_vm2  ;;  %v998_v51 = vshll.u32 %v9282_v28, 16  ;;  %v1008_v45 = vshll.u32 %v9284_v31, 16 }
 0x1b6   : > { %v1079_v21 = vsel %vm15901_vm12, %v1078_v10, %v11805_v54  ;;  %vm15902_vm2 = vmmov %vm15900_vm15  ;;  %v1118_v31 = vld [vmem:[#allocation3 + $0x80] sm:$0x33] }
 0x1b7   : > { %v1169_v7 = vsel %vm15902_vm2, %v1156_v43, %v11815_v60  ;;  %vm15903_vm0 = vmmov %vm15901_vm12  ;;  %v997_v56 = vrot.slane %v995_v62, 7  ;;  %v1154_v35 = vpop.permute.xlu0 %1153  ;;  %10211 = vmatpush3.bf16.msra.mxu1 %v10402_v12 }
 0x1b8   : > { %v1075_v23 = vsel %vm15903_vm0, %v1074_v8, %v1063_v25  ;;  %vm15904_vm15 = vmmov %vm15903_vm0  ;;  %v1362_v25 = vpop.permute.xlu1 %1361 }
 0x1b9   : > { %v9288_v30 = vcombine.low %v1075_v23, %v1079_v21  ;;  %v9290_v18 = vcombine.high %v1075_v23, %v1079_v21  ;;  %v1000_v41 = vor.u32 %v998_v51, %v997_v56  ;;  %v1006_v33 = vrot.slane %v997_v56, 4  ;;  %vm15905_vm12 = vmmov %vm15902_vm2 }
 0x1ba   : > { %v1170_v54 = vsel %vm15904_vm15, %v1169_v7, %v11815_v60  ;;  %v1165_v43 = vsel %vm15905_vm12, %v11785_v42, %v1154_v35  ;;  %vm15906_vm2 = vnez %v15815_v17  ;;  %vm15908_vm11 = vmmov %vm15904_vm15  ;;  %v9345_v51 = vcombine.high %v12185_v46, %v9323_v32 }
 0x1bb   : > { %v1025_v5 = vld [vmem:[#allocation3 + $0x58] sm:$0xff]  ;;  %v1097_v40 = vrot.slane %v9288_v30, 7  ;;  %v1102_v10 = vrot.slane %v9290_v18, 7  ;;  %v1010_v55 = vsel %vm11922_vm4, %v1006_v33, %v1008_v45  ;;  %vm15907_vm0 = vmor %vm11903_vm3, %vm15906_vm2  ;;  %v1166_v60 = vsel %vm15908_vm11, %v1165_v43, %v1154_v35  ;;  %v1269_v12 = vpop.permute.xlu0 %1268 }
 0x1bc   : > { %v12225_v28 = vsel %vm15907_vm0, %v1000_v41, %v1025_v5  ;;  %1029 = vst [vmem:[#allocation3 + $0x38] sm:$0x11] %v1010_v55  ;;  %vm15909_vm15 = vmmov %vm15905_vm12  ;;  %v9294_v50 = vcombine.low %v1166_v60, %v1170_v54  ;;  %v9296_v8 = vcombine.high %v1166_v60, %v1170_v54  ;;  %v10390_v63 = vld [vmem:[#allocation3 + $0x4c] ss:$80 sps:$4 sm:$0xff]   ;;  %v10392_v21 = vld [vmem:[#allocation3 + $0x48] ss:$80 sps:$4 sm:$0xff]   ;;  %vm15910_vm3 = vnez %v15811_v22 }
 0x1bd   : > { %v1101_v62 = vrot.slane %v1097_v40, 4  ;;  %1109 = vst [vmem:[#allocation3 + $0x38] sm:$0xee] %v1097_v40  ;;  %1027 = vst [vmem:[#allocation3 + $0x58] sm:$0xff] %v12225_v28  ;;  %v1284_v42 = vsel %vm15909_vm15, %v1271_v2, %v11825_v6  ;;  %vm15913_vm11 = vnez %v15819_v37  ;;  %v1477_v2 = vpop.permute.xlu1 %1476  ;;  %2181 = vmatprep.mubr.bf16.mxu1 %v10390_v63  ;;  %vm15915_vm0 = vcmask 785408  }
 0x1be   : > { %vm15911_vm4 = vmmov %vm15905_vm12  ;;  %vm15912_vm12 = vnez %v15822_v11  ;;  %v1198_v23 = vshrl.u32 %v9294_v50, 16  ;;  %v1201_v56 = vshll.u32 %v9294_v50, 16  ;;  %v1285_v22 = vsel %vm15915_vm0, %v1284_v42, %v11825_v6  ;;  %2182 = vmatmul.mubr.bf16.gmra.mxu1 %v10392_v21  ;;  %v12249_v41 = vld [vmem:[#allocation3 + $0x18] sm:$0x11]  ;;  %v1324_v50 = vld [vmem:[#allocation3 + $0x30] sm:$0x77] }
 0x1bf   : > { %v1103_v17 = vsel %vm15910_vm3, %v1101_v62, %v1102_v10  ;;  %v1280_v7 = vsel %vm15911_vm4, %v11795_v48, %v1269_v12  ;;  %vm15914_vm2 = vmor %vm15912_vm12, %vm15913_vm11  ;;  %v1213_v48 = vshll.u32 %v9296_v8, 16  ;;  %v1360_v5 = vpop.permute.xlu0 %1359  ;;  %2189 = vmatprep.mubr.bf16.mxu1 %v9345_v51  ;;  %v1490_v32 = vsel %vm15911_vm4, %v1477_v2, %v11845_v26 }
 0x1c0   : > { %v1119_v40 = vsel %vm15914_vm2, %v1103_v17, %v1118_v31  ;;  %vm15916_vm15 = vmmov %vm15911_vm4  ;;  %v1200_v30 = vrot.slane %v1198_v23, 6  ;;  %v1203_v18 = vrot.slane %v1201_v56, 7  ;;  %v11426_v33 = vcombine.low %v12185_v46, %v12129_v29 }
 0x1c1   : > { %1120 = vst [vmem:[#allocation3 + $0x80] sm:$0x33] %v1119_v40  ;;  %v1375_v11 = vsel %vm15916_vm15, %v1362_v25, %v11836_v16  ;;  %vm15917_vm3 = vmmov %vm15915_vm0  ;;  %v1568_v25 = vpop.permute.xlu1 %1567  ;;  %v1215_v55 = vrot.slane %v1213_v48, 7  ;;  %v9349_v60 = vcombine.high %v12249_v41, %v12249_v41  ;;  %v1491_v29 = vsel %vm15915_vm0, %v1490_v32, %v11845_v26 }
 0x1c2   : > { %v1281_v37 = vsel %vm15917_vm3, %v1280_v7, %v1269_v12  ;;  %vm15918_vm12 = vmmov %vm15911_vm4  ;;  %v1204_v45 = vor.u32 %v1203_v18, %v1200_v30 }
 0x1c3   : > { %v9300_v35 = vcombine.low %v1281_v37, %v1285_v22  ;;  %v9302_v38 = vcombine.high %v1281_v37, %v1285_v22  ;;  %v1371_v6 = vsel %vm15918_vm12, %v11801_v52, %v1360_v5  ;;  %vm15919_vm11 = vmmov %vm15915_vm0  ;;  %v1475_v46 = vpop.permute.xlu0 %1474  ;;  %vm15924_vm12 = vnez %v15809_v0 }
 0x1c4   : > { %v1376_v54 = vsel %vm15919_vm11, %v1375_v11, %v11836_v16  ;;  %vm15920_vm2 = vmmov %vm15915_vm0  ;;  %v1211_v42 = vrot.slane %v1204_v45, 4 }
 0x1c5   : > { %v1303_v10 = vrot.slane %v9300_v35, 6  ;;  %v1372_v43 = vsel %vm15920_vm2, %v1371_v6, %v1360_v5  ;;  %v1308_v8 = vrot.slane %v9302_v38, 6  ;;  %vm15921_vm15 = vmmov %vm15911_vm4  ;;  %vm15926_vm2 = vnez %v15835_v1  ;;  %v1530_v5 = vld [vmem:[#allocation3 + $0xa0] sm:$0xff] }
 0x1c6   : > { %v9306_v31 = vcombine.low %v1372_v43, %v1376_v54  ;;  %v9308_v62 = vcombine.high %v1372_v43, %v1376_v54  ;;  %v1581_v63 = vsel %vm15921_vm15, %v1568_v25, %v11852_v34  ;;  %vm15922_vm3 = vmmov %vm15911_vm4  ;;  %vm15923_vm4 = vnez %v15846_v44  ;;  %2190 = vmatmul.mubr.bf16.gmra.mxu1 %v11426_v33 }
 0x1c7   : > { %v1307_v52 = vrot.slane %v1303_v10, 4  ;;  %1315 = vst [vmem:[#allocation3 + $0x10] sm:$0xcc] %v1303_v10  ;;  %v1486_v21 = vsel %vm15922_vm3, %v11811_v59, %v1475_v46  ;;  %v1216_v7 = vsel %vm15923_vm4, %v1211_v42, %v1215_v55  ;;  %vm15925_vm11 = vmmov %vm15915_vm0  ;;  %vm15927_vm0 = vnez %v15832_v57  ;;  %v1566_v22 = vpop.permute.xlu0 %1565  ;;  %2197 = vmatprep.mubr.bf16.mxu1 %v9349_v60 }
 0x1c8   : > { %v1404_v16 = vshrl.u32 %v9306_v31, 16  ;;  %v1407_v12 = vshll.u32 %v9306_v31, 16  ;;  %v1231_v17 = vld [vmem:[#allocation3 + $0x80] sm:$0xee]  ;;  %v1419_v23 = vshll.u32 %v9308_v62, 16  ;;  %v1487_v56 = vsel %vm15925_vm11, %v1486_v21, %v1475_v46  ;;  %vm15928_vm8 = vmor %vm15926_vm2, %vm15927_vm0 }
 0x1c9   : > { %v1309_v40 = vsel %vm15924_vm12, %v1307_v52, %v1308_v8  ;;  %v1232_v26 = vsel %vm15928_vm8, %v1204_v45, %v1231_v17  ;;  %1235 = vst [vmem:[#allocation3 + $0x10] sm:$0x33] %v1216_v7  ;;  %vm15929_vm15 = vnez %v15842_v39  ;;  %vm15930_vm3 = vnez %v15839_v13  ;;  %vm15933_vm8 = vmmov %vm15925_vm11  ;;  %v1683_v13 = vpop.permute.xlu1 %1682 }
 0x1ca   : > { %vm15931_vm7 = vmor %vm15929_vm15, %vm15930_vm3  ;;  %v1406_v44 = vrot.slane %v1404_v16, 5  ;;  %v1409_v2 = vrot.slane %v1407_v12, 6  ;;  %1233 = vst [vmem:[#allocation3 + $0x80] sm:$0xee] %v1232_v26  ;;  %v9312_v0 = vcombine.low %v1487_v56, %v1491_v29  ;;  %v9314_v51 = vcombine.high %v1487_v56, %v1491_v29 }
 0x1cb   : > { %v1325_v59 = vsel %vm15931_vm7, %v1309_v40, %v1324_v50  ;;  %vm15932_vm4 = vcmask 523264   ;;  %v1582_v39 = vsel %vm15933_vm8, %v1581_v63, %v11852_v34  ;;  %vm15934_vm12 = vmmov %vm15933_vm8  ;;  %v1421_v30 = vrot.slane %v1419_v23, 6  ;;  %v1681_v6 = vpop.permute.xlu0 %1680 }
 0x1cc   : > { %1326 = vst [vmem:[#allocation3 + $0x30] sm:$0x77] %v1325_v59  ;;  %v1410_v1 = vor.u32 %v1409_v2, %v1406_v44  ;;  %v1577_v57 = vsel %vm15932_vm4, %v11821_v4, %v1566_v22  ;;  %v1509_v48 = vrot.slane %v9312_v0, 5  ;;  %v1514_v32 = vrot.slane %v9314_v51, 5  ;;  %vm15935_vm7 = vmmov %vm15932_vm4 }
 0x1cd   : > { %v1578_v11 = vsel %vm15934_vm12, %v1577_v57, %v1566_v22  ;;  %v9348_v33 = vcombine.low %v12249_v41, %v12249_v41  ;;  %v1696_v34 = vsel %vm15935_vm7, %v1683_v13, %v11856_v36  ;;  %vm15936_vm11 = vmmov %vm15932_vm4  ;;  %v15937_v25 = vcombine.low %v12165_v3, %v12160_v9  ;;  %v1723_v9 = vld [vmem:[#allocation3] sm:$0x11] }
 0x1ce   : > { %v1417_v37 = vrot.slane %v1410_v1, 4  ;;  %v9318_v18 = vcombine.low %v1578_v11, %v1582_v39  ;;  %v9320_v35 = vcombine.high %v1578_v11, %v1582_v39  ;;  %v1513_v38 = vrot.slane %v1509_v48, 4  ;;  %1521 = vst [vmem:[#allocation3 + $0x68] sm:$0x88] %v1509_v48  ;;  %vm15940_vm2 = vmmov %vm15933_vm8 }
 0x1cf   : > { %v1692_v43 = vsel %vm15936_vm11, %v11832_v14, %v1681_v6  ;;  %v9331_v41 = vcombine.high %v15937_v25, %v12225_v28  ;;  %2198 = vmatmul.mubr.bf16.gmra.mxu1 %v9348_v33  ;;  %v1697_v14 = vsel %vm15940_vm2, %v1696_v34, %v11856_v36  ;;  %vm15941_vm0 = vmmov %vm15940_vm2  ;;  %v11427_v36 = vcombine.low %v12165_v3, %v12225_v28 }
 0x1d0   : > { %v1422_v4 = vsel %vm12038_vm14, %v1417_v37, %v1421_v30  ;;  %v1606_v45 = vshll.u32 %v9318_v18, 16  ;;  %v1619_v54 = vshrl.u32 %v9318_v18, 16  ;;  %v1515_v10 = vsel %vm15880_vm9, %v1513_v38, %v1514_v32  ;;  %vm15938_vm14 = vmor %vm12075_vm1, %vm12069_vm5  ;;  %v1735_v63 = vld [vmem:[#allocation3 + $0x10] sm:$0xff] }
 0x1d1   : > { %1441 = vst [vmem:[#allocation3 + $0x68] sm:$0x77] %v1422_v4  ;;  %v1531_v20 = vsel %vm15938_vm14, %v1515_v10, %v1530_v5  ;;  %v1625_v60 = vshll.u32 %v9320_v35, 16  ;;  %vm15939_vm9 = vmor %vm12060_vm6, %vm12049_vm10  ;;  %v1693_v53 = vsel %vm15941_vm0, %v1692_v43, %v1681_v6  ;;  %2237 = vmatprep.mubr.bf16.mxu1 %v9331_v41  ;;  %vm15942_vm1 = vnez %v15891_v27  ;;  %v10403_v29 = vld [vmem:[#allocation3 + $0x3c] ss:$72 sps:$4 sm:$0xff]  }
 0x1d2   : > { %v1608_v31 = vrot.slane %v1606_v45, 5  ;;  %v1621_v62 = vrot.slane %v1619_v54, 4  ;;  %1532 = vst [vmem:[#allocation3 + $0xa0] sm:$0xff] %v1531_v20  ;;  %v9324_v42 = vcombine.low %v1693_v53, %v1697_v14  ;;  %v9326_v50 = vcombine.high %v1693_v53, %v1697_v14  ;;  %v10405_v12 = vld [vmem:[#allocation3 + $0x38] ss:$72 sps:$4 sm:$0xff]  }
 0x1d3   : > { %v1437_v55 = vld [vmem:[#allocation3 + $0x30] sm:$0xcc]  ;;  %v1627_v8 = vrot.slane %v1625_v60, 5  ;;  %vm15943_vm5 = vnez %v15886_v49  ;;  %vm15944_vm10 = vnez %v15884_v19  ;;  %v12357_v45 = vld [vmem:[%s15691_s4] ss:$0 sm:$0xff]  ;;  %vm2336_vm4 = vcmask 516352  }
 0x1d4   : > { %v1438_v58 = vsel %vm15939_vm9, %v1410_v1, %v1437_v55  ;;  %v1622_v61 = vor.u32 %v1621_v62, %v1608_v31  ;;  %v1724_v15 = vsel %vm15893_vm13, %v9326_v50, %v1723_v9  ;;  %vm15945_vm6 = vmor %vm15943_vm5, %vm15944_vm10  ;;  %v11438_v10 = vmov 1966171168   ;;  %v10411_v20 = vld [vmem:[%s15692_s5 + $0x70] ss:$8 sps:$4 sm:$0xff]   ;;  %v10416_v14 = vld [vmem:[%s15692_s5 + $0x174] ss:$8 sps:$4 sm:$0xff]  }
 0x1d5   : > { %1439 = vst [vmem:[#allocation3 + $0x30] sm:$0xcc] %v1438_v58  ;;  %1725 = vst [vmem:[#allocation3] sm:$0x11] %v1724_v15  ;;  %v2309_v43 = vunpack.c.l.s4 %v11438_v10  ;;  %v15731_v55 = vlaneseq  ;;  %v10414_v58 = vld [vmem:[%s15692_s5 + $0x170] ss:$8 sps:$4 sm:$0xff]   ;;  %5822 = vmatprep.subr.bf16.mxu1 %v10416_v14 }
 0x1d6   : > { %v1623_v52 = vrot.slane %v1622_v61, 4  ;;  %v10419_v15 = vld [vmem:[%s15692_s5 + $0x64] ss:$8 sps:$4 sm:$0xff]   ;;  %vm2302_vm13 = vcmask 253952   ;;  %vm15947_vm15 = vsmask.f32 256 }
 0x1d7   : > { %2238 = vmatmul.mubr.bf16.vlgmr.msra.gmra.mxu1 %v11427_v36  ;;  %vm12398_vm3 = vmand %vm2302_vm13, %vm15947_vm15  ;;  %vm2356_vm7 = vcmask 778752   ;;  %vm2375_vm9 = vcmask 1041152   ;;  %vm9154_vm10 = vcmask 122880  }
 0x1d8   : > { %v1628_v24 = vsel %vm15942_vm1, %v1623_v52, %v1627_v8  ;;  %2245 = vmatprep.mubr.bf16.mxu1 %v10403_v29  ;;  %v12374_v52 = vshrl.u32 %v15731_v55, 7  ;;  %v10417_v8 = vld [vmem:[%s15692_s5 + $0x60] ss:$8 sps:$4 sm:$0xff]   ;;  %5823 = vmatpush1.bf16.msra.mxu1 %v10414_v58  ;;  %vm15981_vm8 = vmmov %vm15947_vm15  ;;  %vm869_vm1 = vcmask 261120  }
 0x1d9   : > { %v1643_v46 = vld [vmem:[#allocation3 + $0xa0] sm:$0x88]  ;;  %v9347_v28 = vcombine.high %v1628_v24, %v9324_v42  ;;  %v11428_v19 = vcombine.low %v1628_v24, %v1693_v53  ;;  %v2310_v53 = vunpack.c.0.s8 %v2309_v43  ;;  %v10420_v29 = vld [vmem:[%s15692_s5 + $0x160] ss:$8 sps:$4 sm:$0xff]   ;;  %vm13176_vm12 = vmand %vm2336_vm4, %vm15981_vm8 }
 0x1da   : > { %v1644_v16 = vsel %vm15945_vm6, %v1608_v31, %v1643_v46  ;;  %v10413_v31 = vld [vmem:[%s15692_s5 + $0x74] ss:$8 sps:$4 sm:$0xff]   ;;  %15946 = vst [vmem:[#allocation6_spill] sm:$0xff] %v12374_v52  ;;  %v10422_v46 = vld [vmem:[%s15692_s5 + $0x164] ss:$8 sps:$4 sm:$0xff]   ;;  %vm15984_vm11 = vmmov %vm15981_vm8 }
 0x1db   : > { %1645 = vst [vmem:[#allocation3 + $0xa0] sm:$0x88] %v1644_v16  ;;  %5781 = vmatprep.subr.bf16.mxu0 %v10413_v31  ;;  %5824 = vmatprep.subr.bf16.mxu1 %v10422_v46  ;;  %vm13197_vm14 = vmand %vm2356_vm7, %vm15984_vm11 }
 0x1dc   : > { %v1737_v47 = vld [vmem:[#allocation3 + $0x30] sm:$0xff]  ;;  %v1747_v49 = vld [vmem:[#allocation3] sm:$0x11]  ;;  %5782 = vmatpush1.bf16.msra.mxu0 %v10411_v20  ;;  %5825 = vmatpush1.bf16.msra.mxu1 %v10420_v29  ;;  %vm15987_vm2 = vmmov %vm15981_vm8 }
 0x1dd   : > { %v9339_v21 = vcombine.high %v1735_v63, %v1737_v47  ;;  %v9338_v27 = vcombine.low %v1735_v63, %v1737_v47  ;;  %v9351_v7 = vcombine.high %v1747_v49, %v1747_v49  ;;  %v9350_v40 = vcombine.low %v1747_v49, %v1747_v49  ;;  %5783 = vmatprep.subr.bf16.mxu0 %v10419_v15  ;;  %v2304_v49 = vld [vmem:[#allocation4] sm:$0x1]  ;;  %vm13234_vm0 = vmand %vm2375_vm9, %vm15987_vm2 }
 0x1df   : > { %2246 = vmatmul.mubr.bf16.gmra.mxu1 %v10405_v12 }
 0x1e0   : > { %2253 = vmatprep.mubr.bf16.mxu1 %v9339_v21  ;;  %5784 = vmatpush1.bf16.msra.mxu0 %v10417_v8  ;;  %v12389_v21 = vsub.s32 %v2310_v53, %v12374_v52 }
 0x1e2   : > { %v10406_v17 = vld [vmem:[#allocation3 + $0x6c] ss:$56 sps:$4 sm:$0xff]   ;;  %v10408_v3 = vld [vmem:[#allocation3 + $0x68] ss:$56 sps:$4 sm:$0xff]  }
 0x1e7   : > { %2254 = vmatmul.mubr.bf16.gmra.mxu1 %v9338_v27  ;;  %v10423_v27 = vld [vmem:[%s15692_s5 + $0x50] ss:$8 sps:$4 sm:$0xff]  }
 0x1e8   : > { %2261 = vmatprep.mubr.bf16.mxu1 %v10406_v17  ;;  %v10425_v17 = vld [vmem:[%s15692_s5 + $0x54] ss:$8 sps:$4 sm:$0xff]  }
 0x1e9   : > { %5785 = vmatprep.subr.bf16.mxu0 %v10425_v17 }
 0x1ea   : > { %5786 = vmatpush1.bf16.msra.mxu0 %v10423_v27 }
 0x1ef   : > { %2262 = vmatmul.mubr.bf16.gmra.mxu1 %v10408_v3  ;;  %v15948_v3 = vmov 0 }
 0x1f0   : > { %2269 = vmatprep.mubr.bf16.mxu1 %v9347_v28  ;;  %v15949_v3 = vsel %vm12398_vm3, 4294967295, %v15948_v3 }
 0x1f1   : > { %15950 = vst [vmem:[#allocation7_spill] sm:$0xff] %v15949_v3 }
 0x1f7   : > { %2270 = vmatmul.mubr.bf16.gmra.mxu1 %v11428_v19 }
 0x1f8   : > { %2277 = vmatprep.mubr.bf16.mxu1 %v9351_v7 }
 0x1ff   : > { %2278 = vmatmul.mubr.bf16.gmra.mxu1 %v9350_v40 }
 0x257   : > { %v10160_v23 = vpop.f32.mrf.mxu1 }
 0x259   : > { %v10161_v56 = vpop.f32.mrf.mxu1 }
 0x25a   : > { %v10162_v34 = vadd.f32 %v10161_v56, %v10160_v23  ;;  %v10426_v56 = vld [vmem:[%s15692_s5 + $0x150] ss:$8 sps:$4 sm:$0xff]  }
 0x25b   : > { %v10163_v26 = vpop.f32.mrf.mxu1 }
 0x25c   : > { %v2160_v60 = vadd.f32 %v10162_v34, %v12357_v45 }
 0x25d   : > { %v10164_v59 = vpop.f32.mrf.mxu1 }
 0x25e   : > { %v10165_v25 = vadd.f32 %v10164_v59, %v10163_v26  ;;  %v10428_v26 = vld [vmem:[%s15692_s5 + $0x154] ss:$8 sps:$4 sm:$0xff]  }
 0x25f   : > { %5826 = vmatprep.subr.bf16.mxu1 %v10428_v26 }
 0x260   : > { %v2163_v61 = vadd.f32 %v10165_v25, %v12357_v45  ;;  %5827 = vmatpush1.bf16.msra.mxu1 %v10426_v56 }
 0x265   : > { %v10166_v44 = vpop.f32.mrf.mxu1 }
 0x267   : > { %v10167_v2 = vpop.f32.mrf.mxu1 }
 0x268   : > { %v10168_v16 = vadd.f32 %v10167_v2, %v10166_v44 }
 0x269   : > { %v10169_v0 = vpop.f32.mrf.mxu1 }
 0x26a   : > { %v2168_v59 = vadd.f32 %v10168_v16, %v12357_v45 }
 0x26b   : > { %v10170_v51 = vpop.f32.mrf.mxu1 }
 0x26c   : > { %v10171_v28 = vadd.f32 %v10170_v51, %v10169_v0 }
 0x272   : > { %v12326_v22 = vpop.f32.mrf.mxu1 }
 0x274   : > { %v12328_v1 = vpop.f32.mrf.mxu1 }
 0x276   : > { %v12330_v57 = vpop.f32.mrf.mxu1 }
 0x278   : > { %v12332_v39 = vpop.f32.mrf.mxu1 }
 0x279   : > { %v10177_v20 = vadd.f32 %v12332_v39, %v12330_v57  ;;  %v2575_v39 = vld [vmem:[#allocation4 + $0x4] sm:$0x1] }
 0x27b   : > { %v2179_v8 = vadd.f32 %v10177_v20, %v12357_v45 }
 0x27e   : > { %v12334_v48 = vpop.f32.mrf.mxu1 }
 0x280   : > { %v12336_v13 = vpop.f32.mrf.mxu1 }
 0x282   : > { %v12338_v11 = vpop.f32.mrf.mxu1 }
 0x284   : > { %v12340_v37 = vpop.f32.mrf.mxu1 }
 0x285   : > { %v10183_v56 = vadd.f32 %v12340_v37, %v12338_v11 }
 0x286   : > { %v12342_v30 = vpop.f32.mrf.mxu1 }
 0x288   : > { %v12344_v18 = vpop.f32.mrf.mxu1 }
 0x28a   : > { %v12346_v35 = vpop.f32.mrf.mxu1 }
 0x28c   : > { %v12348_v5 = vpop.f32.mrf.mxu1 }
 0x28f   : > { %v12350_v38 = vpop.f32.mrf.mxu1 }
 0x291   : > { %v12352_v32 = vpop.f32.mrf.mxu1 }
 0x293   : > { %v10193_v6 = vpop.f32.mrf.mxu1 }
 0x294   : > { %v2171_v6 = vadd.f32 %v10171_v28, %v12357_v45 }
 0x295   : > { %v10194_v33 = vpop.f32.mrf.mxu1 }
 0x296   : > { %v10174_v33 = vadd.f32 %v12328_v1, %v12326_v22 }
 0x297   : > { %v10212_v4 = vpop.f32.mrf.mxu1 }
 0x298   : > { %v2176_v57 = vadd.f32 %v10174_v33, %v12357_v45 }
 0x299   : > { %v10213_v54 = vpop.f32.mrf.mxu1 }
 0x29a   : > { %v10214_v41 = vadd.f32 %v10213_v54, %v10212_v4 }
 0x29b   : > { %v10215_v62 = vpop.f32.mrf.mxu1 }
 0x29c   : > { %v2240_v42 = vadd.f32 %v10214_v41, %v2160_v60 }
 0x29d   : > { %v10216_v9 = vpop.f32.mrf.mxu1 }
 0x29e   : > { %v10217_v50 = vadd.f32 %v10216_v9, %v10215_v62  ;;  %v2285_v12 = vmax.f32 %v2240_v42, 0.0 }
 0x29f   : > { %v10218_v24 = vpop.f32.mrf.mxu1 }
 0x2a0   : > { %v2243_v36 = vadd.f32 %v10217_v50, %v2163_v61 }
 0x2a1   : > { %v10219_v47 = vpop.f32.mrf.mxu1 }
 0x2a2   : > { %v2286_v63 = vmax.f32 %v2243_v36, 0.0  ;;  %v10220_v19 = vadd.f32 %v10219_v47, %v10218_v24 }
 0x2a3   : > { %v10221_v7 = vpop.f32.mrf.mxu1 }
 0x2a4   : > { %v2296_v40 = vpack.c.bf16 %v2286_v63, %v2285_v12  ;;  %v9384_v23 = vpack.c.bf16 %v2286_v63, %v2286_v63  ;;  %v2248_v4 = vadd.f32 %v10220_v19, %v2168_v59 }
 0x2a5   : > { %v10222_v44 = vpop.f32.mrf.mxu1 }
 0x2a6   : > { %v2305_v2 = vsel %vm12398_vm3, %v2296_v40, %v2304_v49  ;;  %v2314_v0 = vrot.slane %v2296_v40, %v12389_v21  ;;  %v2449_v51 = vrot.slane %v9384_v23, %v12389_v21  ;;  %v10223_v34 = vadd.f32 %v10222_v44, %v10221_v7  ;;  %v10429_v44 = vld [vmem:[%s15692_s5 + $0x40] ss:$8 sps:$4 sm:$0xff]  }
 0x2a7   : > { %2306 = vst [vmem:[#allocation4] sm:$0x1] %v2305_v2  ;;  %v10224_v54 = vpop.f32.mrf.mxu1  ;;  %v2287_v58 = vmax.f32 %v2248_v4, 0.0  ;;  %v10180_v23 = vadd.f32 %v12336_v13, %v12334_v48  ;;  %v10431_v2 = vld [vmem:[%s15692_s5 + $0x44] ss:$8 sps:$4 sm:$0xff]  }
 0x2a8   : > { %v12417_v10 = vrot.slane %v2314_v0, %v12389_v21  ;;  %v2345_v43 = vcombine.high %v2314_v0, %v2314_v0  ;;  %v12420_v25 = vrot.slane %v2449_v51, %v12389_v21  ;;  %v2482_v41 = vcombine.high %v2449_v51, %v2449_v51  ;;  %5787 = vmatprep.subr.bf16.mxu0 %v10431_v2 }
 0x2a9   : > { %v2251_v31 = vadd.f32 %v10223_v34, %v2171_v6  ;;  %v10225_v62 = vpop.f32.mrf.mxu1  ;;  %v2840_v6 = vld [vmem:[#allocation4 + $0x8] sm:$0x1]  ;;  %5788 = vmatpush1.bf16.msra.mxu0 %v10429_v44 }
 0x2aa   : > { %v10226_v60 = vadd.f32 %v10225_v62, %v10224_v54  ;;  %v12425_v22 = vrot.slane %v2345_v43, %v12389_v21  ;;  %v2329_v1 = vshrl.u32 %v12417_v10, 16  ;;  %v12430_v53 = vcombine.high %v12417_v10, %v12417_v10  ;;  %v10432_v34 = vld [vmem:[%s15692_s5 + $0x140] ss:$8 sps:$4 sm:$0xff]   ;;  %v10434_v54 = vld [vmem:[%s15692_s5 + $0x144] ss:$8 sps:$4 sm:$0xff]  }
 0x2ab   : > { %v2288_v14 = vmax.f32 %v2251_v31, 0.0  ;;  %v10227_v9 = vpop.f32.mrf.mxu1  ;;  %v12434_v61 = vcombine.high %v12420_v25, %v12420_v25  ;;  %v12444_v50 = vrot.slane %v2482_v41, %v12389_v21  ;;  %v2468_v12 = vshrl.u32 %v12420_v25, 16  ;;  %5828 = vmatprep.subr.bf16.mxu1 %v10434_v54  ;;  %v10444_v54 = vld [vmem:[%s15692_s5 + $0x120] ss:$8 sps:$4 sm:$0xff]  }
 0x2ac   : > { %2353 = vrot.lane.b32.xlu0 %v12425_v22, %s11437_s16  ;;  %v12441_v42 = vcombine.high %v12425_v22, %v12425_v22  ;;  %v2398_v29 = vshrl.u32 %v12430_v53, 16  ;;  %v2256_v46 = vadd.f32 %v10226_v60, %v2176_v57  ;;  %v12450_v47 = vrot.slane %v2329_v1, 7  ;;  %5829 = vmatpush1.bf16.msra.mxu1 %v10432_v34  ;;  %v10435_v57 = vld [vmem:[%s15692_s5 + $0x30] ss:$8 sps:$4 sm:$0xff]  }
 0x2ad   : > { %v2297_v15 = vpack.c.bf16 %v2288_v14, %v2287_v58  ;;  %v9385_v24 = vpack.c.bf16 %v2288_v14, %v2288_v14  ;;  %v10228_v36 = vpop.f32.mrf.mxu1  ;;  %v2531_v28 = vshrl.u32 %v12434_v61, 16  ;;  %v12464_v7 = vcombine.high %v12444_v50, %v12444_v50 }
 0x2ae   : > { %v10229_v16 = vadd.f32 %v10228_v36, %v10227_v9  ;;  %2413 = vrot.lane.b32.xlu1 %v12441_v42, %s11437_s16  ;;  %15951 = vst [vmem:[#allocation8_spill] sm:$0xff] %v12450_v47  ;;  %v12466_v40 = vrot.slane %v2398_v29, 7  ;;  %v2289_v0 = vmax.f32 %v2256_v46, 0.0  ;;  %v15739_v48 = vrot.slane %v12450_v47, 1 }
 0x2af   : > { %v2576_v63 = vsel %vm12398_vm3, %v2297_v15, %v2575_v39  ;;  %v2585_v27 = vrot.slane %v2297_v15, %v12389_v21  ;;  %v10230_v17 = vpop.f32.mrf.mxu1  ;;  %v12458_v49 = vrot.slane %v9385_v24, %v12389_v21  ;;  %v12486_v13 = vrot.slane %v2468_v12, 7  ;;  %v10437_v39 = vld [vmem:[%s15692_s5 + $0x34] ss:$8 sps:$4 sm:$0xff]  }
 0x2b0   : > { %2577 = vst [vmem:[#allocation4 + $0x4] sm:$0x1] %v2576_v63  ;;  %v2259_v19 = vadd.f32 %v10229_v16, %v2179_v8  ;;  %2490 = vrot.lane.b32.xlu0 %v12444_v50, %s11437_s16  ;;  %15952 = vst [vmem:[#allocation9_spill] sm:$0xff] %v12466_v40  ;;  %v12488_v33 = vrot.slane %v2531_v28, 7  ;;  %v15738_v31 = vrot.slane %v12466_v40, 1  ;;  %v2184_v62 = vadd.f32 %v10180_v23, %v12357_v45 }
 0x2b1   : > { %v12473_v26 = vrot.slane %v2585_v27, %v12389_v21  ;;  %v10231_v59 = vpop.f32.mrf.mxu1  ;;  %15953 = vst [vmem:[#allocation10_spill] sm:$0xff] %v12486_v13  ;;  %v2614_v43 = vcombine.high %v2585_v27, %v2585_v27  ;;  %v12502_v41 = vrot.slane %v12458_v49, %v12389_v21  ;;  %v2187_v1 = vadd.f32 %v10183_v56, %v12357_v45  ;;  %v10438_v63 = vld [vmem:[%s15692_s5 + $0x130] ss:$8 sps:$4 sm:$0xff]   ;;  %v10440_v27 = vld [vmem:[%s15692_s5 + $0x134] ss:$8 sps:$4 sm:$0xff]  }
 0x2b2   : > { %v12481_v51 = vmax.f32 %v2259_v19, 0.0  ;;  %2546 = vrot.lane.b32.xlu1 %v12464_v7, %s11437_s16  ;;  %v10232_v11 = vadd.f32 %v10231_v59, %v10230_v17  ;;  %15954 = vst [vmem:[#allocation11_spill] sm:$0xff] %v12488_v33  ;;  %v15737_v14 = vrot.slane %v12486_v13, 1  ;;  %v15736_v36 = vrot.slane %v12488_v33, 1  ;;  %5789 = vmatprep.subr.bf16.mxu0 %v10437_v39  ;;  %v10446_v19 = vld [vmem:[%s15692_s5 + $0x124] ss:$8 sps:$4 sm:$0xff]  }
 0x2b3   : > { %v10233_v37 = vpop.f32.mrf.mxu1  ;;  %v12492_v4 = vcombine.high %v12473_v26, %v12473_v26  ;;  %v2600_v9 = vshrl.u32 %v12473_v26, 16  ;;  %v10186_v46 = vadd.f32 %v12344_v18, %v12342_v30  ;;  %v12535_v16 = vrot.slane %v2614_v43, %v12389_v21  ;;  %v10443_v30 = vld [vmem:[%s15692_s5 + $0x24] ss:$8 sps:$4 sm:$0xff]   ;;  %5790 = vmatpush1.bf16.msra.mxu0 %v10435_v57  ;;  %5830 = vmatprep.subr.bf16.mxu1 %v10440_v27 }
 0x2b4   : > { %v12505_v20 = vpack.c.bf16 %v12481_v51, %v2289_v0  ;;  %2333 = vrot.lane.b32.xlu0 %v15739_v48, %s11439_s25  ;;  %v2264_v8 = vadd.f32 %v10232_v11, %v2184_v62  ;;  %v12539_v12 = vcombine.high %v12502_v41, %v12502_v41  ;;  %v10189_v18 = vadd.f32 %v12348_v5, %v12346_v35  ;;  %v10441_v35 = vld [vmem:[%s15692_s5 + $0x20] ss:$8 sps:$4 sm:$0xff]   ;;  %v3316_v33 = vld [vmem:[#allocation4 + $0xf] sm:$0x1] }
 0x2b5   : > { %v10234_v60 = vpop.f32.mrf.mxu1  ;;  %v2663_v29 = vshrl.u32 %v12492_v4, 16  ;;  %v12558_v56 = vrot.slane %v2600_v9, 7  ;;  %v2733_v59 = vshrl.u32 %v12502_v41, 16  ;;  %5791 = vmatprep.subr.bf16.mxu0 %v10443_v30  ;;  %v2192_v0 = vadd.f32 %v10186_v46, %v12357_v45  ;;  %5831 = vmatpush1.bf16.msra.mxu1 %v10438_v63 }
 0x2b6   : > { %v2841_v58 = vsel %vm12398_vm3, %v12505_v20, %v2840_v6  ;;  %2402 = vrot.lane.b32.xlu1 %v15738_v31, %s11439_s25  ;;  %v10235_v15 = vadd.f32 %v10234_v60, %v10233_v37  ;;  %v2291_v5 = vmax.f32 %v2264_v8, 0.0  ;;  %v3105_v6 = vld [vmem:[#allocation4 + $0xc] sm:$0x1]  ;;  %v12571_v11 = vcombine.high %v12535_v16, %v12535_v16  ;;  %5832 = vmatprep.subr.bf16.mxu1 %v10446_v19  ;;  %v2521_v31 = vld [vmem:[#allocation4 + $0x3] sm:$0x1] }
 0x2b7   : > { %2842 = vst [vmem:[#allocation4 + $0x8] sm:$0x1] %v2841_v58  ;;  %v10236_v24 = vpop.f32.mrf.mxu1  ;;  %15955 = vst [vmem:[#allocation12_spill] sm:$0xff] %v12558_v56  ;;  %v12573_v37 = vrot.slane %v2663_v29, 7  ;;  %v2796_v34 = vshrl.u32 %v12539_v12, 16  ;;  %v2195_v43 = vadd.f32 %v10189_v18, %v12357_v45  ;;  %v10192_v62 = vadd.f32 %v12352_v32, %v12350_v38  ;;  %5792 = vmatpush1.bf16.msra.mxu0 %v10441_v35 }
 0x2b8   : > { %2472 = vrot.lane.b32.xlu0 %v15737_v14, %s11439_s25  ;;  %v2267_v17 = vadd.f32 %v10235_v15, %v2187_v1  ;;  %v10449_v58 = vld [vmem:[%s15692_s5 + $0x14] ss:$8 sps:$4 sm:$0xff]   ;;  %v15735_v39 = vrot.slane %v12558_v56, 1  ;;  %v12591_v8 = vrot.slane %v2733_v59, 7  ;;  %v10447_v38 = vld [vmem:[%s15692_s5 + $0x10] ss:$8 sps:$4 sm:$0xff]   ;;  %v2747_v32 = vcombine.high %v12458_v49, %v12458_v49 }
 0x2b9   : > { %v10237_v28 = vpop.f32.mrf.mxu1  ;;  %15956 = vst [vmem:[#allocation13_spill] sm:$0xff] %v12573_v37  ;;  %5793 = vmatprep.subr.bf16.mxu0 %v10449_v58  ;;  %v10452_v29 = vld [vmem:[%s15692_s5 + $0x114] ss:$8 sps:$4 sm:$0xff]   ;;  %v15734_v63 = vrot.slane %v12573_v37, 1  ;;  %v12608_v27 = vrot.slane %v2796_v34, 7  ;;  %5833 = vmatpush1.bf16.msra.mxu1 %v10444_v54  ;;  %v2200_v30 = vadd.f32 %v10192_v62, %v12357_v45 }
 0x2ba   : > { %v10238_v23 = vadd.f32 %v10237_v28, %v10236_v24  ;;  %2535 = vrot.lane.b32.xlu1 %v15736_v36, %s11439_s25  ;;  %v12564_v44 = vmax.f32 %v2267_v17, 0.0  ;;  %15957 = vst [vmem:[#allocation14_spill] sm:$0xff] %v12591_v8  ;;  %v10450_v49 = vld [vmem:[%s15692_s5 + $0x110] ss:$8 sps:$4 sm:$0xff]   ;;  %v2368_v17 = vshrl.u32 %v12425_v22, 16  ;;  %5834 = vmatprep.subr.bf16.mxu1 %v10452_v29  ;;  %v15733_v45 = vrot.slane %v12591_v8, 1 }
 0x2bb   : > { %v10239_v2 = vpop.f32.mrf.mxu1  ;;  %15958 = vst [vmem:[#allocation15_spill] sm:$0xff] %v12608_v27  ;;  %v10455_v28 = vld [vmem:[%s15692_s5 + $0x4] ss:$8 sps:$4 sm:$0xff]   ;;  %5794 = vmatpush1.bf16.msra.mxu0 %v10447_v38  ;;  %v10461_v34 = vld [vmem:[%s15692_s5 + $0xf4] ss:$8 sps:$4 sm:$0xff]   ;;  %v15732_v62 = vrot.slane %v12608_v27, 1 }
 0x2bc   : > { %2622 = vrot.lane.b32.xlu0 %v12535_v16, %s11437_s16  ;;  %v12583_v60 = vpack.c.bf16 %v12564_v44, %v2291_v5  ;;  %v2272_v9 = vadd.f32 %v10238_v23, %v2192_v0  ;;  %v10458_v19 = vld [vmem:[%s15692_s5 + $0x104] ss:$8 sps:$4 sm:$0xff]   ;;  %v10453_v5 = vld [vmem:[%s15692_s5] ss:$8 sps:$4 sm:$0xff]   ;;  %5795 = vmatprep.subr.bf16.mxu0 %v10455_v28  ;;  %v10464_v29 = vld [vmem:[%s15692_s5 + $0x1f4] ss:$8 sps:$4 sm:$0xff]  }
 0x2bd   : > { %v10240_v1 = vpop.f32.mrf.mxu1  ;;  %5835 = vmatpush1.bf16.msra.mxu1 %v10450_v49  ;;  %v3635_v49 = vld [vmem:[#allocation4 + $0x14] sm:$0x1]  ;;  %v2458_v14 = vld [vmem:[#allocation4 + $0x2] sm:$0x1]  ;;  %v3051_v8 = vld [vmem:[#allocation4 + $0xb] sm:$0x1] }
 0x2be   : > { %v10241_v57 = vadd.f32 %v10240_v1, %v10239_v2  ;;  %2678 = vrot.lane.b32.xlu1 %v12571_v11, %s11437_s16  ;;  %v3106_v15 = vsel %vm12398_vm3, %v12583_v60, %v3105_v6  ;;  %v2293_v23 = vmax.f32 %v2272_v9, 0.0  ;;  %v3370_v2 = vld [vmem:[#allocation4 + $0x10] sm:$0x1]  ;;  %v12631_v6 = vrot.slane %v2747_v32, %v12389_v21  ;;  %v10456_v9 = vld [vmem:[%s15692_s5 + $0x100] ss:$8 sps:$4 sm:$0xff]   ;;  %5836 = vmatprep.subr.bf16.mxu1 %v10458_v19 }
 0x2bf   : > { %v10242_v24 = vpop.f32.mrf.mxu1  ;;  %3107 = vst [vmem:[#allocation4 + $0xc] sm:$0x1] %v3106_v15  ;;  %v2426_v1 = vshrl.u32 %v12441_v42, 16  ;;  %v12653_v32 = vrot.slane %v2368_v17, 7  ;;  %v2503_v15 = vshrl.u32 %v12444_v50, 16  ;;  %5796 = vmatpush1.bf16.msra.mxu0 %v10453_v5  ;;  %v2559_v17 = vshrl.u32 %v12464_v7, 16 }
 0x2c0   : > { %v2275_v46 = vadd.f32 %v10241_v57, %v2195_v43  ;;  %2604 = vrot.lane.b32.xlu0 %v15735_v39, %s11439_s25  ;;  %5797 = vmatprep.subr.bf16.mxu0 %v10461_v34  ;;  %v10462_v19 = vld [vmem:[%s15692_s5 + $0x1f0] ss:$8 sps:$4 sm:$0xff]   ;;  %v2635_v5 = vshrl.u32 %v12535_v16, 16  ;;  %v10470_v34 = vld [vmem:[%s15692_s5 + $0x1e4] ss:$8 sps:$4 sm:$0xff]   ;;  %v2459_v27 = vsel %vm12398_vm3, %v12420_v25, %v2458_v14 }
 0x2c1   : > { %v10243_v18 = vpop.f32.mrf.mxu1  ;;  %5837 = vmatpush1.bf16.msra.mxu1 %v10456_v9  ;;  %v2691_v9 = vshrl.u32 %v12571_v11, 16  ;;  %v10491_v39 = vld [vmem:[%s15692_s5 + $0xa4] ss:$8 sps:$4 sm:$0xff]   ;;  %2460 = vst [vmem:[#allocation4 + $0x2] sm:$0x1] %v2459_v27 }
 0x2c2   : > { %v12621_v59 = vmax.f32 %v2275_v46, 0.0  ;;  %v10244_v35 = vadd.f32 %v10243_v18, %v10242_v24  ;;  %2667 = vrot.lane.b32.xlu1 %v15734_v63, %s11439_s25  ;;  %v10459_v24 = vld [vmem:[%s15692_s5 + $0xf0] ss:$8 sps:$4 sm:$0xff]   ;;  %v10467_v46 = vld [vmem:[%s15692_s5 + $0xe4] ss:$8 sps:$4 sm:$0xff]   ;;  %v12671_v18 = vrot.slane %v2426_v1, 7  ;;  %5838 = vmatprep.subr.bf16.mxu1 %v10464_v29 }
 0x2c3   : > { %v10245_v0 = vpop.f32.mrf.mxu1  ;;  %5798 = vmatpush2.bf16.msra.mxu0 %v10459_v24  ;;  %v2768_v24 = vshrl.u32 %v12631_v6, 16  ;;  %v10471_v29 = vld [vmem:[%s15692_s5 + $0xd0] ss:$8 sps:$4 sm:$0xff]   ;;  %v3183_v37 = vld [vmem:[#allocation4 + $0xd] sm:$0x1] }
 0x2c4   : > { %v12637_v54 = vpack.c.bf16 %v12621_v59, %v2293_v23  ;;  %v2280_v43 = vadd.f32 %v10244_v35, %v2200_v30  ;;  %2737 = vrot.lane.b32.xlu0 %v15733_v45, %s11439_s25  ;;  %v12669_v30 = vcombine.high %v12631_v6, %v12631_v6  ;;  %v15746_v23 = vrot.slane %v12653_v32, 1  ;;  %5799 = vmatprep.subr.bf16.mxu0 %v10467_v46  ;;  %v3253_v56 = vld [vmem:[#allocation4 + $0xe] sm:$0x1] }
 0x2c5   : > { %v10246_v58 = vpop.f32.mrf.mxu1  ;;  %v12682_v35 = vrot.slane %v2503_v15, 7  ;;  %v15745_v1 = vrot.slane %v12671_v18, 1  ;;  %5839 = vmatpush2.bf16.msra.mxu1 %v10462_v19  ;;  %v12711_v15 = vrot.slane %v2635_v5, 7  ;;  %v2850_v46 = vrot.slane %v12505_v20, %v12389_v21  ;;  %v10479_v19 = vld [vmem:[%s15692_s5 + $0xc4] ss:$8 sps:$4 sm:$0xff]  }
 0x2c6   : > { %v3371_v57 = vsel %vm12398_vm3, %v12637_v54, %v3370_v2  ;;  %v2295_v38 = vmax.f32 %v2280_v43, 0.0  ;;  %2800 = vrot.lane.b32.xlu1 %v15732_v62, %s11439_s25  ;;  %v10465_v2 = vld [vmem:[%s15692_s5 + $0xe0] ss:$8 sps:$4 sm:$0xff]   ;;  %v10473_v43 = vld [vmem:[%s15692_s5 + $0xd4] ss:$8 sps:$4 sm:$0xff]   ;;  %v12701_v58 = vrot.slane %v2559_v17, 7  ;;  %5840 = vmatprep.subr.bf16.mxu1 %v10470_v34  ;;  %v9388_v34 = vpack.c.bf16 %v12621_v59, %v12621_v59 }
 0x2c7   : > { %3372 = vst [vmem:[#allocation4 + $0x10] sm:$0x1] %v3371_v57  ;;  %v10468_v57 = vld [vmem:[%s15692_s5 + $0x1e0] ss:$8 sps:$4 sm:$0xff]   ;;  %5800 = vmatpush2.bf16.msra.mxu0 %v10465_v2  ;;  %v10476_v17 = vld [vmem:[%s15692_s5 + $0x1d4] ss:$8 sps:$4 sm:$0xff]   ;;  %v9387_v2 = vpack.c.bf16 %v12564_v44, %v12564_v44  ;;  %v12762_v62 = vrot.slane %v12583_v60, %v12389_v21  ;;  %v12775_v45 = vrot.slane %v12637_v54, %v12389_v21 }
 0x2c8   : > { %2755 = vrot.lane.b32.xlu0 %v12631_v6, %s11437_s16  ;;  %v12674_v28 = vpack.c.bf16 %v2295_v38, %v2295_v38  ;;  %v15744_v38 = vrot.slane %v12682_v35, 1  ;;  %5801 = vmatprep.subr.bf16.mxu0 %v10473_v43  ;;  %v15743_v5 = vrot.slane %v12701_v58, 1  ;;  %v12731_v20 = vrot.slane %v2691_v9, 7  ;;  %v10477_v44 = vld [vmem:[%s15692_s5 + $0xc0] ss:$8 sps:$4 sm:$0xff]  }
 0x2c9   : > { %5841 = vmatpush2.bf16.msra.mxu1 %v10468_v57  ;;  %v15742_v43 = vrot.slane %v12711_v15, 1  ;;  %v12745_v9 = vrot.slane %v2768_v24, 7  ;;  %v12751_v57 = vrot.slane %v2850_v46, %v12389_v21  ;;  %v10482_v59 = vld [vmem:[%s15692_s5 + $0x1c4] ss:$8 sps:$4 sm:$0xff]   ;;  %v10485_v24 = vld [vmem:[%s15692_s5 + $0xb4] ss:$8 sps:$4 sm:$0xff]   ;;  %v12805_v36 = vrot.slane %v12762_v62, %v12389_v21 }
 0x2ca   : > { %15959 = vst [vmem:[#allocation16_spill] sm:$0xff] %v12674_v28  ;;  %2811 = vrot.lane.b32.xlu1 %v12669_v30, %s11437_s16  ;;  %v3636_v0 = vsel %vm12398_vm3, %v12674_v28, %v3635_v49  ;;  %v9386_v49 = vpack.c.bf16 %v12481_v51, %v12481_v51  ;;  %15960 = vst [vmem:[#allocation17_spill] sm:$0xff] %v12731_v20  ;;  %v2824_v51 = vshrl.u32 %v12669_v30, 16  ;;  %5842 = vmatprep.subr.bf16.mxu1 %v10476_v17  ;;  %v10480_v60 = vld [vmem:[%s15692_s5 + $0x1c0] ss:$8 sps:$4 sm:$0xff]  }
 0x2cb   : > { %3637 = vst [vmem:[#allocation4 + $0x14] sm:$0x1] %v3636_v0  ;;  %v10474_v0 = vld [vmem:[%s15692_s5 + $0x1d0] ss:$8 sps:$4 sm:$0xff]   ;;  %15961 = vst [vmem:[#allocation18_spill] sm:$0xff] %v12745_v9  ;;  %5802 = vmatpush2.bf16.msra.mxu0 %v10471_v29  ;;  %v2879_v29 = vcombine.high %v2850_v46, %v2850_v46  ;;  %v12781_v46 = vrot.slane %v9388_v34, %v12389_v21  ;;  %v12792_v63 = vcombine.high %v12751_v57, %v12751_v57 }
 0x2cc   : > { %2372 = vrot.lane.b32.xlu0 %v15746_v23, %s11440_s29  ;;  %15962 = vst [vmem:[#allocation19_spill] sm:$0xff] %v12751_v57  ;;  %v2979_v55 = vrot.slane %v9386_v49, %v12389_v21  ;;  %5803 = vmatprep.subr.bf16.mxu0 %v10479_v19  ;;  %v15740_v49 = vrot.slane %v12731_v20, 1  ;;  %v12768_v17 = vrot.slane %v2824_v51, 7  ;;  %v12771_v19 = vrot.slane %v9387_v2, %v12389_v21  ;;  %v2388_v2 = vld [vmem:[#allocation4 + $0x1] sm:$0x1] }
 0x2cd   : > { %5843 = vmatpush2.bf16.msra.mxu1 %v10474_v0  ;;  %v15741_v51 = vrot.slane %v12745_v9, 1  ;;  %v10483_v54 = vld [vmem:[%s15692_s5 + $0xb0] ss:$8 sps:$4 sm:$0xff]   ;;  %v10488_v34 = vld [vmem:[%s15692_s5 + $0x1b4] ss:$8 sps:$4 sm:$0xff]   ;;  %v2928_v52 = vshrl.u32 %v12792_v63, 16 }
 0x2ce   : > { %2430 = vrot.lane.b32.xlu1 %v15745_v1, %s11440_s29  ;;  %15963 = vst [vmem:[#allocation20_spill] sm:$0xff] %v12768_v17  ;;  %v3012_v0 = vcombine.high %v2979_v55, %v2979_v55  ;;  %5844 = vmatprep.subr.bf16.mxu1 %v10482_v59  ;;  %v15750_v59 = vrot.slane %v12768_v17, 1  ;;  %v12816_v48 = vrot.slane %v12771_v19, %v12389_v21  ;;  %v2786_v1 = vld [vmem:[#allocation4 + $0x7] sm:$0x1]  ;;  %v3448_v17 = vld [vmem:[#allocation4 + $0x11] sm:$0x1] }
 0x2cf   : > { %5804 = vmatpush2.bf16.msra.mxu0 %v10477_v44  ;;  %v12801_v44 = vrot.slane %v2979_v55, %v12389_v21  ;;  %v12820_v55 = vrot.slane %v12775_v45, %v12389_v21  ;;  %v12905_v20 = vrot.slane %v2928_v52, 7 }
 0x2d0   : > { %2507 = vrot.lane.b32.xlu0 %v15744_v38, %s11440_s29  ;;  %5805 = vmatprep.subr.bf16.mxu0 %v10485_v24  ;;  %v12812_v24 = vrot.slane %v2879_v29, %v12389_v21  ;;  %v10486_v29 = vld [vmem:[%s15692_s5 + $0x1b0] ss:$8 sps:$4 sm:$0xff]   ;;  %v12831_v38 = vrot.slane %v12781_v46, %v12389_v21  ;;  %v12840_v23 = vrot.slane %v3012_v0, %v12389_v21 }
 0x2d1   : > { %5845 = vmatpush2.bf16.msra.mxu1 %v10480_v60  ;;  %v2918_v60 = vld [vmem:[#allocation4 + $0x9] sm:$0x1]  ;;  %v12860_v14 = vcombine.high %v12801_v44, %v12801_v44  ;;  %v12873_v40 = vcombine.high %v12816_v48, %v12816_v48  ;;  %v12877_v47 = vcombine.high %v12820_v55, %v12820_v55  ;;  %v2998_v28 = vshrl.u32 %v12801_v44, 16  ;;  %15965 = vst [vmem:[#allocation22_spill] sm:$0xff] %v12905_v20 }
 0x2d2   : > { %2563 = vrot.lane.b32.xlu1 %v15743_v5, %s11440_s29  ;;  %v2723_v5 = vld [vmem:[#allocation4 + $0x6] sm:$0x1]  ;;  %5846 = vmatprep.subr.bf16.mxu1 %v10488_v34  ;;  %v12856_v0 = vcombine.high %v12812_v24, %v12812_v24  ;;  %v2522_v34 = vsel %vm12398_vm3, %v12434_v61, %v2521_v31  ;;  %v10492_v31 = vld [vmem:[%s15692_s5 + $0x1a0] ss:$8 sps:$4 sm:$0xff]   ;;  %v12903_v9 = vcombine.high %v12840_v23, %v12840_v23 }
 0x2d3   : > { %5806 = vmatpush2.bf16.msra.mxu0 %v10483_v54  ;;  %v10497_v54 = vld [vmem:[%s15692_s5 + $0x94] ss:$8 sps:$4 sm:$0xff]   ;;  %2523 = vst [vmem:[#allocation4 + $0x3] sm:$0x1] %v2522_v34  ;;  %v10495_v34 = vld [vmem:[%s15692_s5 + $0x90] ss:$8 sps:$4 sm:$0xff]  }
 0x2d4   : > { %2639 = vrot.lane.b32.xlu0 %v15742_v43, %s11440_s29  ;;  %v2653_v43 = vld [vmem:[#allocation4 + $0x5] sm:$0x1]  ;;  %5807 = vmatprep.subr.bf16.mxu0 %v10491_v39  ;;  %v12864_v39 = vcombine.high %v12805_v36, %v12805_v36 }
 0x2d5   : > { %v2654_v27 = vsel %vm12398_vm3, %v12492_v4, %v2653_v43  ;;  %5847 = vmatpush2.bf16.msra.mxu1 %v10486_v29  ;;  %v2724_v43 = vsel %vm12398_vm3, %v12502_v41, %v2723_v5  ;;  %v2787_v29 = vsel %vm12398_vm3, %v12539_v12, %v2786_v1  ;;  %v10500_v1 = vld [vmem:[%s15692_s5 + $0x194] ss:$8 sps:$4 sm:$0xff]   ;;  %v2919_v5 = vsel %vm12398_vm3, %v12792_v63, %v2918_v60  ;;  %v10498_v60 = vld [vmem:[%s15692_s5 + $0x190] ss:$8 sps:$4 sm:$0xff]  }
 0x2d6   : > { %2695 = vrot.lane.b32.xlu1 %v15740_v49, %s11440_s29  ;;  %v2865_v49 = vshrl.u32 %v12751_v57, 16  ;;  %v12890_v57 = vcombine.high %v12831_v38, %v12831_v38  ;;  %2655 = vst [vmem:[#allocation4 + $0x5] sm:$0x1] %v2654_v27  ;;  %2725 = vst [vmem:[#allocation4 + $0x6] sm:$0x1] %v2724_v43  ;;  %v3061_v27 = vshrl.u32 %v12860_v14, 16 }
 0x2d7   : > { %2788 = vst [vmem:[#allocation4 + $0x7] sm:$0x1] %v2787_v29  ;;  %2920 = vst [vmem:[#allocation4 + $0x9] sm:$0x1] %v2919_v5  ;;  %v12940_v43 = vrot.slane %v2998_v28, 7 }
 0x2d8   : > { %2772 = vrot.lane.b32.xlu0 %v15741_v51, %s11440_s29  ;;  %v2389_v51 = vsel %vm12398_vm3, %v12430_v53, %v2388_v2  ;;  %v10489_v2 = vld [vmem:[%s15692_s5 + $0xa0] ss:$8 sps:$4 sm:$0xff]   ;;  %v12869_v13 = vrot.slane %v2865_v49, 7  ;;  %v3518_v49 = vld [vmem:[#allocation4 + $0x12] sm:$0x1]  ;;  %v12963_v5 = vrot.slane %v3061_v27, 7 }
 0x2d9   : > { %2390 = vst [vmem:[#allocation4 + $0x1] sm:$0x1] %v2389_v51  ;;  %v10494_v51 = vld [vmem:[%s15692_s5 + $0x1a4] ss:$8 sps:$4 sm:$0xff]   ;;  %5808 = vmatpush2.bf16.msra.mxu0 %v10489_v2  ;;  %v3581_v2 = vld [vmem:[#allocation4 + $0x13] sm:$0x1] }
 0x2da   : > { %2828 = vrot.lane.b32.xlu1 %v15750_v59, %s11440_s29  ;;  %v2988_v59 = vld [vmem:[#allocation4 + $0xa] sm:$0x1]  ;;  %15964 = vst [vmem:[#allocation21_spill] sm:$0xff] %v12869_v13  ;;  %5848 = vmatprep.subr.bf16.mxu1 %v10494_v51  ;;  %v3052_v51 = vsel %vm12398_vm3, %v12860_v14, %v3051_v8  ;;  %v3317_v8 = vsel %vm12398_vm3, %v12873_v40, %v3316_v33  ;;  %15966 = vst [vmem:[#allocation23_spill] sm:$0xff] %v12940_v43  ;;  %v10503_v33 = vld [vmem:[%s15692_s5 + $0x84] ss:$8 sps:$4 sm:$0xff]  }
 0x2db   : > { %5809 = vmatprep.subr.bf16.mxu0 %v10497_v54  ;;  %v2989_v52 = vsel %vm12398_vm3, %v12801_v44, %v2988_v59  ;;  %v3184_v54 = vsel %vm12398_vm3, %v12864_v39, %v3183_v37  ;;  %5849 = vmatpush2.bf16.msra.mxu1 %v10492_v31  ;;  %3053 = vst [vmem:[#allocation4 + $0xb] sm:$0x1] %v3052_v51  ;;  %v15770_v31 = vrot.slane %v12869_v13, 1  ;;  %3318 = vst [vmem:[#allocation4 + $0xf] sm:$0x1] %v3317_v8 }
 0x2dc   : > { %2887 = vrot.lane.b32.xlu0 %v12812_v24, %s11437_s16  ;;  %2990 = vst [vmem:[#allocation4 + $0xa] sm:$0x1] %v2989_v52  ;;  %3185 = vst [vmem:[#allocation4 + $0xd] sm:$0x1] %v3184_v54  ;;  %v3254_v59 = vsel %vm12398_vm3, %v12816_v48, %v3253_v56  ;;  %v3449_v37 = vsel %vm12398_vm3, %v12877_v47, %v3448_v17  ;;  %v10501_v56 = vld [vmem:[%s15692_s5 + $0x80] ss:$8 sps:$4 sm:$0xff]   ;;  %v3519_v17 = vsel %vm12398_vm3, %v12831_v38, %v3518_v49 }
 0x2dd   : > { %5810 = vmatpush2.bf16.msra.mxu0 %v10495_v34  ;;  %3255 = vst [vmem:[#allocation4 + $0xe] sm:$0x1] %v3254_v59  ;;  %3450 = vst [vmem:[#allocation4 + $0x11] sm:$0x1] %v3449_v37  ;;  %v3582_v28 = vsel %vm12398_vm3, %v12890_v57, %v3581_v2  ;;  %5850 = vmatprep.subr.bf16.mxu1 %v10500_v1  ;;  %v10506_v29 = vld [vmem:[%s15692_s5 + $0x184] ss:$8 sps:$4 sm:$0xff]   ;;  %v3144_v34 = vcombine.high %v12762_v62, %v12762_v62 }
 0x2de   : > { %2943 = vrot.lane.b32.xlu1 %v12856_v0, %s11437_s16  ;;  %3520 = vst [vmem:[#allocation4 + $0x12] sm:$0x1] %v3519_v17  ;;  %3583 = vst [vmem:[#allocation4 + $0x13] sm:$0x1] %v3582_v28  ;;  %v15769_v49 = vrot.slane %v12905_v20, 1  ;;  %5811 = vmatprep.subr.bf16.mxu0 %v10503_v33  ;;  %v15768_v62 = vrot.slane %v12940_v43, 1 }
 0x2df   : > { %15967 = vst [vmem:[#allocation24_spill] sm:$0xff] %v12963_v5  ;;  %5851 = vmatpush2.bf16.msra.mxu1 %v10498_v60  ;;  %v10504_v1 = vld [vmem:[%s15692_s5 + $0x180] ss:$8 sps:$4 sm:$0xff]   ;;  %v10509_v2 = vld [vmem:[%s15692_s5 + $0x274] ss:$8 sps:$4 sm:$0xff]   ;;  %v3130_v52 = vshrl.u32 %v12805_v36, 16  ;;  %v12984_v54 = vrot.slane %v3144_v34, %v12389_v21 }
 0x2e0   : > { %3020 = vrot.lane.b32.xlu0 %v12840_v23, %s11437_s16  ;;  %5852 = vmatprep.subr.bf16.mxu1 %v10506_v29  ;;  %v10512_v27 = vld [vmem:[%s15692_s5 + $0x374] ss:$8 sps:$4 sm:$0xff]   ;;  %v15767_v51 = vrot.slane %v12963_v5, 1  ;;  %v3193_v60 = vshrl.u32 %v12864_v39, 16  ;;  %v3263_v8 = vshrl.u32 %v12816_v48, 16  ;;  %v3326_v33 = vshrl.u32 %v12873_v40, 16 }
 0x2e1   : > { %5812 = vmatpush2.bf16.msra.mxu0 %v10501_v56  ;;  %v12990_v59 = vrot.slane %v3130_v52, 7  ;;  %v12997_v37 = vcombine.high %v12984_v54, %v12984_v54  ;;  %v3277_v29 = vcombine.high %v12771_v19, %v12771_v19  ;;  %v2900_v52 = vshrl.u32 %v12812_v24, 16 }
 0x2e2   : > { %3076 = vrot.lane.b32.xlu1 %v12903_v9, %s11437_s16  ;;  %5863 = vmatprep.subr.bf16.mxu0 %v10509_v2  ;;  %v12999_v56 = vrot.slane %v3193_v60, 7  ;;  %v13005_v28 = vrot.slane %v3263_v8, 7  ;;  %v2956_v60 = vshrl.u32 %v12856_v0, 16  ;;  %v3409_v5 = vcombine.high %v12775_v45, %v12775_v45 }
 0x2e3   : > { %5853 = vmatpush2.bf16.msra.mxu1 %v10504_v1  ;;  %15968 = vst [vmem:[#allocation25_spill] sm:$0xff] %v12990_v59  ;;  %v15766_v17 = vrot.slane %v12990_v59, 1  ;;  %v13013_v1 = vrot.slane %v3326_v33, 7  ;;  %v13031_v8 = vrot.slane %v2900_v52, 7  ;;  %v3033_v33 = vshrl.u32 %v12840_v23, 16 }
 0x2e4   : > { %2869 = vrot.lane.b32.xlu0 %v15770_v31, %s11439_s25  ;;  %5904 = vmatprep.subr.bf16.mxu1 %v10512_v27  ;;  %15969 = vst [vmem:[#allocation26_spill] sm:$0xff] %v12999_v56  ;;  %15970 = vst [vmem:[#allocation27_spill] sm:$0xff] %v13005_v28  ;;  %v15764_v34 = vrot.slane %v12999_v56, 1  ;;  %v15763_v2 = vrot.slane %v13005_v28, 1  ;;  %v13025_v27 = vrot.slane %v3277_v29, %v12389_v21  ;;  %v3089_v29 = vshrl.u32 %v12903_v9, 16 }
 0x2e5   : > { %15971 = vst [vmem:[#allocation28_spill] sm:$0xff] %v13013_v1  ;;  %v15765_v19 = vrot.slane %v13013_v1, 1  ;;  %v13046_v52 = vrot.slane %v3033_v33, 7  ;;  %v3395_v28 = vshrl.u32 %v12820_v55, 16  ;;  %v3458_v56 = vshrl.u32 %v12877_v47, 16 }
 0x2e6   : > { %2932 = vrot.lane.b32.xlu1 %v15769_v49, %s11439_s25  ;;  %v3298_v31 = vshrl.u32 %v13025_v27, 16  ;;  %v3528_v59 = vshrl.u32 %v12831_v38, 16  ;;  %v3591_v43 = vshrl.u32 %v12890_v57, 16  ;;  %v3542_v45 = vcombine.high %v12781_v46, %v12781_v46 }
 0x2e7   : > { %v15775_v49 = vrot.slane %v13046_v52, 1  ;;  %v13115_v20 = vrot.slane %v3409_v5, %v12389_v21 }
 0x2e8   : > { %3002 = vrot.lane.b32.xlu0 %v15768_v62, %s11439_s25  ;;  %v13053_v62 = vrot.slane %v3089_v29, 7 }
 0x2e9   : > { %v3430_v5 = vshrl.u32 %v13115_v20, 16 }
 0x2ea   : > { %3065 = vrot.lane.b32.xlu1 %v15767_v51, %s11439_s25 }
 0x2ec   : > { %3152 = vrot.lane.b32.xlu0 %v12984_v54, %s11437_s16 }
 0x2ee   : > { %3208 = vrot.lane.b32.xlu1 %v12997_v37, %s11437_s16 }
 0x2f0   : > { %3134 = vrot.lane.b32.xlu0 %v15766_v17, %s11439_s25  ;;  %v3165_v17 = vshrl.u32 %v12984_v54, 16 }
 0x2f2   : > { %3197 = vrot.lane.b32.xlu1 %v15764_v34, %s11439_s25  ;;  %v13040_v34 = vrot.slane %v2956_v60, 7  ;;  %v3221_v60 = vshrl.u32 %v12997_v37, 16  ;;  %v13060_v33 = vrot.slane %v3165_v17, 7  ;;  %v13074_v17 = vrot.slane %v3298_v31, 7 }
 0x2f3   : > { %v13088_v31 = vrot.slane %v3395_v28, 7 }
 0x2f4   : > { %3267 = vrot.lane.b32.xlu0 %v15763_v2, %s11439_s25  ;;  %v13038_v2 = vcombine.high %v13025_v27, %v13025_v27  ;;  %v15773_v51 = vrot.slane %v13040_v34, 1  ;;  %v13067_v29 = vrot.slane %v3221_v60, 7 }
 0x2f5   : > { %15972 = vst [vmem:[#allocation29_spill] sm:$0xff] %v13088_v31  ;;  %v15785_v28 = vrot.slane %v13088_v31, 1 }
 0x2f6   : > { %3330 = vrot.lane.b32.xlu1 %v15765_v19, %s11439_s25  ;;  %v15771_v19 = vrot.slane %v13031_v8, 1  ;;  %v3354_v1 = vshrl.u32 %v13038_v2, 16 }
 0x2f8   : > { %3285 = vrot.lane.b32.xlu0 %v13025_v27, %s11437_s16  ;;  %v13081_v60 = vrot.slane %v3354_v1, 7 }
 0x2fa   : > { %3341 = vrot.lane.b32.xlu1 %v13038_v2, %s11437_s16  ;;  %v15788_v1 = vrot.slane %v13081_v60, 1 }
 0x2fc   : > { %2904 = vrot.lane.b32.xlu0 %v15771_v19, %s11440_s29  ;;  %v15777_v19 = vrot.slane %v13053_v62, 1 }
 0x2fe   : > { %2960 = vrot.lane.b32.xlu1 %v15773_v51, %s11440_s29  ;;  %v15780_v51 = vrot.slane %v13060_v33, 1 }
 0x300   : > { %3037 = vrot.lane.b32.xlu0 %v15775_v49, %s11440_s29  ;;  %v15782_v49 = vrot.slane %v13067_v29, 1 }
 0x302   : > { %3093 = vrot.lane.b32.xlu1 %v15777_v19, %s11440_s29  ;;  %v15783_v19 = vrot.slane %v13074_v17, 1 }
 0x304   : > { %3169 = vrot.lane.b32.xlu0 %v15780_v51, %s11440_s29  ;;  %v13097_v51 = vrot.slane %v3458_v56, 7 }
 0x306   : > { %3225 = vrot.lane.b32.xlu1 %v15782_v49, %s11440_s29  ;;  %15973 = vst [vmem:[#allocation30_spill] sm:$0xff] %v13097_v51  ;;  %v13104_v49 = vrot.slane %v3528_v59, 7  ;;  %v15787_v56 = vrot.slane %v13097_v51, 1 }
 0x308   : > { %3302 = vrot.lane.b32.xlu0 %v15783_v19, %s11440_s29  ;;  %15974 = vst [vmem:[#allocation31_spill] sm:$0xff] %v13104_v49  ;;  %v13112_v19 = vrot.slane %v3591_v43, 7  ;;  %v15786_v59 = vrot.slane %v13104_v49, 1  ;;  %v13130_v43 = vrot.slane %v3542_v45, %v12389_v21  ;;  %v13145_v45 = vrot.slane %v3430_v5, 7 }
 0x30a   : > { %3358 = vrot.lane.b32.xlu1 %v15788_v1, %s11440_s29  ;;  %15975 = vst [vmem:[#allocation32_spill] sm:$0xff] %v13112_v19  ;;  %v15789_v46 = vrot.slane %v13112_v19, 1  ;;  %15977 = vst [vmem:[#allocation34_spill] sm:$0xff] %v13145_v45  ;;  %v3563_v1 = vshrl.u32 %v13130_v43, 16  ;;  %v15797_v49 = vrot.slane %v13145_v45, 1 }
 0x30c   : > { %3399 = vrot.lane.b32.xlu0 %v15785_v28, %s11439_s25  ;;  %v13127_v28 = vcombine.high %v13115_v20, %v13115_v20  ;;  %v13156_v51 = vrot.slane %v3563_v1, 7 }
 0x30e   : > { %3462 = vrot.lane.b32.xlu1 %v15787_v56, %s11439_s25  ;;  %v3486_v56 = vshrl.u32 %v13127_v28, 16  ;;  %15979 = vst [vmem:[#allocation36_spill] sm:$0xff] %v13156_v51 }
 0x310   : > { %3532 = vrot.lane.b32.xlu0 %v15786_v59, %s11439_s25  ;;  %v13140_v59 = vcombine.high %v13130_v43, %v13130_v43 }
 0x312   : > { %3595 = vrot.lane.b32.xlu1 %v15789_v46, %s11439_s25  ;;  %15976 = vst [vmem:[#allocation33_spill] sm:$0xff] %v13140_v59  ;;  %v13150_v46 = vrot.slane %v3486_v56, 7  ;;  %v3619_v19 = vshrl.u32 %v13140_v59, 16  ;;  %v15799_v56 = vrot.slane %v13156_v51, 1  ;;  %v2338_v51 = vld [vmem:[#allocation4] sm:$0x1] }
 0x314   : > { %3417 = vrot.lane.b32.xlu0 %v13115_v20, %s11437_s16  ;;  %15978 = vst [vmem:[#allocation35_spill] sm:$0xff] %v13150_v46  ;;  %v15798_v5 = vrot.slane %v13150_v46, 1  ;;  %v13162_v31 = vrot.slane %v3619_v19, 7  ;;  %v10773_v19 = vld [vmem:[%s15692_s5 + $0x6b0] ss:$8 sps:$4 sm:$0xff]  }
 0x316   : > { %3473 = vrot.lane.b32.xlu1 %v13127_v28, %s11437_s16  ;;  %15980 = vst [vmem:[#allocation37_spill] sm:$0xff] %v13162_v31  ;;  %v15803_v1 = vrot.slane %v13162_v31, 1 }
 0x318   : > { %3550 = vrot.lane.b32.xlu0 %v13130_v43, %s11437_s16 }
 0x31a   : > { %3606 = vrot.lane.b32.xlu1 %v13140_v59, %s11437_s16 }
 0x31c   : > { %3434 = vrot.lane.b32.xlu0 %v15797_v49, %s11440_s29 }
 0x31e   : > { %v2354_v13 = vpop.permute.xlu0 %2353  ;;  %3490 = vrot.lane.b32.xlu1 %v15798_v5, %s11440_s29 }
 0x320   : > { %v2414_v3 = vpop.permute.xlu1 %2413  ;;  %3567 = vrot.lane.b32.xlu0 %v15799_v56, %s11440_s29 }
 0x322   : > { %v2491_v49 = vpop.permute.xlu0 %2490  ;;  %3623 = vrot.lane.b32.xlu1 %v15803_v1, %s11440_s29  ;;  %v2405_v1 = vld [vmem:[#allocation4 + $0x1] sm:$0x1] }
 0x324   : > { %v2547_v5 = vpop.permute.xlu1 %2546  ;;  %2322 = vrot.lane.b32.xlu0 %v12417_v10, %s11440_s29  ;;  %v2475_v10 = vld [vmem:[#allocation4 + $0x2] sm:$0x1] }
 0x326   : > { %2391 = vrot.lane.b32.xlu1 %v12430_v53, %s11440_s29  ;;  %v2334_v56 = vpop.permute.xlu0 %2333 }
 0x327   : > { %v2339_v46 = vsel %vm13176_vm12, %v2334_v56, %v2338_v51  ;;  %v2538_v51 = vld [vmem:[#allocation4 + $0x3] sm:$0x1] }
 0x328   : > { %2340 = vst [vmem:[#allocation4] sm:$0x1] %v2339_v46  ;;  %v2403_v31 = vpop.permute.xlu1 %2402  ;;  %2461 = vrot.lane.b32.xlu0 %v12420_v25, %s11440_s29  ;;  %v10785_v25 = vld [vmem:[%s15692_s5 + $0x690] ss:$8 sps:$4 sm:$0xff]  }
 0x329   : > { %v2406_v45 = vsel %vm13176_vm12, %v2403_v31, %v2405_v1 }
 0x32a   : > { %2407 = vst [vmem:[#allocation4 + $0x1] sm:$0x1] %v2406_v45  ;;  %2524 = vrot.lane.b32.xlu1 %v12434_v61, %s11440_s29  ;;  %v2473_v53 = vpop.permute.xlu0 %2472 }
 0x32b   : > { %v2476_v59 = vsel %vm13176_vm12, %v2473_v53, %v2475_v10  ;;  %v2607_v10 = vld [vmem:[#allocation4 + $0x4] sm:$0x1] }
 0x32c   : > { %2477 = vst [vmem:[#allocation4 + $0x2] sm:$0x1] %v2476_v59  ;;  %v2536_v46 = vpop.permute.xlu1 %2535  ;;  %2593 = vrot.lane.b32.xlu0 %v12473_v26, %s11440_s29 }
 0x32d   : > { %v2539_v31 = vsel %vm13176_vm12, %v2536_v46, %v2538_v51 }
 0x32e   : > { %2540 = vst [vmem:[#allocation4 + $0x3] sm:$0x1] %v2539_v31  ;;  %2656 = vrot.lane.b32.xlu1 %v12492_v4, %s11440_s29  ;;  %v2623_v61 = vpop.permute.xlu0 %2622 }
 0x32f   : > { %v2358_v45 = vld [vmem:[#allocation4] sm:$0x1] }
 0x330   : > { %v2359_v59 = vsel %vm13197_vm14, %v2354_v13, %v2358_v45  ;;  %v2679_v56 = vpop.permute.xlu1 %2678  ;;  %2726 = vrot.lane.b32.xlu0 %v12502_v41, %s11440_s29  ;;  %v2670_v41 = vld [vmem:[#allocation4 + $0x5] sm:$0x1]  ;;  %v2740_v45 = vld [vmem:[#allocation4 + $0x6] sm:$0x1] }
 0x331   : > { %2360 = vst [vmem:[#allocation4] sm:$0x1] %v2359_v59  ;;  %v2416_v26 = vld [vmem:[#allocation4 + $0x1] sm:$0x1] }
 0x332   : > { %v2417_v1 = vsel %vm13197_vm14, %v2414_v3, %v2416_v26  ;;  %2789 = vrot.lane.b32.xlu1 %v12539_v12, %s11440_s29  ;;  %v2605_v53 = vpop.permute.xlu0 %2604 }
 0x333   : > { %2418 = vst [vmem:[#allocation4 + $0x1] sm:$0x1] %v2417_v1  ;;  %v2493_v4 = vld [vmem:[#allocation4 + $0x2] sm:$0x1]  ;;  %v2608_v51 = vsel %vm13176_vm12, %v2605_v53, %v2607_v10 }
 0x334   : > { %v2494_v13 = vsel %vm13197_vm14, %v2491_v49, %v2493_v4  ;;  %2609 = vst [vmem:[#allocation4 + $0x4] sm:$0x1] %v2608_v51  ;;  %v2668_v46 = vpop.permute.xlu1 %2667  ;;  %2361 = vrot.lane.b32.xlu0 %v12425_v22, %s11439_s25  ;;  %v2803_v22 = vld [vmem:[#allocation4 + $0x7] sm:$0x1] }
 0x335   : > { %2495 = vst [vmem:[#allocation4 + $0x2] sm:$0x1] %v2494_v13  ;;  %v2549_v3 = vld [vmem:[#allocation4 + $0x3] sm:$0x1]  ;;  %v2671_v12 = vsel %vm13176_vm12, %v2668_v46, %v2670_v41 }
 0x336   : > { %v2550_v31 = vsel %vm13197_vm14, %v2547_v5, %v2549_v3  ;;  %2672 = vst [vmem:[#allocation4 + $0x5] sm:$0x1] %v2671_v12  ;;  %2419 = vrot.lane.b32.xlu1 %v12441_v42, %s11439_s25  ;;  %v2738_v49 = vpop.permute.xlu0 %2737 }
 0x337   : > { %2551 = vst [vmem:[#allocation4 + $0x3] sm:$0x1] %v2550_v31  ;;  %v2741_v59 = vsel %vm13176_vm12, %v2738_v49, %v2740_v45 }
 0x338   : > { %2742 = vst [vmem:[#allocation4 + $0x6] sm:$0x1] %v2741_v59  ;;  %v2801_v26 = vpop.permute.xlu1 %2800  ;;  %2496 = vrot.lane.b32.xlu0 %v12444_v50, %s11439_s25  ;;  %v2377_v13 = vld [vmem:[#allocation4] sm:$0x1] }
 0x339   : > { %v2804_v5 = vsel %vm13176_vm12, %v2801_v26, %v2803_v22  ;;  %v15990_v22 = vrot.slane %v12653_v32, 1  ;;  %v15992_v32 = vrot.slane %v12682_v35, 1  ;;  %v15994_v35 = vrot.slane %v12711_v15, 1 }
 0x33a   : > { %2805 = vst [vmem:[#allocation4 + $0x7] sm:$0x1] %v2804_v5  ;;  %2552 = vrot.lane.b32.xlu1 %v12464_v7, %s11439_s25  ;;  %v2756_v42 = vpop.permute.xlu0 %2755  ;;  %v2433_v3 = vld [vmem:[#allocation4 + $0x1] sm:$0x1] }
 0x33b   : > { %v2625_v1 = vld [vmem:[#allocation4 + $0x4] sm:$0x1] }
 0x33c   : > { %v2626_v53 = vsel %vm13197_vm14, %v2623_v61, %v2625_v1  ;;  %v2812_v4 = vpop.permute.xlu1 %2811  ;;  %2628 = vrot.lane.b32.xlu0 %v12535_v16, %s11439_s25  ;;  %v2510_v31 = vld [vmem:[#allocation4 + $0x2] sm:$0x1] }
 0x33d   : > { %2627 = vst [vmem:[#allocation4 + $0x4] sm:$0x1] %v2626_v53  ;;  %v2681_v50 = vld [vmem:[#allocation4 + $0x5] sm:$0x1] }
 0x33e   : > { %v2682_v51 = vsel %vm13197_vm14, %v2679_v56, %v2681_v50  ;;  %2684 = vrot.lane.b32.xlu1 %v12571_v11, %s11439_s25  ;;  %v2373_v7 = vpop.permute.xlu0 %2372 }
 0x33f   : > { %2683 = vst [vmem:[#allocation4 + $0x5] sm:$0x1] %v2682_v51  ;;  %v2758_v41 = vld [vmem:[#allocation4 + $0x6] sm:$0x1]  ;;  %v2378_v46 = vsel %vm13234_vm0, %v2373_v7, %v2377_v13 }
 0x340   : > { %v2759_v61 = vsel %vm13197_vm14, %v2756_v42, %v2758_v41  ;;  %2379 = vst [vmem:[#allocation4] sm:$0x1] %v2378_v46  ;;  %v2431_v16 = vpop.permute.xlu1 %2430  ;;  %2761 = vrot.lane.b32.xlu0 %v12631_v6, %s11439_s25  ;;  %v2566_v6 = vld [vmem:[#allocation4 + $0x3] sm:$0x1] }
 0x341   : > { %2760 = vst [vmem:[#allocation4 + $0x6] sm:$0x1] %v2759_v61  ;;  %v2814_v56 = vld [vmem:[#allocation4 + $0x7] sm:$0x1]  ;;  %v2434_v11 = vsel %vm13234_vm0, %v2431_v16, %v2433_v3 }
 0x342   : > { %v2815_v12 = vsel %vm13197_vm14, %v2812_v4, %v2814_v56  ;;  %2435 = vst [vmem:[#allocation4 + $0x1] sm:$0x1] %v2434_v11  ;;  %2817 = vrot.lane.b32.xlu1 %v12669_v30, %s11439_s25  ;;  %v2508_v45 = vpop.permute.xlu0 %2507  ;;  %v15991_v30 = vrot.slane %v12671_v18, 1  ;;  %v15993_v18 = vrot.slane %v12701_v58, 1  ;;  %v15995_v16 = vld [vmem:[#allocation17_spill] sm:$0xff]  ;;  %v15997_v11 = vld [vmem:[#allocation18_spill] sm:$0xff] }
 0x343   : > { %2816 = vst [vmem:[#allocation4 + $0x7] sm:$0x1] %v2815_v12  ;;  %v2511_v49 = vsel %vm13234_vm0, %v2508_v45, %v2510_v31  ;;  %v15996_v58 = vrot.slane %v15995_v16, 1  ;;  %v15998_v12 = vrot.slane %v15997_v11, 1  ;;  %v15999_v31 = vld [vmem:[#allocation20_spill] sm:$0xff] }
 0x344   : > { %2512 = vst [vmem:[#allocation4 + $0x2] sm:$0x1] %v2511_v49  ;;  %v2564_v59 = vpop.permute.xlu1 %2563  ;;  %2380 = vrot.lane.b32.xlu0 %v15990_v22, %s11437_s16  ;;  %v2642_v5 = vld [vmem:[#allocation4 + $0x4] sm:$0x1]  ;;  %v16000_v45 = vrot.slane %v15999_v31, 1 }
 0x345   : > { %v2567_v26 = vsel %vm13234_vm0, %v2564_v59, %v2566_v6  ;;  %v16001_v6 = vld [vmem:[#allocation19_spill] sm:$0xff]  ;;  %v2872_v22 = vld [vmem:[#allocation4 + $0x8] sm:$0x1]  ;;  %v10516_v11 = vld [vmem:[%s15692_s5 + $0x264] ss:$8 sps:$4 sm:$0xff]  }
 0x346   : > { %2568 = vst [vmem:[#allocation4 + $0x3] sm:$0x1] %v2567_v26  ;;  %2436 = vrot.lane.b32.xlu1 %v15991_v30, %s11437_s16  ;;  %v2640_v42 = vpop.permute.xlu0 %2639  ;;  %v2698_v53 = vld [vmem:[#allocation4 + $0x5] sm:$0x1]  ;;  %v10514_v31 = vld [vmem:[%s15692_s5 + $0x260] ss:$8 sps:$4 sm:$0xff]  }
 0x347   : > { %v2643_v1 = vsel %vm13234_vm0, %v2640_v42, %v2642_v5 }
 0x348   : > { %2644 = vst [vmem:[#allocation4 + $0x4] sm:$0x1] %v2643_v1  ;;  %v2696_v4 = vpop.permute.xlu1 %2695  ;;  %2513 = vrot.lane.b32.xlu0 %v15992_v32, %s11437_s16  ;;  %v2775_v51 = vld [vmem:[#allocation4 + $0x6] sm:$0x1]  ;;  %v2935_v1 = vld [vmem:[#allocation4 + $0x9] sm:$0x1] }
 0x349   : > { %v2699_v50 = vsel %vm13234_vm0, %v2696_v4, %v2698_v53 }
 0x34a   : > { %2700 = vst [vmem:[#allocation4 + $0x5] sm:$0x1] %v2699_v50  ;;  %2569 = vrot.lane.b32.xlu1 %v15993_v18, %s11437_s16  ;;  %v2773_v7 = vpop.permute.xlu0 %2772  ;;  %v2831_v41 = vld [vmem:[#allocation4 + $0x7] sm:$0x1]  ;;  %v3005_v50 = vld [vmem:[#allocation4 + $0xa] sm:$0x1] }
 0x34b   : > { %v2776_v13 = vsel %vm13234_vm0, %v2773_v7, %v2775_v51  ;;  %v10507_v51 = vld [vmem:[%s15692_s5 + $0x270] ss:$8 sps:$4 sm:$0xff]  }
 0x34c   : > { %2777 = vst [vmem:[#allocation4 + $0x6] sm:$0x1] %v2776_v13  ;;  %v2829_v46 = vpop.permute.xlu1 %2828  ;;  %2645 = vrot.lane.b32.xlu0 %v15994_v35, %s11437_s16 }
 0x34d   : > { %v2832_v61 = vsel %vm13234_vm0, %v2829_v46, %v2831_v41  ;;  %v3068_v46 = vld [vmem:[#allocation4 + $0xb] sm:$0x1] }
 0x34e   : > { %2833 = vst [vmem:[#allocation4 + $0x7] sm:$0x1] %v2832_v61  ;;  %2701 = vrot.lane.b32.xlu1 %v15996_v58, %s11437_s16  ;;  %v2888_v3 = vpop.permute.xlu0 %2887  ;;  %v10510_v58 = vld [vmem:[%s15692_s5 + $0x370] ss:$8 sps:$4 sm:$0xff]  }
 0x350   : > { %v13288_v56 = vpop.permute.xlu1 %2943  ;;  %2778 = vrot.lane.b32.xlu0 %v15998_v12, %s11437_s16 }
 0x352   : > { %2834 = vrot.lane.b32.xlu1 %v16000_v45, %s11437_s16  ;;  %v13296_v15 = vpop.permute.xlu0 %3020 }
 0x354   : > { %v13298_v49 = vpop.permute.xlu1 %3076  ;;  %2858 = vrot.lane.b32.xlu0 %v16001_v6, %s11440_s29 }
 0x355   : > { %v3659_v59 = vld [vmem:[#allocation4] sm:$0xff] }
 0x356   : > { %2921 = vrot.lane.b32.xlu1 %v12792_v63, %s11440_s29  ;;  %v2870_v26 = vpop.permute.xlu0 %2869  ;;  %v3997_v30 = vrot.slane %v3659_v59, %v12389_v21  ;;  %v3990_v5 = vcombine.high %v3659_v59, %v3659_v59  ;;  %v10519_v59 = vld [vmem:[%s15692_s5 + $0x364] ss:$8 sps:$4 sm:$0xff]  }
 0x357   : > { %v2873_v42 = vsel %vm13176_vm12, %v2870_v26, %v2872_v22  ;;  %v10522_v26 = vld [vmem:[%s15692_s5 + $0x254] ss:$8 sps:$4 sm:$0xff]  }
 0x358   : > { %2874 = vst [vmem:[#allocation4 + $0x8] sm:$0x1] %v2873_v42  ;;  %v2933_v53 = vpop.permute.xlu1 %2932  ;;  %2991 = vrot.lane.b32.xlu0 %v12801_v44, %s11440_s29  ;;  %v4005_v4 = vcombine.high %v3997_v30, %v3997_v30  ;;  %v13310_v32 = vrot.slane %v3990_v5, %v12389_v21  ;;  %v4013_v7 = vrot.slane %v3997_v30, %v12389_v21  ;;  %v10517_v5 = vld [vmem:[%s15692_s5 + $0x360] ss:$8 sps:$4 sm:$0xff]   ;;  %v3137_v42 = vld [vmem:[#allocation4 + $0xc] sm:$0x1] }
 0x359   : > { %v2936_v63 = vsel %vm13176_vm12, %v2933_v53, %v2935_v1  ;;  %v10520_v1 = vld [vmem:[%s15692_s5 + $0x250] ss:$8 sps:$4 sm:$0xff]   ;;  %v10525_v53 = vld [vmem:[%s15692_s5 + $0x354] ss:$8 sps:$4 sm:$0xff]  }
 0x35a   : > { %2937 = vst [vmem:[#allocation4 + $0x9] sm:$0x1] %v2936_v63  ;;  %3054 = vrot.lane.b32.xlu1 %v12860_v14, %s11440_s29  ;;  %v3003_v18 = vpop.permute.xlu0 %3002  ;;  %v4027_v44 = vrot.slane %v4005_v4, %v12389_v21  ;;  %v4006_v13 = vcombine.high %v13310_v32, %v13310_v32  ;;  %v4035_v12 = vcombine.high %v4013_v7, %v4013_v7  ;;  %v10528_v63 = vld [vmem:[%s15692_s5 + $0x244] ss:$8 sps:$4 sm:$0xff]  }
 0x35b   : > { %v3006_v41 = vsel %vm13176_vm12, %v3003_v18, %v3005_v50  ;;  %v3200_v18 = vld [vmem:[#allocation4 + $0xd] sm:$0x1] }
 0x35c   : > { %3007 = vst [vmem:[#allocation4 + $0xa] sm:$0x1] %v3006_v41  ;;  %v3066_v35 = vpop.permute.xlu1 %3065  ;;  %3123 = vrot.lane.b32.xlu0 %v12805_v36, %s11440_s29  ;;  %5813 = vmatprep.mubr.bf16.mxu0 %v4027_v44  ;;  %v4037_v14 = vcombine.high %v4027_v44, %v4027_v44  ;;  %v4034_v61 = vrot.slane %v4006_v13, %v12389_v21  ;;  %v10523_v44 = vld [vmem:[%s15692_s5 + $0x350] ss:$8 sps:$4 sm:$0xff]   ;;  %v3270_v13 = vld [vmem:[#allocation4 + $0xe] sm:$0x1] }
 0x35d   : > { %v3069_v16 = vsel %vm13176_vm12, %v3066_v35, %v3068_v46  ;;  %5814 = vmatmul.mubr.bf16.vlgmr.msra.gmra.mxu0 %v4013_v7  ;;  %v10531_v46 = vld [vmem:[%s15692_s5 + $0x344] ss:$8 sps:$4 sm:$0xff]   ;;  %v10534_v35 = vld [vmem:[%s15692_s5 + $0x234] ss:$8 sps:$4 sm:$0xff]  }
 0x35e   : > { %3070 = vst [vmem:[#allocation4 + $0xb] sm:$0x1] %v3069_v16  ;;  %5864 = vmatpush1.bf16.msra.mxu0 %v10507_v51  ;;  %3186 = vrot.lane.b32.xlu1 %v12864_v39, %s11440_s29  ;;  %v13338_v36 = vpop.permute.xlu0 %3152  ;;  %v4038_v45 = vcombine.high %v4034_v61, %v4034_v61 }
 0x35f   : > { %v2890_v6 = vld [vmem:[#allocation4 + $0x8] sm:$0x1]  ;;  %5854 = vmatprep.mubr.bf16.mxu1 %v4037_v14  ;;  %5895 = vmatprep.mubr.bf16.mxu0 %v4034_v61  ;;  %v3333_v14 = vld [vmem:[#allocation4 + $0xf] sm:$0x1] }
 0x360   : > { %v2891_v22 = vsel %vm13197_vm14, %v2888_v3, %v2890_v6  ;;  %5855 = vmatmul.mubr.bf16.vlgmr.msra.gmra.mxu1 %v4035_v12  ;;  %v13348_v39 = vpop.permute.xlu1 %3208  ;;  %3256 = vrot.lane.b32.xlu0 %v12816_v48, %s11440_s29 }
 0x361   : > { %2892 = vst [vmem:[#allocation4 + $0x8] sm:$0x1] %v2891_v22  ;;  %v2946_v30 = vld [vmem:[#allocation4 + $0x9] sm:$0x1]  ;;  %5905 = vmatpush1.bf16.msra.mxu1 %v10510_v58  ;;  %5865 = vmatprep.subr.bf16.mxu0 %v10516_v11  ;;  %v10532_v11 = vld [vmem:[%s15692_s5 + $0x230] ss:$8 sps:$4 sm:$0xff]  }
 0x362   : > { %v2947_v3 = vsel %vm13197_vm14, %v13288_v56, %v2946_v30  ;;  %5936 = vmatprep.mubr.bf16.mxu1 %v4038_v45  ;;  %5866 = vmatpush1.bf16.msra.mxu0 %v10514_v31  ;;  %v3135_v48 = vpop.permute.xlu0 %3134  ;;  %v10540_v31 = vld [vmem:[%s15692_s5 + $0x224] ss:$8 sps:$4 sm:$0xff]  }
 0x363   : > { %2948 = vst [vmem:[#allocation4 + $0x9] sm:$0x1] %v2947_v3  ;;  %v3023_v4 = vld [vmem:[#allocation4 + $0xa] sm:$0x1]  ;;  %3319 = vrot.lane.b32.xlu1 %v12873_v40, %s11440_s29  ;;  %v3138_v56 = vsel %vm13176_vm12, %v3135_v48, %v3137_v42  ;;  %5906 = vmatprep.subr.bf16.mxu1 %v10519_v59  ;;  %v10546_v3 = vld [vmem:[%s15692_s5 + $0x214] ss:$8 sps:$4 sm:$0xff]  }
 0x364   : > { %v3024_v50 = vsel %vm13197_vm14, %v13296_v15, %v3023_v4  ;;  %3139 = vst [vmem:[#allocation4 + $0xc] sm:$0x1] %v3138_v56  ;;  %v3198_v51 = vpop.permute.xlu1 %3197  ;;  %2893 = vrot.lane.b32.xlu0 %v12812_v24, %s11439_s25  ;;  %5867 = vmatprep.subr.bf16.mxu0 %v10522_v26  ;;  %v10526_v24 = vld [vmem:[%s15692_s5 + $0x240] ss:$8 sps:$4 sm:$0xff]  }
 0x365   : > { %3025 = vst [vmem:[#allocation4 + $0xa] sm:$0x1] %v3024_v50  ;;  %v3079_v40 = vld [vmem:[#allocation4 + $0xb] sm:$0x1]  ;;  %5907 = vmatpush1.bf16.msra.mxu1 %v10517_v5  ;;  %v3201_v7 = vsel %vm13176_vm12, %v3198_v51, %v3200_v18  ;;  %v10549_v18 = vld [vmem:[%s15692_s5 + $0x314] ss:$8 sps:$4 sm:$0xff]  }
 0x366   : > { %v3080_v15 = vsel %vm13197_vm14, %v13298_v49, %v3079_v40  ;;  %3202 = vst [vmem:[#allocation4 + $0xd] sm:$0x1] %v3201_v7  ;;  %5868 = vmatpush1.bf16.msra.mxu0 %v10520_v1  ;;  %v3268_v41 = vpop.permute.xlu0 %3267  ;;  %5908 = vmatprep.subr.bf16.mxu1 %v10525_v53  ;;  %v10541_v4 = vld [vmem:[%s15692_s5 + $0x320] ss:$8 sps:$4 sm:$0xff]   ;;  %v10552_v40 = vld [vmem:[%s15692_s5 + $0x204] ss:$8 sps:$4 sm:$0xff]  }
 0x367   : > { %3081 = vst [vmem:[#allocation4 + $0xb] sm:$0x1] %v3080_v15  ;;  %2949 = vrot.lane.b32.xlu1 %v12856_v0, %s11439_s25  ;;  %v3271_v49 = vsel %vm13176_vm12, %v3268_v41, %v3270_v13  ;;  %5869 = vmatprep.subr.bf16.mxu0 %v10528_v63  ;;  %v10529_v0 = vld [vmem:[%s15692_s5 + $0x340] ss:$8 sps:$4 sm:$0xff]   ;;  %v16002_v15 = vrot.slane %v13031_v8, 1 }
 0x368   : > { %3272 = vst [vmem:[#allocation4 + $0xe] sm:$0x1] %v3271_v49  ;;  %v3331_v61 = vpop.permute.xlu1 %3330  ;;  %3026 = vrot.lane.b32.xlu0 %v12840_v23, %s11439_s25  ;;  %v10537_v23 = vld [vmem:[%s15692_s5 + $0x334] ss:$8 sps:$4 sm:$0xff]   ;;  %v2907_v26 = vld [vmem:[#allocation4 + $0x8] sm:$0x1] }
 0x369   : > { %5909 = vmatpush1.bf16.msra.mxu1 %v10523_v44  ;;  %v3334_v16 = vsel %vm13176_vm12, %v3331_v61, %v3333_v14  ;;  %v10555_v8 = vld [vmem:[%s15692_s5 + $0x304] ss:$8 sps:$4 sm:$0xff]   ;;  %v16003_v49 = vrot.slane %v13040_v34, 1  ;;  %v10558_v14 = vld [vmem:[%s15692_s5 + $0x2f4] ss:$8 sps:$4 sm:$0xff]  }
 0x36a   : > { %3335 = vst [vmem:[#allocation4 + $0xf] sm:$0x1] %v3334_v16  ;;  %5870 = vmatpush1.bf16.msra.mxu0 %v10526_v24  ;;  %v3286_v58 = vpop.permute.xlu0 %3285  ;;  %5910 = vmatprep.subr.bf16.mxu1 %v10531_v46  ;;  %v2963_v48 = vld [vmem:[#allocation4 + $0x9] sm:$0x1] }
 0x36b   : > { %v3155_v12 = vld [vmem:[#allocation4 + $0xc] sm:$0x1]  ;;  %3082 = vrot.lane.b32.xlu1 %v12903_v9, %s11439_s25  ;;  %5871 = vmatprep.subr.bf16.mxu0 %v10534_v35  ;;  %v10535_v9 = vld [vmem:[%s15692_s5 + $0x330] ss:$8 sps:$4 sm:$0xff]   ;;  %v10550_v46 = vld [vmem:[%s15692_s5 + $0x200] ss:$8 sps:$4 sm:$0xff]  }
 0x36c   : > { %v3156_v45 = vsel %vm13197_vm14, %v13338_v36, %v3155_v12  ;;  %v3342_v6 = vpop.permute.xlu1 %3341  ;;  %3158 = vrot.lane.b32.xlu0 %v12984_v54, %s11439_s25  ;;  %v10538_v36 = vld [vmem:[%s15692_s5 + $0x220] ss:$8 sps:$4 sm:$0xff]   ;;  %v10543_v54 = vld [vmem:[%s15692_s5 + $0x324] ss:$8 sps:$4 sm:$0xff]   ;;  %v10556_v12 = vld [vmem:[%s15692_s5 + $0x2f0] ss:$8 sps:$4 sm:$0xff]  }
 0x36d   : > { %3157 = vst [vmem:[#allocation4 + $0xc] sm:$0x1] %v3156_v45  ;;  %v3211_v59 = vld [vmem:[#allocation4 + $0xd] sm:$0x1]  ;;  %5911 = vmatpush1.bf16.msra.mxu1 %v10529_v0  ;;  %v3040_v63 = vld [vmem:[#allocation4 + $0xa] sm:$0x1] }
 0x36e   : > { %v3212_v22 = vsel %vm13197_vm14, %v13348_v39, %v3211_v59  ;;  %5872 = vmatpush1.bf16.msra.mxu0 %v10532_v11  ;;  %v2905_v30 = vpop.permute.xlu0 %2904  ;;  %5912 = vmatprep.subr.bf16.mxu1 %v10537_v23  ;;  %v3096_v7 = vld [vmem:[#allocation4 + $0xb] sm:$0x1]  ;;  %v16004_v0 = vrot.slane %v13046_v52, 1  ;;  %v10561_v52 = vld [vmem:[%s15692_s5 + $0x3f4] ss:$8 sps:$4 sm:$0xff]  }
 0x36f   : > { %3213 = vst [vmem:[#allocation4 + $0xd] sm:$0x1] %v3212_v22  ;;  %v3288_v5 = vld [vmem:[#allocation4 + $0xe] sm:$0x1]  ;;  %3214 = vrot.lane.b32.xlu1 %v12997_v37, %s11439_s25  ;;  %v2908_v39 = vsel %vm13234_vm0, %v2905_v30, %v2907_v26  ;;  %5873 = vmatprep.subr.bf16.mxu0 %v10540_v31  ;;  %v16005_v31 = vrot.slane %v13053_v62, 1  ;;  %v16006_v22 = vrot.slane %v13060_v33, 1 }
 0x370   : > { %v3289_v42 = vsel %vm13197_vm14, %v3286_v58, %v3288_v5  ;;  %2909 = vst [vmem:[#allocation4 + $0x8] sm:$0x1] %v2908_v39  ;;  %v2961_v1 = vpop.permute.xlu1 %2960  ;;  %3291 = vrot.lane.b32.xlu0 %v13025_v27, %s11439_s25  ;;  %v10544_v27 = vld [vmem:[%s15692_s5 + $0x210] ss:$8 sps:$4 sm:$0xff]   ;;  %v10553_v58 = vld [vmem:[%s15692_s5 + $0x300] ss:$8 sps:$4 sm:$0xff]  }
 0x371   : > { %3290 = vst [vmem:[#allocation4 + $0xe] sm:$0x1] %v3289_v42  ;;  %v3344_v53 = vld [vmem:[#allocation4 + $0xf] sm:$0x1]  ;;  %5913 = vmatpush1.bf16.msra.mxu1 %v10535_v9  ;;  %v2964_v37 = vsel %vm13234_vm0, %v2961_v1, %v2963_v48  ;;  %v10559_v26 = vld [vmem:[%s15692_s5 + $0x3f0] ss:$8 sps:$4 sm:$0xff]  }
 0x372   : > { %v3345_v56 = vsel %vm13197_vm14, %v3342_v6, %v3344_v53  ;;  %2965 = vst [vmem:[#allocation4 + $0x9] sm:$0x1] %v2964_v37  ;;  %5874 = vmatpush1.bf16.msra.mxu0 %v10538_v36  ;;  %v3038_v50 = vpop.permute.xlu0 %3037  ;;  %5914 = vmatprep.subr.bf16.mxu1 %v10543_v54  ;;  %v10564_v6 = vld [vmem:[%s15692_s5 + $0x2e4] ss:$8 sps:$4 sm:$0xff]   ;;  %v3402_v30 = vld [vmem:[#allocation4 + $0x10] sm:$0x1] }
 0x373   : > { %3346 = vst [vmem:[#allocation4 + $0xf] sm:$0x1] %v3345_v56  ;;  %3347 = vrot.lane.b32.xlu1 %v13038_v2, %s11439_s25  ;;  %v3041_v51 = vsel %vm13234_vm0, %v3038_v50, %v3040_v63  ;;  %5875 = vmatprep.subr.bf16.mxu0 %v10546_v3  ;;  %v10547_v2 = vld [vmem:[%s15692_s5 + $0x310] ss:$8 sps:$4 sm:$0xff]   ;;  %v10562_v54 = vld [vmem:[%s15692_s5 + $0x2e0] ss:$8 sps:$4 sm:$0xff]  }
 0x374   : > { %3042 = vst [vmem:[#allocation4 + $0xa] sm:$0x1] %v3041_v51  ;;  %v3094_v44 = vpop.permute.xlu1 %3093  ;;  %2910 = vrot.lane.b32.xlu0 %v16002_v15, %s11437_s16  ;;  %v3172_v41 = vld [vmem:[#allocation4 + $0xc] sm:$0x1]  ;;  %v16007_v5 = vrot.slane %v13067_v29, 1  ;;  %v16008_v1 = vrot.slane %v13074_v17, 1 }
 0x375   : > { %5915 = vmatpush1.bf16.msra.mxu1 %v10541_v4  ;;  %v3097_v13 = vsel %vm13234_vm0, %v3094_v44, %v3096_v7  ;;  %v10567_v33 = vld [vmem:[%s15692_s5 + $0x3e4] ss:$8 sps:$4 sm:$0xff]   ;;  %v10570_v3 = vld [vmem:[%s15692_s5 + $0x2d4] ss:$8 sps:$4 sm:$0xff]   ;;  %v3465_v42 = vld [vmem:[#allocation4 + $0x11] sm:$0x1] }
 0x376   : > { %3098 = vst [vmem:[#allocation4 + $0xb] sm:$0x1] %v3097_v13  ;;  %5876 = vmatpush1.bf16.msra.mxu0 %v10544_v27  ;;  %v3170_v24 = vpop.permute.xlu0 %3169  ;;  %5916 = vmatprep.subr.bf16.mxu1 %v10549_v18  ;;  %v3228_v61 = vld [vmem:[#allocation4 + $0xd] sm:$0x1]  ;;  %v10565_v53 = vld [vmem:[%s15692_s5 + $0x3e0] ss:$8 sps:$4 sm:$0xff]  }
 0x377   : > { %2966 = vrot.lane.b32.xlu1 %v16003_v49, %s11437_s16  ;;  %v3173_v35 = vsel %vm13234_vm0, %v3170_v24, %v3172_v41  ;;  %5877 = vmatprep.subr.bf16.mxu0 %v10552_v40  ;;  %v3535_v37 = vld [vmem:[#allocation4 + $0x12] sm:$0x1]  ;;  %v10573_v17 = vld [vmem:[%s15692_s5 + $0x3d4] ss:$8 sps:$4 sm:$0xff]   ;;  %v16009_v63 = vrot.slane %v13081_v60, 1 }
 0x378   : > { %3174 = vst [vmem:[#allocation4 + $0xc] sm:$0x1] %v3173_v35  ;;  %v3226_v16 = vpop.permute.xlu1 %3225  ;;  %3043 = vrot.lane.b32.xlu0 %v16004_v0, %s11437_s16  ;;  %v3305_v11 = vld [vmem:[#allocation4 + $0xe] sm:$0x1]  ;;  %v10568_v56 = vld [vmem:[%s15692_s5 + $0x2d0] ss:$8 sps:$4 sm:$0xff]  }
 0x379   : > { %5917 = vmatpush1.bf16.msra.mxu1 %v10547_v2  ;;  %v3229_v34 = vsel %vm13234_vm0, %v3226_v16, %v3228_v61  ;;  %v10576_v27 = vld [vmem:[%s15692_s5 + $0x2c4] ss:$8 sps:$4 sm:$0xff]   ;;  %v3598_v18 = vld [vmem:[#allocation4 + $0x13] sm:$0x1]  ;;  %v10574_v44 = vld [vmem:[%s15692_s5 + $0x2c0] ss:$8 sps:$4 sm:$0xff]  }
 0x37a   : > { %3230 = vst [vmem:[#allocation4 + $0xd] sm:$0x1] %v3229_v34  ;;  %5878 = vmatpush1.bf16.msra.mxu0 %v10550_v46  ;;  %v3303_v23 = vpop.permute.xlu0 %3302  ;;  %5918 = vmatprep.subr.bf16.mxu1 %v10555_v8  ;;  %v3361_v59 = vld [vmem:[#allocation4 + $0xf] sm:$0x1]  ;;  %v10571_v60 = vld [vmem:[%s15692_s5 + $0x3d0] ss:$8 sps:$4 sm:$0xff]  }
 0x37b   : > { %3099 = vrot.lane.b32.xlu1 %v16005_v31, %s11437_s16  ;;  %v3306_v45 = vsel %vm13234_vm0, %v3303_v23, %v3305_v11  ;;  %5879 = vmatprep.subr.bf16.mxu0 %v10558_v14  ;;  %v10582_v13 = vld [vmem:[%s15692_s5 + $0x2b4] ss:$8 sps:$4 sm:$0xff]   ;;  %v10580_v49 = vld [vmem:[%s15692_s5 + $0x2b0] ss:$8 sps:$4 sm:$0xff]   ;;  %v10588_v14 = vld [vmem:[%s15692_s5 + $0x2a4] ss:$8 sps:$4 sm:$0xff]  }
 0x37c   : > { %3307 = vst [vmem:[#allocation4 + $0xe] sm:$0x1] %v3306_v45  ;;  %v3359_v9 = vpop.permute.xlu1 %3358  ;;  %3175 = vrot.lane.b32.xlu0 %v16006_v22, %s11437_s16  ;;  %v10586_v11 = vld [vmem:[%s15692_s5 + $0x2a0] ss:$8 sps:$4 sm:$0xff]   ;;  %v10594_v23 = vld [vmem:[%s15692_s5 + $0x294] ss:$8 sps:$4 sm:$0xff]  }
 0x37d   : > { %5919 = vmatpush1.bf16.msra.mxu1 %v10553_v58  ;;  %v3362_v62 = vsel %vm13234_vm0, %v3359_v9, %v3361_v59  ;;  %v10592_v9 = vld [vmem:[%s15692_s5 + $0x290] ss:$8 sps:$4 sm:$0xff]  }
 0x37e   : > { %3363 = vst [vmem:[#allocation4 + $0xf] sm:$0x1] %v3362_v62  ;;  %5880 = vmatpush2.bf16.msra.mxu0 %v10556_v12  ;;  %v3400_v36 = vpop.permute.xlu0 %3399  ;;  %5920 = vmatprep.subr.bf16.mxu1 %v10561_v52  ;;  %v16010_v62 = vld [vmem:[#allocation33_spill] sm:$0xff] }
 0x37f   : > { %3231 = vrot.lane.b32.xlu1 %v16007_v5, %s11437_s16  ;;  %v3403_v39 = vsel %vm13176_vm12, %v3400_v36, %v3402_v30  ;;  %5881 = vmatprep.subr.bf16.mxu0 %v10564_v6 }
 0x380   : > { %3404 = vst [vmem:[#allocation4 + $0x10] sm:$0x1] %v3403_v39  ;;  %v3463_v48 = vpop.permute.xlu1 %3462  ;;  %3308 = vrot.lane.b32.xlu0 %v16008_v1, %s11437_s16  ;;  %v2325_v39 = vld [vmem:[#allocation5] sm:$0x1]  ;;  %v16013_v1 = vld [vmem:[#allocation16_spill] sm:$0xff] }
 0x381   : > { %5921 = vmatpush2.bf16.msra.mxu1 %v10559_v26  ;;  %v3466_v29 = vsel %vm13176_vm12, %v3463_v48, %v3465_v42  ;;  %v10600_v26 = vld [vmem:[%s15692_s5 + $0x284] ss:$8 sps:$4 sm:$0xff]   ;;  %v10595_v42 = vld [vmem:[%s15692_s5 + $0x390] ss:$8 sps:$4 sm:$0xff]   ;;  %v2394_v48 = vld [vmem:[#allocation5 + $0x1] sm:$0x1] }
 0x382   : > { %3467 = vst [vmem:[#allocation4 + $0x11] sm:$0x1] %v3466_v29  ;;  %5882 = vmatpush2.bf16.msra.mxu0 %v10562_v54  ;;  %v3533_v4 = vpop.permute.xlu0 %3532  ;;  %5922 = vmatprep.subr.bf16.mxu1 %v10567_v33  ;;  %v16011_v33 = vld [vmem:[#allocation34_spill] sm:$0xff]  ;;  %v3645_v29 = vrot.slane %v16013_v1, %v12389_v21 }
 0x383   : > { %3364 = vrot.lane.b32.xlu1 %v16009_v63, %s11437_s16  ;;  %v3536_v50 = vsel %vm13176_vm12, %v3533_v4, %v3535_v37  ;;  %5883 = vmatprep.subr.bf16.mxu0 %v10570_v3  ;;  %v16012_v5 = vrot.slane %v16011_v33, 1  ;;  %v10598_v4 = vld [vmem:[%s15692_s5 + $0x280] ss:$8 sps:$4 sm:$0xff]   ;;  %v16014_v63 = vld [vmem:[#allocation35_spill] sm:$0xff] }
 0x384   : > { %3537 = vst [vmem:[#allocation4 + $0x12] sm:$0x1] %v3536_v50  ;;  %v3596_v51 = vpop.permute.xlu1 %3595  ;;  %3388 = vrot.lane.b32.xlu0 %v12820_v55, %s11440_s29  ;;  %v10579_v55 = vld [vmem:[%s15692_s5 + $0x3c4] ss:$8 sps:$4 sm:$0xff]   ;;  %v16015_v50 = vrot.slane %v16014_v63, 1 }
 0x385   : > { %5923 = vmatpush2.bf16.msra.mxu1 %v10565_v53  ;;  %v3599_v40 = vsel %vm13176_vm12, %v3596_v51, %v3598_v18  ;;  %v13614_v31 = vld [vmem:[#allocation4 + $0x8] sm:$0xff]  ;;  %v10606_v51 = vld [vmem:[%s15692_s5 + $0x474] ss:$8 sps:$4 sm:$0xff]  }
 0x386   : > { %3600 = vst [vmem:[#allocation4 + $0x13] sm:$0x1] %v3599_v40  ;;  %5884 = vmatpush2.bf16.msra.mxu0 %v10568_v56  ;;  %v3418_v7 = vpop.permute.xlu0 %3417  ;;  %5924 = vmatprep.subr.bf16.mxu1 %v10573_v17  ;;  %v13636_v30 = vrot.slane %v13614_v31, %v12389_v21  ;;  %v10603_v56 = vld [vmem:[%s15692_s5 + $0x384] ss:$8 sps:$4 sm:$0xff]  }
 0x387   : > { %3451 = vrot.lane.b32.xlu1 %v12877_v47, %s11440_s29  ;;  %v3420_v15 = vld [vmem:[#allocation4 + $0x10] sm:$0x1]  ;;  %5885 = vmatprep.subr.bf16.mxu0 %v10576_v27  ;;  %v10577_v47 = vld [vmem:[%s15692_s5 + $0x3c0] ss:$8 sps:$4 sm:$0xff]  }
 0x388   : > { %v3421_v2 = vsel %vm13197_vm14, %v3418_v7, %v3420_v15  ;;  %v3474_v41 = vpop.permute.xlu1 %3473  ;;  %3521 = vrot.lane.b32.xlu0 %v12831_v38, %s11440_s29  ;;  %v10585_v38 = vld [vmem:[%s15692_s5 + $0x3b4] ss:$8 sps:$4 sm:$0xff]   ;;  %v4054_v40 = vcombine.high %v13636_v30, %v13636_v30 }
 0x389   : > { %3422 = vst [vmem:[#allocation4 + $0x10] sm:$0x1] %v3421_v2  ;;  %5925 = vmatpush2.bf16.msra.mxu1 %v10571_v60  ;;  %v3476_v24 = vld [vmem:[#allocation4 + $0x11] sm:$0x1]  ;;  %v16017_v7 = vld [vmem:[#allocation36_spill] sm:$0xff] }
 0x38a   : > { %v3477_v46 = vsel %vm13197_vm14, %v3474_v41, %v3476_v24  ;;  %5886 = vmatpush2.bf16.msra.mxu0 %v10574_v44  ;;  %v3551_v8 = vpop.permute.xlu0 %3550  ;;  %5926 = vmatprep.subr.bf16.mxu1 %v10579_v55  ;;  %v16018_v44 = vrot.slane %v16017_v7, 1  ;;  %v2464_v55 = vld [vmem:[#allocation5 + $0x2] sm:$0x1]  ;;  %v2527_v41 = vld [vmem:[#allocation5 + $0x3] sm:$0x1]  ;;  %v3652_v24 = vrot.slane %v3645_v29, %v12389_v21 }
 0x38b   : > { %3478 = vst [vmem:[#allocation4 + $0x11] sm:$0x1] %v3477_v46  ;;  %3584 = vrot.lane.b32.xlu1 %v12890_v57, %s11440_s29  ;;  %v3553_v35 = vld [vmem:[#allocation4 + $0x12] sm:$0x1]  ;;  %5887 = vmatprep.subr.bf16.mxu0 %v10582_v13  ;;  %v10601_v13 = vld [vmem:[%s15692_s5 + $0x380] ss:$8 sps:$4 sm:$0xff]  }
 0x38c   : > { %v3554_v61 = vsel %vm13197_vm14, %v3551_v8, %v3553_v35  ;;  %v3607_v16 = vpop.permute.xlu1 %3606  ;;  %3423 = vrot.lane.b32.xlu0 %v13115_v20, %s11439_s25  ;;  %v10583_v57 = vld [vmem:[%s15692_s5 + $0x3b0] ss:$8 sps:$4 sm:$0xff]   ;;  %v10591_v20 = vld [vmem:[%s15692_s5 + $0x3a4] ss:$8 sps:$4 sm:$0xff]   ;;  %v4076_v35 = vrot.slane %v4054_v40, %v12389_v21 }
 0x38d   : > { %3555 = vst [vmem:[#allocation4 + $0x12] sm:$0x1] %v3554_v61  ;;  %5927 = vmatpush2.bf16.msra.mxu1 %v10577_v47  ;;  %v3609_v0 = vld [vmem:[#allocation4 + $0x13] sm:$0x1]  ;;  %v4020_v47 = vrot.slane %v13310_v32, %v12389_v21  ;;  %v16019_v8 = vld [vmem:[#allocation37_spill] sm:$0xff] }
 0x38e   : > { %v3610_v34 = vsel %vm13197_vm14, %v3607_v16, %v3609_v0  ;;  %5888 = vmatpush2.bf16.msra.mxu0 %v10580_v49  ;;  %v3435_v58 = vpop.permute.xlu0 %3434  ;;  %5928 = vmatprep.subr.bf16.mxu1 %v10585_v38  ;;  %v10604_v46 = vld [vmem:[%s15692_s5 + $0x470] ss:$8 sps:$4 sm:$0xff]   ;;  %v16020_v49 = vrot.slane %v16019_v8, 1  ;;  %v10612_v32 = vld [vmem:[%s15692_s5 + $0x464] ss:$8 sps:$4 sm:$0xff]  }
 0x38f   : > { %3611 = vst [vmem:[#allocation4 + $0x13] sm:$0x1] %v3610_v34  ;;  %3479 = vrot.lane.b32.xlu1 %v13127_v28, %s11439_s25  ;;  %5889 = vmatprep.subr.bf16.mxu0 %v10588_v14  ;;  %v10589_v28 = vld [vmem:[%s15692_s5 + $0x3a0] ss:$8 sps:$4 sm:$0xff]   ;;  %v10609_v14 = vld [vmem:[%s15692_s5 + $0x574] ss:$8 sps:$4 sm:$0xff]  }
 0x390   : > { %v3437_v12 = vld [vmem:[#allocation4 + $0x10] sm:$0x1]  ;;  %v3491_v52 = vpop.permute.xlu1 %3490  ;;  %3556 = vrot.lane.b32.xlu0 %v13130_v43, %s11439_s25  ;;  %v10597_v43 = vld [vmem:[%s15692_s5 + $0x394] ss:$8 sps:$4 sm:$0xff]   ;;  %v2596_v16 = vld [vmem:[#allocation5 + $0x4] sm:$0x1] }
 0x391   : > { %v3438_v45 = vsel %vm13234_vm0, %v3435_v58, %v3437_v12  ;;  %5929 = vmatpush2.bf16.msra.mxu1 %v10583_v57  ;;  %v10607_v57 = vld [vmem:[%s15692_s5 + $0x570] ss:$8 sps:$4 sm:$0xff]   ;;  %v4036_v58 = vcombine.high %v4020_v47, %v4020_v47 }
 0x392   : > { %3439 = vst [vmem:[#allocation4 + $0x10] sm:$0x1] %v3438_v45  ;;  %v3493_v6 = vld [vmem:[#allocation4 + $0x11] sm:$0x1]  ;;  %5890 = vmatpush2.bf16.msra.mxu0 %v10586_v11  ;;  %v3568_v59 = vpop.permute.xlu0 %3567  ;;  %5930 = vmatprep.subr.bf16.mxu1 %v10591_v20  ;;  %v2659_v11 = vld [vmem:[#allocation5 + $0x5] sm:$0x1]  ;;  %v4086_v45 = vcombine.high %v4076_v35, %v4076_v35 }
 0x393   : > { %v3494_v22 = vsel %vm13234_vm0, %v3491_v52, %v3493_v6  ;;  %3612 = vrot.lane.b32.xlu1 %v16010_v62, %s11439_s25  ;;  %5891 = vmatprep.subr.bf16.mxu0 %v10594_v23  ;;  %v10610_v20 = vld [vmem:[%s15692_s5 + $0x460] ss:$8 sps:$4 sm:$0xff]   ;;  %v10615_v23 = vld [vmem:[%s15692_s5 + $0x564] ss:$8 sps:$4 sm:$0xff]   ;;  %s382_s25 = scalar_lea.vmem %s15698_s11, %s16064_s18 }
 0x394   : > { %3495 = vst [vmem:[#allocation4 + $0x11] sm:$0x1] %v3494_v22  ;;  %v3570_v36 = vld [vmem:[#allocation4 + $0x12] sm:$0x1]  ;;  %v3624_v54 = vpop.permute.xlu1 %3623  ;;  %3440 = vrot.lane.b32.xlu0 %v16012_v5, %s11437_s16  ;;  %v16021_v6 = vld [vmem:[#allocation8_spill] sm:$0xff] }
 0x395   : > { %v3571_v3 = vsel %vm13234_vm0, %v3568_v59, %v3570_v36  ;;  %5931 = vmatpush2.bf16.msra.mxu1 %v10589_v28  ;;  %v10618_v28 = vld [vmem:[%s15692_s5 + $0x454] ss:$8 sps:$4 sm:$0xff]   ;;  %v16022_v59 = vrot.slane %v16021_v6, 1  ;;  %v2729_v22 = vld [vmem:[#allocation5 + $0x6] sm:$0x1] }
 0x396   : > { %3572 = vst [vmem:[#allocation4 + $0x12] sm:$0x1] %v3571_v3  ;;  %v3626_v53 = vld [vmem:[#allocation4 + $0x13] sm:$0x1]  ;;  %5892 = vmatpush2.bf16.msra.mxu0 %v10592_v9  ;;  %v2323_v37 = vpop.permute.xlu0 %2322  ;;  %5932 = vmatprep.subr.bf16.mxu1 %v10597_v43  ;;  %v10613_v36 = vld [vmem:[%s15692_s5 + $0x560] ss:$8 sps:$4 sm:$0xff]  }
 0x397   : > { %v3627_v17 = vsel %vm13234_vm0, %v3624_v54, %v3626_v53  ;;  %3496 = vrot.lane.b32.xlu1 %v16015_v50, %s11437_s16  ;;  %v2326_v18 = vsel %vm12398_vm3, %v2323_v37, %v2325_v39  ;;  %5893 = vmatprep.subr.bf16.mxu0 %v10600_v26  ;;  %v16023_v54 = vld [vmem:[#allocation9_spill] sm:$0xff]  ;;  %v2792_v3 = vld [vmem:[#allocation5 + $0x7] sm:$0x1]  ;;  %v16025_v37 = vld [vmem:[#allocation10_spill] sm:$0xff] }
 0x398   : > { %3628 = vst [vmem:[#allocation4 + $0x13] sm:$0x1] %v3627_v17  ;;  %2327 = vst [vmem:[#allocation5] sm:$0x1] %v2326_v18  ;;  %v2392_v60 = vpop.permute.xlu1 %2391  ;;  %3573 = vrot.lane.b32.xlu0 %v16018_v44, %s11437_s16  ;;  %v16024_v33 = vrot.slane %v16023_v54, 1 }
 0x399   : > { %5933 = vmatpush2.bf16.msra.mxu1 %v10595_v42  ;;  %v2395_v15 = vsel %vm12398_vm3, %v2392_v60, %v2394_v48  ;;  %v10616_v42 = vld [vmem:[%s15692_s5 + $0x450] ss:$8 sps:$4 sm:$0xff]   ;;  %v10621_v48 = vld [vmem:[%s15692_s5 + $0x554] ss:$8 sps:$4 sm:$0xff]   ;;  %v10624_v53 = vld [vmem:[%s15692_s5 + $0x444] ss:$8 sps:$4 sm:$0xff]  }
 0x39a   : > { %2396 = vst [vmem:[#allocation5 + $0x1] sm:$0x1] %v2395_v15  ;;  %5894 = vmatpush2.bf16.msra.mxu0 %v10598_v4  ;;  %v2462_v2 = vpop.permute.xlu0 %2461  ;;  %5934 = vmatprep.subr.bf16.mxu1 %v10603_v56  ;;  %v16026_v4 = vrot.slane %v16025_v37, 1  ;;  %v10619_v18 = vld [vmem:[%s15692_s5 + $0x550] ss:$8 sps:$4 sm:$0xff]  }
 0x39b   : > { %3629 = vrot.lane.b32.xlu1 %v16020_v49, %s11437_s16  ;;  %v2465_v38 = vsel %vm12398_vm3, %v2462_v2, %v2464_v55  ;;  %5945 = vmatprep.subr.bf16.mxu0 %v10606_v51  ;;  %v16027_v51 = vld [vmem:[#allocation11_spill] sm:$0xff]  ;;  %v10622_v44 = vld [vmem:[%s15692_s5 + $0x440] ss:$8 sps:$4 sm:$0xff]   ;;  %v10627_v55 = vld [vmem:[%s15692_s5 + $0x544] ss:$8 sps:$4 sm:$0xff]  }
 0x39c   : > { %2466 = vst [vmem:[#allocation5 + $0x2] sm:$0x1] %v2465_v38  ;;  %v2525_v61 = vpop.permute.xlu1 %2524  ;;  %3653 = vrot.lane.b32.xlu0 %v3652_v24, %s11440_s29  ;;  %v16028_v40 = vrot.slane %v16027_v51, 1  ;;  %v16029_v2 = vld [vmem:[#allocation12_spill] sm:$0xff]  ;;  %v10639_v54 = vld [vmem:[%s15692_s5 + $0x524] ss:$8 sps:$4 sm:$0xff]  }
 0x39d   : > { %5935 = vmatpush2.bf16.msra.mxu1 %v10601_v13  ;;  %v2528_v0 = vsel %vm12398_vm3, %v2525_v61, %v2527_v41  ;;  %5896 = vmatmul.mubr.bf16.vlgmr.msra.gmra.mxu0 %v4020_v47  ;;  %v10630_v13 = vld [vmem:[%s15692_s5 + $0x434] ss:$8 sps:$4 sm:$0xff]   ;;  %v16030_v41 = vrot.slane %v16029_v2, 1  ;;  %v10625_v38 = vld [vmem:[%s15692_s5 + $0x540] ss:$8 sps:$4 sm:$0xff]  }
 0x39e   : > { %2529 = vst [vmem:[#allocation5 + $0x3] sm:$0x1] %v2528_v0  ;;  %5946 = vmatpush1.bf16.msra.mxu0 %v10604_v46  ;;  %5977 = vmatprep.mubr.bf16.mxu0 %v4076_v35  ;;  %v2594_v34 = vpop.permute.xlu0 %2593  ;;  %v16031_v35 = vld [vmem:[#allocation13_spill] sm:$0xff]  ;;  %v10628_v0 = vld [vmem:[%s15692_s5 + $0x430] ss:$8 sps:$4 sm:$0xff]  }
 0x39f   : > { %v2342_v12 = vld [vmem:[#allocation5] sm:$0x1]  ;;  %v2597_v52 = vsel %vm12398_vm3, %v2594_v34, %v2596_v16  ;;  %5986 = vmatprep.subr.bf16.mxu1 %v10609_v14  ;;  %5947 = vmatprep.subr.bf16.mxu0 %v10612_v32  ;;  %v16032_v14 = vrot.slane %v16031_v35, 1  ;;  %v10646_v51 = vld [vmem:[%s15692_s5 + $0x400] ss:$8 sps:$4 sm:$0xff]  }
 0x3a0   : > { %v2343_v9 = vsel %vm13176_vm12, %v16022_v59, %v2342_v12  ;;  %2598 = vst [vmem:[#allocation5 + $0x4] sm:$0x1] %v2597_v52  ;;  %5937 = vmatmul.mubr.bf16.vlgmr.msra.gmra.mxu1 %v4036_v58  ;;  %v2657_v43 = vpop.permute.xlu1 %2656  ;;  %v10631_v59 = vld [vmem:[%s15692_s5 + $0x530] ss:$8 sps:$4 sm:$0xff]   ;;  %v10645_v37 = vld [vmem:[%s15692_s5 + $0x514] ss:$8 sps:$4 sm:$0xff]  }
 0x3a1   : > { %2344 = vst [vmem:[#allocation5] sm:$0x1] %v2343_v9  ;;  %v2409_v62 = vld [vmem:[#allocation5 + $0x1] sm:$0x1]  ;;  %5987 = vmatpush1.bf16.msra.mxu1 %v10607_v57  ;;  %6018 = vmatprep.mubr.bf16.mxu1 %v4086_v45  ;;  %v2660_v26 = vsel %vm12398_vm3, %v2657_v43, %v2659_v11  ;;  %v10636_v11 = vld [vmem:[%s15692_s5 + $0x424] ss:$8 sps:$4 sm:$0xff]  }
 0x3a2   : > { %v2410_v5 = vsel %vm13176_vm12, %v16024_v33, %v2409_v62  ;;  %2661 = vst [vmem:[#allocation5 + $0x5] sm:$0x1] %v2660_v26  ;;  %5948 = vmatpush1.bf16.msra.mxu0 %v10610_v20  ;;  %v2727_v39 = vpop.permute.xlu0 %2726  ;;  %5988 = vmatprep.subr.bf16.mxu1 %v10615_v23  ;;  %v10633_v57 = vld [vmem:[%s15692_s5 + $0x534] ss:$8 sps:$4 sm:$0xff]   ;;  %v16033_v20 = vld [vmem:[#allocation14_spill] sm:$0xff] }
 0x3a3   : > { %2411 = vst [vmem:[#allocation5 + $0x1] sm:$0x1] %v2410_v5  ;;  %v2479_v1 = vld [vmem:[#allocation5 + $0x2] sm:$0x1]  ;;  %v2730_v29 = vsel %vm12398_vm3, %v2727_v39, %v2729_v22  ;;  %5949 = vmatprep.subr.bf16.mxu0 %v10618_v28  ;;  %v16034_v23 = vrot.slane %v16033_v20, 1 }
 0x3a4   : > { %v2480_v56 = vsel %vm13176_vm12, %v16026_v4, %v2479_v1  ;;  %2731 = vst [vmem:[#allocation5 + $0x6] sm:$0x1] %v2730_v29  ;;  %v2790_v17 = vpop.permute.xlu1 %2789  ;;  %v16035_v9 = vld [vmem:[#allocation15_spill] sm:$0xff] }
 0x3a5   : > { %2481 = vst [vmem:[#allocation5 + $0x2] sm:$0x1] %v2480_v56  ;;  %v2542_v63 = vld [vmem:[#allocation5 + $0x3] sm:$0x1]  ;;  %5989 = vmatpush1.bf16.msra.mxu1 %v10613_v36  ;;  %v2793_v50 = vsel %vm12398_vm3, %v2790_v17, %v2792_v3  ;;  %v16036_v43 = vrot.slane %v16035_v9, 1 }
 0x3a6   : > { %v2543_v60 = vsel %vm13176_vm12, %v16028_v40, %v2542_v63  ;;  %2794 = vst [vmem:[#allocation5 + $0x7] sm:$0x1] %v2793_v50  ;;  %5950 = vmatpush1.bf16.msra.mxu0 %v10616_v42  ;;  %v2362_v7 = vpop.permute.xlu0 %2361  ;;  %5990 = vmatprep.subr.bf16.mxu1 %v10621_v48  ;;  %v10634_v36 = vld [vmem:[%s15692_s5 + $0x420] ss:$8 sps:$4 sm:$0xff]   ;;  %v10642_v5 = vld [vmem:[%s15692_s5 + $0x414] ss:$8 sps:$4 sm:$0xff]  }
 0x3a7   : > { %2544 = vst [vmem:[#allocation5 + $0x3] sm:$0x1] %v2543_v60  ;;  %v2611_v15 = vld [vmem:[#allocation5 + $0x4] sm:$0x1]  ;;  %5951 = vmatprep.subr.bf16.mxu0 %v10624_v53  ;;  %v10637_v48 = vld [vmem:[%s15692_s5 + $0x520] ss:$8 sps:$4 sm:$0xff]  }
 0x3a8   : > { %v2612_v24 = vsel %vm13176_vm12, %v16030_v41, %v2611_v15  ;;  %v2364_v47 = vld [vmem:[#allocation5] sm:$0x1]  ;;  %v2420_v46 = vpop.permute.xlu1 %2419  ;;  %v10640_v53 = vld [vmem:[%s15692_s5 + $0x410] ss:$8 sps:$4 sm:$0xff]   ;;  %v10648_v56 = vld [vmem:[%s15692_s5 + $0x404] ss:$8 sps:$4 sm:$0xff]  }
 0x3a9   : > { %2613 = vst [vmem:[#allocation5 + $0x4] sm:$0x1] %v2612_v24  ;;  %v2674_v8 = vld [vmem:[#allocation5 + $0x5] sm:$0x1]  ;;  %v2365_v49 = vsel %vm13197_vm14, %v2362_v7, %v2364_v47  ;;  %5991 = vmatpush1.bf16.msra.mxu1 %v10619_v18  ;;  %v10649_v47 = vld [vmem:[%s15692_s5 + $0x500] ss:$8 sps:$4 sm:$0xff]  }
 0x3aa   : > { %v2675_v32 = vsel %vm13176_vm12, %v16032_v14, %v2674_v8  ;;  %2366 = vst [vmem:[#allocation5] sm:$0x1] %v2365_v49  ;;  %v2422_v61 = vld [vmem:[#allocation5 + $0x1] sm:$0x1]  ;;  %5952 = vmatpush1.bf16.msra.mxu0 %v10622_v44  ;;  %v2497_v16 = vpop.permute.xlu0 %2496  ;;  %5992 = vmatprep.subr.bf16.mxu1 %v10627_v55  ;;  %v10643_v18 = vld [vmem:[%s15692_s5 + $0x510] ss:$8 sps:$4 sm:$0xff]  }
 0x3ab   : > { %2676 = vst [vmem:[#allocation5 + $0x5] sm:$0x1] %v2675_v32  ;;  %v2744_v34 = vld [vmem:[#allocation5 + $0x6] sm:$0x1]  ;;  %v2423_v58 = vsel %vm13197_vm14, %v2420_v46, %v2422_v61  ;;  %5953 = vmatprep.subr.bf16.mxu0 %v10630_v13  ;;  %v10651_v44 = vld [vmem:[%s15692_s5 + $0x504] ss:$8 sps:$4 sm:$0xff]  }
 0x3ac   : > { %v2745_v12 = vsel %vm13176_vm12, %v16034_v23, %v2744_v34  ;;  %2424 = vst [vmem:[#allocation5 + $0x1] sm:$0x1] %v2423_v58  ;;  %v2499_v52 = vld [vmem:[#allocation5 + $0x2] sm:$0x1]  ;;  %v2553_v45 = vpop.permute.xlu1 %2552  ;;  %v10652_v49 = vld [vmem:[%s15692_s5 + $0x4f0] ss:$8 sps:$4 sm:$0xff]  }
 0x3ad   : > { %2746 = vst [vmem:[#allocation5 + $0x6] sm:$0x1] %v2745_v12  ;;  %v2807_v28 = vld [vmem:[#allocation5 + $0x7] sm:$0x1]  ;;  %v2500_v6 = vsel %vm13197_vm14, %v2497_v16, %v2499_v52  ;;  %5993 = vmatpush1.bf16.msra.mxu1 %v10625_v38  ;;  %v10660_v14 = vld [vmem:[%s15692_s5 + $0x4e4] ss:$8 sps:$4 sm:$0xff]  }
 0x3ae   : > { %v2808_v22 = vsel %vm13176_vm12, %v16036_v43, %v2807_v28  ;;  %2501 = vst [vmem:[#allocation5 + $0x2] sm:$0x1] %v2500_v6  ;;  %v2555_v62 = vld [vmem:[#allocation5 + $0x3] sm:$0x1]  ;;  %5954 = vmatpush1.bf16.msra.mxu0 %v10628_v0  ;;  %v2629_v26 = vpop.permute.xlu0 %2628  ;;  %5994 = vmatprep.subr.bf16.mxu1 %v10633_v57  ;;  %v10654_v13 = vld [vmem:[%s15692_s5 + $0x4f4] ss:$8 sps:$4 sm:$0xff]  }
 0x3af   : > { %2809 = vst [vmem:[#allocation5 + $0x7] sm:$0x1] %v2808_v22  ;;  %v2556_v33 = vsel %vm13197_vm14, %v2553_v45, %v2555_v62  ;;  %5955 = vmatprep.subr.bf16.mxu0 %v10636_v11  ;;  %v10657_v38 = vld [vmem:[%s15692_s5 + $0x5f4] ss:$8 sps:$4 sm:$0xff]   ;;  %v10655_v0 = vld [vmem:[%s15692_s5 + $0x5f0] ss:$8 sps:$4 sm:$0xff]  }
 0x3b0   : > { %2557 = vst [vmem:[#allocation5 + $0x3] sm:$0x1] %v2556_v33  ;;  %v2631_v39 = vld [vmem:[#allocation5 + $0x4] sm:$0x1]  ;;  %v2685_v3 = vpop.permute.xlu1 %2684  ;;  %v10658_v58 = vld [vmem:[%s15692_s5 + $0x4e0] ss:$8 sps:$4 sm:$0xff]  }
 0x3b1   : > { %v2632_v42 = vsel %vm13197_vm14, %v2629_v26, %v2631_v39  ;;  %5995 = vmatpush1.bf16.msra.mxu1 %v10631_v59  ;;  %v2383_v60 = vld [vmem:[#allocation5] sm:$0x1]  ;;  %v10663_v11 = vld [vmem:[%s15692_s5 + $0x5e4] ss:$8 sps:$4 sm:$0xff]   ;;  %v10661_v28 = vld [vmem:[%s15692_s5 + $0x5e0] ss:$8 sps:$4 sm:$0xff]  }
 0x3b2   : > { %2633 = vst [vmem:[#allocation5 + $0x4] sm:$0x1] %v2632_v42  ;;  %v2687_v1 = vld [vmem:[#allocation5 + $0x5] sm:$0x1]  ;;  %5956 = vmatpush1.bf16.msra.mxu0 %v10634_v36  ;;  %v2762_v29 = vpop.permute.xlu0 %2761  ;;  %5996 = vmatprep.subr.bf16.mxu1 %v10639_v54  ;;  %v10666_v23 = vld [vmem:[%s15692_s5 + $0x4d4] ss:$8 sps:$4 sm:$0xff]  }
 0x3b3   : > { %v2688_v4 = vsel %vm13197_vm14, %v2685_v3, %v2687_v1  ;;  %5957 = vmatprep.subr.bf16.mxu0 %v10642_v5  ;;  %v2439_v2 = vld [vmem:[#allocation5 + $0x1] sm:$0x1]  ;;  %v10664_v9 = vld [vmem:[%s15692_s5 + $0x4d0] ss:$8 sps:$4 sm:$0xff]   ;;  %v10672_v62 = vld [vmem:[%s15692_s5 + $0x4c4] ss:$8 sps:$4 sm:$0xff]  }
 0x3b4   : > { %2689 = vst [vmem:[#allocation5 + $0x5] sm:$0x1] %v2688_v4  ;;  %v2764_v17 = vld [vmem:[#allocation5 + $0x6] sm:$0x1]  ;;  %v2818_v63 = vpop.permute.xlu1 %2817  ;;  %v10669_v43 = vld [vmem:[%s15692_s5 + $0x5d4] ss:$8 sps:$4 sm:$0xff]  }
 0x3b5   : > { %v2765_v50 = vsel %vm13197_vm14, %v2762_v29, %v2764_v17  ;;  %5997 = vmatpush1.bf16.msra.mxu1 %v10637_v48  ;;  %v2516_v46 = vld [vmem:[#allocation5 + $0x2] sm:$0x1]  ;;  %v2861_v54 = vld [vmem:[#allocation5 + $0x8] sm:$0x1]  ;;  %v10667_v5 = vld [vmem:[%s15692_s5 + $0x5d0] ss:$8 sps:$4 sm:$0xff]  }
 0x3b6   : > { %2766 = vst [vmem:[#allocation5 + $0x6] sm:$0x1] %v2765_v50  ;;  %v2820_v40 = vld [vmem:[#allocation5 + $0x7] sm:$0x1]  ;;  %5958 = vmatpush1.bf16.msra.mxu0 %v10640_v53  ;;  %v2381_v7 = vpop.permute.xlu0 %2380  ;;  %5998 = vmatprep.subr.bf16.mxu1 %v10645_v37  ;;  %v2924_v3 = vld [vmem:[#allocation5 + $0x9] sm:$0x1] }
 0x3b7   : > { %v2821_v55 = vsel %vm13197_vm14, %v2818_v63, %v2820_v40  ;;  %v2384_v15 = vsel %vm13234_vm0, %v2381_v7, %v2383_v60  ;;  %5959 = vmatprep.subr.bf16.mxu0 %v10648_v56  ;;  %v2572_v32 = vld [vmem:[#allocation5 + $0x3] sm:$0x1]  ;;  %v10670_v42 = vld [vmem:[%s15692_s5 + $0x4c0] ss:$8 sps:$4 sm:$0xff]   ;;  %v10675_v48 = vld [vmem:[%s15692_s5 + $0x5c4] ss:$8 sps:$4 sm:$0xff]  }
 0x3b8   : > { %2822 = vst [vmem:[#allocation5 + $0x7] sm:$0x1] %v2821_v55  ;;  %2385 = vst [vmem:[#allocation5] sm:$0x1] %v2384_v15  ;;  %v2437_v41 = vpop.permute.xlu1 %2436  ;;  %v10678_v29 = vld [vmem:[%s15692_s5 + $0x4b4] ss:$8 sps:$4 sm:$0xff]  }
 0x3b9   : > { %5999 = vmatpush1.bf16.msra.mxu1 %v10643_v18  ;;  %v2440_v24 = vsel %vm13234_vm0, %v2437_v41, %v2439_v2  ;;  %v2648_v57 = vld [vmem:[#allocation5 + $0x4] sm:$0x1]  ;;  %v2994_v37 = vld [vmem:[#allocation5 + $0xa] sm:$0x1]  ;;  %v10673_v56 = vld [vmem:[%s15692_s5 + $0x5c0] ss:$8 sps:$4 sm:$0xff]  }
 0x3ba   : > { %2441 = vst [vmem:[#allocation5 + $0x1] sm:$0x1] %v2440_v24  ;;  %5960 = vmatpush1.bf16.msra.mxu0 %v10646_v51  ;;  %v2514_v8 = vpop.permute.xlu0 %2513  ;;  %6000 = vmatprep.subr.bf16.mxu1 %v10651_v44  ;;  %v3057_v63 = vld [vmem:[#allocation5 + $0xb] sm:$0x1]  ;;  %v10676_v50 = vld [vmem:[%s15692_s5 + $0x4b0] ss:$8 sps:$4 sm:$0xff]  }
 0x3bb   : > { %v2517_v35 = vsel %vm13234_vm0, %v2514_v8, %v2516_v46  ;;  %5961 = vmatprep.subr.bf16.mxu0 %v10654_v13  ;;  %v2704_v12 = vld [vmem:[#allocation5 + $0x5] sm:$0x1]  ;;  %v10681_v18 = vld [vmem:[%s15692_s5 + $0x5b4] ss:$8 sps:$4 sm:$0xff]   ;;  %v10684_v40 = vld [vmem:[%s15692_s5 + $0x4a4] ss:$8 sps:$4 sm:$0xff]   ;;  %v4039_v8 = vcombine.high %v13614_v31, %v13614_v31 }
 0x3bc   : > { %2518 = vst [vmem:[#allocation5 + $0x2] sm:$0x1] %v2517_v35  ;;  %v2570_v61 = vpop.permute.xlu1 %2569  ;;  %v3126_v7 = vld [vmem:[#allocation5 + $0xc] sm:$0x1]  ;;  %v10679_v55 = vld [vmem:[%s15692_s5 + $0x5b0] ss:$8 sps:$4 sm:$0xff]  }
 0x3bd   : > { %6001 = vmatpush1.bf16.msra.mxu1 %v10649_v47  ;;  %v2573_v16 = vsel %vm13234_vm0, %v2570_v61, %v2572_v32  ;;  %v2781_v6 = vld [vmem:[#allocation5 + $0x6] sm:$0x1]  ;;  %v3189_v13 = vld [vmem:[#allocation5 + $0xd] sm:$0x1]  ;;  %v10687_v41 = vld [vmem:[%s15692_s5 + $0x5a4] ss:$8 sps:$4 sm:$0xff]  }
 0x3be   : > { %2574 = vst [vmem:[#allocation5 + $0x3] sm:$0x1] %v2573_v16  ;;  %5962 = vmatpush2.bf16.msra.mxu0 %v10652_v49  ;;  %v2646_v34 = vpop.permute.xlu0 %2645  ;;  %6002 = vmatprep.subr.bf16.mxu1 %v10657_v38  ;;  %v10682_v2 = vld [vmem:[%s15692_s5 + $0x4a0] ss:$8 sps:$4 sm:$0xff]   ;;  %v10690_v46 = vld [vmem:[%s15692_s5 + $0x494] ss:$8 sps:$4 sm:$0xff]  }
 0x3bf   : > { %v2649_v20 = vsel %vm13234_vm0, %v2646_v34, %v2648_v57  ;;  %5963 = vmatprep.subr.bf16.mxu0 %v10660_v14  ;;  %v2837_v26 = vld [vmem:[#allocation5 + $0x7] sm:$0x1]  ;;  %v16037_v49 = vld [vmem:[#allocation21_spill] sm:$0xff]  ;;  %v16039_v57 = vld [vmem:[#allocation22_spill] sm:$0xff] }
 0x3c0   : > { %2650 = vst [vmem:[#allocation5 + $0x4] sm:$0x1] %v2649_v20  ;;  %v2702_v52 = vpop.permute.xlu1 %2701  ;;  %v16038_v38 = vrot.slane %v16037_v49, 1  ;;  %v3259_v32 = vld [vmem:[#allocation5 + $0xe] sm:$0x1]  ;;  %v16040_v31 = vrot.slane %v16039_v57, 1 }
 0x3c1   : > { %6003 = vmatpush2.bf16.msra.mxu1 %v10655_v0  ;;  %v2705_v45 = vsel %vm13234_vm0, %v2702_v52, %v2704_v12  ;;  %v10685_v0 = vld [vmem:[%s15692_s5 + $0x5a0] ss:$8 sps:$4 sm:$0xff]   ;;  %v10693_v20 = vld [vmem:[%s15692_s5 + $0x594] ss:$8 sps:$4 sm:$0xff]   ;;  %v3322_v52 = vld [vmem:[#allocation5 + $0xf] sm:$0x1] }
 0x3c2   : > { %2706 = vst [vmem:[#allocation5 + $0x5] sm:$0x1] %v2705_v45  ;;  %5964 = vmatpush2.bf16.msra.mxu0 %v10658_v58  ;;  %v2779_v59 = vpop.permute.xlu0 %2778  ;;  %6004 = vmatprep.subr.bf16.mxu1 %v10663_v11  ;;  %v10688_v11 = vld [vmem:[%s15692_s5 + $0x490] ss:$8 sps:$4 sm:$0xff]   ;;  %v10696_v45 = vld [vmem:[%s15692_s5 + $0x484] ss:$8 sps:$4 sm:$0xff]  }
 0x3c3   : > { %v2782_v22 = vsel %vm13234_vm0, %v2779_v59, %v2781_v6  ;;  %5965 = vmatprep.subr.bf16.mxu0 %v10666_v23  ;;  %v16041_v6 = vld [vmem:[#allocation23_spill] sm:$0xff]  ;;  %v10712_v57 = vld [vmem:[%s15692_s5 + $0x764] ss:$8 sps:$4 sm:$0xff]  }
 0x3c4   : > { %2783 = vst [vmem:[#allocation5 + $0x6] sm:$0x1] %v2782_v22  ;;  %v2835_v36 = vpop.permute.xlu1 %2834  ;;  %v16042_v59 = vrot.slane %v16041_v6, 1  ;;  %v10710_v6 = vld [vmem:[%s15692_s5 + $0x760] ss:$8 sps:$4 sm:$0xff]  }
 0x3c5   : > { %6005 = vmatpush2.bf16.msra.mxu1 %v10661_v28  ;;  %v2838_v33 = vsel %vm13234_vm0, %v2835_v36, %v2837_v26  ;;  %v13960_v28 = vrot.slane %v4039_v8, %v12389_v21  ;;  %v16043_v26 = vld [vmem:[#allocation24_spill] sm:$0xff] }
 0x3c6   : > { %2839 = vst [vmem:[#allocation5 + $0x7] sm:$0x1] %v2838_v33  ;;  %5966 = vmatpush2.bf16.msra.mxu0 %v10664_v9  ;;  %v2859_v39 = vpop.permute.xlu0 %2858  ;;  %6006 = vmatprep.subr.bf16.mxu1 %v10669_v43  ;;  %v16044_v36 = vrot.slane %v16043_v26, 1  ;;  %v10721_v26 = vld [vmem:[%s15692_s5 + $0x644] ss:$8 sps:$4 sm:$0xff]  }
 0x3c7   : > { %v2862_v1 = vsel %vm12398_vm3, %v2859_v39, %v2861_v54  ;;  %5967 = vmatprep.subr.bf16.mxu0 %v10672_v62  ;;  %v10691_v62 = vld [vmem:[%s15692_s5 + $0x590] ss:$8 sps:$4 sm:$0xff]   ;;  %v10694_v39 = vld [vmem:[%s15692_s5 + $0x480] ss:$8 sps:$4 sm:$0xff]  }
 0x3c8   : > { %2863 = vst [vmem:[#allocation5 + $0x8] sm:$0x1] %v2862_v1  ;;  %v2922_v53 = vpop.permute.xlu1 %2921  ;;  %v4055_v1 = vcombine.high %v13960_v28, %v13960_v28 }
 0x3c9   : > { %6007 = vmatpush2.bf16.msra.mxu1 %v10667_v5  ;;  %v2925_v4 = vsel %vm12398_vm3, %v2922_v53, %v2924_v3  ;;  %v10699_v3 = vld [vmem:[%s15692_s5 + $0x584] ss:$8 sps:$4 sm:$0xff]  }
 0x3ca   : > { %2926 = vst [vmem:[#allocation5 + $0x9] sm:$0x1] %v2925_v4  ;;  %5968 = vmatpush2.bf16.msra.mxu0 %v10670_v42  ;;  %v2992_v17 = vpop.permute.xlu0 %2991  ;;  %6008 = vmatprep.subr.bf16.mxu1 %v10675_v48  ;;  %v10702_v48 = vld [vmem:[%s15692_s5 + $0x674] ss:$8 sps:$4 sm:$0xff]  }
 0x3cb   : > { %v2995_v51 = vsel %vm12398_vm3, %v2992_v17, %v2994_v37  ;;  %5969 = vmatprep.subr.bf16.mxu0 %v10678_v29  ;;  %v16045_v29 = vld [vmem:[#allocation25_spill] sm:$0xff] }
 0x3cc   : > { %2996 = vst [vmem:[#allocation5 + $0xa] sm:$0x1] %v2995_v51  ;;  %v3055_v60 = vpop.permute.xlu1 %3054  ;;  %v16046_v53 = vrot.slane %v16045_v29, 1 }
 0x3cd   : > { %6009 = vmatpush2.bf16.msra.mxu1 %v10673_v56  ;;  %v3058_v44 = vsel %vm12398_vm3, %v3055_v60, %v3057_v63 }
 0x3ce   : > { %3059 = vst [vmem:[#allocation5 + $0xb] sm:$0x1] %v3058_v44  ;;  %5970 = vmatpush2.bf16.msra.mxu0 %v10676_v50  ;;  %v3124_v15 = vpop.permute.xlu0 %3123  ;;  %6010 = vmatprep.subr.bf16.mxu1 %v10681_v18  ;;  %v10697_v50 = vld [vmem:[%s15692_s5 + $0x580] ss:$8 sps:$4 sm:$0xff]   ;;  %v4062_v44 = vrot.slane %v13636_v30, %v12389_v21  ;;  %v10709_v30 = vld [vmem:[%s15692_s5 + $0x664] ss:$8 sps:$4 sm:$0xff]  }
 0x3cf   : > { %v2876_v24 = vld [vmem:[#allocation5 + $0x8] sm:$0x1]  ;;  %v3127_v47 = vsel %vm12398_vm3, %v3124_v15, %v3126_v7  ;;  %5971 = vmatprep.subr.bf16.mxu0 %v10684_v40  ;;  %v16047_v18 = vld [vmem:[#allocation26_spill] sm:$0xff] }
 0x3d0   : > { %v2877_v35 = vsel %vm13176_vm12, %v16038_v38, %v2876_v24  ;;  %3128 = vst [vmem:[#allocation5 + $0xc] sm:$0x1] %v3127_v47  ;;  %v3187_v14 = vpop.permute.xlu1 %3186  ;;  %v16048_v51 = vrot.slane %v16047_v18, 1  ;;  %v16049_v24 = vld [vmem:[#allocation27_spill] sm:$0xff] }
 0x3d1   : > { %2878 = vst [vmem:[#allocation5 + $0x8] sm:$0x1] %v2877_v35  ;;  %v2939_v61 = vld [vmem:[#allocation5 + $0x9] sm:$0x1]  ;;  %6011 = vmatpush2.bf16.msra.mxu1 %v10679_v55  ;;  %v3190_v16 = vsel %vm12398_vm3, %v3187_v14, %v3189_v13  ;;  %v10700_v55 = vld [vmem:[%s15692_s5 + $0x670] ss:$8 sps:$4 sm:$0xff]  }
 0x3d2   : > { %v2940_v34 = vsel %vm13176_vm12, %v16040_v31, %v2939_v61  ;;  %3191 = vst [vmem:[#allocation5 + $0xd] sm:$0x1] %v3190_v16  ;;  %5972 = vmatpush2.bf16.msra.mxu0 %v10682_v2  ;;  %v3257_v58 = vpop.permute.xlu0 %3256  ;;  %6012 = vmatprep.subr.bf16.mxu1 %v10687_v41  ;;  %v4083_v2 = vrot.slane %v4055_v1, %v12389_v21  ;;  %v10706_v41 = vld [vmem:[%s15692_s5 + $0x774] ss:$8 sps:$4 sm:$0xff]   ;;  %v16050_v47 = vrot.slane %v16049_v24, 1 }
 0x3d3   : > { %2941 = vst [vmem:[#allocation5 + $0x9] sm:$0x1] %v2940_v34  ;;  %v3009_v23 = vld [vmem:[#allocation5 + $0xa] sm:$0x1]  ;;  %v3260_v12 = vsel %vm12398_vm3, %v3257_v58, %v3259_v32  ;;  %5973 = vmatprep.subr.bf16.mxu0 %v10690_v46  ;;  %v10704_v35 = vld [vmem:[%s15692_s5 + $0x770] ss:$8 sps:$4 sm:$0xff]  }
 0x3d4   : > { %v3010_v9 = vsel %vm13176_vm12, %v16042_v59, %v3009_v23  ;;  %3261 = vst [vmem:[#allocation5 + $0xe] sm:$0x1] %v3260_v12  ;;  %v10707_v14 = vld [vmem:[%s15692_s5 + $0x660] ss:$8 sps:$4 sm:$0xff]   ;;  %v10715_v23 = vld [vmem:[%s15692_s5 + $0x654] ss:$8 sps:$4 sm:$0xff]  }
 0x3d5   : > { %3011 = vst [vmem:[#allocation5 + $0xa] sm:$0x1] %v3010_v9  ;;  %v3072_v43 = vld [vmem:[#allocation5 + $0xb] sm:$0x1]  ;;  %6013 = vmatpush2.bf16.msra.mxu1 %v10685_v0  ;;  %v3320_v22 = vpop.permute.xlu1 %3319  ;;  %v4084_v0 = vcombine.high %v4062_v44, %v4062_v44  ;;  %v10736_v24 = vld [vmem:[%s15692_s5 + $0x724] ss:$8 sps:$4 sm:$0xff]  }
 0x3d6   : > { %v3073_v54 = vsel %vm13176_vm12, %v16044_v36, %v3072_v43  ;;  %v3323_v33 = vsel %vm12398_vm3, %v3320_v22, %v3322_v52  ;;  %5974 = vmatpush2.bf16.msra.mxu0 %v10688_v11  ;;  %v2894_v5 = vpop.permute.xlu0 %2893  ;;  %6014 = vmatprep.subr.bf16.mxu1 %v10693_v20  ;;  %v16051_v31 = vld [vmem:[#allocation28_spill] sm:$0xff]  ;;  %v4087_v20 = vcombine.high %v4083_v2, %v4083_v2 }
 0x3d7   : > { %3074 = vst [vmem:[#allocation5 + $0xb] sm:$0x1] %v3073_v54  ;;  %v3141_v42 = vld [vmem:[#allocation5 + $0xc] sm:$0x1]  ;;  %3324 = vst [vmem:[#allocation5 + $0xf] sm:$0x1] %v3323_v33  ;;  %5975 = vmatprep.subr.bf16.mxu0 %v10696_v45 }
 0x3d8   : > { %v3142_v37 = vsel %vm13176_vm12, %v16046_v53, %v3141_v42  ;;  %v2896_v4 = vld [vmem:[#allocation5 + $0x8] sm:$0x1]  ;;  %v16052_v34 = vrot.slane %v16051_v31, 1  ;;  %v10713_v43 = vld [vmem:[%s15692_s5 + $0x650] ss:$8 sps:$4 sm:$0xff]  }
 0x3d9   : > { %3143 = vst [vmem:[#allocation5 + $0xc] sm:$0x1] %v3142_v37  ;;  %v3204_v56 = vld [vmem:[#allocation5 + $0xd] sm:$0x1]  ;;  %v2897_v17 = vsel %vm13197_vm14, %v2894_v5, %v2896_v4  ;;  %6015 = vmatpush2.bf16.msra.mxu1 %v10691_v62  ;;  %v2950_v63 = vpop.permute.xlu1 %2949  ;;  %v10718_v22 = vld [vmem:[%s15692_s5 + $0x754] ss:$8 sps:$4 sm:$0xff]  }
 0x3da   : > { %v3205_v40 = vsel %vm13176_vm12, %v16048_v51, %v3204_v56  ;;  %2898 = vst [vmem:[#allocation5 + $0x8] sm:$0x1] %v2897_v17  ;;  %v2952_v60 = vld [vmem:[#allocation5 + $0x9] sm:$0x1]  ;;  %5976 = vmatpush2.bf16.msra.mxu0 %v10694_v39  ;;  %v3027_v7 = vpop.permute.xlu0 %3026  ;;  %6016 = vmatprep.subr.bf16.mxu1 %v10699_v3  ;;  %v10716_v5 = vld [vmem:[%s15692_s5 + $0x750] ss:$8 sps:$4 sm:$0xff]  }
 0x3db   : > { %3206 = vst [vmem:[#allocation5 + $0xd] sm:$0x1] %v3205_v40  ;;  %v3274_v15 = vld [vmem:[#allocation5 + $0xe] sm:$0x1]  ;;  %v2953_v13 = vsel %vm13197_vm14, %v2950_v63, %v2952_v60  ;;  %6027 = vmatprep.subr.bf16.mxu0 %v10702_v48  ;;  %v10724_v48 = vld [vmem:[%s15692_s5 + $0x744] ss:$8 sps:$4 sm:$0xff]  }
 0x3dc   : > { %v3275_v46 = vsel %vm13176_vm12, %v16050_v47, %v3274_v15  ;;  %2954 = vst [vmem:[#allocation5 + $0x9] sm:$0x1] %v2953_v13  ;;  %v3029_v8 = vld [vmem:[#allocation5 + $0xa] sm:$0x1]  ;;  %v10719_v42 = vld [vmem:[%s15692_s5 + $0x640] ss:$8 sps:$4 sm:$0xff]  }
 0x3dd   : > { %3276 = vst [vmem:[#allocation5 + $0xe] sm:$0x1] %v3275_v46  ;;  %v3030_v49 = vsel %vm13197_vm14, %v3027_v7, %v3029_v8  ;;  %6017 = vmatpush2.bf16.msra.mxu1 %v10697_v50  ;;  %v3083_v38 = vpop.permute.xlu1 %3082  ;;  %5978 = vmatmul.mubr.bf16.vlgmr.msra.gmra.mxu0 %v4062_v44  ;;  %v10727_v53 = vld [vmem:[%s15692_s5 + $0x634] ss:$8 sps:$4 sm:$0xff]   ;;  %v10722_v17 = vld [vmem:[%s15692_s5 + $0x740] ss:$8 sps:$4 sm:$0xff]  }
 0x3de   : > { %v3337_v32 = vld [vmem:[#allocation5 + $0xf] sm:$0x1]  ;;  %3031 = vst [vmem:[#allocation5 + $0xa] sm:$0x1] %v3030_v49  ;;  %v3085_v61 = vld [vmem:[#allocation5 + $0xb] sm:$0x1]  ;;  %6028 = vmatpush1.bf16.msra.mxu0 %v10700_v55  ;;  %6059 = vmatprep.mubr.bf16.mxu0 %v4083_v2  ;;  %v3159_v16 = vpop.permute.xlu0 %3158 }
 0x3df   : > { %v3338_v58 = vsel %vm13176_vm12, %v16052_v34, %v3337_v32  ;;  %v3086_v11 = vsel %vm13197_vm14, %v3083_v38, %v3085_v61  ;;  %6068 = vmatprep.subr.bf16.mxu1 %v10706_v41  ;;  %6029 = vmatprep.subr.bf16.mxu0 %v10709_v30  ;;  %v10725_v51 = vld [vmem:[%s15692_s5 + $0x630] ss:$8 sps:$4 sm:$0xff]   ;;  %v10730_v40 = vld [vmem:[%s15692_s5 + $0x734] ss:$8 sps:$4 sm:$0xff]   ;;  %v10733_v7 = vld [vmem:[%s15692_s5 + $0x624] ss:$8 sps:$4 sm:$0xff]  }
 0x3e0   : > { %3339 = vst [vmem:[#allocation5 + $0xf] sm:$0x1] %v3338_v58  ;;  %3087 = vst [vmem:[#allocation5 + $0xb] sm:$0x1] %v3086_v11  ;;  %v3161_v12 = vld [vmem:[#allocation5 + $0xc] sm:$0x1]  ;;  %6019 = vmatmul.mubr.bf16.vlgmr.msra.gmra.mxu1 %v4084_v0 }
 0x3e1   : > { %v3162_v52 = vsel %vm13197_vm14, %v3159_v16, %v3161_v12  ;;  %6069 = vmatpush1.bf16.msra.mxu1 %v10704_v35  ;;  %6100 = vmatprep.mubr.bf16.mxu1 %v4087_v20  ;;  %v3215_v45 = vpop.permute.xlu1 %3214  ;;  %v2913_v39 = vld [vmem:[#allocation5 + $0x8] sm:$0x1]  ;;  %v10728_v15 = vld [vmem:[%s15692_s5 + $0x730] ss:$8 sps:$4 sm:$0xff]   ;;  %v10731_v30 = vld [vmem:[%s15692_s5 + $0x620] ss:$8 sps:$4 sm:$0xff]  }
 0x3e2   : > { %3163 = vst [vmem:[#allocation5 + $0xc] sm:$0x1] %v3162_v52  ;;  %v3217_v59 = vld [vmem:[#allocation5 + $0xd] sm:$0x1]  ;;  %6030 = vmatpush1.bf16.msra.mxu0 %v10707_v14  ;;  %v3292_v9 = vpop.permute.xlu0 %3291  ;;  %6070 = vmatprep.subr.bf16.mxu1 %v10712_v57  ;;  %v10739_v46 = vld [vmem:[%s15692_s5 + $0x614] ss:$8 sps:$4 sm:$0xff]  }
 0x3e3   : > { %v3218_v62 = vsel %vm13197_vm14, %v3215_v45, %v3217_v59  ;;  %6031 = vmatprep.subr.bf16.mxu0 %v10715_v23  ;;  %v2969_v4 = vld [vmem:[#allocation5 + $0x9] sm:$0x1]  ;;  %v10734_v38 = vld [vmem:[%s15692_s5 + $0x720] ss:$8 sps:$4 sm:$0xff]   ;;  %v10737_v61 = vld [vmem:[%s15692_s5 + $0x610] ss:$8 sps:$4 sm:$0xff]  }
 0x3e4   : > { %3219 = vst [vmem:[#allocation5 + $0xd] sm:$0x1] %v3218_v62  ;;  %v3294_v36 = vld [vmem:[#allocation5 + $0xe] sm:$0x1]  ;;  %v10742_v16 = vld [vmem:[%s15692_s5 + $0x714] ss:$8 sps:$4 sm:$0xff]  }
 0x3e5   : > { %v3295_v54 = vsel %vm13197_vm14, %v3292_v9, %v3294_v36  ;;  %6071 = vmatpush1.bf16.msra.mxu1 %v10710_v6  ;;  %v3348_v33 = vpop.permute.xlu1 %3347  ;;  %v3046_v50 = vld [vmem:[#allocation5 + $0xa] sm:$0x1]  ;;  %v10745_v57 = vld [vmem:[%s15692_s5 + $0x604] ss:$8 sps:$4 sm:$0xff]   ;;  %v10740_v11 = vld [vmem:[%s15692_s5 + $0x710] ss:$8 sps:$4 sm:$0xff]  }
 0x3e6   : > { %3296 = vst [vmem:[#allocation5 + $0xe] sm:$0x1] %v3295_v54  ;;  %6032 = vmatpush1.bf16.msra.mxu0 %v10713_v43  ;;  %v2911_v3 = vpop.permute.xlu0 %2910  ;;  %6072 = vmatprep.subr.bf16.mxu1 %v10718_v22  ;;  %v3391_v31 = vld [vmem:[#allocation5 + $0x10] sm:$0x1]  ;;  %v10743_v12 = vld [vmem:[%s15692_s5 + $0x600] ss:$8 sps:$4 sm:$0xff]  }
 0x3e7   : > { %v3350_v1 = vld [vmem:[#allocation5 + $0xf] sm:$0x1]  ;;  %v2914_v29 = vsel %vm13234_vm0, %v2911_v3, %v2913_v39  ;;  %6033 = vmatprep.subr.bf16.mxu0 %v10721_v26  ;;  %v3102_v44 = vld [vmem:[#allocation5 + $0xb] sm:$0x1]  ;;  %v3454_v6 = vld [vmem:[#allocation5 + $0x11] sm:$0x1] }
 0x3e8   : > { %v3351_v37 = vsel %vm13197_vm14, %v3348_v33, %v3350_v1  ;;  %2915 = vst [vmem:[#allocation5 + $0x8] sm:$0x1] %v2914_v29  ;;  %v10748_v52 = vld [vmem:[%s15692_s5 + $0x704] ss:$8 sps:$4 sm:$0xff]   ;;  %v10751_v59 = vld [vmem:[%s15692_s5 + $0x6f4] ss:$8 sps:$4 sm:$0xff]  }
 0x3e9   : > { %3352 = vst [vmem:[#allocation5 + $0xf] sm:$0x1] %v3351_v37  ;;  %6073 = vmatpush1.bf16.msra.mxu1 %v10716_v5  ;;  %v2967_v56 = vpop.permute.xlu1 %2966  ;;  %v3178_v2 = vld [vmem:[#allocation5 + $0xc] sm:$0x1]  ;;  %v3524_v9 = vld [vmem:[#allocation5 + $0x12] sm:$0x1] }
 0x3ea   : > { %v2970_v63 = vsel %vm13234_vm0, %v2967_v56, %v2969_v4  ;;  %6034 = vmatpush1.bf16.msra.mxu0 %v10719_v42  ;;  %v3044_v18 = vpop.permute.xlu0 %3043  ;;  %6074 = vmatprep.subr.bf16.mxu1 %v10724_v48  ;;  %v10746_v22 = vld [vmem:[%s15692_s5 + $0x700] ss:$8 sps:$4 sm:$0xff]   ;;  %v10749_v36 = vld [vmem:[%s15692_s5 + $0x6f0] ss:$8 sps:$4 sm:$0xff]   ;;  %v10754_v54 = vld [vmem:[%s15692_s5 + $0x7f4] ss:$8 sps:$4 sm:$0xff]  }
 0x3eb   : > { %2971 = vst [vmem:[#allocation5 + $0x9] sm:$0x1] %v2970_v63  ;;  %v3047_v60 = vsel %vm13234_vm0, %v3044_v18, %v3046_v50  ;;  %6035 = vmatprep.subr.bf16.mxu0 %v10727_v53  ;;  %v3234_v8 = vld [vmem:[#allocation5 + $0xd] sm:$0x1]  ;;  %v3587_v5 = vld [vmem:[#allocation5 + $0x13] sm:$0x1] }
 0x3ec   : > { %3048 = vst [vmem:[#allocation5 + $0xa] sm:$0x1] %v3047_v60  ;;  %v10757_v39 = vld [vmem:[%s15692_s5 + $0x6e4] ss:$8 sps:$4 sm:$0xff]   ;;  %v10752_v42 = vld [vmem:[%s15692_s5 + $0x7f0] ss:$8 sps:$4 sm:$0xff]  }
 0x3ed   : > { %6075 = vmatpush1.bf16.msra.mxu1 %v10722_v17  ;;  %v3100_v55 = vpop.permute.xlu1 %3099  ;;  %v3311_v14 = vld [vmem:[#allocation5 + $0xe] sm:$0x1]  ;;  %v10760_v53 = vld [vmem:[%s15692_s5 + $0x7e4] ss:$8 sps:$4 sm:$0xff]   ;;  %v10763_v4 = vld [vmem:[%s15692_s5 + $0x6d4] ss:$8 sps:$4 sm:$0xff]  }
 0x3ee   : > { %v3103_v13 = vsel %vm13234_vm0, %v3100_v55, %v3102_v44  ;;  %6036 = vmatpush1.bf16.msra.mxu0 %v10725_v51  ;;  %v3176_v41 = vpop.permute.xlu0 %3175  ;;  %6076 = vmatprep.subr.bf16.mxu1 %v10730_v40  ;;  %v10755_v29 = vld [vmem:[%s15692_s5 + $0x6e0] ss:$8 sps:$4 sm:$0xff]   ;;  %v10761_v40 = vld [vmem:[%s15692_s5 + $0x6d0] ss:$8 sps:$4 sm:$0xff]   ;;  %v10766_v60 = vld [vmem:[%s15692_s5 + $0x7d4] ss:$8 sps:$4 sm:$0xff]  }
 0x3ef   : > { %3104 = vst [vmem:[#allocation5 + $0xb] sm:$0x1] %v3103_v13  ;;  %v3179_v47 = vsel %vm13234_vm0, %v3176_v41, %v3178_v2  ;;  %6037 = vmatprep.subr.bf16.mxu0 %v10733_v7  ;;  %v16053_v56 = vld [vmem:[#allocation29_spill] sm:$0xff]  ;;  %v16055_v7 = vld [vmem:[#allocation30_spill] sm:$0xff]  ;;  %v16057_v2 = vld [vmem:[#allocation31_spill] sm:$0xff] }
 0x3f0   : > { %3180 = vst [vmem:[#allocation5 + $0xc] sm:$0x1] %v3179_v47  ;;  %v3367_v34 = vld [vmem:[#allocation5 + $0xf] sm:$0x1]  ;;  %v16054_v17 = vrot.slane %v16053_v56, 1  ;;  %v16056_v44 = vrot.slane %v16055_v7, 1 }
 0x3f1   : > { %6077 = vmatpush1.bf16.msra.mxu1 %v10728_v15  ;;  %v3232_v49 = vpop.permute.xlu1 %3231  ;;  %v10758_v50 = vld [vmem:[%s15692_s5 + $0x7e0] ss:$8 sps:$4 sm:$0xff]   ;;  %v10769_v13 = vld [vmem:[%s15692_s5 + $0x6c4] ss:$8 sps:$4 sm:$0xff]   ;;  %v16058_v41 = vrot.slane %v16057_v2, 1 }
 0x3f2   : > { %v3235_v35 = vsel %vm13234_vm0, %v3232_v49, %v3234_v8  ;;  %6038 = vmatpush1.bf16.msra.mxu0 %v10731_v30  ;;  %v3309_v32 = vpop.permute.xlu0 %3308  ;;  %6078 = vmatprep.subr.bf16.mxu1 %v10736_v24  ;;  %v10764_v24 = vld [vmem:[%s15692_s5 + $0x7d0] ss:$8 sps:$4 sm:$0xff]   ;;  %v10767_v49 = vld [vmem:[%s15692_s5 + $0x6c0] ss:$8 sps:$4 sm:$0xff]  }
 0x3f3   : > { %3236 = vst [vmem:[#allocation5 + $0xd] sm:$0x1] %v3235_v35  ;;  %v3312_v0 = vsel %vm13234_vm0, %v3309_v32, %v3311_v14  ;;  %6039 = vmatprep.subr.bf16.mxu0 %v10739_v46  ;;  %v16059_v35 = vld [vmem:[#allocation32_spill] sm:$0xff] }
 0x3f4   : > { %3313 = vst [vmem:[#allocation5 + $0xe] sm:$0x1] %v3312_v0  ;;  %v16060_v14 = vrot.slane %v16059_v35, 1  ;;  %v10791_v56 = vld [vmem:[%s15692_s5 + $0x680] ss:$8 sps:$4 sm:$0xff]  }
 0x3f5   : > { %6079 = vmatpush1.bf16.msra.mxu1 %v10734_v38  ;;  %v3365_v58 = vpop.permute.xlu1 %3364  ;;  %v10772_v38 = vld [vmem:[%s15692_s5 + $0x7c4] ss:$8 sps:$4 sm:$0xff]   ;;  %v10797_v2 = vld [vmem:[%s15692_s5 + $0x870] ss:$8 sps:$4 sm:$0xff]  }
 0x3f6   : > { %v3368_v20 = vsel %vm13234_vm0, %v3365_v58, %v3367_v34  ;;  %6040 = vmatpush1.bf16.msra.mxu0 %v10737_v61  ;;  %v3389_v23 = vpop.permute.xlu0 %3388  ;;  %6080 = vmatprep.subr.bf16.mxu1 %v10742_v16  ;;  %v10775_v61 = vld [vmem:[%s15692_s5 + $0x6b4] ss:$8 sps:$4 sm:$0xff]   ;;  %v10809_v35 = vld [vmem:[%s15692_s5 + $0x964] ss:$8 sps:$4 sm:$0xff]  }
 0x3f7   : > { %3369 = vst [vmem:[#allocation5 + $0xf] sm:$0x1] %v3368_v20  ;;  %v3392_v45 = vsel %vm12398_vm3, %v3389_v23, %v3391_v31  ;;  %6041 = vmatprep.subr.bf16.mxu0 %v10745_v57  ;;  %v10770_v57 = vld [vmem:[%s15692_s5 + $0x7c0] ss:$8 sps:$4 sm:$0xff]   ;;  %v10778_v34 = vld [vmem:[%s15692_s5 + $0x7b4] ss:$8 sps:$4 sm:$0xff]  }
 0x3f8   : > { %3393 = vst [vmem:[#allocation5 + $0x10] sm:$0x1] %v3392_v45 }
 0x3f9   : > { %6081 = vmatpush1.bf16.msra.mxu1 %v10740_v11  ;;  %v3452_v43 = vpop.permute.xlu1 %3451  ;;  %v10781_v11 = vld [vmem:[%s15692_s5 + $0x6a4] ss:$8 sps:$4 sm:$0xff]  }
 0x3fa   : > { %v3455_v62 = vsel %vm12398_vm3, %v3452_v43, %v3454_v6  ;;  %6042 = vmatpush1.bf16.msra.mxu0 %v10743_v12  ;;  %v3522_v26 = vpop.permute.xlu0 %3521  ;;  %6082 = vmatprep.subr.bf16.mxu1 %v10748_v52  ;;  %v3656_v52 = vld [vmem:[#allocation5 + $0x14] sm:$0x1]  ;;  %v10776_v6 = vld [vmem:[%s15692_s5 + $0x7b0] ss:$8 sps:$4 sm:$0xff]   ;;  %v10784_v43 = vld [vmem:[%s15692_s5 + $0x7a4] ss:$8 sps:$4 sm:$0xff]  }
 0x3fb   : > { %3456 = vst [vmem:[#allocation5 + $0x11] sm:$0x1] %v3455_v62  ;;  %v3525_v33 = vsel %vm12398_vm3, %v3522_v26, %v3524_v9  ;;  %6043 = vmatprep.subr.bf16.mxu0 %v10751_v59  ;;  %v10779_v9 = vld [vmem:[%s15692_s5 + $0x6a0] ss:$8 sps:$4 sm:$0xff]   ;;  %v10787_v26 = vld [vmem:[%s15692_s5 + $0x694] ss:$8 sps:$4 sm:$0xff]  }
 0x3fc   : > { %3526 = vst [vmem:[#allocation5 + $0x12] sm:$0x1] %v3525_v33 }
 0x3fd   : > { %6083 = vmatpush1.bf16.msra.mxu1 %v10746_v22  ;;  %v3585_v3 = vpop.permute.xlu1 %3584 }
 0x3fe   : > { %v3588_v48 = vsel %vm12398_vm3, %v3585_v3, %v3587_v5  ;;  %6044 = vmatpush2.bf16.msra.mxu0 %v10749_v36  ;;  %v3424_v1 = vpop.permute.xlu0 %3423  ;;  %6084 = vmatprep.subr.bf16.mxu1 %v10754_v54  ;;  %v14239_v54 = vld [vmem:[#allocation4 + $0x10] sm:$0x1f]  ;;  %v10782_v5 = vld [vmem:[%s15692_s5 + $0x7a0] ss:$8 sps:$4 sm:$0xff]  }
 0x3ff   : > { %v3406_v37 = vld [vmem:[#allocation5 + $0x10] sm:$0x1]  ;;  %3589 = vst [vmem:[#allocation5 + $0x13] sm:$0x1] %v3588_v48  ;;  %6045 = vmatprep.subr.bf16.mxu0 %v10757_v39  ;;  %v10790_v3 = vld [vmem:[%s15692_s5 + $0x794] ss:$8 sps:$4 sm:$0xff]   ;;  %v14257_v48 = vrot.slane %v14239_v54, %v12389_v21 }
 0x400   : > { %v3407_v63 = vsel %vm13176_vm12, %v16054_v17, %v3406_v37  ;;  %v10788_v37 = vld [vmem:[%s15692_s5 + $0x790] ss:$8 sps:$4 sm:$0xff]   ;;  %v10796_v17 = vld [vmem:[%s15692_s5 + $0x784] ss:$8 sps:$4 sm:$0xff]  }
 0x401   : > { %3408 = vst [vmem:[#allocation5 + $0x10] sm:$0x1] %v3407_v63  ;;  %6085 = vmatpush2.bf16.msra.mxu1 %v10752_v42  ;;  %v3480_v46 = vpop.permute.xlu1 %3479  ;;  %v10793_v42 = vld [vmem:[%s15692_s5 + $0x684] ss:$8 sps:$4 sm:$0xff]  }
 0x402   : > { %v3469_v18 = vld [vmem:[#allocation5 + $0x11] sm:$0x1]  ;;  %6046 = vmatpush2.bf16.msra.mxu0 %v10755_v29  ;;  %v3557_v51 = vpop.permute.xlu0 %3556  ;;  %6086 = vmatprep.subr.bf16.mxu1 %v10760_v53  ;;  %v16061_v63 = vld [vmem:[#allocation6_spill] sm:$0xff] }
 0x403   : > { %v3470_v55 = vsel %vm13176_vm12, %v16056_v44, %v3469_v18  ;;  %v3539_v15 = vld [vmem:[#allocation5 + $0x12] sm:$0x1]  ;;  %6047 = vmatprep.subr.bf16.mxu0 %v10763_v4  ;;  %v10799_v18 = vld [vmem:[%s15692_s5 + $0x874] ss:$8 sps:$4 sm:$0xff]   ;;  %v5774_v44 = vsub.s32 1, %v16061_v63 }
 0x404   : > { %3471 = vst [vmem:[#allocation5 + $0x11] sm:$0x1] %v3470_v55  ;;  %v3540_v30 = vsel %vm13176_vm12, %v16058_v41, %v3539_v15  ;;  %v10794_v15 = vld [vmem:[%s15692_s5 + $0x780] ss:$8 sps:$4 sm:$0xff]  }
 0x405   : > { %3541 = vst [vmem:[#allocation5 + $0x12] sm:$0x1] %v3540_v30  ;;  %6087 = vmatpush2.bf16.msra.mxu1 %v10758_v50  ;;  %v3613_v12 = vpop.permute.xlu1 %3612  ;;  %v5770_v50 = vsub.s32 0, %v16061_v63  ;;  %v10803_v30 = vld [vmem:[%s15692_s5 + $0x974] ss:$8 sps:$4 sm:$0xff]  }
 0x406   : > { %v3602_v47 = vld [vmem:[#allocation5 + $0x13] sm:$0x1]  ;;  %6048 = vmatpush2.bf16.msra.mxu0 %v10761_v40  ;;  %v3441_v8 = vpop.permute.xlu0 %3440  ;;  %6088 = vmatprep.subr.bf16.mxu1 %v10766_v60  ;;  %v4103_v40 = vcombine.high %v14257_v48, %v14257_v48  ;;  %v11307_v63 = vld [vmem:[%s15694_s7 + $0x834] ss:$8 sps:$4 sm:$0xff]  }
 0x407   : > { %v3603_v32 = vsel %vm13176_vm12, %v16060_v14, %v3602_v47  ;;  %6049 = vmatprep.subr.bf16.mxu0 %v10769_v13  ;;  %v4069_v13 = vrot.slane %v13960_v28, %v12389_v21 }
 0x408   : > { %3604 = vst [vmem:[#allocation5 + $0x13] sm:$0x1] %v3603_v32  ;;  %v3426_v16 = vld [vmem:[#allocation5 + $0x10] sm:$0x1]  ;;  %v4124_v10 = vrot.slane %v4103_v40, %v12389_v21  ;;  %v10849_v40 = vld [vmem:[%s15692_s5 + $0x9f0] ss:$8 sps:$4 sm:$0xff]  }
 0x409   : > { %v3427_v0 = vsel %vm13197_vm14, %v3424_v1, %v3426_v16  ;;  %6089 = vmatpush2.bf16.msra.mxu1 %v10764_v24  ;;  %v3497_v39 = vpop.permute.xlu1 %3496  ;;  %v10806_v24 = vld [vmem:[%s15692_s5 + $0x864] ss:$8 sps:$4 sm:$0xff]  }
 0x40a   : > { %3428 = vst [vmem:[#allocation5 + $0x10] sm:$0x1] %v3427_v0  ;;  %6050 = vmatpush2.bf16.msra.mxu0 %v10767_v49  ;;  %v3574_v31 = vpop.permute.xlu0 %3573  ;;  %6090 = vmatprep.subr.bf16.mxu1 %v10772_v38  ;;  %v4085_v49 = vcombine.high %v4069_v13, %v4069_v13  ;;  %v10804_v38 = vld [vmem:[%s15692_s5 + $0x860] ss:$8 sps:$4 sm:$0xff]   ;;  %v4126_v32 = vcombine.high %v4124_v10, %v4124_v10 }
 0x40b   : > { %v3482_v58 = vld [vmem:[#allocation5 + $0x11] sm:$0x1]  ;;  %6051 = vmatprep.subr.bf16.mxu0 %v10775_v61  ;;  %v10812_v61 = vld [vmem:[%s15692_s5 + $0x854] ss:$8 sps:$4 sm:$0xff]  }
 0x40c   : > { %v3483_v20 = vsel %vm13197_vm14, %v3480_v46, %v3482_v58  ;;  %v3559_v23 = vld [vmem:[#allocation5 + $0x12] sm:$0x1]  ;;  %v10801_v46 = vld [vmem:[%s15692_s5 + $0x970] ss:$8 sps:$4 sm:$0xff]  }
 0x40d   : > { %3484 = vst [vmem:[#allocation5 + $0x11] sm:$0x1] %v3483_v20  ;;  %v3560_v45 = vsel %vm13197_vm14, %v3557_v51, %v3559_v23  ;;  %6091 = vmatpush2.bf16.msra.mxu1 %v10770_v57  ;;  %v3986_v51 = vld [vmem:[%s15693_s6] sm:$0x3]  ;;  %v3630_v7 = vpop.permute.xlu1 %3629  ;;  %v10810_v58 = vld [vmem:[%s15692_s5 + $0x850] ss:$8 sps:$4 sm:$0xff]  }
 0x40e   : > { %3561 = vst [vmem:[#allocation5 + $0x12] sm:$0x1] %v3560_v45  ;;  %6052 = vmatpush2.bf16.msra.mxu0 %v10773_v19  ;;  %v3654_v59 = vpop.permute.xlu0 %3653  ;;  %6092 = vmatprep.subr.bf16.mxu1 %v10778_v34  ;;  %v5771_v41 = vrot.slane %v3986_v51, %v5770_v50  ;;  %v5775_v28 = vrot.slane %v3986_v51, %v5774_v44  ;;  %v10807_v19 = vld [vmem:[%s15692_s5 + $0x960] ss:$8 sps:$4 sm:$0xff]   ;;  %v10813_v45 = vld [vmem:[%s15692_s5 + $0x950] ss:$8 sps:$4 sm:$0xff]  }
 0x40f   : > { %v3615_v22 = vld [vmem:[#allocation5 + $0x13] sm:$0x1]  ;;  %v3657_v62 = vsel %vm12398_vm3, %v3654_v59, %v3656_v52  ;;  %6053 = vmatprep.subr.bf16.mxu0 %v10781_v11  ;;  %v10815_v11 = vld [vmem:[%s15692_s5 + $0x954] ss:$8 sps:$4 sm:$0xff]   ;;  %v10854_v51 = vld [vmem:[%s15692_s5 + $0x8e4] ss:$8 sps:$4 sm:$0xff]  }
 0x410   : > { %v3616_v36 = vsel %vm13197_vm14, %v3613_v12, %v3615_v22  ;;  %3658 = vst [vmem:[#allocation5 + $0x14] sm:$0x1] %v3657_v62  ;;  %v10818_v12 = vld [vmem:[%s15692_s5 + $0x844] ss:$8 sps:$4 sm:$0xff]   ;;  %v10816_v59 = vld [vmem:[%s15692_s5 + $0x840] ss:$8 sps:$4 sm:$0xff]  }
 0x411   : > { %3617 = vst [vmem:[#allocation5 + $0x13] sm:$0x1] %v3616_v36  ;;  %v3443_v33 = vld [vmem:[#allocation5 + $0x10] sm:$0x1]  ;;  %6093 = vmatpush2.bf16.msra.mxu1 %v10776_v6  ;;  %v10819_v22 = vld [vmem:[%s15692_s5 + $0x940] ss:$8 sps:$4 sm:$0xff]  }
 0x412   : > { %v3444_v27 = vsel %vm13234_vm0, %v3441_v8, %v3443_v33  ;;  %6054 = vmatpush2.bf16.msra.mxu0 %v10779_v9  ;;  %6094 = vmatprep.subr.bf16.mxu1 %v10784_v43  ;;  %v10821_v9 = vld [vmem:[%s15692_s5 + $0x944] ss:$8 sps:$4 sm:$0xff]   ;;  %v10824_v43 = vld [vmem:[%s15692_s5 + $0x834] ss:$8 sps:$4 sm:$0xff]   ;;  %v10822_v62 = vld [vmem:[%s15692_s5 + $0x830] ss:$8 sps:$4 sm:$0xff]  }
 0x413   : > { %3445 = vst [vmem:[#allocation5 + $0x10] sm:$0x1] %v3444_v27  ;;  %6055 = vmatprep.subr.bf16.mxu0 %v10787_v26  ;;  %v10827_v26 = vld [vmem:[%s15692_s5 + $0x934] ss:$8 sps:$4 sm:$0xff]   ;;  %v10830_v36 = vld [vmem:[%s15692_s5 + $0x824] ss:$8 sps:$4 sm:$0xff]  }
 0x414   : > { %v3499_v1 = vld [vmem:[#allocation5 + $0x11] sm:$0x1]  ;;  %v10825_v33 = vld [vmem:[%s15692_s5 + $0x930] ss:$8 sps:$4 sm:$0xff]  }
 0x415   : > { %v3500_v29 = vsel %vm13234_vm0, %v3497_v39, %v3499_v1  ;;  %v3576_v53 = vld [vmem:[#allocation5 + $0x12] sm:$0x1]  ;;  %6095 = vmatpush2.bf16.msra.mxu1 %v10782_v5  ;;  %v10828_v5 = vld [vmem:[%s15692_s5 + $0x820] ss:$8 sps:$4 sm:$0xff]   ;;  %v10836_v39 = vld [vmem:[%s15692_s5 + $0x814] ss:$8 sps:$4 sm:$0xff]  }
 0x416   : > { %3501 = vst [vmem:[#allocation5 + $0x11] sm:$0x1] %v3500_v29  ;;  %v3577_v4 = vsel %vm13234_vm0, %v3574_v31, %v3576_v53  ;;  %6056 = vmatpush2.bf16.msra.mxu0 %v10785_v25  ;;  %6096 = vmatprep.subr.bf16.mxu1 %v10790_v3  ;;  %v10833_v27 = vld [vmem:[%s15692_s5 + $0x924] ss:$8 sps:$4 sm:$0xff]   ;;  %v10831_v25 = vld [vmem:[%s15692_s5 + $0x920] ss:$8 sps:$4 sm:$0xff]  }
 0x417   : > { %3578 = vst [vmem:[#allocation5 + $0x12] sm:$0x1] %v3577_v4  ;;  %6057 = vmatprep.subr.bf16.mxu0 %v10793_v42  ;;  %v10834_v3 = vld [vmem:[%s15692_s5 + $0x810] ss:$8 sps:$4 sm:$0xff]   ;;  %v10839_v42 = vld [vmem:[%s15692_s5 + $0x914] ss:$8 sps:$4 sm:$0xff]  }
 0x418   : > { %v3632_v60 = vld [vmem:[#allocation5 + $0x13] sm:$0x1]  ;;  %v10842_v1 = vld [vmem:[%s15692_s5 + $0x804] ss:$8 sps:$4 sm:$0xff]   ;;  %v10837_v29 = vld [vmem:[%s15692_s5 + $0x910] ss:$8 sps:$4 sm:$0xff]  }
 0x419   : > { %v3633_v55 = vsel %vm13234_vm0, %v3630_v7, %v3632_v60  ;;  %6097 = vmatpush2.bf16.msra.mxu1 %v10788_v37  ;;  %v10840_v53 = vld [vmem:[%s15692_s5 + $0x800] ss:$8 sps:$4 sm:$0xff]   ;;  %v10845_v37 = vld [vmem:[%s15692_s5 + $0x904] ss:$8 sps:$4 sm:$0xff]   ;;  %v10848_v4 = vld [vmem:[%s15692_s5 + $0x8f4] ss:$8 sps:$4 sm:$0xff]  }
 0x41a   : > { %3634 = vst [vmem:[#allocation5 + $0x13] sm:$0x1] %v3633_v55  ;;  %6058 = vmatpush2.bf16.msra.mxu0 %v10791_v56  ;;  %6098 = vmatprep.subr.bf16.mxu1 %v10796_v17  ;;  %v10843_v56 = vld [vmem:[%s15692_s5 + $0x900] ss:$8 sps:$4 sm:$0xff]   ;;  %v10846_v17 = vld [vmem:[%s15692_s5 + $0x8f0] ss:$8 sps:$4 sm:$0xff]  }
 0x41b   : > { %6109 = vmatprep.subr.bf16.mxu0 %v10799_v18  ;;  %v10851_v18 = vld [vmem:[%s15692_s5 + $0x9f4] ss:$8 sps:$4 sm:$0xff]   ;;  %v10852_v60 = vld [vmem:[%s15692_s5 + $0x8e0] ss:$8 sps:$4 sm:$0xff]   ;;  %v10857_v7 = vld [vmem:[%s15692_s5 + $0x9e4] ss:$8 sps:$4 sm:$0xff]  }
 0x41c   : > { %v10860_v55 = vld [vmem:[%s15692_s5 + $0x8d4] ss:$8 sps:$4 sm:$0xff]  }
 0x41d   : > { %6099 = vmatpush2.bf16.msra.mxu1 %v10794_v15  ;;  %6060 = vmatmul.mubr.bf16.vlgmr.msra.gmra.mxu0 %v4069_v13  ;;  %v5815_v47 = vpop.f32.mrf.mxu0  ;;  %v10855_v15 = vld [vmem:[%s15692_s5 + $0x9e0] ss:$8 sps:$4 sm:$0xff]   ;;  %v10858_v13 = vld [vmem:[%s15692_s5 + $0x8d0] ss:$8 sps:$4 sm:$0xff]  }
 0x41e   : > { %v5816_v8 = vadd.f32 %v5815_v47, %v5771_v41  ;;  %6110 = vmatpush1.bf16.msra.mxu0 %v10797_v2  ;;  %6141 = vmatprep.mubr.bf16.mxu0 %v4124_v10  ;;  %v10863_v2 = vld [vmem:[%s15692_s5 + $0x9d4] ss:$8 sps:$4 sm:$0xff]   ;;  %v10866_v41 = vld [vmem:[%s15692_s5 + $0x8c4] ss:$8 sps:$4 sm:$0xff]   ;;  %v10861_v10 = vld [vmem:[%s15692_s5 + $0x9d0] ss:$8 sps:$4 sm:$0xff]  }
 0x41f   : > { %6150 = vmatprep.subr.bf16.mxu1 %v10803_v30  ;;  %v5817_v14 = vpop.f32.mrf.mxu0  ;;  %6111 = vmatprep.subr.bf16.mxu0 %v10806_v24  ;;  %v10864_v30 = vld [vmem:[%s15692_s5 + $0x8c0] ss:$8 sps:$4 sm:$0xff]   ;;  %v10869_v24 = vld [vmem:[%s15692_s5 + $0x9c4] ss:$8 sps:$4 sm:$0xff]  }
 0x420   : > { %6101 = vmatmul.mubr.bf16.vlgmr.msra.gmra.mxu1 %v4085_v49  ;;  %v5818_v16 = vadd.f32 %v5817_v14, %v5775_v28  ;;  %v5856_v0 = vpop.f32.mrf.mxu1  ;;  %v10872_v28 = vld [vmem:[%s15692_s5 + $0x8b4] ss:$8 sps:$4 sm:$0xff]   ;;  %v10867_v47 = vld [vmem:[%s15692_s5 + $0x9c0] ss:$8 sps:$4 sm:$0xff]   ;;  %v10878_v49 = vld [vmem:[%s15692_s5 + $0x8a4] ss:$8 sps:$4 sm:$0xff]  }
 0x421   : > { %v14315_v57 = vadd.f32 %v5856_v0, %v5816_v8  ;;  %6151 = vmatpush1.bf16.msra.mxu1 %v10801_v46  ;;  %6182 = vmatprep.mubr.bf16.mxu1 %v4126_v32  ;;  %v5819_v31 = vpop.f32.mrf.mxu0  ;;  %v10870_v46 = vld [vmem:[%s15692_s5 + $0x8b0] ss:$8 sps:$4 sm:$0xff]   ;;  %v10875_v8 = vld [vmem:[%s15692_s5 + $0x9b4] ss:$8 sps:$4 sm:$0xff]   ;;  %v10881_v14 = vld [vmem:[%s15692_s5 + $0x9a4] ss:$8 sps:$4 sm:$0xff]  }
 0x422   : > { %v5858_v34 = vpop.f32.mrf.mxu1  ;;  %6112 = vmatpush1.bf16.msra.mxu0 %v10804_v38  ;;  %6152 = vmatprep.subr.bf16.mxu1 %v10809_v35  ;;  %v10873_v38 = vld [vmem:[%s15692_s5 + $0x9b0] ss:$8 sps:$4 sm:$0xff]   ;;  %v10876_v35 = vld [vmem:[%s15692_s5 + $0x8a0] ss:$8 sps:$4 sm:$0xff]   ;;  %v10884_v32 = vld [vmem:[%s15692_s5 + $0x894] ss:$8 sps:$4 sm:$0xff]  }
 0x423   : > { %v14326_v20 = vadd.f32 %v5858_v34, %v5818_v16  ;;  %v5820_v23 = vpop.f32.mrf.mxu0  ;;  %6113 = vmatprep.subr.bf16.mxu0 %v10812_v61  ;;  %v10879_v61 = vld [vmem:[%s15692_s5 + $0x9a0] ss:$8 sps:$4 sm:$0xff]   ;;  %v14466_v16 = vld [vmem:[#allocation5] sm:$0xff] }
 0x424   : > { %v5860_v52 = vpop.f32.mrf.mxu1  ;;  %v10882_v0 = vld [vmem:[%s15692_s5 + $0x890] ss:$8 sps:$4 sm:$0xff]   ;;  %v10887_v31 = vld [vmem:[%s15692_s5 + $0x994] ss:$8 sps:$4 sm:$0xff]   ;;  %v14479_v34 = vrot.slane %v14466_v16, %v12389_v21  ;;  %v10893_v23 = vld [vmem:[%s15692_s5 + $0x984] ss:$8 sps:$4 sm:$0xff]  }
 0x425   : > { %6153 = vmatpush1.bf16.msra.mxu1 %v10807_v19  ;;  %v10890_v19 = vld [vmem:[%s15692_s5 + $0x884] ss:$8 sps:$4 sm:$0xff]  }
 0x426   : > { %v5861_v6 = vpop.f32.mrf.mxu1  ;;  %6114 = vmatpush1.bf16.msra.mxu0 %v10810_v58  ;;  %6154 = vmatprep.subr.bf16.mxu1 %v10815_v11  ;;  %v10885_v58 = vld [vmem:[%s15692_s5 + $0x990] ss:$8 sps:$4 sm:$0xff]   ;;  %v10888_v11 = vld [vmem:[%s15692_s5 + $0x880] ss:$8 sps:$4 sm:$0xff]   ;;  %v6582_v52 = vcombine.high %v14479_v34, %v14479_v34 }
 0x427   : > { %6115 = vmatprep.subr.bf16.mxu0 %v10818_v12  ;;  %v10896_v12 = vld [vmem:[%s15694_s7 + $0x74] ss:$8 sps:$4 sm:$0xff]   ;;  %v4110_v6 = vrot.slane %v14257_v48, %v12389_v21  ;;  %v10897_v48 = vld [vmem:[%s15692_s5 + $0xa10] ss:$8 sps:$4 sm:$0xff]  }
 0x429   : > { %6155 = vmatpush1.bf16.msra.mxu1 %v10813_v45  ;;  %v10891_v45 = vld [vmem:[%s15692_s5 + $0x980] ss:$8 sps:$4 sm:$0xff]  }
 0x42a   : > { %6116 = vmatpush1.bf16.msra.mxu0 %v10816_v59  ;;  %6156 = vmatprep.subr.bf16.mxu1 %v10821_v9  ;;  %v10894_v59 = vld [vmem:[%s15694_s7 + $0x70] ss:$8 sps:$4 sm:$0xff]   ;;  %v10899_v9 = vld [vmem:[%s15692_s5 + $0xa14] ss:$8 sps:$4 sm:$0xff]  }
 0x42b   : > { %6117 = vmatprep.subr.bf16.mxu0 %v10824_v43  ;;  %v10902_v43 = vld [vmem:[%s15694_s7 + $0x64] ss:$8 sps:$4 sm:$0xff]  }
 0x42d   : > { %6157 = vmatpush1.bf16.msra.mxu1 %v10819_v22  ;;  %v6604_v22 = vrot.slane %v6582_v52, %v12389_v21  ;;  %v10948_v52 = vld [vmem:[%s15694_s7 + $0xe0] ss:$8 sps:$4 sm:$0xff]  }
 0x42e   : > { %6118 = vmatpush1.bf16.msra.mxu0 %v10822_v62  ;;  %6158 = vmatprep.subr.bf16.mxu1 %v10827_v26  ;;  %v4088_v26 = vcombine.high %v14239_v54, %v14239_v54  ;;  %v10908_v54 = vld [vmem:[%s15694_s7 + $0x54] ss:$8 sps:$4 sm:$0xff]  }
 0x42f   : > { %6119 = vmatprep.subr.bf16.mxu0 %v10830_v36 }
 0x431   : > { %6159 = vmatpush1.bf16.msra.mxu1 %v10825_v33  ;;  %v4125_v33 = vcombine.high %v4110_v6, %v4110_v6 }
 0x432   : > { %6120 = vmatpush1.bf16.msra.mxu0 %v10828_v5  ;;  %6160 = vmatprep.subr.bf16.mxu1 %v10833_v27  ;;  %v10900_v5 = vld [vmem:[%s15694_s7 + $0x60] ss:$8 sps:$4 sm:$0xff]   ;;  %v10905_v27 = vld [vmem:[%s15692_s5 + $0xa04] ss:$8 sps:$4 sm:$0xff]  }
 0x433   : > { %6121 = vmatprep.subr.bf16.mxu0 %v10836_v39 }
 0x435   : > { %6161 = vmatpush1.bf16.msra.mxu1 %v10831_v25 }
 0x436   : > { %6122 = vmatpush1.bf16.msra.mxu0 %v10834_v3  ;;  %6162 = vmatprep.subr.bf16.mxu1 %v10839_v42 }
 0x437   : > { %6123 = vmatprep.subr.bf16.mxu0 %v10842_v1  ;;  %v10903_v1 = vld [vmem:[%s15692_s5 + $0xa00] ss:$8 sps:$4 sm:$0xff]  }
 0x439   : > { %6163 = vmatpush1.bf16.msra.mxu1 %v10837_v29  ;;  %v11441_v29 = vmov 0  }
 0x43a   : > { %6124 = vmatpush1.bf16.msra.mxu0 %v10840_v53  ;;  %6164 = vmatprep.subr.bf16.mxu1 %v10845_v37  ;;  %v4102_v53 = vrot.slane %v4088_v26, %v12389_v21  ;;  %v10965_v26 = vld [vmem:[%s15694_s7 + $0x1e4] ss:$8 sps:$4 sm:$0xff]  }
 0x43b   : > { %6125 = vmatprep.subr.bf16.mxu0 %v10848_v4  ;;  %v10911_v4 = vld [vmem:[%s15694_s7 + $0x174] ss:$8 sps:$4 sm:$0xff]  }
 0x43d   : > { %6165 = vmatpush1.bf16.msra.mxu1 %v10843_v56 }
 0x43e   : > { %6126 = vmatpush2.bf16.msra.mxu0 %v10846_v17  ;;  %6166 = vmatprep.subr.bf16.mxu1 %v10851_v18  ;;  %v10914_v18 = vld [vmem:[%s15694_s7 + $0x44] ss:$8 sps:$4 sm:$0xff]  }
 0x43f   : > { %6127 = vmatprep.subr.bf16.mxu0 %v10854_v51 }
 0x441   : > { %6167 = vmatpush2.bf16.msra.mxu1 %v10849_v40  ;;  %v10909_v40 = vld [vmem:[%s15694_s7 + $0x170] ss:$8 sps:$4 sm:$0xff]  }
 0x442   : > { %6128 = vmatpush2.bf16.msra.mxu0 %v10852_v60  ;;  %6168 = vmatprep.subr.bf16.mxu1 %v10857_v7  ;;  %v4117_v7 = vrot.slane %v4102_v53, %v12389_v21  ;;  %v10975_v53 = vld [vmem:[%s15694_s7 + $0x1c0] ss:$8 sps:$4 sm:$0xff]  }
 0x443   : > { %6129 = vmatprep.subr.bf16.mxu0 %v10860_v55  ;;  %v10912_v55 = vld [vmem:[%s15694_s7 + $0x40] ss:$8 sps:$4 sm:$0xff]  }
 0x445   : > { %6169 = vmatpush2.bf16.msra.mxu1 %v10855_v15  ;;  %v10917_v15 = vld [vmem:[%s15694_s7 + $0x164] ss:$8 sps:$4 sm:$0xff]  }
 0x446   : > { %6130 = vmatpush2.bf16.msra.mxu0 %v10858_v13  ;;  %6170 = vmatprep.subr.bf16.mxu1 %v10863_v2  ;;  %v6614_v13 = vcombine.high %v6604_v22, %v6604_v22  ;;  %v10920_v2 = vld [vmem:[%s15694_s7 + $0x34] ss:$8 sps:$4 sm:$0xff]  }
 0x447   : > { %6131 = vmatprep.subr.bf16.mxu0 %v10866_v41  ;;  %v10915_v41 = vld [vmem:[%s15694_s7 + $0x160] ss:$8 sps:$4 sm:$0xff]  }
 0x449   : > { %6171 = vmatpush2.bf16.msra.mxu1 %v10861_v10  ;;  %v10918_v10 = vld [vmem:[%s15694_s7 + $0x30] ss:$8 sps:$4 sm:$0xff]  }
 0x44a   : > { %6132 = vmatpush2.bf16.msra.mxu0 %v10864_v30  ;;  %6172 = vmatprep.subr.bf16.mxu1 %v10869_v24  ;;  %v10923_v30 = vld [vmem:[%s15694_s7 + $0x154] ss:$8 sps:$4 sm:$0xff]   ;;  %v10926_v24 = vld [vmem:[%s15694_s7 + $0x24] ss:$8 sps:$4 sm:$0xff]  }
 0x44b   : > { %6133 = vmatprep.subr.bf16.mxu0 %v10872_v28  ;;  %v10921_v28 = vld [vmem:[%s15694_s7 + $0x150] ss:$8 sps:$4 sm:$0xff]  }
 0x44d   : > { %6173 = vmatpush2.bf16.msra.mxu1 %v10867_v47  ;;  %v10924_v47 = vld [vmem:[%s15694_s7 + $0x20] ss:$8 sps:$4 sm:$0xff]  }
 0x44e   : > { %6134 = vmatpush2.bf16.msra.mxu0 %v10870_v46  ;;  %6174 = vmatprep.subr.bf16.mxu1 %v10875_v8  ;;  %v10929_v46 = vld [vmem:[%s15694_s7 + $0x144] ss:$8 sps:$4 sm:$0xff]   ;;  %v10932_v8 = vld [vmem:[%s15694_s7 + $0x14] ss:$8 sps:$4 sm:$0xff]  }
 0x44f   : > { %6135 = vmatprep.subr.bf16.mxu0 %v10878_v49  ;;  %v10927_v49 = vld [vmem:[%s15694_s7 + $0x140] ss:$8 sps:$4 sm:$0xff]  }
 0x451   : > { %6175 = vmatpush2.bf16.msra.mxu1 %v10873_v38  ;;  %v10930_v38 = vld [vmem:[%s15694_s7 + $0x10] ss:$8 sps:$4 sm:$0xff]  }
 0x452   : > { %6136 = vmatpush2.bf16.msra.mxu0 %v10876_v35  ;;  %6176 = vmatprep.subr.bf16.mxu1 %v10881_v14  ;;  %v10935_v35 = vld [vmem:[%s15694_s7 + $0x134] ss:$8 sps:$4 sm:$0xff]   ;;  %v10938_v14 = vld [vmem:[%s15694_s7 + $0x4] ss:$8 sps:$4 sm:$0xff]  }
 0x453   : > { %6137 = vmatprep.subr.bf16.mxu0 %v10884_v32  ;;  %v10933_v32 = vld [vmem:[%s15694_s7 + $0x130] ss:$8 sps:$4 sm:$0xff]  }
 0x455   : > { %6177 = vmatpush2.bf16.msra.mxu1 %v10879_v61  ;;  %v10936_v61 = vld [vmem:[%s15694_s7] ss:$8 sps:$4 sm:$0xff]  }
 0x456   : > { %6138 = vmatpush2.bf16.msra.mxu0 %v10882_v0  ;;  %6178 = vmatprep.subr.bf16.mxu1 %v10887_v31  ;;  %v10941_v0 = vld [vmem:[%s15694_s7 + $0x124] ss:$8 sps:$4 sm:$0xff]   ;;  %v10944_v31 = vld [vmem:[%s15694_s7 + $0xf4] ss:$8 sps:$4 sm:$0xff]  }
 0x457   : > { %6139 = vmatprep.subr.bf16.mxu0 %v10890_v19  ;;  %v10939_v19 = vld [vmem:[%s15694_s7 + $0x120] ss:$8 sps:$4 sm:$0xff]  }
 0x459   : > { %6179 = vmatpush2.bf16.msra.mxu1 %v10885_v58  ;;  %v10942_v58 = vld [vmem:[%s15694_s7 + $0xf0] ss:$8 sps:$4 sm:$0xff]  }
 0x45a   : > { %6140 = vmatpush2.bf16.msra.mxu0 %v10888_v11  ;;  %6180 = vmatprep.subr.bf16.mxu1 %v10893_v23  ;;  %v10947_v11 = vld [vmem:[%s15694_s7 + $0x114] ss:$8 sps:$4 sm:$0xff]   ;;  %v10950_v23 = vld [vmem:[%s15694_s7 + $0xe4] ss:$8 sps:$4 sm:$0xff]  }
 0x45b   : > { %8358 = vmatprep.subr.bf16.mxu0 %v10896_v12  ;;  %v10945_v12 = vld [vmem:[%s15694_s7 + $0x110] ss:$8 sps:$4 sm:$0xff]  }
 0x45d   : > { %6181 = vmatpush2.bf16.msra.mxu1 %v10891_v45  ;;  %v5897_v62 = vpop.f32.mrf.mxu0  ;;  %6142 = vmatmul.mubr.bf16.vlgmr.msra.gmra.mxu0 %v4110_v6  ;;  %v10953_v45 = vld [vmem:[%s15694_s7 + $0x104] ss:$8 sps:$4 sm:$0xff]   ;;  %v10956_v6 = vld [vmem:[%s15694_s7 + $0xd4] ss:$8 sps:$4 sm:$0xff]  }
 0x45e   : > { %v5898_v36 = vadd.f32 %v5897_v62, %v14315_v57  ;;  %8359 = vmatpush1.bf16.msra.mxu0 %v10894_v59  ;;  %8390 = vmatprep.mubr.bf16.mxu0 %v6604_v22  ;;  %v10951_v59 = vld [vmem:[%s15694_s7 + $0x100] ss:$8 sps:$4 sm:$0xff]   ;;  %v10962_v22 = vld [vmem:[%s15694_s7 + $0xc4] ss:$8 sps:$4 sm:$0xff]   ;;  %v10957_v62 = vld [vmem:[%s15694_s7 + $0x1f0] ss:$8 sps:$4 sm:$0xff]  }
 0x45f   : > { %v5899_v39 = vpop.f32.mrf.mxu0  ;;  %6203 = vmatprep.subr.bf16.mxu1 %v10899_v9  ;;  %8360 = vmatprep.subr.bf16.mxu0 %v10902_v43  ;;  %v10954_v9 = vld [vmem:[%s15694_s7 + $0xd0] ss:$8 sps:$4 sm:$0xff]   ;;  %v10959_v43 = vld [vmem:[%s15694_s7 + $0x1f4] ss:$8 sps:$4 sm:$0xff]  }
 0x460   : > { %v5900_v57 = vadd.f32 %v5899_v39, %v14326_v20  ;;  %v5938_v25 = vpop.f32.mrf.mxu1  ;;  %6183 = vmatmul.mubr.bf16.vlgmr.msra.gmra.mxu1 %v4125_v33  ;;  %v10906_v20 = vld [vmem:[%s15694_s7 + $0x50] ss:$8 sps:$4 sm:$0xff]   ;;  %v10963_v33 = vld [vmem:[%s15694_s7 + $0x1e0] ss:$8 sps:$4 sm:$0xff]   ;;  %v10974_v39 = vld [vmem:[%s15694_s7 + $0xa4] ss:$8 sps:$4 sm:$0xff]  }
 0x461   : > { %v14526_v3 = vadd.f32 %v5938_v25, %v5898_v36  ;;  %6204 = vmatpush1.bf16.msra.mxu1 %v10897_v48  ;;  %v5901_v42 = vpop.f32.mrf.mxu0  ;;  %6223 = vmatprep.mubr.bf16.mxu1 %v11441_v29  ;;  %v10960_v48 = vld [vmem:[%s15694_s7 + $0xc0] ss:$8 sps:$4 sm:$0xff]   ;;  %v10968_v36 = vld [vmem:[%s15694_s7 + $0xb4] ss:$8 sps:$4 sm:$0xff]   ;;  %v10977_v25 = vld [vmem:[%s15694_s7 + $0x1c4] ss:$8 sps:$4 sm:$0xff]  }
 0x462   : > { %v5940_v37 = vpop.f32.mrf.mxu1  ;;  %8361 = vmatpush1.bf16.msra.mxu0 %v10900_v5  ;;  %6205 = vmatprep.subr.bf16.mxu1 %v10905_v27  ;;  %v10966_v5 = vld [vmem:[%s15694_s7 + $0xb0] ss:$8 sps:$4 sm:$0xff]   ;;  %v10971_v27 = vld [vmem:[%s15694_s7 + $0x1d4] ss:$8 sps:$4 sm:$0xff]  }
 0x463   : > { %v14539_v56 = vadd.f32 %v5940_v37, %v5900_v57  ;;  %v5902_v17 = vpop.f32.mrf.mxu0  ;;  %8362 = vmatprep.subr.bf16.mxu0 %v10908_v54  ;;  %v10969_v54 = vld [vmem:[%s15694_s7 + $0x1d0] ss:$8 sps:$4 sm:$0xff]   ;;  %v10972_v57 = vld [vmem:[%s15694_s7 + $0xa0] ss:$8 sps:$4 sm:$0xff]   ;;  %v10980_v42 = vld [vmem:[%s15694_s7 + $0x94] ss:$8 sps:$4 sm:$0xff]  }
 0x464   : > { %v5942_v51 = vpop.f32.mrf.mxu1  ;;  %v10978_v37 = vld [vmem:[%s15694_s7 + $0x90] ss:$8 sps:$4 sm:$0xff]  }
 0x465   : > { %6206 = vmatpush1.bf16.msra.mxu1 %v10903_v1  ;;  %v6567_v1 = vcombine.high %v14466_v16, %v14466_v16  ;;  %v10986_v16 = vld [vmem:[%s15694_s7 + $0x84] ss:$8 sps:$4 sm:$0xff]   ;;  %v10981_v17 = vld [vmem:[%s15694_s7 + $0x1b0] ss:$8 sps:$4 sm:$0xff]  }
 0x466   : > { %v5943_v60 = vpop.f32.mrf.mxu1  ;;  %8363 = vmatpush1.bf16.msra.mxu0 %v10906_v20  ;;  %8399 = vmatprep.subr.bf16.mxu1 %v10911_v4  ;;  %v10983_v20 = vld [vmem:[%s15694_s7 + $0x1b4] ss:$8 sps:$4 sm:$0xff]   ;;  %v10989_v51 = vld [vmem:[%s15694_s7 + $0x1a4] ss:$8 sps:$4 sm:$0xff]  }
 0x467   : > { %8364 = vmatprep.subr.bf16.mxu0 %v10914_v18  ;;  %v14693_v4 = vrot.slane %v6567_v1, %v12389_v21  ;;  %v10984_v18 = vld [vmem:[%s15694_s7 + $0x80] ss:$8 sps:$4 sm:$0xff]  }
 0x468   : > { %9713 = vmatmul.mubr.msk.bf16.vlgmr.msra.gmra.mxu1 %vm869_vm1, %v4117_v7  ;;  %v10987_v7 = vld [vmem:[%s15694_s7 + $0x1a0] ss:$8 sps:$4 sm:$0xff]  }
 0x469   : > { %8400 = vmatpush1.bf16.msra.mxu1 %v10909_v40  ;;  %8431 = vmatprep.mubr.bf16.mxu1 %v6614_v13  ;;  %v10992_v40 = vld [vmem:[%s15694_s7 + $0x274] ss:$8 sps:$4 sm:$0xff]   ;;  %v6583_v60 = vcombine.high %v14693_v4, %v14693_v4  ;;  %v11036_v1 = vld [vmem:[%s15694_s7 + $0x320] ss:$8 sps:$4 sm:$0xff]  }
 0x46a   : > { %8365 = vmatpush1.bf16.msra.mxu0 %v10912_v55  ;;  %8401 = vmatprep.subr.bf16.mxu1 %v10917_v15  ;;  %v10990_v55 = vld [vmem:[%s15694_s7 + $0x270] ss:$8 sps:$4 sm:$0xff]   ;;  %v6590_v15 = vrot.slane %v14479_v34, %v12389_v21  ;;  %v10996_v13 = vld [vmem:[%s15694_s7 + $0x194] ss:$8 sps:$4 sm:$0xff]  }
 0x46b   : > { %8366 = vmatprep.subr.bf16.mxu0 %v10920_v2  ;;  %v10999_v2 = vld [vmem:[%s15694_s7 + $0x264] ss:$8 sps:$4 sm:$0xff]  }
 0x46d   : > { %8402 = vmatpush1.bf16.msra.mxu1 %v10915_v41  ;;  %v6611_v41 = vrot.slane %v6583_v60, %v12389_v21  ;;  %v11051_v60 = vld [vmem:[%s15694_s7 + $0x2d0] ss:$8 sps:$4 sm:$0xff]  }
 0x46e   : > { %8367 = vmatpush1.bf16.msra.mxu0 %v10918_v10  ;;  %8403 = vmatprep.subr.bf16.mxu1 %v10923_v30  ;;  %v10994_v30 = vld [vmem:[%s15694_s7 + $0x190] ss:$8 sps:$4 sm:$0xff]  }
 0x46f   : > { %8368 = vmatprep.subr.bf16.mxu0 %v10926_v24  ;;  %v10997_v24 = vld [vmem:[%s15694_s7 + $0x260] ss:$8 sps:$4 sm:$0xff]  }
 0x471   : > { %8404 = vmatpush1.bf16.msra.mxu1 %v10921_v28  ;;  %v11002_v28 = vld [vmem:[%s15694_s7 + $0x184] ss:$8 sps:$4 sm:$0xff]  }
 0x472   : > { %8369 = vmatpush1.bf16.msra.mxu0 %v10924_v47  ;;  %8405 = vmatprep.subr.bf16.mxu1 %v10929_v46  ;;  %v11005_v46 = vld [vmem:[%s15694_s7 + $0x254] ss:$8 sps:$4 sm:$0xff]  }
 0x473   : > { %8370 = vmatprep.subr.bf16.mxu0 %v10932_v8 }
 0x475   : > { %8406 = vmatpush1.bf16.msra.mxu1 %v10927_v49 }
 0x476   : > { %8371 = vmatpush1.bf16.msra.mxu0 %v10930_v38  ;;  %8407 = vmatprep.subr.bf16.mxu1 %v10935_v35  ;;  %v11000_v35 = vld [vmem:[%s15694_s7 + $0x180] ss:$8 sps:$4 sm:$0xff]  }
 0x477   : > { %8372 = vmatprep.subr.bf16.mxu0 %v10938_v14 }
 0x479   : > { %8408 = vmatpush1.bf16.msra.mxu1 %v10933_v32  ;;  %v11003_v32 = vld [vmem:[%s15694_s7 + $0x250] ss:$8 sps:$4 sm:$0xff]  }
 0x47a   : > { %8373 = vmatpush1.bf16.msra.mxu0 %v10936_v61  ;;  %8409 = vmatprep.subr.bf16.mxu1 %v10941_v0 }
 0x47b   : > { %8374 = vmatprep.subr.bf16.mxu0 %v10944_v31  ;;  %v11011_v31 = vld [vmem:[%s15694_s7 + $0x244] ss:$8 sps:$4 sm:$0xff]  }
 0x47d   : > { %8410 = vmatpush1.bf16.msra.mxu1 %v10939_v19 }
 0x47e   : > { %8375 = vmatpush2.bf16.msra.mxu0 %v10942_v58  ;;  %8411 = vmatprep.subr.bf16.mxu1 %v10947_v11  ;;  %v11006_v58 = vld [vmem:[%s15694_s7 + $0x370] ss:$8 sps:$4 sm:$0xff]  }
 0x47f   : > { %8376 = vmatprep.subr.bf16.mxu0 %v10950_v23  ;;  %v6612_v23 = vcombine.high %v6590_v15, %v6590_v15 }
 0x481   : > { %8412 = vmatpush1.bf16.msra.mxu1 %v10945_v12  ;;  %v11009_v12 = vld [vmem:[%s15694_s7 + $0x240] ss:$8 sps:$4 sm:$0xff]  }
 0x482   : > { %8377 = vmatpush2.bf16.msra.mxu0 %v10948_v52  ;;  %8413 = vmatprep.subr.bf16.mxu1 %v10953_v45  ;;  %v11014_v52 = vld [vmem:[%s15694_s7 + $0x364] ss:$8 sps:$4 sm:$0xff]   ;;  %v6615_v45 = vcombine.high %v6611_v41, %v6611_v41 }
 0x483   : > { %8378 = vmatprep.subr.bf16.mxu0 %v10956_v6  ;;  %v11017_v6 = vld [vmem:[%s15694_s7 + $0x234] ss:$8 sps:$4 sm:$0xff]  }
 0x485   : > { %8414 = vmatpush1.bf16.msra.mxu1 %v10951_v59  ;;  %v11012_v59 = vld [vmem:[%s15694_s7 + $0x360] ss:$8 sps:$4 sm:$0xff]  }
 0x486   : > { %8379 = vmatpush2.bf16.msra.mxu0 %v10954_v9  ;;  %8415 = vmatprep.subr.bf16.mxu1 %v10959_v43  ;;  %v11015_v9 = vld [vmem:[%s15694_s7 + $0x230] ss:$8 sps:$4 sm:$0xff]   ;;  %v11020_v43 = vld [vmem:[%s15694_s7 + $0x354] ss:$8 sps:$4 sm:$0xff]  }
 0x487   : > { %8380 = vmatprep.subr.bf16.mxu0 %v10962_v22  ;;  %v11023_v22 = vld [vmem:[%s15694_s7 + $0x224] ss:$8 sps:$4 sm:$0xff]  }
 0x489   : > { %8416 = vmatpush2.bf16.msra.mxu1 %v10957_v62  ;;  %v11018_v62 = vld [vmem:[%s15694_s7 + $0x350] ss:$8 sps:$4 sm:$0xff]  }
 0x48a   : > { %8381 = vmatpush2.bf16.msra.mxu0 %v10960_v48  ;;  %8417 = vmatprep.subr.bf16.mxu1 %v10965_v26  ;;  %v11021_v48 = vld [vmem:[%s15694_s7 + $0x220] ss:$8 sps:$4 sm:$0xff]   ;;  %v11026_v26 = vld [vmem:[%s15694_s7 + $0x344] ss:$8 sps:$4 sm:$0xff]  }
 0x48b   : > { %8382 = vmatprep.subr.bf16.mxu0 %v10968_v36  ;;  %v11029_v36 = vld [vmem:[%s15694_s7 + $0x214] ss:$8 sps:$4 sm:$0xff]  }
 0x48d   : > { %8418 = vmatpush2.bf16.msra.mxu1 %v10963_v33  ;;  %v11024_v33 = vld [vmem:[%s15694_s7 + $0x340] ss:$8 sps:$4 sm:$0xff]  }
 0x48e   : > { %8383 = vmatpush2.bf16.msra.mxu0 %v10966_v5  ;;  %8419 = vmatprep.subr.bf16.mxu1 %v10971_v27  ;;  %v11027_v5 = vld [vmem:[%s15694_s7 + $0x210] ss:$8 sps:$4 sm:$0xff]   ;;  %v11032_v27 = vld [vmem:[%s15694_s7 + $0x334] ss:$8 sps:$4 sm:$0xff]  }
 0x48f   : > { %8384 = vmatprep.subr.bf16.mxu0 %v10974_v39  ;;  %v11035_v39 = vld [vmem:[%s15694_s7 + $0x204] ss:$8 sps:$4 sm:$0xff]  }
 0x491   : > { %8420 = vmatpush2.bf16.msra.mxu1 %v10969_v54  ;;  %v11030_v54 = vld [vmem:[%s15694_s7 + $0x330] ss:$8 sps:$4 sm:$0xff]  }
 0x492   : > { %8385 = vmatpush2.bf16.msra.mxu0 %v10972_v57  ;;  %8421 = vmatprep.subr.bf16.mxu1 %v10977_v25  ;;  %v11033_v57 = vld [vmem:[%s15694_s7 + $0x200] ss:$8 sps:$4 sm:$0xff]   ;;  %v11038_v25 = vld [vmem:[%s15694_s7 + $0x324] ss:$8 sps:$4 sm:$0xff]  }
 0x493   : > { %8386 = vmatprep.subr.bf16.mxu0 %v10980_v42  ;;  %v11041_v42 = vld [vmem:[%s15694_s7 + $0x2f4] ss:$8 sps:$4 sm:$0xff]  }
 0x495   : > { %8422 = vmatpush2.bf16.msra.mxu1 %v10975_v53  ;;  %v11039_v53 = vld [vmem:[%s15694_s7 + $0x2f0] ss:$8 sps:$4 sm:$0xff]  }
 0x496   : > { %8387 = vmatpush2.bf16.msra.mxu0 %v10978_v37  ;;  %8423 = vmatprep.subr.bf16.mxu1 %v10983_v20  ;;  %v11044_v37 = vld [vmem:[%s15694_s7 + $0x314] ss:$8 sps:$4 sm:$0xff]   ;;  %v11047_v20 = vld [vmem:[%s15694_s7 + $0x2e4] ss:$8 sps:$4 sm:$0xff]  }
 0x497   : > { %8388 = vmatprep.subr.bf16.mxu0 %v10986_v16  ;;  %v11042_v16 = vld [vmem:[%s15694_s7 + $0x310] ss:$8 sps:$4 sm:$0xff]  }
 0x499   : > { %8424 = vmatpush2.bf16.msra.mxu1 %v10981_v17  ;;  %v11045_v17 = vld [vmem:[%s15694_s7 + $0x2e0] ss:$8 sps:$4 sm:$0xff]  }
 0x49a   : > { %8389 = vmatpush2.bf16.msra.mxu0 %v10984_v18  ;;  %8425 = vmatprep.subr.bf16.mxu1 %v10989_v51  ;;  %v11050_v18 = vld [vmem:[%s15694_s7 + $0x304] ss:$8 sps:$4 sm:$0xff]   ;;  %v11053_v51 = vld [vmem:[%s15694_s7 + $0x2d4] ss:$8 sps:$4 sm:$0xff]  }
 0x49b   : > { %8440 = vmatprep.subr.bf16.mxu0 %v10992_v40  ;;  %v11048_v40 = vld [vmem:[%s15694_s7 + $0x300] ss:$8 sps:$4 sm:$0xff]  }
 0x49d   : > { %8426 = vmatpush2.bf16.msra.mxu1 %v10987_v7  ;;  %v5979_v10 = vpop.f32.mrf.mxu0  ;;  %8391 = vmatmul.mubr.bf16.vlgmr.msra.gmra.mxu0 %v6590_v15  ;;  %v11056_v7 = vld [vmem:[%s15694_s7 + $0x3f4] ss:$8 sps:$4 sm:$0xff]   ;;  %v11054_v15 = vld [vmem:[%s15694_s7 + $0x3f0] ss:$8 sps:$4 sm:$0xff]  }
 0x49e   : > { %v5980_v34 = vadd.f32 %v5979_v10, %v14526_v3  ;;  %8441 = vmatpush1.bf16.msra.mxu0 %v10990_v55  ;;  %8472 = vmatprep.mubr.bf16.mxu0 %v6611_v41  ;;  %v11059_v55 = vld [vmem:[%s15694_s7 + $0x2c4] ss:$8 sps:$4 sm:$0xff]   ;;  %v11065_v41 = vld [vmem:[%s15694_s7 + $0x2b4] ss:$8 sps:$4 sm:$0xff]   ;;  %v11060_v10 = vld [vmem:[%s15694_s7 + $0x3e0] ss:$8 sps:$4 sm:$0xff]  }
 0x49f   : > { %v5981_v47 = vpop.f32.mrf.mxu0  ;;  %8427 = vmatprep.subr.bf16.mxu1 %v10996_v13  ;;  %8442 = vmatprep.subr.bf16.mxu0 %v10999_v2  ;;  %v11057_v13 = vld [vmem:[%s15694_s7 + $0x2c0] ss:$8 sps:$4 sm:$0xff]   ;;  %v11062_v2 = vld [vmem:[%s15694_s7 + $0x3e4] ss:$8 sps:$4 sm:$0xff]  }
 0x4a0   : > { %v5982_v8 = vadd.f32 %v5981_v47, %v14539_v56  ;;  %v6020_v3 = vpop.f32.mrf.mxu1  ;;  %v11008_v56 = vld [vmem:[%s15694_s7 + $0x374] ss:$8 sps:$4 sm:$0xff]   ;;  %v11069_v47 = vld [vmem:[%s15694_s7 + $0x2a0] ss:$8 sps:$4 sm:$0xff]  }
 0x4a1   : > { %v14738_v49 = vadd.f32 %v6020_v3, %v5980_v34  ;;  %8428 = vmatpush2.bf16.msra.mxu1 %v10994_v30  ;;  %v5983_v38 = vpop.f32.mrf.mxu0  ;;  %v11063_v30 = vld [vmem:[%s15694_s7 + $0x2b0] ss:$8 sps:$4 sm:$0xff]   ;;  %v11068_v34 = vld [vmem:[%s15694_s7 + $0x3d4] ss:$8 sps:$4 sm:$0xff]   ;;  %v11072_v3 = vld [vmem:[%s15694_s7 + $0x3c0] ss:$8 sps:$4 sm:$0xff]  }
 0x4a2   : > { %v6022_v14 = vpop.f32.mrf.mxu1  ;;  %8443 = vmatpush1.bf16.msra.mxu0 %v10997_v24  ;;  %8429 = vmatprep.subr.bf16.mxu1 %v11002_v28  ;;  %v11071_v24 = vld [vmem:[%s15694_s7 + $0x2a4] ss:$8 sps:$4 sm:$0xff]   ;;  %v11066_v28 = vld [vmem:[%s15694_s7 + $0x3d0] ss:$8 sps:$4 sm:$0xff]  }
 0x4a3   : > { %v14749_v61 = vadd.f32 %v6022_v14, %v5982_v8  ;;  %v5984_v0 = vpop.f32.mrf.mxu0  ;;  %8444 = vmatprep.subr.bf16.mxu0 %v11005_v46  ;;  %v11074_v46 = vld [vmem:[%s15694_s7 + $0x3c4] ss:$8 sps:$4 sm:$0xff]   ;;  %v11077_v8 = vld [vmem:[%s15694_s7 + $0x294] ss:$8 sps:$4 sm:$0xff]  }
 0x4a4   : > { %v6024_v19 = vpop.f32.mrf.mxu1  ;;  %v14889_v38 = vld [vmem:[#allocation5 + $0x8] sm:$0xff]  ;;  %v11078_v0 = vld [vmem:[%s15694_s7 + $0x3b0] ss:$8 sps:$4 sm:$0xff]  }
 0x4a5   : > { %8430 = vmatpush2.bf16.msra.mxu1 %v11000_v35  ;;  %v11075_v35 = vld [vmem:[%s15694_s7 + $0x290] ss:$8 sps:$4 sm:$0xff]   ;;  %v11080_v14 = vld [vmem:[%s15694_s7 + $0x3b4] ss:$8 sps:$4 sm:$0xff]   ;;  %v11086_v19 = vld [vmem:[%s15694_s7 + $0x3a4] ss:$8 sps:$4 sm:$0xff]  }
 0x4a6   : > { %v6025_v11 = vpop.f32.mrf.mxu1  ;;  %8445 = vmatpush1.bf16.msra.mxu0 %v11003_v32  ;;  %8481 = vmatprep.subr.bf16.mxu1 %v11008_v56  ;;  %v11083_v32 = vld [vmem:[%s15694_s7 + $0x284] ss:$8 sps:$4 sm:$0xff]   ;;  %v14902_v56 = vrot.slane %v14889_v38, %v12389_v21 }
 0x4a7   : > { %8446 = vmatprep.subr.bf16.mxu0 %v11011_v31  ;;  %v11081_v31 = vld [vmem:[%s15694_s7 + $0x280] ss:$8 sps:$4 sm:$0xff]  }
 0x4a8   : > { %8432 = vmatmul.mubr.bf16.vlgmr.msra.gmra.mxu1 %v6612_v23  ;;  %v6631_v11 = vcombine.high %v14902_v56, %v14902_v56  ;;  %v11084_v23 = vld [vmem:[%s15694_s7 + $0x3a0] ss:$8 sps:$4 sm:$0xff]  }
 0x4a9   : > { %8482 = vmatpush1.bf16.msra.mxu1 %v11006_v58  ;;  %8513 = vmatprep.mubr.bf16.mxu1 %v6615_v45  ;;  %v11089_v58 = vld [vmem:[%s15694_s7 + $0x474] ss:$8 sps:$4 sm:$0xff]  }
 0x4aa   : > { %8447 = vmatpush1.bf16.msra.mxu0 %v11009_v12  ;;  %8483 = vmatprep.subr.bf16.mxu1 %v11014_v52  ;;  %v11087_v12 = vld [vmem:[%s15694_s7 + $0x470] ss:$8 sps:$4 sm:$0xff]   ;;  %v6597_v52 = vrot.slane %v14693_v4, %v12389_v21  ;;  %v11092_v45 = vld [vmem:[%s15694_s7 + $0x394] ss:$8 sps:$4 sm:$0xff]  }
 0x4ab   : > { %8448 = vmatprep.subr.bf16.mxu0 %v11017_v6  ;;  %v11095_v6 = vld [vmem:[%s15694_s7 + $0x464] ss:$8 sps:$4 sm:$0xff]  }
 0x4ad   : > { %8484 = vmatpush1.bf16.msra.mxu1 %v11012_v59  ;;  %v6653_v59 = vrot.slane %v6631_v11, %v12389_v21  ;;  %v11144_v11 = vld [vmem:[%s15694_s7 + $0x500] ss:$8 sps:$4 sm:$0xff]  }
 0x4ae   : > { %8449 = vmatpush1.bf16.msra.mxu0 %v11015_v9  ;;  %8485 = vmatprep.subr.bf16.mxu1 %v11020_v43  ;;  %v11090_v43 = vld [vmem:[%s15694_s7 + $0x390] ss:$8 sps:$4 sm:$0xff]  }
 0x4af   : > { %8450 = vmatprep.subr.bf16.mxu0 %v11023_v22  ;;  %v11093_v22 = vld [vmem:[%s15694_s7 + $0x460] ss:$8 sps:$4 sm:$0xff]  }
 0x4b1   : > { %8486 = vmatpush1.bf16.msra.mxu1 %v11018_v62  ;;  %v11098_v62 = vld [vmem:[%s15694_s7 + $0x384] ss:$8 sps:$4 sm:$0xff]  }
 0x4b2   : > { %8451 = vmatpush1.bf16.msra.mxu0 %v11021_v48  ;;  %8487 = vmatprep.subr.bf16.mxu1 %v11026_v26  ;;  %v11101_v26 = vld [vmem:[%s15694_s7 + $0x454] ss:$8 sps:$4 sm:$0xff]  }
 0x4b3   : > { %8452 = vmatprep.subr.bf16.mxu0 %v11029_v36 }
 0x4b5   : > { %8488 = vmatpush1.bf16.msra.mxu1 %v11024_v33 }
 0x4b6   : > { %8453 = vmatpush1.bf16.msra.mxu0 %v11027_v5  ;;  %8489 = vmatprep.subr.bf16.mxu1 %v11032_v27  ;;  %v11096_v27 = vld [vmem:[%s15694_s7 + $0x380] ss:$8 sps:$4 sm:$0xff]  }
 0x4b7   : > { %8454 = vmatprep.subr.bf16.mxu0 %v11035_v39 }
 0x4b9   : > { %8490 = vmatpush1.bf16.msra.mxu1 %v11030_v54  ;;  %v11099_v54 = vld [vmem:[%s15694_s7 + $0x450] ss:$8 sps:$4 sm:$0xff]  }
 0x4ba   : > { %8455 = vmatpush1.bf16.msra.mxu0 %v11033_v57  ;;  %8491 = vmatprep.subr.bf16.mxu1 %v11038_v25 }
 0x4bb   : > { %8456 = vmatprep.subr.bf16.mxu0 %v11041_v42  ;;  %v11107_v42 = vld [vmem:[%s15694_s7 + $0x444] ss:$8 sps:$4 sm:$0xff]  }
 0x4bd   : > { %8492 = vmatpush1.bf16.msra.mxu1 %v11036_v1 }
 0x4be   : > { %8457 = vmatpush2.bf16.msra.mxu0 %v11039_v53  ;;  %8493 = vmatprep.subr.bf16.mxu1 %v11044_v37  ;;  %v11102_v53 = vld [vmem:[%s15694_s7 + $0x570] ss:$8 sps:$4 sm:$0xff]  }
 0x4bf   : > { %8458 = vmatprep.subr.bf16.mxu0 %v11047_v20  ;;  %v6613_v20 = vcombine.high %v6597_v52, %v6597_v52 }
 0x4c1   : > { %8494 = vmatpush1.bf16.msra.mxu1 %v11042_v16  ;;  %v11105_v16 = vld [vmem:[%s15694_s7 + $0x440] ss:$8 sps:$4 sm:$0xff]  }
 0x4c2   : > { %8459 = vmatpush2.bf16.msra.mxu0 %v11045_v17  ;;  %8495 = vmatprep.subr.bf16.mxu1 %v11050_v18  ;;  %v11110_v17 = vld [vmem:[%s15694_s7 + $0x564] ss:$8 sps:$4 sm:$0xff]   ;;  %v6663_v18 = vcombine.high %v6653_v59, %v6653_v59 }
 0x4c3   : > { %8460 = vmatprep.subr.bf16.mxu0 %v11053_v51  ;;  %v11113_v51 = vld [vmem:[%s15694_s7 + $0x434] ss:$8 sps:$4 sm:$0xff]  }
 0x4c5   : > { %8496 = vmatpush1.bf16.msra.mxu1 %v11048_v40  ;;  %v11108_v40 = vld [vmem:[%s15694_s7 + $0x560] ss:$8 sps:$4 sm:$0xff]  }
 0x4c6   : > { %8461 = vmatpush2.bf16.msra.mxu0 %v11051_v60  ;;  %8497 = vmatprep.subr.bf16.mxu1 %v11056_v7  ;;  %v11111_v60 = vld [vmem:[%s15694_s7 + $0x430] ss:$8 sps:$4 sm:$0xff]   ;;  %v11116_v7 = vld [vmem:[%s15694_s7 + $0x554] ss:$8 sps:$4 sm:$0xff]  }
 0x4c7   : > { %8462 = vmatprep.subr.bf16.mxu0 %v11059_v55  ;;  %v11119_v55 = vld [vmem:[%s15694_s7 + $0x424] ss:$8 sps:$4 sm:$0xff]  }
 0x4c9   : > { %8498 = vmatpush2.bf16.msra.mxu1 %v11054_v15  ;;  %v11114_v15 = vld [vmem:[%s15694_s7 + $0x550] ss:$8 sps:$4 sm:$0xff]  }
 0x4ca   : > { %8463 = vmatpush2.bf16.msra.mxu0 %v11057_v13  ;;  %8499 = vmatprep.subr.bf16.mxu1 %v11062_v2  ;;  %v11117_v13 = vld [vmem:[%s15694_s7 + $0x420] ss:$8 sps:$4 sm:$0xff]   ;;  %v11122_v2 = vld [vmem:[%s15694_s7 + $0x544] ss:$8 sps:$4 sm:$0xff]  }
 0x4cb   : > { %8464 = vmatprep.subr.bf16.mxu0 %v11065_v41  ;;  %v11125_v41 = vld [vmem:[%s15694_s7 + $0x414] ss:$8 sps:$4 sm:$0xff]  }
 0x4cd   : > { %8500 = vmatpush2.bf16.msra.mxu1 %v11060_v10  ;;  %v11120_v10 = vld [vmem:[%s15694_s7 + $0x540] ss:$8 sps:$4 sm:$0xff]  }
 0x4ce   : > { %8465 = vmatpush2.bf16.msra.mxu0 %v11063_v30  ;;  %8501 = vmatprep.subr.bf16.mxu1 %v11068_v34  ;;  %v11123_v30 = vld [vmem:[%s15694_s7 + $0x410] ss:$8 sps:$4 sm:$0xff]   ;;  %v11128_v34 = vld [vmem:[%s15694_s7 + $0x534] ss:$8 sps:$4 sm:$0xff]  }
 0x4cf   : > { %8466 = vmatprep.subr.bf16.mxu0 %v11071_v24  ;;  %v11131_v24 = vld [vmem:[%s15694_s7 + $0x404] ss:$8 sps:$4 sm:$0xff]  }
 0x4d1   : > { %8502 = vmatpush2.bf16.msra.mxu1 %v11066_v28  ;;  %v11126_v28 = vld [vmem:[%s15694_s7 + $0x530] ss:$8 sps:$4 sm:$0xff]  }
 0x4d2   : > { %8467 = vmatpush2.bf16.msra.mxu0 %v11069_v47  ;;  %8503 = vmatprep.subr.bf16.mxu1 %v11074_v46  ;;  %v11129_v47 = vld [vmem:[%s15694_s7 + $0x400] ss:$8 sps:$4 sm:$0xff]   ;;  %v11134_v46 = vld [vmem:[%s15694_s7 + $0x524] ss:$8 sps:$4 sm:$0xff]  }
 0x4d3   : > { %8468 = vmatprep.subr.bf16.mxu0 %v11077_v8  ;;  %v11137_v8 = vld [vmem:[%s15694_s7 + $0x4f4] ss:$8 sps:$4 sm:$0xff]  }
 0x4d5   : > { %8504 = vmatpush2.bf16.msra.mxu1 %v11072_v3  ;;  %v11132_v3 = vld [vmem:[%s15694_s7 + $0x520] ss:$8 sps:$4 sm:$0xff]  }
 0x4d6   : > { %8469 = vmatpush2.bf16.msra.mxu0 %v11075_v35  ;;  %8505 = vmatprep.subr.bf16.mxu1 %v11080_v14  ;;  %v11135_v35 = vld [vmem:[%s15694_s7 + $0x4f0] ss:$8 sps:$4 sm:$0xff]   ;;  %v11140_v14 = vld [vmem:[%s15694_s7 + $0x514] ss:$8 sps:$4 sm:$0xff]  }
 0x4d7   : > { %8470 = vmatprep.subr.bf16.mxu0 %v11083_v32  ;;  %v11143_v32 = vld [vmem:[%s15694_s7 + $0x4e4] ss:$8 sps:$4 sm:$0xff]  }
 0x4d9   : > { %8506 = vmatpush2.bf16.msra.mxu1 %v11078_v0  ;;  %v11138_v0 = vld [vmem:[%s15694_s7 + $0x510] ss:$8 sps:$4 sm:$0xff]  }
 0x4da   : > { %8471 = vmatpush2.bf16.msra.mxu0 %v11081_v31  ;;  %8507 = vmatprep.subr.bf16.mxu1 %v11086_v19  ;;  %v11141_v31 = vld [vmem:[%s15694_s7 + $0x4e0] ss:$8 sps:$4 sm:$0xff]   ;;  %v11146_v19 = vld [vmem:[%s15694_s7 + $0x504] ss:$8 sps:$4 sm:$0xff]  }
 0x4db   : > { %8522 = vmatprep.subr.bf16.mxu0 %v11089_v58  ;;  %v11149_v58 = vld [vmem:[%s15694_s7 + $0x4d4] ss:$8 sps:$4 sm:$0xff]  }
 0x4dd   : > { %8508 = vmatpush2.bf16.msra.mxu1 %v11084_v23  ;;  %v6061_v9 = vpop.f32.mrf.mxu0  ;;  %8473 = vmatmul.mubr.bf16.vlgmr.msra.gmra.mxu0 %v6597_v52  ;;  %v11147_v23 = vld [vmem:[%s15694_s7 + $0x4d0] ss:$8 sps:$4 sm:$0xff]   ;;  %v11155_v52 = vld [vmem:[%s15694_s7 + $0x4c4] ss:$8 sps:$4 sm:$0xff]  }
 0x4de   : > { %v6062_v4 = vadd.f32 %v6061_v9, %v14738_v49  ;;  %8523 = vmatpush1.bf16.msra.mxu0 %v11087_v12  ;;  %8554 = vmatprep.mubr.bf16.mxu0 %v6653_v59  ;;  %v11152_v12 = vld [vmem:[%s15694_s7 + $0x5f4] ss:$8 sps:$4 sm:$0xff]   ;;  %v11158_v59 = vld [vmem:[%s15694_s7 + $0x5e4] ss:$8 sps:$4 sm:$0xff]  }
 0x4df   : > { %v6063_v48 = vpop.f32.mrf.mxu0  ;;  %8509 = vmatprep.subr.bf16.mxu1 %v11092_v45  ;;  %8524 = vmatprep.subr.bf16.mxu0 %v11095_v6  ;;  %v11150_v45 = vld [vmem:[%s15694_s7 + $0x5f0] ss:$8 sps:$4 sm:$0xff]   ;;  %v11153_v6 = vld [vmem:[%s15694_s7 + $0x4c0] ss:$8 sps:$4 sm:$0xff]   ;;  %v11161_v9 = vld [vmem:[%s15694_s7 + $0x4b4] ss:$8 sps:$4 sm:$0xff]  }
 0x4e0   : > { %v6064_v36 = vadd.f32 %v6063_v48, %v14749_v61  ;;  %v6102_v49 = vpop.f32.mrf.mxu1  ;;  %v11104_v61 = vld [vmem:[%s15694_s7 + $0x574] ss:$8 sps:$4 sm:$0xff]   ;;  %v11162_v48 = vld [vmem:[%s15694_s7 + $0x5d0] ss:$8 sps:$4 sm:$0xff]  }
 0x4e1   : > { %v14947_v33 = vadd.f32 %v6102_v49, %v6062_v4  ;;  %8510 = vmatpush2.bf16.msra.mxu1 %v11090_v43  ;;  %v6065_v5 = vpop.f32.mrf.mxu0  ;;  %v11156_v43 = vld [vmem:[%s15694_s7 + $0x5e0] ss:$8 sps:$4 sm:$0xff]   ;;  %v11159_v4 = vld [vmem:[%s15694_s7 + $0x4b0] ss:$8 sps:$4 sm:$0xff]   ;;  %v11173_v49 = vld [vmem:[%s15694_s7 + $0x494] ss:$8 sps:$4 sm:$0xff]  }
 0x4e2   : > { %v6104_v39 = vpop.f32.mrf.mxu1  ;;  %8525 = vmatpush1.bf16.msra.mxu0 %v11093_v22  ;;  %8511 = vmatprep.subr.bf16.mxu1 %v11098_v62  ;;  %v11164_v22 = vld [vmem:[%s15694_s7 + $0x5d4] ss:$8 sps:$4 sm:$0xff]   ;;  %v11167_v62 = vld [vmem:[%s15694_s7 + $0x4a4] ss:$8 sps:$4 sm:$0xff]   ;;  %v6616_v5 = vcombine.high %v14889_v38, %v14889_v38 }
 0x4e3   : > { %v14958_v57 = vadd.f32 %v6104_v39, %v6064_v36  ;;  %v6066_v25 = vpop.f32.mrf.mxu0  ;;  %8526 = vmatprep.subr.bf16.mxu0 %v11101_v26  ;;  %v11165_v26 = vld [vmem:[%s15694_s7 + $0x4a0] ss:$8 sps:$4 sm:$0xff]   ;;  %v11170_v36 = vld [vmem:[%s15694_s7 + $0x5c4] ss:$8 sps:$4 sm:$0xff]   ;;  %v11171_v39 = vld [vmem:[%s15694_s7 + $0x490] ss:$8 sps:$4 sm:$0xff]  }
 0x4e4   : > { %v6106_v1 = vpop.f32.mrf.mxu1  ;;  %v11179_v38 = vld [vmem:[%s15694_s7 + $0x484] ss:$8 sps:$4 sm:$0xff]   ;;  %v11174_v25 = vld [vmem:[%s15694_s7 + $0x5b0] ss:$8 sps:$4 sm:$0xff]  }
 0x4e5   : > { %8512 = vmatpush2.bf16.msra.mxu1 %v11096_v27  ;;  %v11168_v27 = vld [vmem:[%s15694_s7 + $0x5c0] ss:$8 sps:$4 sm:$0xff]   ;;  %v11182_v1 = vld [vmem:[%s15694_s7 + $0x5a4] ss:$8 sps:$4 sm:$0xff]  }
 0x4e6   : > { %v6107_v37 = vpop.f32.mrf.mxu1  ;;  %8527 = vmatpush1.bf16.msra.mxu0 %v11099_v54  ;;  %8563 = vmatprep.subr.bf16.mxu1 %v11104_v61  ;;  %v11176_v54 = vld [vmem:[%s15694_s7 + $0x5b4] ss:$8 sps:$4 sm:$0xff]   ;;  %v15110_v61 = vrot.slane %v6616_v5, %v12389_v21 }
 0x4e7   : > { %8528 = vmatprep.subr.bf16.mxu0 %v11107_v42  ;;  %v11177_v42 = vld [vmem:[%s15694_s7 + $0x480] ss:$8 sps:$4 sm:$0xff]   ;;  %v11225_v5 = vld [vmem:[%s15694_s7 + $0x734] ss:$8 sps:$4 sm:$0xff]  }
 0x4e8   : > { %8514 = vmatmul.mubr.bf16.vlgmr.msra.gmra.mxu1 %v6613_v20  ;;  %v6632_v37 = vcombine.high %v15110_v61, %v15110_v61  ;;  %v11180_v20 = vld [vmem:[%s15694_s7 + $0x5a0] ss:$8 sps:$4 sm:$0xff]  }
 0x4e9   : > { %8564 = vmatpush1.bf16.msra.mxu1 %v11102_v53  ;;  %8595 = vmatprep.mubr.bf16.mxu1 %v6663_v18  ;;  %v11185_v53 = vld [vmem:[%s15694_s7 + $0x674] ss:$8 sps:$4 sm:$0xff]  }
 0x4ea   : > { %8529 = vmatpush1.bf16.msra.mxu0 %v11105_v16  ;;  %8565 = vmatprep.subr.bf16.mxu1 %v11110_v17  ;;  %v11183_v16 = vld [vmem:[%s15694_s7 + $0x670] ss:$8 sps:$4 sm:$0xff]   ;;  %v6639_v17 = vrot.slane %v14902_v56, %v12389_v21  ;;  %v11189_v18 = vld [vmem:[%s15694_s7 + $0x594] ss:$8 sps:$4 sm:$0xff]  }
 0x4eb   : > { %8530 = vmatprep.subr.bf16.mxu0 %v11113_v51  ;;  %v11192_v51 = vld [vmem:[%s15694_s7 + $0x664] ss:$8 sps:$4 sm:$0xff]  }
 0x4ed   : > { %8566 = vmatpush1.bf16.msra.mxu1 %v11108_v40  ;;  %v6660_v40 = vrot.slane %v6632_v37, %v12389_v21  ;;  %v11240_v37 = vld [vmem:[%s15694_s7 + $0x6e4] ss:$8 sps:$4 sm:$0xff]  }
 0x4ee   : > { %8531 = vmatpush1.bf16.msra.mxu0 %v11111_v60  ;;  %8567 = vmatprep.subr.bf16.mxu1 %v11116_v7  ;;  %v11187_v7 = vld [vmem:[%s15694_s7 + $0x590] ss:$8 sps:$4 sm:$0xff]  }
 0x4ef   : > { %8532 = vmatprep.subr.bf16.mxu0 %v11119_v55  ;;  %v11190_v55 = vld [vmem:[%s15694_s7 + $0x660] ss:$8 sps:$4 sm:$0xff]  }
 0x4f1   : > { %8568 = vmatpush1.bf16.msra.mxu1 %v11114_v15  ;;  %v11195_v15 = vld [vmem:[%s15694_s7 + $0x584] ss:$8 sps:$4 sm:$0xff]  }
 0x4f2   : > { %8533 = vmatpush1.bf16.msra.mxu0 %v11117_v13  ;;  %8569 = vmatprep.subr.bf16.mxu1 %v11122_v2  ;;  %v11198_v2 = vld [vmem:[%s15694_s7 + $0x654] ss:$8 sps:$4 sm:$0xff]  }
 0x4f3   : > { %8534 = vmatprep.subr.bf16.mxu0 %v11125_v41 }
 0x4f5   : > { %8570 = vmatpush1.bf16.msra.mxu1 %v11120_v10 }
 0x4f6   : > { %8535 = vmatpush1.bf16.msra.mxu0 %v11123_v30  ;;  %8571 = vmatprep.subr.bf16.mxu1 %v11128_v34  ;;  %v11193_v34 = vld [vmem:[%s15694_s7 + $0x580] ss:$8 sps:$4 sm:$0xff]  }
 0x4f7   : > { %8536 = vmatprep.subr.bf16.mxu0 %v11131_v24 }
 0x4f9   : > { %8572 = vmatpush1.bf16.msra.mxu1 %v11126_v28  ;;  %v11196_v28 = vld [vmem:[%s15694_s7 + $0x650] ss:$8 sps:$4 sm:$0xff]  }
 0x4fa   : > { %8537 = vmatpush1.bf16.msra.mxu0 %v11129_v47  ;;  %8573 = vmatprep.subr.bf16.mxu1 %v11134_v46  ;;  %v11201_v47 = vld [vmem:[%s15694_s7 + $0x774] ss:$8 sps:$4 sm:$0xff]  }
 0x4fb   : > { %8538 = vmatprep.subr.bf16.mxu0 %v11137_v8  ;;  %v11204_v8 = vld [vmem:[%s15694_s7 + $0x644] ss:$8 sps:$4 sm:$0xff]  }
 0x4fd   : > { %8574 = vmatpush1.bf16.msra.mxu1 %v11132_v3 }
 0x4fe   : > { %8539 = vmatpush2.bf16.msra.mxu0 %v11135_v35  ;;  %8575 = vmatprep.subr.bf16.mxu1 %v11140_v14  ;;  %v11199_v35 = vld [vmem:[%s15694_s7 + $0x770] ss:$8 sps:$4 sm:$0xff]  }
 0x4ff   : > { %8540 = vmatprep.subr.bf16.mxu0 %v11143_v32  ;;  %v6661_v32 = vcombine.high %v6639_v17, %v6639_v17 }
 0x501   : > { %8576 = vmatpush1.bf16.msra.mxu1 %v11138_v0  ;;  %v11202_v0 = vld [vmem:[%s15694_s7 + $0x640] ss:$8 sps:$4 sm:$0xff]  }
 0x502   : > { %8541 = vmatpush2.bf16.msra.mxu0 %v11141_v31  ;;  %8577 = vmatprep.subr.bf16.mxu1 %v11146_v19  ;;  %v11207_v31 = vld [vmem:[%s15694_s7 + $0x764] ss:$8 sps:$4 sm:$0xff]   ;;  %v6664_v19 = vcombine.high %v6660_v40, %v6660_v40 }
 0x503   : > { %8542 = vmatprep.subr.bf16.mxu0 %v11149_v58  ;;  %v11210_v58 = vld [vmem:[%s15694_s7 + $0x634] ss:$8 sps:$4 sm:$0xff]  }
 0x505   : > { %8578 = vmatpush1.bf16.msra.mxu1 %v11144_v11 }
 0x506   : > { %8543 = vmatpush2.bf16.msra.mxu0 %v11147_v23  ;;  %8579 = vmatprep.subr.bf16.mxu1 %v11152_v12  ;;  %v11205_v12 = vld [vmem:[%s15694_s7 + $0x760] ss:$8 sps:$4 sm:$0xff]  }
 0x507   : > { %8544 = vmatprep.subr.bf16.mxu0 %v11155_v52 }
 0x509   : > { %8580 = vmatpush2.bf16.msra.mxu1 %v11150_v45  ;;  %v11208_v45 = vld [vmem:[%s15694_s7 + $0x630] ss:$8 sps:$4 sm:$0xff]  }
 0x50a   : > { %8545 = vmatpush2.bf16.msra.mxu0 %v11153_v6  ;;  %8581 = vmatprep.subr.bf16.mxu1 %v11158_v59  ;;  %v11213_v6 = vld [vmem:[%s15694_s7 + $0x754] ss:$8 sps:$4 sm:$0xff]  }
 0x50b   : > { %8546 = vmatprep.subr.bf16.mxu0 %v11161_v9  ;;  %v11216_v9 = vld [vmem:[%s15694_s7 + $0x624] ss:$8 sps:$4 sm:$0xff]  }
 0x50d   : > { %8582 = vmatpush2.bf16.msra.mxu1 %v11156_v43 }
 0x50e   : > { %8547 = vmatpush2.bf16.msra.mxu0 %v11159_v4  ;;  %8583 = vmatprep.subr.bf16.mxu1 %v11164_v22  ;;  %v11211_v4 = vld [vmem:[%s15694_s7 + $0x750] ss:$8 sps:$4 sm:$0xff]  }
 0x50f   : > { %8548 = vmatprep.subr.bf16.mxu0 %v11167_v62  ;;  %v11214_v62 = vld [vmem:[%s15694_s7 + $0x620] ss:$8 sps:$4 sm:$0xff]  }
 0x511   : > { %8584 = vmatpush2.bf16.msra.mxu1 %v11162_v48  ;;  %v11219_v48 = vld [vmem:[%s15694_s7 + $0x744] ss:$8 sps:$4 sm:$0xff]  }
 0x512   : > { %8549 = vmatpush2.bf16.msra.mxu0 %v11165_v26  ;;  %8585 = vmatprep.subr.bf16.mxu1 %v11170_v36  ;;  %v11222_v26 = vld [vmem:[%s15694_s7 + $0x614] ss:$8 sps:$4 sm:$0xff]   ;;  %v11217_v36 = vld [vmem:[%s15694_s7 + $0x740] ss:$8 sps:$4 sm:$0xff]  }
 0x513   : > { %8550 = vmatprep.subr.bf16.mxu0 %v11173_v49  ;;  %v11220_v49 = vld [vmem:[%s15694_s7 + $0x610] ss:$8 sps:$4 sm:$0xff]  }
 0x515   : > { %8586 = vmatpush2.bf16.msra.mxu1 %v11168_v27  ;;  %v11228_v27 = vld [vmem:[%s15694_s7 + $0x604] ss:$8 sps:$4 sm:$0xff]  }
 0x516   : > { %8551 = vmatpush2.bf16.msra.mxu0 %v11171_v39  ;;  %8587 = vmatprep.subr.bf16.mxu1 %v11176_v54  ;;  %v11223_v39 = vld [vmem:[%s15694_s7 + $0x730] ss:$8 sps:$4 sm:$0xff]   ;;  %v11226_v54 = vld [vmem:[%s15694_s7 + $0x600] ss:$8 sps:$4 sm:$0xff]  }
 0x517   : > { %8552 = vmatprep.subr.bf16.mxu0 %v11179_v38  ;;  %v11231_v38 = vld [vmem:[%s15694_s7 + $0x724] ss:$8 sps:$4 sm:$0xff]  }
 0x519   : > { %8588 = vmatpush2.bf16.msra.mxu1 %v11174_v25  ;;  %v11234_v25 = vld [vmem:[%s15694_s7 + $0x6f4] ss:$8 sps:$4 sm:$0xff]  }
 0x51a   : > { %8553 = vmatpush2.bf16.msra.mxu0 %v11177_v42  ;;  %8589 = vmatprep.subr.bf16.mxu1 %v11182_v1  ;;  %v11229_v42 = vld [vmem:[%s15694_s7 + $0x720] ss:$8 sps:$4 sm:$0xff]   ;;  %v11232_v1 = vld [vmem:[%s15694_s7 + $0x6f0] ss:$8 sps:$4 sm:$0xff]  }
 0x51b   : > { %8604 = vmatprep.subr.bf16.mxu0 %v11185_v53  ;;  %v11237_v53 = vld [vmem:[%s15694_s7 + $0x714] ss:$8 sps:$4 sm:$0xff]  }
 0x51d   : > { %8590 = vmatpush2.bf16.msra.mxu1 %v11180_v20  ;;  %v6143_v60 = vpop.f32.mrf.mxu0  ;;  %8555 = vmatmul.mubr.bf16.vlgmr.msra.gmra.mxu0 %v6639_v17  ;;  %v11235_v20 = vld [vmem:[%s15694_s7 + $0x710] ss:$8 sps:$4 sm:$0xff]   ;;  %v11243_v17 = vld [vmem:[%s15694_s7 + $0x704] ss:$8 sps:$4 sm:$0xff]  }
 0x51e   : > { %v6144_v56 = vadd.f32 %v6143_v60, %v14947_v33  ;;  %8605 = vmatpush1.bf16.msra.mxu0 %v11183_v16  ;;  %8636 = vmatprep.mubr.bf16.mxu0 %v6660_v40  ;;  %v11238_v16 = vld [vmem:[%s15694_s7 + $0x6e0] ss:$8 sps:$4 sm:$0xff]   ;;  %v11244_v40 = vld [vmem:[%s15694_s7 + $0x6d0] ss:$8 sps:$4 sm:$0xff]   ;;  %v11249_v60 = vld [vmem:[%s15694_s7 + $0x7f4] ss:$8 sps:$4 sm:$0xff]  }
 0x51f   : > { %v6145_v13 = vpop.f32.mrf.mxu0  ;;  %8591 = vmatprep.subr.bf16.mxu1 %v11189_v18  ;;  %8606 = vmatprep.subr.bf16.mxu0 %v11192_v51  ;;  %v11246_v18 = vld [vmem:[%s15694_s7 + $0x6d4] ss:$8 sps:$4 sm:$0xff]   ;;  %v11241_v51 = vld [vmem:[%s15694_s7 + $0x700] ss:$8 sps:$4 sm:$0xff]  }
 0x520   : > { %v6146_v41 = vadd.f32 %v6145_v13, %v14958_v57  ;;  %v6184_v33 = vpop.f32.mrf.mxu1  ;;  %v11258_v13 = vld [vmem:[%s15694_s7 + $0x6b4] ss:$8 sps:$4 sm:$0xff]  }
 0x521   : > { %v6185_v10 = vadd.f32 %v6184_v33, %v6144_v56  ;;  %8592 = vmatpush2.bf16.msra.mxu1 %v11187_v7  ;;  %v6147_v30 = vpop.f32.mrf.mxu0  ;;  %v11252_v7 = vld [vmem:[%s15694_s7 + $0x6c4] ss:$8 sps:$4 sm:$0xff]   ;;  %v11247_v56 = vld [vmem:[%s15694_s7 + $0x7f0] ss:$8 sps:$4 sm:$0xff]   ;;  %v11261_v33 = vld [vmem:[%s15694_s7 + $0x7d4] ss:$8 sps:$4 sm:$0xff]  }
 0x522   : > { %v6186_v24 = vpop.f32.mrf.mxu1  ;;  %8607 = vmatpush1.bf16.msra.mxu0 %v11190_v55  ;;  %8593 = vmatprep.subr.bf16.mxu1 %v11195_v15  ;;  %v11250_v55 = vld [vmem:[%s15694_s7 + $0x6c0] ss:$8 sps:$4 sm:$0xff]   ;;  %v11255_v15 = vld [vmem:[%s15694_s7 + $0x7e4] ss:$8 sps:$4 sm:$0xff]   ;;  %v11259_v30 = vld [vmem:[%s15694_s7 + $0x7d0] ss:$8 sps:$4 sm:$0xff]  }
 0x523   : > { %v6187_v57 = vadd.f32 %v6186_v24, %v6146_v41  ;;  %v6148_v46 = vpop.f32.mrf.mxu0  ;;  %8608 = vmatprep.subr.bf16.mxu0 %v11198_v2  ;;  %v11253_v2 = vld [vmem:[%s15694_s7 + $0x7e0] ss:$8 sps:$4 sm:$0xff]   ;;  %v11256_v41 = vld [vmem:[%s15694_s7 + $0x6b0] ss:$8 sps:$4 sm:$0xff]   ;;  %v11267_v24 = vld [vmem:[%s15694_s7 + $0x7c4] ss:$8 sps:$4 sm:$0xff]  }
 0x524   : > { %v6188_v3 = vpop.f32.mrf.mxu1  ;;  %v11268_v46 = vld [vmem:[%s15694_s7 + $0x690] ss:$8 sps:$4 sm:$0xff]  }
 0x525   : > { %8594 = vmatpush2.bf16.msra.mxu1 %v11193_v34  ;;  %v11262_v34 = vld [vmem:[%s15694_s7 + $0x6a0] ss:$8 sps:$4 sm:$0xff]   ;;  %v11276_v3 = vld [vmem:[%s15694_s7 + $0x684] ss:$8 sps:$4 sm:$0xff]  }
 0x526   : > { %v6189_v14 = vpop.f32.mrf.mxu1  ;;  %8609 = vmatpush1.bf16.msra.mxu0 %v11196_v28  ;;  %8645 = vmatprep.subr.bf16.mxu1 %v11201_v47  ;;  %v11270_v28 = vld [vmem:[%s15694_s7 + $0x694] ss:$8 sps:$4 sm:$0xff]   ;;  %v11265_v47 = vld [vmem:[%s15694_s7 + $0x7c0] ss:$8 sps:$4 sm:$0xff]  }
 0x527   : > { %8610 = vmatprep.subr.bf16.mxu0 %v11204_v8  ;;  %v11273_v8 = vld [vmem:[%s15694_s7 + $0x7b4] ss:$8 sps:$4 sm:$0xff]   ;;  %v11271_v14 = vld [vmem:[%s15694_s7 + $0x7b0] ss:$8 sps:$4 sm:$0xff]  }
 0x528   : > { %v6225_v11 = vpop.f32.mrf.mxu1  ;;  %8596 = vmatmul.mubr.bf16.vlgmr.msra.gmra.mxu1 %v6661_v32  ;;  %v11274_v32 = vld [vmem:[%s15694_s7 + $0x680] ss:$8 sps:$4 sm:$0xff]  }
 0x529   : > { %v15179_v23 = vadd.f32 %v6225_v11, %v6185_v10  ;;  %8646 = vmatpush1.bf16.msra.mxu1 %v11199_v35  ;;  %8677 = vmatprep.mubr.bf16.mxu1 %v6664_v19  ;;  %v11264_v10 = vld [vmem:[%s15694_s7 + $0x6a4] ss:$8 sps:$4 sm:$0xff]   ;;  %v11280_v11 = vld [vmem:[%s15694_s7 + $0x870] ss:$8 sps:$4 sm:$0xff]  }
 0x52a   : > { %v6227_v52 = vpop.f32.mrf.mxu1  ;;  %8611 = vmatpush1.bf16.msra.mxu0 %v11202_v0  ;;  %8647 = vmatprep.subr.bf16.mxu1 %v11207_v31  ;;  %v11279_v0 = vld [vmem:[%s15694_s7 + $0x7a4] ss:$8 sps:$4 sm:$0xff]   ;;  %v11282_v31 = vld [vmem:[%s15694_s7 + $0x874] ss:$8 sps:$4 sm:$0xff]  }
 0x52b   : > { %v15190_v59 = vadd.f32 %v6227_v52, %v6187_v57  ;;  %8612 = vmatprep.subr.bf16.mxu0 %v11210_v58  ;;  %v15306_v57 = vld [vmem:[#allocation5 + $0x10] sm:$0x1f]  ;;  %v11286_v52 = vld [vmem:[%s15694_s7 + $0x794] ss:$8 sps:$4 sm:$0xff]  }
 0x52c   : > { %v6229_v43 = vpop.f32.mrf.mxu1  ;;  %v15319_v35 = vrot.slane %v15306_v57, %v12389_v21  ;;  %v11277_v58 = vld [vmem:[%s15694_s7 + $0x7a0] ss:$8 sps:$4 sm:$0xff]  }
 0x52d   : > { %8648 = vmatpush1.bf16.msra.mxu1 %v11205_v12  ;;  %v6646_v12 = vrot.slane %v15110_v61, %v12389_v21  ;;  %v11284_v43 = vld [vmem:[%s15694_s7 + $0x790] ss:$8 sps:$4 sm:$0xff]   ;;  %v11287_v61 = vld [vmem:[%s15694_s7 + $0x860] ss:$8 sps:$4 sm:$0xff]  }
 0x52e   : > { %v6230_v22 = vpop.f32.mrf.mxu1  ;;  %8613 = vmatpush1.bf16.msra.mxu0 %v11208_v45  ;;  %8649 = vmatprep.subr.bf16.mxu1 %v11213_v6  ;;  %v6680_v19 = vcombine.high %v15319_v35, %v15319_v35  ;;  %v11289_v45 = vld [vmem:[%s15694_s7 + $0x864] ss:$8 sps:$4 sm:$0xff]  }
 0x52f   : > { %8614 = vmatprep.subr.bf16.mxu0 %v11216_v9 }
 0x530   : > { %v6701_v6 = vrot.slane %v6680_v19, %v12389_v21  ;;  %v11340_v19 = vld [vmem:[%s15694_s7 + $0x904] ss:$8 sps:$4 sm:$0xff]  }
 0x531   : > { %8650 = vmatpush1.bf16.msra.mxu1 %v11211_v4  ;;  %v11292_v4 = vld [vmem:[%s15694_s7 + $0x784] ss:$8 sps:$4 sm:$0xff]  }
 0x532   : > { %8615 = vmatpush1.bf16.msra.mxu0 %v11214_v62  ;;  %8651 = vmatprep.subr.bf16.mxu1 %v11219_v48  ;;  %v11295_v62 = vld [vmem:[%s15694_s7 + $0x854] ss:$8 sps:$4 sm:$0xff]   ;;  %v6563_v48 = vld [vmem:[%s15695_s8] sm:$0x3] }
 0x533   : > { %8616 = vmatprep.subr.bf16.mxu0 %v11222_v26 }
 0x535   : > { %8652 = vmatpush1.bf16.msra.mxu1 %v11217_v36  ;;  %v11290_v36 = vld [vmem:[%s15694_s7 + $0x780] ss:$8 sps:$4 sm:$0xff]  }
 0x536   : > { %8617 = vmatpush1.bf16.msra.mxu0 %v11220_v49  ;;  %8653 = vmatprep.subr.bf16.mxu1 %v11225_v5  ;;  %v11293_v49 = vld [vmem:[%s15694_s7 + $0x850] ss:$8 sps:$4 sm:$0xff]   ;;  %v11298_v5 = vld [vmem:[%s15694_s7 + $0x974] ss:$8 sps:$4 sm:$0xff]  }
 0x537   : > { %8618 = vmatprep.subr.bf16.mxu0 %v11228_v27  ;;  %v8348_v27 = vrot.slane %v6563_v48, %v5770_v50  ;;  %v11299_v50 = vld [vmem:[%s15694_s7 + $0x840] ss:$8 sps:$4 sm:$0xff]  }
 0x539   : > { %8654 = vmatpush1.bf16.msra.mxu1 %v11223_v39 }
 0x53a   : > { %8619 = vmatpush1.bf16.msra.mxu0 %v11226_v54  ;;  %8655 = vmatprep.subr.bf16.mxu1 %v11231_v38  ;;  %v11301_v54 = vld [vmem:[%s15694_s7 + $0x844] ss:$8 sps:$4 sm:$0xff]   ;;  %v8352_v38 = vrot.slane %v6563_v48, %v5774_v44 }
 0x53b   : > { %8620 = vmatprep.subr.bf16.mxu0 %v11234_v25  ;;  %v11296_v25 = vld [vmem:[%s15694_s7 + $0x970] ss:$8 sps:$4 sm:$0xff]   ;;  %v11361_v48 = vld [vmem:[%s15694_s7 + $0x8a4] ss:$8 sps:$4 sm:$0xff]  }
 0x53d   : > { %8656 = vmatpush1.bf16.msra.mxu1 %v11229_v42  ;;  %v6662_v42 = vcombine.high %v6646_v12, %v6646_v12 }
 0x53e   : > { %8621 = vmatpush2.bf16.msra.mxu0 %v11232_v1  ;;  %8657 = vmatprep.subr.bf16.mxu1 %v11237_v53  ;;  %v11304_v1 = vld [vmem:[%s15694_s7 + $0x964] ss:$8 sps:$4 sm:$0xff]  }
 0x53f   : > { %8622 = vmatprep.subr.bf16.mxu0 %v11240_v37  ;;  %v6703_v37 = vcombine.high %v6701_v6, %v6701_v6 }
 0x541   : > { %8658 = vmatpush1.bf16.msra.mxu1 %v11235_v20 }
 0x542   : > { %8623 = vmatpush2.bf16.msra.mxu0 %v11238_v16  ;;  %8659 = vmatprep.subr.bf16.mxu1 %v11243_v17  ;;  %v11302_v17 = vld [vmem:[%s15694_s7 + $0x960] ss:$8 sps:$4 sm:$0xff]  }
 0x543   : > { %8624 = vmatprep.subr.bf16.mxu0 %v11246_v18 }
 0x545   : > { %8660 = vmatpush1.bf16.msra.mxu1 %v11241_v51  ;;  %v11305_v51 = vld [vmem:[%s15694_s7 + $0x830] ss:$8 sps:$4 sm:$0xff]  }
 0x546   : > { %8625 = vmatpush2.bf16.msra.mxu0 %v11244_v40  ;;  %8661 = vmatprep.subr.bf16.mxu1 %v11249_v60  ;;  %v11310_v40 = vld [vmem:[%s15694_s7 + $0x954] ss:$8 sps:$4 sm:$0xff]  }
 0x547   : > { %8626 = vmatprep.subr.bf16.mxu0 %v11252_v7  ;;  %v11313_v7 = vld [vmem:[%s15694_s7 + $0x824] ss:$8 sps:$4 sm:$0xff]  }
 0x549   : > { %8662 = vmatpush2.bf16.msra.mxu1 %v11247_v56 }
 0x54a   : > { %8627 = vmatpush2.bf16.msra.mxu0 %v11250_v55  ;;  %8663 = vmatprep.subr.bf16.mxu1 %v11255_v15  ;;  %v11308_v55 = vld [vmem:[%s15694_s7 + $0x950] ss:$8 sps:$4 sm:$0xff]  }
 0x54b   : > { %8628 = vmatprep.subr.bf16.mxu0 %v11258_v13  ;;  %v11311_v13 = vld [vmem:[%s15694_s7 + $0x820] ss:$8 sps:$4 sm:$0xff]  }
 0x54d   : > { %8664 = vmatpush2.bf16.msra.mxu1 %v11253_v2  ;;  %v11316_v2 = vld [vmem:[%s15694_s7 + $0x944] ss:$8 sps:$4 sm:$0xff]  }
 0x54e   : > { %8629 = vmatpush2.bf16.msra.mxu0 %v11256_v41  ;;  %8665 = vmatprep.subr.bf16.mxu1 %v11261_v33  ;;  %v11319_v41 = vld [vmem:[%s15694_s7 + $0x814] ss:$8 sps:$4 sm:$0xff]   ;;  %v11314_v33 = vld [vmem:[%s15694_s7 + $0x940] ss:$8 sps:$4 sm:$0xff]  }
 0x54f   : > { %8630 = vmatprep.subr.bf16.mxu0 %v11264_v10  ;;  %v11317_v10 = vld [vmem:[%s15694_s7 + $0x810] ss:$8 sps:$4 sm:$0xff]  }
 0x551   : > { %8666 = vmatpush2.bf16.msra.mxu1 %v11259_v30  ;;  %v11322_v30 = vld [vmem:[%s15694_s7 + $0x934] ss:$8 sps:$4 sm:$0xff]  }
 0x552   : > { %8631 = vmatpush2.bf16.msra.mxu0 %v11262_v34  ;;  %8667 = vmatprep.subr.bf16.mxu1 %v11267_v24  ;;  %v11325_v34 = vld [vmem:[%s15694_s7 + $0x804] ss:$8 sps:$4 sm:$0xff]   ;;  %v11320_v24 = vld [vmem:[%s15694_s7 + $0x930] ss:$8 sps:$4 sm:$0xff]  }
 0x553   : > { %8632 = vmatprep.subr.bf16.mxu0 %v11270_v28  ;;  %v11323_v28 = vld [vmem:[%s15694_s7 + $0x800] ss:$8 sps:$4 sm:$0xff]  }
 0x555   : > { %8668 = vmatpush2.bf16.msra.mxu1 %v11265_v47  ;;  %v11328_v47 = vld [vmem:[%s15694_s7 + $0x924] ss:$8 sps:$4 sm:$0xff]  }
 0x556   : > { %8633 = vmatpush2.bf16.msra.mxu0 %v11268_v46  ;;  %8669 = vmatprep.subr.bf16.mxu1 %v11273_v8  ;;  %v11331_v46 = vld [vmem:[%s15694_s7 + $0x8f4] ss:$8 sps:$4 sm:$0xff]   ;;  %v11326_v8 = vld [vmem:[%s15694_s7 + $0x920] ss:$8 sps:$4 sm:$0xff]  }
 0x557   : > { %8634 = vmatprep.subr.bf16.mxu0 %v11276_v3  ;;  %v11329_v3 = vld [vmem:[%s15694_s7 + $0x8f0] ss:$8 sps:$4 sm:$0xff]  }
 0x559   : > { %8670 = vmatpush2.bf16.msra.mxu1 %v11271_v14  ;;  %v11334_v14 = vld [vmem:[%s15694_s7 + $0x914] ss:$8 sps:$4 sm:$0xff]  }
 0x55a   : > { %8635 = vmatpush2.bf16.msra.mxu0 %v11274_v32  ;;  %8671 = vmatprep.subr.bf16.mxu1 %v11279_v0  ;;  %v11337_v32 = vld [vmem:[%s15694_s7 + $0x8e4] ss:$8 sps:$4 sm:$0xff]   ;;  %v11332_v0 = vld [vmem:[%s15694_s7 + $0x910] ss:$8 sps:$4 sm:$0xff]  }
 0x55b   : > { %8686 = vmatprep.subr.bf16.mxu0 %v11282_v31  ;;  %v11335_v31 = vld [vmem:[%s15694_s7 + $0x8e0] ss:$8 sps:$4 sm:$0xff]  }
 0x55d   : > { %8672 = vmatpush2.bf16.msra.mxu1 %v11277_v58  ;;  %v8392_v9 = vpop.f32.mrf.mxu0  ;;  %8637 = vmatmul.mubr.bf16.vlgmr.msra.gmra.mxu0 %v6646_v12  ;;  %v11343_v58 = vld [vmem:[%s15694_s7 + $0x8d4] ss:$8 sps:$4 sm:$0xff]   ;;  %v11341_v12 = vld [vmem:[%s15694_s7 + $0x8d0] ss:$8 sps:$4 sm:$0xff]  }
 0x55e   : > { %8687 = vmatpush1.bf16.msra.mxu0 %v11280_v11  ;;  %8718 = vmatprep.mubr.bf16.mxu0 %v6701_v6  ;;  %v8393_v53 = vadd.f32 %v8392_v9, %v8348_v27  ;;  %v11338_v11 = vld [vmem:[%s15694_s7 + $0x900] ss:$8 sps:$4 sm:$0xff]   ;;  %v11344_v6 = vld [vmem:[%s15694_s7 + $0x9f0] ss:$8 sps:$4 sm:$0xff]  }
 0x55f   : > { %v8394_v22 = vpop.f32.mrf.mxu0  ;;  %8673 = vmatprep.subr.bf16.mxu1 %v11286_v52  ;;  %8688 = vmatprep.subr.bf16.mxu0 %v11289_v45  ;;  %v11346_v52 = vld [vmem:[%s15694_s7 + $0x9f4] ss:$8 sps:$4 sm:$0xff]   ;;  %v11349_v45 = vld [vmem:[%s15694_s7 + $0x8c4] ss:$8 sps:$4 sm:$0xff]   ;;  %v11347_v9 = vld [vmem:[%s15694_s7 + $0x8c0] ss:$8 sps:$4 sm:$0xff]  }
 0x560   : > { %v8395_v20 = vadd.f32 %v8394_v22, %v8352_v38  ;;  %v11353_v22 = vld [vmem:[%s15694_s7 + $0x8b0] ss:$8 sps:$4 sm:$0xff]   ;;  %v11362_v27 = vld [vmem:[%s15694_s7 + $0x9c0] ss:$8 sps:$4 sm:$0xff]   ;;  %v11373_v38 = vld [vmem:[%s15694_s7 + $0x884] ss:$8 sps:$4 sm:$0xff]  }
 0x561   : > { %8674 = vmatpush2.bf16.msra.mxu1 %v11284_v43  ;;  %v8396_v26 = vpop.f32.mrf.mxu0  ;;  %v11352_v43 = vld [vmem:[%s15694_s7 + $0x9e4] ss:$8 sps:$4 sm:$0xff]  }
 0x562   : > { %8689 = vmatpush1.bf16.msra.mxu0 %v11287_v61  ;;  %8675 = vmatprep.subr.bf16.mxu1 %v11292_v4  ;;  %v11355_v61 = vld [vmem:[%s15694_s7 + $0x8b4] ss:$8 sps:$4 sm:$0xff]   ;;  %v11350_v4 = vld [vmem:[%s15694_s7 + $0x9e0] ss:$8 sps:$4 sm:$0xff]   ;;  %v11356_v26 = vld [vmem:[%s15694_s7 + $0x9d0] ss:$8 sps:$4 sm:$0xff]  }
 0x563   : > { %v8397_v39 = vpop.f32.mrf.mxu0  ;;  %8690 = vmatprep.subr.bf16.mxu0 %v11295_v62  ;;  %v11358_v62 = vld [vmem:[%s15694_s7 + $0x9d4] ss:$8 sps:$4 sm:$0xff]  }
 0x564   : > { %v11365_v39 = vld [vmem:[%s15694_s7 + $0x890] ss:$8 sps:$4 sm:$0xff]  }
 0x565   : > { %8676 = vmatpush2.bf16.msra.mxu1 %v11290_v36  ;;  %v11359_v36 = vld [vmem:[%s15694_s7 + $0x8a0] ss:$8 sps:$4 sm:$0xff]  }
 0x566   : > { %8691 = vmatpush1.bf16.msra.mxu0 %v11293_v49  ;;  %8727 = vmatprep.subr.bf16.mxu1 %v11298_v5  ;;  %v11364_v49 = vld [vmem:[%s15694_s7 + $0x9c4] ss:$8 sps:$4 sm:$0xff]   ;;  %v11367_v5 = vld [vmem:[%s15694_s7 + $0x894] ss:$8 sps:$4 sm:$0xff]  }
 0x567   : > { %8692 = vmatprep.subr.bf16.mxu0 %v11301_v54  ;;  %v11370_v54 = vld [vmem:[%s15694_s7 + $0x9b4] ss:$8 sps:$4 sm:$0xff]  }
 0x568   : > { %v8433_v44 = vpop.f32.mrf.mxu1  ;;  %8678 = vmatmul.mubr.bf16.vlgmr.msra.gmra.mxu1 %v6662_v42  ;;  %v11371_v42 = vld [vmem:[%s15694_s7 + $0x880] ss:$8 sps:$4 sm:$0xff]  }
 0x569   : > { %v15393_v16 = vadd.f32 %v8433_v44, %v8393_v53  ;;  %8728 = vmatpush1.bf16.msra.mxu1 %v11296_v25  ;;  %8759 = vmatprep.mubr.bf16.mxu1 %v6703_v37  ;;  %v11368_v25 = vld [vmem:[%s15694_s7 + $0x9b0] ss:$8 sps:$4 sm:$0xff]   ;;  %v6233_v53 = vmax.f32 %v15190_v59, 0.0  ;;  %v11374_v37 = vld [vmem:[%s15694_s7 + $0x9a0] ss:$8 sps:$4 sm:$0xff]   ;;  %v6687_v44 = vrot.slane %v15319_v35, %v12389_v21 }
 0x56a   : > { %v8435_v18 = vpop.f32.mrf.mxu1  ;;  %8693 = vmatpush1.bf16.msra.mxu0 %v11299_v50  ;;  %8729 = vmatprep.subr.bf16.mxu1 %v11304_v1  ;;  %v11376_v50 = vld [vmem:[%s15694_s7 + $0x9a4] ss:$8 sps:$4 sm:$0xff]   ;;  %v11377_v1 = vld [vmem:[%s15696_s9 + $0x78] sm:$0xff]   ;;  %v11382_v59 = vld [vmem:[%s15696_s9 + $0x70] sm:$0xff]  }
 0x56b   : > { %v15404_v60 = vadd.f32 %v8435_v18, %v8395_v20  ;;  %8694 = vmatprep.subr.bf16.mxu0 %v11307_v63  ;;  %v11378_v63 = vld [vmem:[%s15696_s9 + $0x38] sm:$0xff]   ;;  %v11383_v35 = vld [vmem:[%s15696_s9 + $0x30] sm:$0xff]  }
 0x56c   : > { %v8437_v56 = vpop.f32.mrf.mxu1  ;;  %v11381_v20 = vld [vmem:[%s15694_s7 + $0x994] ss:$8 sps:$4 sm:$0xff]  }
 0x56d   : > { %8730 = vmatpush1.bf16.msra.mxu1 %v11302_v17  ;;  %v6235_v17 = vpack.c.bf16 %v6233_v53, %v6233_v53  ;;  %v11414_v53 = vld [vmem:[%s15696_s9 + $0x98] sm:$0xff]  }
 0x56e   : > { %v8438_v15 = vpop.f32.mrf.mxu1  ;;  %8695 = vmatpush1.bf16.msra.mxu0 %v11305_v51  ;;  %8731 = vmatprep.subr.bf16.mxu1 %v11310_v40  ;;  %v11379_v51 = vld [vmem:[%s15694_s7 + $0x990] ss:$8 sps:$4 sm:$0xff]  }
 0x56f   : > { %8696 = vmatprep.subr.bf16.mxu0 %v11313_v7  ;;  %v11386_v7 = vld [vmem:[%s15694_s7 + $0x984] ss:$8 sps:$4 sm:$0xff]  }
 0x571   : > { %8732 = vmatpush1.bf16.msra.mxu1 %v11308_v55  ;;  %v11387_v55 = vld [vmem:[%s15696_s9 + $0x68] sm:$0xff]  }
 0x572   : > { %8697 = vmatpush1.bf16.msra.mxu0 %v11311_v13  ;;  %8733 = vmatprep.subr.bf16.mxu1 %v11316_v2  ;;  %v11384_v13 = vld [vmem:[%s15694_s7 + $0x980] ss:$8 sps:$4 sm:$0xff]  }
 0x573   : > { %8698 = vmatprep.subr.bf16.mxu0 %v11319_v41  ;;  %v11388_v2 = vld [vmem:[%s15696_s9 + $0x28] sm:$0xff]   ;;  %v11391_v41 = vld [vmem:[%s15694_s7 + $0xa14] ss:$8 sps:$4 sm:$0xff]  }
 0x575   : > { %8734 = vmatpush1.bf16.msra.mxu1 %v11314_v33 }
 0x576   : > { %8699 = vmatpush1.bf16.msra.mxu0 %v11317_v10  ;;  %8735 = vmatprep.subr.bf16.mxu1 %v11322_v30  ;;  %v11389_v10 = vld [vmem:[%s15694_s7 + $0xa10] ss:$8 sps:$4 sm:$0xff]   ;;  %v6665_v30 = vcombine.high %v15306_v57, %v15306_v57  ;;  %v11394_v57 = vld [vmem:[%s15694_s7 + $0xa00] ss:$8 sps:$4 sm:$0xff]  }
 0x577   : > { %8700 = vmatprep.subr.bf16.mxu0 %v11325_v34  ;;  %v6702_v34 = vcombine.high %v6687_v44, %v6687_v44 }
 0x579   : > { %8736 = vmatpush1.bf16.msra.mxu1 %v11320_v24  ;;  %v11393_v24 = vld [vmem:[%s15696_s9 + $0x20] sm:$0xff]  }
 0x57a   : > { %8701 = vmatpush1.bf16.msra.mxu0 %v11323_v28  ;;  %8737 = vmatprep.subr.bf16.mxu1 %v11328_v47  ;;  %v11396_v28 = vld [vmem:[%s15694_s7 + $0xa04] ss:$8 sps:$4 sm:$0xff]   ;;  %v11397_v47 = vld [vmem:[%s15696_s9 + $0x58] sm:$0xff]  }
 0x57b   : > { %8702 = vmatprep.subr.bf16.mxu0 %v11331_v46 }
 0x57d   : > { %8738 = vmatpush1.bf16.msra.mxu1 %v11326_v8 }
 0x57e   : > { %8703 = vmatpush2.bf16.msra.mxu0 %v11329_v3  ;;  %8739 = vmatprep.subr.bf16.mxu1 %v11334_v14  ;;  %v6679_v3 = vrot.slane %v6665_v30, %v12389_v21 }
 0x57f   : > { %8704 = vmatprep.subr.bf16.mxu0 %v11337_v32  ;;  %v11398_v32 = vld [vmem:[%s15696_s9 + $0x18] sm:$0xff]  }
 0x581   : > { %8740 = vmatpush1.bf16.msra.mxu1 %v11332_v0 }
 0x582   : > { %8705 = vmatpush2.bf16.msra.mxu0 %v11335_v31  ;;  %8741 = vmatprep.subr.bf16.mxu1 %v11340_v19  ;;  %v11399_v31 = vld [vmem:[%s15696_s9 + $0x50] sm:$0xff]  }
 0x583   : > { %8706 = vmatprep.subr.bf16.mxu0 %v11343_v58 }
 0x585   : > { %8742 = vmatpush1.bf16.msra.mxu1 %v11338_v11  ;;  %v11400_v11 = vld [vmem:[%s15696_s9 + $0x10] sm:$0xff]  }
 0x586   : > { %8707 = vmatpush2.bf16.msra.mxu0 %v11341_v12  ;;  %8743 = vmatprep.subr.bf16.mxu1 %v11346_v52  ;;  %v11401_v12 = vld [vmem:[%s15696_s9 + $0x48] sm:$0xff]  }
 0x587   : > { %8708 = vmatprep.subr.bf16.mxu0 %v11349_v45  ;;  %v11402_v52 = vld [vmem:[%s15696_s9 + $0x8] sm:$0xff]   ;;  %v11404_v45 = vld [vmem:[%s15696_s9] sm:$0xff]  }
 0x589   : > { %8744 = vmatpush2.bf16.msra.mxu1 %v11344_v6  ;;  %v6232_v6 = vmax.f32 %v15179_v23, 0.0  ;;  %v11407_v23 = vld [vmem:[%s15696_s9 + $0xf0] sm:$0xff]  }
 0x58a   : > { %8709 = vmatpush2.bf16.msra.mxu0 %v11347_v9  ;;  %8745 = vmatprep.subr.bf16.mxu1 %v11352_v43  ;;  %v11405_v9 = vld [vmem:[%s15696_s9 + $0xf8] sm:$0xff]  }
 0x58b   : > { %8710 = vmatprep.subr.bf16.mxu0 %v11355_v61  ;;  %v11406_v43 = vld [vmem:[%s15696_s9 + $0xb8] sm:$0xff]   ;;  %v6234_v61 = vpack.c.bf16 %v6232_v6, %v6232_v6 }
 0x58d   : > { %8746 = vmatpush2.bf16.msra.mxu1 %v11350_v4 }
 0x58e   : > { %8711 = vmatpush2.bf16.msra.mxu0 %v11353_v22  ;;  %8747 = vmatprep.subr.bf16.mxu1 %v11358_v62  ;;  %v11408_v62 = vld [vmem:[%s15696_s9 + $0xb0] sm:$0xff]  }
 0x58f   : > { %8712 = vmatprep.subr.bf16.mxu0 %v11361_v48 }
 0x591   : > { %8748 = vmatpush2.bf16.msra.mxu1 %v11356_v26 }
 0x592   : > { %8713 = vmatpush2.bf16.msra.mxu0 %v11359_v36  ;;  %8749 = vmatprep.subr.bf16.mxu1 %v11364_v49  ;;  %v11409_v49 = vld [vmem:[%s15696_s9 + $0xe8] sm:$0xff]  }
 0x593   : > { %8714 = vmatprep.subr.bf16.mxu0 %v11367_v5  ;;  %v11410_v5 = vld [vmem:[%s15696_s9 + $0xa8] sm:$0xff]  }
 0x595   : > { %8750 = vmatpush2.bf16.msra.mxu1 %v11362_v27 }
 0x596   : > { %8715 = vmatpush2.bf16.msra.mxu0 %v11365_v39  ;;  %8751 = vmatprep.subr.bf16.mxu1 %v11370_v54  ;;  %v11411_v39 = vld [vmem:[%s15696_s9 + $0xe0] sm:$0xff]  }
 0x597   : > { %8716 = vmatprep.subr.bf16.mxu0 %v11373_v38  ;;  %v11412_v54 = vld [vmem:[%s15696_s9 + $0xa0] sm:$0xff]  }
 0x599   : > { %8752 = vmatpush2.bf16.msra.mxu1 %v11368_v25 }
 0x59a   : > { %8717 = vmatpush2.bf16.msra.mxu0 %v11371_v42  ;;  %8753 = vmatprep.subr.bf16.mxu1 %v11376_v50 }
 0x59b   : > { %10248 = vmatprep.subr.bf16.mxu0 %v11377_v1  ;;  %v11413_v1 = vld [vmem:[%s15696_s9 + $0xd8] sm:$0xff]  }
 0x59d   : > { %8754 = vmatpush2.bf16.msra.mxu1 %v11374_v37  ;;  %v8474_v18 = vpop.f32.mrf.mxu0  ;;  %8719 = vmatmul.mubr.bf16.vlgmr.msra.gmra.mxu0 %v6687_v44  ;;  %v11415_v44 = vld [vmem:[%s15696_s9 + $0xd0] sm:$0xff]  }
 0x59e   : > { %v8475_v40 = vadd.f32 %v8474_v18, %v15393_v16  ;;  %10249 = vmatpush3.bf16.msra.mxu0 %v11378_v63  ;;  %9102 = vmatprep.mubr.bf16.mxu0 %v6235_v17  ;;  %v11418_v17 = vld [vmem:[%s15696_s9 + $0x88] sm:$0xff]   ;;  %v11419_v18 = vld [vmem:[%s15696_s9 + $0xc0] sm:$0xff]  }
 0x59f   : > { %v8476_v56 = vpop.f32.mrf.mxu0  ;;  %8755 = vmatprep.subr.bf16.mxu1 %v11381_v20  ;;  %10250 = vmatprep.subr.bf16.mxu0 %v11382_v59  ;;  %v11416_v20 = vld [vmem:[%s15696_s9 + $0x90] sm:$0xff]   ;;  %v11417_v59 = vld [vmem:[%s15696_s9 + $0xc8] sm:$0xff]  }
 0x5a0   : > { %v8477_v15 = vadd.f32 %v8476_v56, %v15404_v60  ;;  %v11392_v60 = vld [vmem:[%s15696_s9 + $0x60] sm:$0xff]  }
 0x5a1   : > { %8756 = vmatpush2.bf16.msra.mxu1 %v11379_v51  ;;  %v8478_v16 = vpop.f32.mrf.mxu0  ;;  %v11420_v51 = vld [vmem:[%s15696_s9 + $0x80] sm:$0xff]  }
 0x5a2   : > { %10251 = vmatpush3.bf16.msra.mxu0 %v11383_v35  ;;  %8757 = vmatprep.subr.bf16.mxu1 %v11386_v7 }
 0x5a3   : > { %v8479_v33 = vpop.f32.mrf.mxu0  ;;  %10252 = vmatprep.subr.bf16.mxu0 %v11387_v55 }
 0x5a5   : > { %8758 = vmatpush2.bf16.msra.mxu1 %v11384_v13 }
 0x5a6   : > { %10253 = vmatpush3.bf16.msra.mxu0 %v11388_v2  ;;  %8780 = vmatprep.subr.bf16.mxu1 %v11391_v41 }
 0x5a7   : > { %10254 = vmatprep.subr.bf16.mxu0 %v11392_v60 }
 0x5a8   : > { %v8515_v46 = vpop.f32.mrf.mxu1  ;;  %8760 = vmatmul.mubr.bf16.vlgmr.msra.gmra.mxu1 %v6702_v34 }
 0x5a9   : > { %v8516_v8 = vadd.f32 %v8515_v46, %v8475_v40  ;;  %8781 = vmatpush1.bf16.msra.mxu1 %v11389_v10  ;;  %8800 = vmatprep.mubr.bf16.mxu1 %v11441_v29  ;;  %v6694_v29 = vrot.slane %v6679_v3, %v12389_v21  ;;  %v11403_v21 = vld [vmem:[%s15696_s9 + $0x40] sm:$0xff]  }
 0x5aa   : > { %v8517_v14 = vpop.f32.mrf.mxu1  ;;  %10255 = vmatpush3.bf16.msra.mxu0 %v11393_v24  ;;  %8782 = vmatprep.subr.bf16.mxu1 %v11396_v28 }
 0x5ab   : > { %v8518_v0 = vadd.f32 %v8517_v14, %v8477_v15  ;;  %10256 = vmatprep.subr.bf16.mxu0 %v11397_v47 }
 0x5ac   : > { %v8519_v19 = vpop.f32.mrf.mxu1 }
 0x5ad   : > { %8783 = vmatpush1.bf16.msra.mxu1 %v11394_v57 }
 0x5ae   : > { %v8520_v58 = vpop.f32.mrf.mxu1  ;;  %10257 = vmatpush3.bf16.msra.mxu0 %v11398_v32 }
 0x5af   : > { %10258 = vmatprep.subr.bf16.mxu0 %v11399_v31 }
 0x5b0   : > { %10038 = vmatmul.mubr.msk.bf16.vlgmr.msra.gmra.mxu1 %vm869_vm1, %v6694_v29 }
 0x5b2   : > { %10259 = vmatpush3.bf16.msra.mxu0 %v11400_v11 }
 0x5b3   : > { %10260 = vmatprep.subr.bf16.mxu0 %v11401_v12 }
 0x5b6   : > { %10261 = vmatpush3.bf16.msra.mxu0 %v11402_v52 }
 0x5b7   : > { %10262 = vmatprep.subr.bf16.mxu0 %v11403_v21 }
 0x5ba   : > { %10263 = vmatpush3.bf16.msra.mxu0 %v11404_v45 }
 0x5bb   : > { %10270 = vmatprep.subr.bf16.mxu0 %v11405_v9 }
 0x5bd   : > { %9103 = vmatmul.mubr.bf16.vlgmr.msra.gmra.mxu0 %v6234_v61 }
 0x5be   : > { %10271 = vmatpush3.bf16.msra.mxu0 %v11406_v43 }
 0x5bf   : > { %10272 = vmatprep.subr.bf16.mxu0 %v11407_v23 }
 0x5c2   : > { %10273 = vmatpush3.bf16.msra.mxu0 %v11408_v62  ;;  %v16062_v62 = vlaneseq }
 0x5c3   : > { %10274 = vmatprep.subr.bf16.mxu0 %v11409_v49 }
 0x5c6   : > { %10275 = vmatpush3.bf16.msra.mxu0 %v11410_v5 }
 0x5c7   : > { %10276 = vmatprep.subr.bf16.mxu0 %v11411_v39 }
 0x5ca   : > { %10277 = vmatpush3.bf16.msra.mxu0 %v11412_v54 }
 0x5cb   : > { %10278 = vmatprep.subr.bf16.mxu0 %v11413_v1 }
 0x5ce   : > { %10279 = vmatpush3.bf16.msra.mxu0 %v11414_v53 }
 0x5cf   : > { %10280 = vmatprep.subr.bf16.mxu0 %v11415_v44 }
 0x5d2   : > { %10281 = vmatpush3.bf16.msra.mxu0 %v11416_v20 }
 0x5d3   : > { %10282 = vmatprep.subr.bf16.mxu0 %v11417_v59 }
 0x5d6   : > { %10283 = vmatpush3.bf16.msra.mxu0 %v11418_v17 }
 0x5d7   : > { %10284 = vmatprep.subr.bf16.mxu0 %v11419_v18 }
 0x5da   : > { %10285 = vmatpush3.bf16.msra.mxu0 %v11420_v51 }
 0x5dd   : > { %v8556_v4 = vpop.f32.mrf.mxu0 }
 0x5de   : > { %v8557_v22 = vadd.f32 %v8556_v4, %v8516_v8 }
 0x5df   : > { %v8558_v48 = vpop.f32.mrf.mxu0 }
 0x5e0   : > { %v8559_v26 = vadd.f32 %v8558_v48, %v8518_v0  ;;  %v9151_v48 = vand.u32 127, %v16062_v62 }
 0x5e1   : > { %v8560_v36 = vpop.f32.mrf.mxu0 }
 0x5e2   : > { %vm9152_vm5 = vcmp.lt.s32.totalorder %v9151_v48, 6  ;;  %vm9166_vm6 = vcmp.lt.s32.totalorder %v9151_v48, 8 }
 0x5e3   : > { %v8561_v27 = vpop.f32.mrf.mxu0 }
 0x5e8   : > { %v8597_v38 = vpop.f32.mrf.mxu1 }
 0x5e9   : > { %v8598_v25 = vadd.f32 %v8597_v38, %v8557_v22  ;;  %v8877_v22 = vld [vmem:[%s15697_s10] sm:$0x1] }
 0x5ea   : > { %v8599_v42 = vpop.f32.mrf.mxu1 }
 0x5eb   : > { %v8600_v50 = vadd.f32 %v8599_v42, %v8559_v26 }
 0x5ec   : > { %v8601_v37 = vpop.f32.mrf.mxu1 }
 0x5ee   : > { %v8602_v63 = vpop.f32.mrf.mxu1 }
 0x61d   : > { %v8638_v40 = vpop.f32.mrf.mxu0 }
 0x61e   : > { %v8639_v35 = vadd.f32 %v8638_v40, %v8598_v25 }
 0x61f   : > { %v8640_v7 = vpop.f32.mrf.mxu0 }
 0x620   : > { %v8641_v56 = vadd.f32 %v8640_v7, %v8600_v50 }
 0x621   : > { %v8642_v55 = vpop.f32.mrf.mxu0 }
 0x623   : > { %v8643_v15 = vpop.f32.mrf.mxu0 }
 0x628   : > { %v8679_v16 = vpop.f32.mrf.mxu1 }
 0x629   : > { %v8680_v13 = vadd.f32 %v8679_v16, %v8639_v35 }
 0x62a   : > { %v8681_v2 = vpop.f32.mrf.mxu1 }
 0x62b   : > { %v8682_v41 = vadd.f32 %v8681_v2, %v8641_v56 }
 0x62c   : > { %v8683_v33 = vpop.f32.mrf.mxu1 }
 0x62e   : > { %v8684_v60 = vpop.f32.mrf.mxu1 }
 0x65d   : > { %v8720_v10 = vpop.f32.mrf.mxu0 }
 0x65e   : > { %v8721_v8 = vadd.f32 %v8720_v10, %v8680_v13 }
 0x65f   : > { %v8722_v30 = vpop.f32.mrf.mxu0 }
 0x660   : > { %v8723_v3 = vadd.f32 %v8722_v30, %v8682_v41 }
 0x661   : > { %v8724_v34 = vpop.f32.mrf.mxu0 }
 0x663   : > { %v8725_v24 = vpop.f32.mrf.mxu0 }
 0x668   : > { %v8761_v28 = vpop.f32.mrf.mxu1 }
 0x669   : > { %v8762_v14 = vadd.f32 %v8761_v28, %v8721_v8 }
 0x66a   : > { %v8763_v47 = vpop.f32.mrf.mxu1 }
 0x66b   : > { %v8764_v0 = vadd.f32 %v8763_v47, %v8723_v3 }
 0x66c   : > { %v8765_v46 = vpop.f32.mrf.mxu1 }
 0x66e   : > { %v8766_v57 = vpop.f32.mrf.mxu1 }
 0x670   : > { %v8802_v32 = vpop.f32.mrf.mxu1 }
 0x671   : > { %v8803_v31 = vadd.f32 %v8802_v32, %v8762_v14 }
 0x672   : > { %v8804_v19 = vpop.f32.mrf.mxu1 }
 0x673   : > { %v8805_v58 = vadd.f32 %v8804_v19, %v8764_v0  ;;  %v8809_v29 = vmax.f32 %v8803_v31, 0.0 }
 0x674   : > { %v8806_v11 = vpop.f32.mrf.mxu1 }
 0x675   : > { %v8810_v12 = vmax.f32 %v8805_v58, 0.0  ;;  %v8811_v45 = vpack.c.bf16 %v8809_v29, %v8809_v29 }
 0x676   : > { %v8807_v52 = vpop.f32.mrf.mxu1 }
 0x677   : > { %v8812_v21 = vpack.c.bf16 %v8810_v12, %v8810_v12 }
 0x679   : > { %9142 = vmatprep.mubr.bf16.mxu0 %v8812_v21 }
 0x67a   : > { %9143 = vmatmul.mubr.bf16.vlgmr.msra.gmra.mxu0 %v8811_v45 }
 0x67d   : > { %v10264_v6 = vpop.f32.mrf.mxu0 }
 0x67f   : > { %v10265_v9 = vpop.f32.mrf.mxu0 }
 0x680   : > { %v10266_v43 = vadd.f32 %v10265_v9, %v10264_v6 }
 0x681   : > { %v10267_v61 = vpop.f32.mrf.mxu0 }
 0x682   : > { %v9105_v36 = vadd.f32 %v10266_v43, %v8877_v22 }
 0x683   : > { %v10268_v4 = vpop.f32.mrf.mxu0 }
 0x73a   : > { %v10286_v23 = vpop.f32.mrf.mxu0 }
 0x73c   : > { %v10287_v26 = vpop.f32.mrf.mxu0 }
 0x73d   : > { %v10288_v49 = vadd.f32 %v10287_v26, %v10286_v23 }
 0x73e   : > { %v10289_v5 = vpop.f32.mrf.mxu0 }
 0x73f   : > { %v9145_v27 = vadd.f32 %v10288_v49, %v9105_v36 }
 0x740   : > { %v10290_v39 = vpop.f32.mrf.mxu0 }
 0x741   : > { %v9153_v54 = vsel %vm9152_vm5, %v9145_v27, -1e+30 }
 0x742   : > { %v9155_v38 = vsel %vm9154_vm10, %v9153_v54, -inf }
 0x743   : > { %9156 = vmax.xlane.f32.xlu1 %v9155_v38 }
 0x7cc   : > { %v9157_v25 = vpop.xlane.xlu1 %9156 }
 0x7cd   : > { %v9158_v42 = vsub.f32 %v9153_v54, %v9157_v25 }
 0x7cf   : > { %v9159_v50 = vmul.f32 1.442695, %v9158_v42 }
 0x7d1   : > { %11421 = vpow2.f32 %v9159_v50 }
 0x7de   : > { %v11422_v1 = vpop.eup %11421 }
 0x7df   : > { %v9161_v53 = vsel %vm9154_vm10, %v11422_v1, 0.0 }
 0x7e0   : > { %9162 = vadd.xlane.f32.xlu0 %v9161_v53 }
 0x869   : > { %v9163_v37 = vpop.xlane.xlu0 %9162 }
 0x86a   : > { %11423 = vrcp.f32 %v9163_v37 }
 0x877   : > { %v11424_v63 = vpop.eup %11423 }
 0x878   : > { %v9165_v44 = vmul.f32 %v11424_v63, %v11422_v1 }
 0x87a   : > { %v9167_v20 = vsel %vm9166_vm6, %v9165_v44, %v9145_v27 }
 0x87b   : > { %9168 = vst.msk [vmem:[%s382_s25] sm:$0x1] %vm9154_vm10, %v9167_v20 }
 0x87c PF: > { %s21_s17 = sadd.s32 1, %s11435_s17  }
 0x87d   : > { %p18_p4 = scmp.ge.s32.totalorder %s21_s17, 4  }
 0x87f   :  { %20 = sbr.rel (!%p18_p4) target bundleno = 1 (0x1), region = 103 }

</bundles_post_ra>
